<compile_context>
chip_gen: v6e
topology: v6e:2x2x1
jax: 0.10.0
libtpu: 0.0.40
codegen_flags: <defaults>
</compile_context>

<pallas_src>
import numpy as np
import jax
import jax.numpy as jnp
from jax.experimental import pallas as pl
from jax.experimental.pallas import tpu as pltpu

LANES = 128      # lane width of the packed channel axis
EPS = 1e-5       # torch InstanceNorm2d default eps


# ----------------------- host-side constant builders ------------------------

def _round_up(x, m):
    return (x + m - 1) // m * m


def _bilinear_matrix_np(n):
    """(2n, n) torch bilinear 2x upsample matrix, align_corners=False."""
    m = np.zeros((2 * n, n), dtype=np.float32)
    for o in range(2 * n):
        src = (o + 0.5) / 2.0 - 0.5
        i0 = int(np.floor(src))
        frac = src - i0
        i0c = min(max(i0, 0), n - 1)
        i1c = min(max(i0 + 1, 0), n - 1)
        m[o, i0c] += 1.0 - frac
        m[o, i1c] += frac
    return m


def _tap_ops_np(hin, win, k, stride, pad):
    """(k*k, Ho*Wo, Hin*Win) 0/1 gather operators, one per conv tap (dh, dw).
    Zero-padding at the borders is expressed as all-zero rows."""
    ho_n = (hin + 2 * pad - k) // stride + 1
    wo_n = (win + 2 * pad - k) // stride + 1
    ops = np.zeros((k * k, ho_n * wo_n, hin * win), np.float32)
    for dh in range(k):
        for dw in range(k):
            t = dh * k + dw
            for ho in range(ho_n):
                hi = ho * stride + dh - pad
                if hi < 0 or hi >= hin:
                    continue
                for wo in range(wo_n):
                    wi = wo * stride + dw - pad
                    if wi < 0 or wi >= win:
                        continue
                    ops[t, ho * wo_n + wo, hi * win + wi] = 1.0
    return ops


def _maxpool_op_np(h, w):
    """(4*Ho*Wo, H*W): the 4 phase selectors of MaxPool2d(2,2), stacked rows."""
    ho_n, wo_n = h // 2, w // 2
    m = np.zeros((4 * ho_n * wo_n, h * w), np.float32)
    p = 0
    for dh in range(2):
        for dw in range(2):
            for ho in range(ho_n):
                for wo in range(wo_n):
                    m[p * ho_n * wo_n + ho * wo_n + wo,
                      (2 * ho + dh) * w + (2 * wo + dw)] = 1.0
            p += 1
    return m


# ---------------------------- weight preparation -----------------------------

def _blockdiag(w2d, in_slot, out_slot, pack):
    """(Cin, Cout) weight -> (pack*in_slot, pack*out_slot) block-diagonal."""
    w2d = jnp.asarray(w2d, jnp.float32)
    wp = jnp.pad(w2d, ((0, in_slot - w2d.shape[0]), (0, out_slot - w2d.shape[1])))
    return jnp.kron(jnp.eye(pack, dtype=jnp.float32), wp)


def _w1x1(w, slot, pack):            # torch (Cout, Cin, 1, 1) -> (128, 128) bf16
    return _blockdiag(w[:, :, 0, 0].T, slot, slot, pack).astype(jnp.bfloat16)


def _w3x3_taps(w, slot, pack):       # torch (Cout, Cin, 3, 3) -> (9,128,128) bf16
    taps = [_blockdiag(w[:, :, dh, dw].T, slot, slot, pack)
            for dh in range(3) for dw in range(3)]
    return jnp.stack(taps, axis=0).astype(jnp.bfloat16)


def _w_stem(w, kk_slot, slot, pack):  # torch (Cout,Cin,3,3) -> (pack*kk_slot,128)
    cout, cin, k, _ = w.shape
    w2 = jnp.transpose(w, (2, 3, 1, 0)).reshape(k * k * cin, cout)
    return _blockdiag(w2, kk_slot, slot, pack).astype(jnp.bfloat16)


def _w_final(w, slot, pack):          # torch (1, Cin, 1, 1) -> (128, 128) bf16
    # maps input lanes s*slot + c to the single dense output lane s
    m = _blockdiag(w[:, :, 0, 0].T, slot, 1, pack)          # (pack*slot, pack)
    return jnp.pad(m, ((0, 0), (0, LANES - pack))).astype(jnp.bfloat16)


def _im2col(x, k, stride, padding):
    """x: (N,H,W,C) -> (N, Ho*Wo, k*k*C), column layout (dh*k+dw)*C + c."""
    n, h, w, c = x.shape
    if padding:
        x = jnp.pad(x, ((0, 0), (padding, padding), (padding, padding), (0, 0)))
    ho = (h + 2 * padding - k) // stride + 1
    wo = (w + 2 * padding - k) // stride + 1
    pieces = [x[:, dh:dh + stride * ho:stride, dw:dw + stride * wo:stride, :]
              for dh in range(k) for dw in range(k)]
    return jnp.stack(pieces, axis=3).reshape(n, ho * wo, k * k * c)


# ------------------------------- the kernel ----------------------------------

def _im_generator_kernel(
        patches_ref,                       # (1, 256, P*KKslot) bf16 packed im2col
        w_stem_ref,                        # (P*KKslot, 128)
        m_pool_ref,                        # (256, 256)  4 stacked pool phases
        w_rb1c0_ref,                       # (128, 128)
        m_rb1c1_ref, w_rb1c1_ref,          # (9,16,64), (9,128,128)
        w_rb1c2_ref,                       # (128, 128)
        m_rb1ex_ref, w_rb1ex_ref,          # (16, 64), (128, 128)
        w_rb2c0_ref,                       # (128, 128)
        m_rb2c1_ref, w_rb2c1_ref,          # (9,16,16), (9,128,128)
        w_rb2c2_ref,                       # (128, 128)
        w_d1_ref, m_d1s_ref,               # (9,128,128), (64, 144)   upsample folded
        w_d2_ref, m_d2s_ref,               # (9,128,128), (256, 576)  upsample folded
        w_d3_ref, b_d3_ref,                # (128,128) bf16, (1,128) f32
        out_ref,                           # (1, 256, 128) f32
        slab1_ref, slab2_ref):             # VMEM scratch (144,128), (576,128) f32
    f32, bf16 = jnp.float32, jnp.bfloat16

    def mm(a, b):
        return jnp.dot(a.astype(bf16), b.astype(bf16), preferred_element_type=f32)

    def instnorm(y):
        # one-pass InstanceNorm2d(affine=False): independent reductions
        mean = jnp.mean(y, axis=0, keepdims=True)
        msq = jnp.mean(y * y, axis=0, keepdims=True)
        var = jnp.maximum(msq - mean * mean, 0.0)
        return (y - mean) * jax.lax.rsqrt(var + EPS)

    def conv3x3(x, m_ref, w_ref):          # sum_t (M_t @ x) @ W_t  (small P_out)
        xb = x.astype(bf16)
        acc = None
        for t in range(9):
            term = mm(mm(m_ref[t], xb), w_ref[t])
            acc = term if acc is None else acc + term
        return acc

    def conv3x3_up(x, w_ref, m_stack_ref, slab_ref, pin):
        # reassociated upsample-conv: stack Y_t = x @ W_t in VMEM, then one
        # (P_out, 9*P_in) @ (9*P_in, 128) gather matmul.
        xb = x.astype(bf16)
        for t in range(9):
            slab_ref[pl.ds(t * pin, pin), :] = jnp.dot(
                xb, w_ref[t], preferred_element_type=f32)
        return mm(m_stack_ref[...], slab_ref[...])

    # ---- stem: Conv3x3(pad=1) + InstanceNorm + ReLU, then MaxPool2d(2) ----
    y = mm(patches_ref[0], w_stem_ref[...])                    # (256, 128)
    y = jnp.maximum(instnorm(y), 0.0)
    ph = mm(m_pool_ref[...], y)                                # 4 phases stacked
    h = jnp.maximum(jnp.maximum(ph[0:64], ph[64:128]),
                    jnp.maximum(ph[128:192], ph[192:256]))     # (64,128)  8x8

    # ---- layer1[0]: Resblk(16, 16, stride=2) ----
    res = instnorm(mm(mm(m_rb1ex_ref[...], h), w_rb1ex_ref[...]))  # shortcut ConvBn
    t = instnorm(mm(h, w_rb1c0_ref[...]))                          # conv0 1x1
    t = instnorm(conv3x3(t, m_rb1c1_ref, w_rb1c1_ref))             # conv1 3x3 s2
    t = instnorm(mm(t, w_rb1c2_ref[...]))                          # conv2 1x1 ->2c
    h = jnp.maximum(t + res, 0.0)                                  # (16,128) 4x4

    # ---- layer1[1]: Resblk(32, 16) (extra == identity) ----
    t = instnorm(mm(h, w_rb2c0_ref[...]))
    t = instnorm(conv3x3(t, m_rb2c1_ref, w_rb2c1_ref))
    t = instnorm(mm(t, w_rb2c2_ref[...]))
    h = jnp.maximum(t + h, 0.0)                                    # (16,128) 4x4
    # TODO(synk): torch forward's `print(input.shape)` debug side-effect omitted.

    # ---- decode (bilinear 2x upsamples folded into d1/d2 gather operators) ----
    d = jnp.maximum(instnorm(conv3x3_up(h, w_d1_ref, m_d1s_ref, slab1_ref, 16)), 0.0)
    d = jnp.maximum(instnorm(conv3x3_up(d, w_d2_ref, m_d2s_ref, slab2_ref, 64)), 0.0)
    d = mm(d, w_d3_ref[...]) + b_d3_ref[...]                       # 1x1 conv + bias
    out_ref[0] = d.astype(out_ref.dtype)


# ------------------------------ forward wrapper -------------------------------

def im_generator_forward(x_nchw, params):
    n, cin, h, w = x_nchw.shape
    assert (h, w) == (16, 16), "operator matrices are built for 16x16 inputs"
    p = params

    # ---- packing geometry: 4 images per 128-lane group, 32 lanes per image ----
    slot = _round_up(p['rb1']['c2'][0].shape[0], 8)            # widest channel count
    pack = LANES // slot                                       # images per lane group
    kk_slot = _round_up(9 * cin, LANES // pack)                # per-image K slot
    g = -(-n // pack)                                          # packed grid length

    # ---- stem im2col, packed block-diagonally along K ----
    x = jnp.transpose(x_nchw, (0, 2, 3, 1))                    # NHWC
    patches = _im2col(x, 3, 1, 1)                              # (N, 256, 9*cin)
    patches = jnp.pad(patches, ((0, g * pack - n), (0, 0),
                                (0, kk_slot - patches.shape[-1])))
    patches = (patches.reshape(g, pack, 256, kk_slot)
                       .transpose(0, 2, 1, 3)
                       .reshape(g, 256, pack * kk_slot)
                       .astype(jnp.bfloat16))

    bf = lambda a: jnp.asarray(a, jnp.bfloat16)

    # ---- spatial operators (compile-time constants, exact in bf16) ----
    m_pool = bf(_maxpool_op_np(16, 16))                        # (256, 256)
    m_rb1c1 = bf(_tap_ops_np(8, 8, 3, 2, 1))                   # (9, 16, 64)
    m_rb1ex = bf(_tap_ops_np(8, 8, 1, 2, 0)[0])                # (16, 64)
    m_rb2c1 = bf(_tap_ops_np(4, 4, 3, 1, 1))                   # (9, 16, 16)
    u1 = np.kron(_bilinear_matrix_np(4), _bilinear_matrix_np(4))    # (64, 16)
    u2 = np.kron(_bilinear_matrix_np(8), _bilinear_matrix_np(8))    # (256, 64)
    t_d1 = _tap_ops_np(8, 8, 3, 1, 1)                          # (9, 64, 64)
    t_d2 = _tap_ops_np(16, 16, 3, 1, 1)                        # (9, 256, 256)
    m_d1s = bf(np.concatenate([t_d1[t] @ u1 for t in range(9)], axis=1))   # (64, 144)
    m_d2s = bf(np.concatenate([t_d2[t] @ u2 for t in range(9)], axis=1))   # (256, 576)

    # ---- block-diagonal (lane-packed) weights; biases before InstanceNorm2d
    #      (affine=False) are exactly cancelled by the mean subtraction ----
    w_stem = _w_stem(p['stem'][0], kk_slot, slot, pack)
    w_rb1c0 = _w1x1(p['rb1']['c0'][0], slot, pack)
    w_rb1c1 = _w3x3_taps(p['rb1']['c1'][0], slot, pack)
    w_rb1c2 = _w1x1(p['rb1']['c2'][0], slot, pack)
    w_rb1ex = _w1x1(p['rb1']['extra'][0], slot, pack)
    w_rb2c0 = _w1x1(p['rb2']['c0'][0], slot, pack)
    w_rb2c1 = _w3x3_taps(p['rb2']['c1'][0], slot, pack)
    w_rb2c2 = _w1x1(p['rb2']['c2'][0], slot, pack)
    w_d1 = _w3x3_taps(p['d1'][0], slot, pack)
    w_d2 = _w3x3_taps(p['d2'][0], slot, pack)
    w_d3 = _w_final(p['d3'][0], slot, pack)
    b_d3 = jnp.pad(jnp.tile(p['d3'][1].astype(jnp.float32), pack),
                   (0, LANES - pack)).reshape(1, LANES)

    consts = [w_stem, m_pool, w_rb1c0, m_rb1c1, w_rb1c1, w_rb1c2,
              m_rb1ex, w_rb1ex, w_rb2c0, m_rb2c1, w_rb2c1, w_rb2c2,
              w_d1, m_d1s, w_d2, m_d2s, w_d3, b_d3]

    def const_spec(a):
        nd = a.ndim
        return pl.BlockSpec(a.shape, lambda i, _nd=nd: (0,) * _nd)

    # advisory cost estimate (per-pack MXU flops; helps XLA scheduling)
    pkk = pack * kk_slot
    flops_per_pack = 2 * (
        256 * pkk * 128 + 256 * 256 * 128
        + 16 * 64 * 128 + 16 * 128 * 128 + 64 * 128 * 128
        + 9 * (16 * 64 * 128 + 16 * 128 * 128) + 16 * 128 * 128
        + 16 * 128 * 128 + 9 * (16 * 16 * 128 + 16 * 128 * 128) + 16 * 128 * 128
        + 9 * (16 * 128 * 128) + 64 * 144 * 128
        + 9 * (64 * 128 * 128) + 256 * 576 * 128
        + 256 * 128 * 128)
    const_bytes = int(sum(int(np.prod(a.shape)) * a.dtype.itemsize for a in consts))
    cost = pl.CostEstimate(
        flops=g * flops_per_pack,
        transcendentals=g * 10 * LANES,
        bytes_accessed=const_bytes + g * (256 * pkk * 2 + 256 * LANES * 4))

    out = pl.pallas_call(
        _im_generator_kernel,
        out_shape=jax.ShapeDtypeStruct((g, 256, LANES), jnp.float32),
        grid=(g,),
        in_specs=[pl.BlockSpec((1, 256, pkk), lambda i: (i, 0, 0))]
                 + [const_spec(a) for a in consts],
        out_specs=pl.BlockSpec((1, 256, LANES), lambda i: (i, 0, 0)),
        scratch_shapes=[pltpu.VMEM((9 * 16, LANES), jnp.float32),
                        pltpu.VMEM((9 * 64, LANES), jnp.float32)],
        compiler_params=pltpu.CompilerParams(
            dimension_semantics=("parallel",)),
        cost_estimate=cost,
    )(patches, *consts)

    # kernel output lane s of pack g holds image g*pack+s -> NCHW (N,1,16,16)
    imgs = jnp.transpose(out[:, :, :pack], (0, 2, 1)).reshape(g * pack, 16, 16)
    return imgs[:n, None, :, :]


# ------------------------------- parameters -----------------------------------

def init_params(key, n_channels):
    keys = iter(jax.random.split(key, 32))

    def conv(cout, cin, k):
        w = jax.random.normal(next(keys), (cout, cin, k, k), jnp.float32)
        w = w * (1.0 / np.sqrt(cin * k * k))
        b = jax.random.normal(next(keys), (cout,), jnp.float32) * 0.01
        return (w, b)

    c = 16  # 16 * multi_channel
    return {
        'stem': conv(c, n_channels, 3),
        'rb1': {'c0': conv(c, c, 1), 'c1': conv(c, c, 3),
                'c2': conv(2 * c, c, 1), 'extra': conv(2 * c, c, 1)},
        'rb2': {'c0': conv(c, 2 * c, 1), 'c1': conv(c, c, 3),
                'c2': conv(2 * c, c, 1)},
        'd1': conv(16, 2 * c, 3),
        'd2': conv(4, 16, 3),
        'd3': conv(1, 4, 1),
    }


if __name__ == "__main__":
    key = jax.random.PRNGKey(0)
    k_x, k_p = jax.random.split(key)
    n, c_in, h, w = 2, 4, 16, 16
    x = jax.random.normal(k_x, (n, c_in, h, w), jnp.float32)
    params = init_params(k_p, c_in)

    fwd = jax.jit(im_generator_forward)
    out = jax.block_until_ready(fwd(x, params))
    assert out.shape == (n, 1, h, w), out.shape
    assert bool(jnp.all(jnp.isfinite(out)))
    print("KERNEL_OK")
</pallas_src>

<mosaic_0001>
module attributes {stable_mosaic.version = 11 : i64} {
  func.func @_im_generator_kernel(%arg0: i32, %arg1: memref<1x256x256xbf16, #tpu.memory_space<vmem>>, %arg2: memref<256x128xbf16, #tpu.memory_space<vmem>>, %arg3: memref<256x256xbf16, #tpu.memory_space<vmem>>, %arg4: memref<128x128xbf16, #tpu.memory_space<vmem>>, %arg5: memref<9x16x64xbf16, #tpu.memory_space<vmem>>, %arg6: memref<9x128x128xbf16, #tpu.memory_space<vmem>>, %arg7: memref<128x128xbf16, #tpu.memory_space<vmem>>, %arg8: memref<16x64xbf16, #tpu.memory_space<vmem>>, %arg9: memref<128x128xbf16, #tpu.memory_space<vmem>>, %arg10: memref<128x128xbf16, #tpu.memory_space<vmem>>, %arg11: memref<9x16x16xbf16, #tpu.memory_space<vmem>>, %arg12: memref<9x128x128xbf16, #tpu.memory_space<vmem>>, %arg13: memref<128x128xbf16, #tpu.memory_space<vmem>>, %arg14: memref<9x128x128xbf16, #tpu.memory_space<vmem>>, %arg15: memref<64x144xbf16, #tpu.memory_space<vmem>>, %arg16: memref<9x128x128xbf16, #tpu.memory_space<vmem>>, %arg17: memref<256x576xbf16, #tpu.memory_space<vmem>>, %arg18: memref<128x128xbf16, #tpu.memory_space<vmem>>, %arg19: memref<1x128xf32, #tpu.memory_space<vmem>>, %arg20: memref<1x256x128xf32, #tpu.memory_space<vmem>>, %arg21: memref<144x128xf32, #tpu.memory_space<vmem>>, %arg22: memref<576x128xf32, #tpu.memory_space<vmem>>) attributes {dimension_semantics = [#tpu.dimension_semantics<parallel>], iteration_bounds = array<i64: 1>, scalar_prefetch = 0 : i64, scratch_operands = 2 : i64, tpu.core_type = #tpu.core_type<tc>, window_params = [{transform_indices = @transform_0, window_bounds = array<i64: 1, 256, 256>}, {pipeline_mode = #tpu.pipeline_mode<synchronous>, transform_indices = @transform_1, window_bounds = array<i64: 256, 128>}, {pipeline_mode = #tpu.pipeline_mode<synchronous>, transform_indices = @transform_2, window_bounds = array<i64: 256, 256>}, {pipeline_mode = #tpu.pipeline_mode<synchronous>, transform_indices = @transform_3, window_bounds = array<i64: 128, 128>}, {pipeline_mode = #tpu.pipeline_mode<synchronous>, transform_indices = @transform_4, window_bounds = array<i64: 9, 16, 64>}, {pipeline_mode = #tpu.pipeline_mode<synchronous>, transform_indices = @transform_5, window_bounds = array<i64: 9, 128, 128>}, {pipeline_mode = #tpu.pipeline_mode<synchronous>, transform_indices = @transform_6, window_bounds = array<i64: 128, 128>}, {pipeline_mode = #tpu.pipeline_mode<synchronous>, transform_indices = @transform_7, window_bounds = array<i64: 16, 64>}, {pipeline_mode = #tpu.pipeline_mode<synchronous>, transform_indices = @transform_8, window_bounds = array<i64: 128, 128>}, {pipeline_mode = #tpu.pipeline_mode<synchronous>, transform_indices = @transform_9, window_bounds = array<i64: 128, 128>}, {pipeline_mode = #tpu.pipeline_mode<synchronous>, transform_indices = @transform_10, window_bounds = array<i64: 9, 16, 16>}, {pipeline_mode = #tpu.pipeline_mode<synchronous>, transform_indices = @transform_11, window_bounds = array<i64: 9, 128, 128>}, {pipeline_mode = #tpu.pipeline_mode<synchronous>, transform_indices = @transform_12, window_bounds = array<i64: 128, 128>}, {pipeline_mode = #tpu.pipeline_mode<synchronous>, transform_indices = @transform_13, window_bounds = array<i64: 9, 128, 128>}, {pipeline_mode = #tpu.pipeline_mode<synchronous>, transform_indices = @transform_14, window_bounds = array<i64: 64, 144>}, {pipeline_mode = #tpu.pipeline_mode<synchronous>, transform_indices = @transform_15, window_bounds = array<i64: 9, 128, 128>}, {pipeline_mode = #tpu.pipeline_mode<synchronous>, transform_indices = @transform_16, window_bounds = array<i64: 256, 576>}, {pipeline_mode = #tpu.pipeline_mode<synchronous>, transform_indices = @transform_17, window_bounds = array<i64: 128, 128>}, {pipeline_mode = #tpu.pipeline_mode<synchronous>, transform_indices = @transform_18, window_bounds = array<i64: 1, 128>}, {transform_indices = @transform_19, window_bounds = array<i64: 1, 256, 128>}]} {
    %c0 = arith.constant 0 : index
    %c0_0 = arith.constant 0 : index
    %c0_1 = arith.constant 0 : index
    %0 = vector.load %arg1[%c0, %c0_0, %c0_1] : memref<1x256x256xbf16, #tpu.memory_space<vmem>>, vector<1x256x256xbf16>
    %1 = vector.shape_cast %0 : vector<1x256x256xbf16> to vector<256x256xbf16>
    %c0_2 = arith.constant 0 : index
    %c0_3 = arith.constant 0 : index
    %2 = vector.load %arg2[%c0_2, %c0_3] : memref<256x128xbf16, #tpu.memory_space<vmem>>, vector<256x128xbf16>
    %cst = arith.constant dense<0.000000e+00> : vector<256x128xf32>
    %3 = tpu.matmul %1, %2, %cst {dimension_numbers = #tpu.dot_dimension_numbers<[1], [0], [0], [1], [0, 0, 1, 1], [], []>} : vector<256x256xbf16>, vector<256x128xbf16>, vector<256x128xf32> -> vector<256x128xf32>
    %cst_4 = arith.constant dense<0.000000e+00> : vector<128xf32>
    %4 = vector.multi_reduction <add>, %3, %cst_4 [0] : vector<256x128xf32> to vector<128xf32>
    %5 = vector.shape_cast %4 : vector<128xf32> to vector<1x128xf32>
    %cst_5 = arith.constant 2.560000e+02 : f32
    %6 = vector.broadcast %cst_5 : f32 to vector<1x128xf32>
    %7 = arith.divf %5, %6 : vector<1x128xf32>
    %8 = arith.mulf %3, %3 : vector<256x128xf32>
    %cst_6 = arith.constant dense<0.000000e+00> : vector<128xf32>
    %9 = vector.multi_reduction <add>, %8, %cst_6 [0] : vector<256x128xf32> to vector<128xf32>
    %10 = vector.shape_cast %9 : vector<128xf32> to vector<1x128xf32>
    %cst_7 = arith.constant 2.560000e+02 : f32
    %11 = vector.broadcast %cst_7 : f32 to vector<1x128xf32>
    %12 = arith.divf %10, %11 : vector<1x128xf32>
    %13 = arith.mulf %7, %7 : vector<1x128xf32>
    %14 = arith.subf %12, %13 : vector<1x128xf32>
    %cst_8 = arith.constant 0.000000e+00 : f32
    %15 = vector.broadcast %cst_8 : f32 to vector<1x128xf32>
    %16 = arith.maximumf %14, %15 : vector<1x128xf32>
    %17 = vector.broadcast %7 : vector<1x128xf32> to vector<256x128xf32>
    %18 = arith.subf %3, %17 : vector<256x128xf32>
    %cst_9 = arith.constant 9.99999974E-6 : f32
    %19 = vector.broadcast %cst_9 : f32 to vector<1x128xf32>
    %20 = arith.addf %16, %19 : vector<1x128xf32>
    %21 = math.rsqrt %20 : vector<1x128xf32>
    %22 = vector.broadcast %21 : vector<1x128xf32> to vector<256x128xf32>
    %23 = arith.mulf %18, %22 : vector<256x128xf32>
    %cst_10 = arith.constant 0.000000e+00 : f32
    %24 = vector.broadcast %cst_10 : f32 to vector<256x128xf32>
    %25 = arith.maximumf %23, %24 : vector<256x128xf32>
    %c0_11 = arith.constant 0 : index
    %c0_12 = arith.constant 0 : index
    %26 = vector.load %arg3[%c0_11, %c0_12] : memref<256x256xbf16, #tpu.memory_space<vmem>>, vector<256x256xbf16>
    %27 = arith.truncf %25 : vector<256x128xf32> to vector<256x128xbf16>
    %cst_13 = arith.constant dense<0.000000e+00> : vector<256x128xf32>
    %28 = tpu.matmul %26, %27, %cst_13 {dimension_numbers = #tpu.dot_dimension_numbers<[1], [0], [0], [1], [0, 0, 1, 1], [], []>} : vector<256x256xbf16>, vector<256x128xbf16>, vector<256x128xf32> -> vector<256x128xf32>
    %29 = vector.extract_strided_slice %28 {offsets = [0, 0], sizes = [64, 128], strides = [1, 1]} : vector<256x128xf32> to vector<64x128xf32>
    %30 = vector.extract_strided_slice %28 {offsets = [64, 0], sizes = [64, 128], strides = [1, 1]} : vector<256x128xf32> to vector<64x128xf32>
    %31 = arith.maximumf %29, %30 : vector<64x128xf32>
    %32 = vector.extract_strided_slice %28 {offsets = [128, 0], sizes = [64, 128], strides = [1, 1]} : vector<256x128xf32> to vector<64x128xf32>
    %33 = vector.extract_strided_slice %28 {offsets = [192, 0], sizes = [64, 128], strides = [1, 1]} : vector<256x128xf32> to vector<64x128xf32>
    %34 = arith.maximumf %32, %33 : vector<64x128xf32>
    %35 = arith.maximumf %31, %34 : vector<64x128xf32>
    %c0_14 = arith.constant 0 : index
    %c0_15 = arith.constant 0 : index
    %36 = vector.load %arg8[%c0_14, %c0_15] : memref<16x64xbf16, #tpu.memory_space<vmem>>, vector<16x64xbf16>
    %37 = arith.truncf %35 : vector<64x128xf32> to vector<64x128xbf16>
    %cst_16 = arith.constant dense<0.000000e+00> : vector<16x128xf32>
    %38 = tpu.matmul %36, %37, %cst_16 {dimension_numbers = #tpu.dot_dimension_numbers<[1], [0], [0], [1], [0, 0, 1, 1], [], []>} : vector<16x64xbf16>, vector<64x128xbf16>, vector<16x128xf32> -> vector<16x128xf32>
    %c0_17 = arith.constant 0 : index
    %c0_18 = arith.constant 0 : index
    %39 = vector.load %arg9[%c0_17, %c0_18] : memref<128x128xbf16, #tpu.memory_space<vmem>>, vector<128x128xbf16>
    %40 = arith.truncf %38 : vector<16x128xf32> to vector<16x128xbf16>
    %cst_19 = arith.constant dense<0.000000e+00> : vector<16x128xf32>
    %41 = tpu.matmul %40, %39, %cst_19 {dimension_numbers = #tpu.dot_dimension_numbers<[1], [0], [0], [1], [0, 0, 1, 1], [], []>} : vector<16x128xbf16>, vector<128x128xbf16>, vector<16x128xf32> -> vector<16x128xf32>
    %cst_20 = arith.constant dense<0.000000e+00> : vector<128xf32>
    %42 = vector.multi_reduction <add>, %41, %cst_20 [0] : vector<16x128xf32> to vector<128xf32>
    %43 = vector.shape_cast %42 : vector<128xf32> to vector<1x128xf32>
    %cst_21 = arith.constant 1.600000e+01 : f32
    %44 = vector.broadcast %cst_21 : f32 to vector<1x128xf32>
    %45 = arith.divf %43, %44 : vector<1x128xf32>
    %46 = arith.mulf %41, %41 : vector<16x128xf32>
    %cst_22 = arith.constant dense<0.000000e+00> : vector<128xf32>
    %47 = vector.multi_reduction <add>, %46, %cst_22 [0] : vector<16x128xf32> to vector<128xf32>
    %48 = vector.shape_cast %47 : vector<128xf32> to vector<1x128xf32>
    %cst_23 = arith.constant 1.600000e+01 : f32
    %49 = vector.broadcast %cst_23 : f32 to vector<1x128xf32>
    %50 = arith.divf %48, %49 : vector<1x128xf32>
    %51 = arith.mulf %45, %45 : vector<1x128xf32>
    %52 = arith.subf %50, %51 : vector<1x128xf32>
    %cst_24 = arith.constant 0.000000e+00 : f32
    %53 = vector.broadcast %cst_24 : f32 to vector<1x128xf32>
    %54 = arith.maximumf %52, %53 : vector<1x128xf32>
    %55 = vector.broadcast %45 : vector<1x128xf32> to vector<16x128xf32>
    %56 = arith.subf %41, %55 : vector<16x128xf32>
    %cst_25 = arith.constant 9.99999974E-6 : f32
    %57 = vector.broadcast %cst_25 : f32 to vector<1x128xf32>
    %58 = arith.addf %54, %57 : vector<1x128xf32>
    %59 = math.rsqrt %58 : vector<1x128xf32>
    %60 = vector.broadcast %59 : vector<1x128xf32> to vector<16x128xf32>
    %61 = arith.mulf %56, %60 : vector<16x128xf32>
    %c0_26 = arith.constant 0 : index
    %c0_27 = arith.constant 0 : index
    %62 = vector.load %arg4[%c0_26, %c0_27] : memref<128x128xbf16, #tpu.memory_space<vmem>>, vector<128x128xbf16>
    %63 = arith.truncf %35 : vector<64x128xf32> to vector<64x128xbf16>
    %cst_28 = arith.constant dense<0.000000e+00> : vector<64x128xf32>
    %64 = tpu.matmul %63, %62, %cst_28 {dimension_numbers = #tpu.dot_dimension_numbers<[1], [0], [0], [1], [0, 0, 1, 1], [], []>} : vector<64x128xbf16>, vector<128x128xbf16>, vector<64x128xf32> -> vector<64x128xf32>
    %cst_29 = arith.constant dense<0.000000e+00> : vector<128xf32>
    %65 = vector.multi_reduction <add>, %64, %cst_29 [0] : vector<64x128xf32> to vector<128xf32>
    %66 = vector.shape_cast %65 : vector<128xf32> to vector<1x128xf32>
    %cst_30 = arith.constant 6.400000e+01 : f32
    %67 = vector.broadcast %cst_30 : f32 to vector<1x128xf32>
    %68 = arith.divf %66, %67 : vector<1x128xf32>
    %69 = arith.mulf %64, %64 : vector<64x128xf32>
    %cst_31 = arith.constant dense<0.000000e+00> : vector<128xf32>
    %70 = vector.multi_reduction <add>, %69, %cst_31 [0] : vector<64x128xf32> to vector<128xf32>
    %71 = vector.shape_cast %70 : vector<128xf32> to vector<1x128xf32>
    %cst_32 = arith.constant 6.400000e+01 : f32
    %72 = vector.broadcast %cst_32 : f32 to vector<1x128xf32>
    %73 = arith.divf %71, %72 : vector<1x128xf32>
    %74 = arith.mulf %68, %68 : vector<1x128xf32>
    %75 = arith.subf %73, %74 : vector<1x128xf32>
    %cst_33 = arith.constant 0.000000e+00 : f32
    %76 = vector.broadcast %cst_33 : f32 to vector<1x128xf32>
    %77 = arith.maximumf %75, %76 : vector<1x128xf32>
    %78 = vector.broadcast %68 : vector<1x128xf32> to vector<64x128xf32>
    %79 = arith.subf %64, %78 : vector<64x128xf32>
    %cst_34 = arith.constant 9.99999974E-6 : f32
    %80 = vector.broadcast %cst_34 : f32 to vector<1x128xf32>
    %81 = arith.addf %77, %80 : vector<1x128xf32>
    %82 = math.rsqrt %81 : vector<1x128xf32>
    %83 = vector.broadcast %82 : vector<1x128xf32> to vector<64x128xf32>
    %84 = arith.mulf %79, %83 : vector<64x128xf32>
    %85 = arith.truncf %84 : vector<64x128xf32> to vector<64x128xbf16>
    %c0_35 = arith.constant 0 : index
    %c0_36 = arith.constant 0 : index
    %c0_37 = arith.constant 0 : index
    %86 = vector.load %arg5[%c0_35, %c0_36, %c0_37] : memref<9x16x64xbf16, #tpu.memory_space<vmem>>, vector<1x16x64xbf16>
    %87 = vector.shape_cast %86 : vector<1x16x64xbf16> to vector<16x64xbf16>
    %cst_38 = arith.constant dense<0.000000e+00> : vector<16x128xf32>
    %88 = tpu.matmul %87, %85, %cst_38 {dimension_numbers = #tpu.dot_dimension_numbers<[1], [0], [0], [1], [0, 0, 1, 1], [], []>} : vector<16x64xbf16>, vector<64x128xbf16>, vector<16x128xf32> -> vector<16x128xf32>
    %c0_39 = arith.constant 0 : index
    %c0_40 = arith.constant 0 : index
    %c0_41 = arith.constant 0 : index
    %89 = vector.load %arg6[%c0_39, %c0_40, %c0_41] : memref<9x128x128xbf16, #tpu.memory_space<vmem>>, vector<1x128x128xbf16>
    %90 = vector.shape_cast %89 : vector<1x128x128xbf16> to vector<128x128xbf16>
    %91 = arith.truncf %88 : vector<16x128xf32> to vector<16x128xbf16>
    %cst_42 = arith.constant dense<0.000000e+00> : vector<16x128xf32>
    %92 = tpu.matmul %91, %90, %cst_42 {dimension_numbers = #tpu.dot_dimension_numbers<[1], [0], [0], [1], [0, 0, 1, 1], [], []>} : vector<16x128xbf16>, vector<128x128xbf16>, vector<16x128xf32> -> vector<16x128xf32>
    %c1 = arith.constant 1 : index
    %c0_43 = arith.constant 0 : index
    %c0_44 = arith.constant 0 : index
    %93 = vector.load %arg5[%c1, %c0_43, %c0_44] : memref<9x16x64xbf16, #tpu.memory_space<vmem>>, vector<1x16x64xbf16>
    %94 = vector.shape_cast %93 : vector<1x16x64xbf16> to vector<16x64xbf16>
    %cst_45 = arith.constant dense<0.000000e+00> : vector<16x128xf32>
    %95 = tpu.matmul %94, %85, %cst_45 {dimension_numbers = #tpu.dot_dimension_numbers<[1], [0], [0], [1], [0, 0, 1, 1], [], []>} : vector<16x64xbf16>, vector<64x128xbf16>, vector<16x128xf32> -> vector<16x128xf32>
    %c1_46 = arith.constant 1 : index
    %c0_47 = arith.constant 0 : index
    %c0_48 = arith.constant 0 : index
    %96 = vector.load %arg6[%c1_46, %c0_47, %c0_48] : memref<9x128x128xbf16, #tpu.memory_space<vmem>>, vector<1x128x128xbf16>
    %97 = vector.shape_cast %96 : vector<1x128x128xbf16> to vector<128x128xbf16>
    %98 = arith.truncf %95 : vector<16x128xf32> to vector<16x128xbf16>
    %cst_49 = arith.constant dense<0.000000e+00> : vector<16x128xf32>
    %99 = tpu.matmul %98, %97, %cst_49 {dimension_numbers = #tpu.dot_dimension_numbers<[1], [0], [0], [1], [0, 0, 1, 1], [], []>} : vector<16x128xbf16>, vector<128x128xbf16>, vector<16x128xf32> -> vector<16x128xf32>
    %100 = arith.addf %92, %99 : vector<16x128xf32>
    %c2 = arith.constant 2 : index
    %c0_50 = arith.constant 0 : index
    %c0_51 = arith.constant 0 : index
    %101 = vector.load %arg5[%c2, %c0_50, %c0_51] : memref<9x16x64xbf16, #tpu.memory_space<vmem>>, vector<1x16x64xbf16>
    %102 = vector.shape_cast %101 : vector<1x16x64xbf16> to vector<16x64xbf16>
    %cst_52 = arith.constant dense<0.000000e+00> : vector<16x128xf32>
    %103 = tpu.matmul %102, %85, %cst_52 {dimension_numbers = #tpu.dot_dimension_numbers<[1], [0], [0], [1], [0, 0, 1, 1], [], []>} : vector<16x64xbf16>, vector<64x128xbf16>, vector<16x128xf32> -> vector<16x128xf32>
    %c2_53 = arith.constant 2 : index
    %c0_54 = arith.constant 0 : index
    %c0_55 = arith.constant 0 : index
    %104 = vector.load %arg6[%c2_53, %c0_54, %c0_55] : memref<9x128x128xbf16, #tpu.memory_space<vmem>>, vector<1x128x128xbf16>
    %105 = vector.shape_cast %104 : vector<1x128x128xbf16> to vector<128x128xbf16>
    %106 = arith.truncf %103 : vector<16x128xf32> to vector<16x128xbf16>
    %cst_56 = arith.constant dense<0.000000e+00> : vector<16x128xf32>
    %107 = tpu.matmul %106, %105, %cst_56 {dimension_numbers = #tpu.dot_dimension_numbers<[1], [0], [0], [1], [0, 0, 1, 1], [], []>} : vector<16x128xbf16>, vector<128x128xbf16>, vector<16x128xf32> -> vector<16x128xf32>
    %108 = arith.addf %100, %107 : vector<16x128xf32>
    %c3 = arith.constant 3 : index
    %c0_57 = arith.constant 0 : index
    %c0_58 = arith.constant 0 : index
    %109 = vector.load %arg5[%c3, %c0_57, %c0_58] : memref<9x16x64xbf16, #tpu.memory_space<vmem>>, vector<1x16x64xbf16>
    %110 = vector.shape_cast %109 : vector<1x16x64xbf16> to vector<16x64xbf16>
    %cst_59 = arith.constant dense<0.000000e+00> : vector<16x128xf32>
    %111 = tpu.matmul %110, %85, %cst_59 {dimension_numbers = #tpu.dot_dimension_numbers<[1], [0], [0], [1], [0, 0, 1, 1], [], []>} : vector<16x64xbf16>, vector<64x128xbf16>, vector<16x128xf32> -> vector<16x128xf32>
    %c3_60 = arith.constant 3 : index
    %c0_61 = arith.constant 0 : index
    %c0_62 = arith.constant 0 : index
    %112 = vector.load %arg6[%c3_60, %c0_61, %c0_62] : memref<9x128x128xbf16, #tpu.memory_space<vmem>>, vector<1x128x128xbf16>
    %113 = vector.shape_cast %112 : vector<1x128x128xbf16> to vector<128x128xbf16>
    %114 = arith.truncf %111 : vector<16x128xf32> to vector<16x128xbf16>
    %cst_63 = arith.constant dense<0.000000e+00> : vector<16x128xf32>
    %115 = tpu.matmul %114, %113, %cst_63 {dimension_numbers = #tpu.dot_dimension_numbers<[1], [0], [0], [1], [0, 0, 1, 1], [], []>} : vector<16x128xbf16>, vector<128x128xbf16>, vector<16x128xf32> -> vector<16x128xf32>
    %116 = arith.addf %108, %115 : vector<16x128xf32>
    %c4 = arith.constant 4 : index
    %c0_64 = arith.constant 0 : index
    %c0_65 = arith.constant 0 : index
    %117 = vector.load %arg5[%c4, %c0_64, %c0_65] : memref<9x16x64xbf16, #tpu.memory_space<vmem>>, vector<1x16x64xbf16>
    %118 = vector.shape_cast %117 : vector<1x16x64xbf16> to vector<16x64xbf16>
    %cst_66 = arith.constant dense<0.000000e+00> : vector<16x128xf32>
    %119 = tpu.matmul %118, %85, %cst_66 {dimension_numbers = #tpu.dot_dimension_numbers<[1], [0], [0], [1], [0, 0, 1, 1], [], []>} : vector<16x64xbf16>, vector<64x128xbf16>, vector<16x128xf32> -> vector<16x128xf32>
    %c4_67 = arith.constant 4 : index
    %c0_68 = arith.constant 0 : index
    %c0_69 = arith.constant 0 : index
    %120 = vector.load %arg6[%c4_67, %c0_68, %c0_69] : memref<9x128x128xbf16, #tpu.memory_space<vmem>>, vector<1x128x128xbf16>
    %121 = vector.shape_cast %120 : vector<1x128x128xbf16> to vector<128x128xbf16>
    %122 = arith.truncf %119 : vector<16x128xf32> to vector<16x128xbf16>
    %cst_70 = arith.constant dense<0.000000e+00> : vector<16x128xf32>
    %123 = tpu.matmul %122, %121, %cst_70 {dimension_numbers = #tpu.dot_dimension_numbers<[1], [0], [0], [1], [0, 0, 1, 1], [], []>} : vector<16x128xbf16>, vector<128x128xbf16>, vector<16x128xf32> -> vector<16x128xf32>
    %124 = arith.addf %116, %123 : vector<16x128xf32>
    %c5 = arith.constant 5 : index
    %c0_71 = arith.constant 0 : index
    %c0_72 = arith.constant 0 : index
    %125 = vector.load %arg5[%c5, %c0_71, %c0_72] : memref<9x16x64xbf16, #tpu.memory_space<vmem>>, vector<1x16x64xbf16>
    %126 = vector.shape_cast %125 : vector<1x16x64xbf16> to vector<16x64xbf16>
    %cst_73 = arith.constant dense<0.000000e+00> : vector<16x128xf32>
    %127 = tpu.matmul %126, %85, %cst_73 {dimension_numbers = #tpu.dot_dimension_numbers<[1], [0], [0], [1], [0, 0, 1, 1], [], []>} : vector<16x64xbf16>, vector<64x128xbf16>, vector<16x128xf32> -> vector<16x128xf32>
    %c5_74 = arith.constant 5 : index
    %c0_75 = arith.constant 0 : index
    %c0_76 = arith.constant 0 : index
    %128 = vector.load %arg6[%c5_74, %c0_75, %c0_76] : memref<9x128x128xbf16, #tpu.memory_space<vmem>>, vector<1x128x128xbf16>
    %129 = vector.shape_cast %128 : vector<1x128x128xbf16> to vector<128x128xbf16>
    %130 = arith.truncf %127 : vector<16x128xf32> to vector<16x128xbf16>
    %cst_77 = arith.constant dense<0.000000e+00> : vector<16x128xf32>
    %131 = tpu.matmul %130, %129, %cst_77 {dimension_numbers = #tpu.dot_dimension_numbers<[1], [0], [0], [1], [0, 0, 1, 1], [], []>} : vector<16x128xbf16>, vector<128x128xbf16>, vector<16x128xf32> -> vector<16x128xf32>
    %132 = arith.addf %124, %131 : vector<16x128xf32>
    %c6 = arith.constant 6 : index
    %c0_78 = arith.constant 0 : index
    %c0_79 = arith.constant 0 : index
    %133 = vector.load %arg5[%c6, %c0_78, %c0_79] : memref<9x16x64xbf16, #tpu.memory_space<vmem>>, vector<1x16x64xbf16>
    %134 = vector.shape_cast %133 : vector<1x16x64xbf16> to vector<16x64xbf16>
    %cst_80 = arith.constant dense<0.000000e+00> : vector<16x128xf32>
    %135 = tpu.matmul %134, %85, %cst_80 {dimension_numbers = #tpu.dot_dimension_numbers<[1], [0], [0], [1], [0, 0, 1, 1], [], []>} : vector<16x64xbf16>, vector<64x128xbf16>, vector<16x128xf32> -> vector<16x128xf32>
    %c6_81 = arith.constant 6 : index
    %c0_82 = arith.constant 0 : index
    %c0_83 = arith.constant 0 : index
    %136 = vector.load %arg6[%c6_81, %c0_82, %c0_83] : memref<9x128x128xbf16, #tpu.memory_space<vmem>>, vector<1x128x128xbf16>
    %137 = vector.shape_cast %136 : vector<1x128x128xbf16> to vector<128x128xbf16>
    %138 = arith.truncf %135 : vector<16x128xf32> to vector<16x128xbf16>
    %cst_84 = arith.constant dense<0.000000e+00> : vector<16x128xf32>
    %139 = tpu.matmul %138, %137, %cst_84 {dimension_numbers = #tpu.dot_dimension_numbers<[1], [0], [0], [1], [0, 0, 1, 1], [], []>} : vector<16x128xbf16>, vector<128x128xbf16>, vector<16x128xf32> -> vector<16x128xf32>
    %140 = arith.addf %132, %139 : vector<16x128xf32>
    %c7 = arith.constant 7 : index
    %c0_85 = arith.constant 0 : index
    %c0_86 = arith.constant 0 : index
    %141 = vector.load %arg5[%c7, %c0_85, %c0_86] : memref<9x16x64xbf16, #tpu.memory_space<vmem>>, vector<1x16x64xbf16>
    %142 = vector.shape_cast %141 : vector<1x16x64xbf16> to vector<16x64xbf16>
    %cst_87 = arith.constant dense<0.000000e+00> : vector<16x128xf32>
    %143 = tpu.matmul %142, %85, %cst_87 {dimension_numbers = #tpu.dot_dimension_numbers<[1], [0], [0], [1], [0, 0, 1, 1], [], []>} : vector<16x64xbf16>, vector<64x128xbf16>, vector<16x128xf32> -> vector<16x128xf32>
    %c7_88 = arith.constant 7 : index
    %c0_89 = arith.constant 0 : index
    %c0_90 = arith.constant 0 : index
    %144 = vector.load %arg6[%c7_88, %c0_89, %c0_90] : memref<9x128x128xbf16, #tpu.memory_space<vmem>>, vector<1x128x128xbf16>
    %145 = vector.shape_cast %144 : vector<1x128x128xbf16> to vector<128x128xbf16>
    %146 = arith.truncf %143 : vector<16x128xf32> to vector<16x128xbf16>
    %cst_91 = arith.constant dense<0.000000e+00> : vector<16x128xf32>
    %147 = tpu.matmul %146, %145, %cst_91 {dimension_numbers = #tpu.dot_dimension_numbers<[1], [0], [0], [1], [0, 0, 1, 1], [], []>} : vector<16x128xbf16>, vector<128x128xbf16>, vector<16x128xf32> -> vector<16x128xf32>
    %148 = arith.addf %140, %147 : vector<16x128xf32>
    %c8 = arith.constant 8 : index
    %c0_92 = arith.constant 0 : index
    %c0_93 = arith.constant 0 : index
    %149 = vector.load %arg5[%c8, %c0_92, %c0_93] : memref<9x16x64xbf16, #tpu.memory_space<vmem>>, vector<1x16x64xbf16>
    %150 = vector.shape_cast %149 : vector<1x16x64xbf16> to vector<16x64xbf16>
    %cst_94 = arith.constant dense<0.000000e+00> : vector<16x128xf32>
    %151 = tpu.matmul %150, %85, %cst_94 {dimension_numbers = #tpu.dot_dimension_numbers<[1], [0], [0], [1], [0, 0, 1, 1], [], []>} : vector<16x64xbf16>, vector<64x128xbf16>, vector<16x128xf32> -> vector<16x128xf32>
    %c8_95 = arith.constant 8 : index
    %c0_96 = arith.constant 0 : index
    %c0_97 = arith.constant 0 : index
    %152 = vector.load %arg6[%c8_95, %c0_96, %c0_97] : memref<9x128x128xbf16, #tpu.memory_space<vmem>>, vector<1x128x128xbf16>
    %153 = vector.shape_cast %152 : vector<1x128x128xbf16> to vector<128x128xbf16>
    %154 = arith.truncf %151 : vector<16x128xf32> to vector<16x128xbf16>
    %cst_98 = arith.constant dense<0.000000e+00> : vector<16x128xf32>
    %155 = tpu.matmul %154, %153, %cst_98 {dimension_numbers = #tpu.dot_dimension_numbers<[1], [0], [0], [1], [0, 0, 1, 1], [], []>} : vector<16x128xbf16>, vector<128x128xbf16>, vector<16x128xf32> -> vector<16x128xf32>
    %156 = arith.addf %148, %155 : vector<16x128xf32>
    %cst_99 = arith.constant dense<0.000000e+00> : vector<128xf32>
    %157 = vector.multi_reduction <add>, %156, %cst_99 [0] : vector<16x128xf32> to vector<128xf32>
    %158 = vector.shape_cast %157 : vector<128xf32> to vector<1x128xf32>
    %cst_100 = arith.constant 1.600000e+01 : f32
    %159 = vector.broadcast %cst_100 : f32 to vector<1x128xf32>
    %160 = arith.divf %158, %159 : vector<1x128xf32>
    %161 = arith.mulf %156, %156 : vector<16x128xf32>
    %cst_101 = arith.constant dense<0.000000e+00> : vector<128xf32>
    %162 = vector.multi_reduction <add>, %161, %cst_101 [0] : vector<16x128xf32> to vector<128xf32>
    %163 = vector.shape_cast %162 : vector<128xf32> to vector<1x128xf32>
    %cst_102 = arith.constant 1.600000e+01 : f32
    %164 = vector.broadcast %cst_102 : f32 to vector<1x128xf32>
    %165 = arith.divf %163, %164 : vector<1x128xf32>
    %166 = arith.mulf %160, %160 : vector<1x128xf32>
    %167 = arith.subf %165, %166 : vector<1x128xf32>
    %cst_103 = arith.constant 0.000000e+00 : f32
    %168 = vector.broadcast %cst_103 : f32 to vector<1x128xf32>
    %169 = arith.maximumf %167, %168 : vector<1x128xf32>
    %170 = vector.broadcast %160 : vector<1x128xf32> to vector<16x128xf32>
    %171 = arith.subf %156, %170 : vector<16x128xf32>
    %cst_104 = arith.constant 9.99999974E-6 : f32
    %172 = vector.broadcast %cst_104 : f32 to vector<1x128xf32>
    %173 = arith.addf %169, %172 : vector<1x128xf32>
    %174 = math.rsqrt %173 : vector<1x128xf32>
    %175 = vector.broadcast %174 : vector<1x128xf32> to vector<16x128xf32>
    %176 = arith.mulf %171, %175 : vector<16x128xf32>
    %c0_105 = arith.constant 0 : index
    %c0_106 = arith.constant 0 : index
    %177 = vector.load %arg7[%c0_105, %c0_106] : memref<128x128xbf16, #tpu.memory_space<vmem>>, vector<128x128xbf16>
    %178 = arith.truncf %176 : vector<16x128xf32> to vector<16x128xbf16>
    %cst_107 = arith.constant dense<0.000000e+00> : vector<16x128xf32>
    %179 = tpu.matmul %178, %177, %cst_107 {dimension_numbers = #tpu.dot_dimension_numbers<[1], [0], [0], [1], [0, 0, 1, 1], [], []>} : vector<16x128xbf16>, vector<128x128xbf16>, vector<16x128xf32> -> vector<16x128xf32>
    %cst_108 = arith.constant dense<0.000000e+00> : vector<128xf32>
    %180 = vector.multi_reduction <add>, %179, %cst_108 [0] : vector<16x128xf32> to vector<128xf32>
    %181 = vector.shape_cast %180 : vector<128xf32> to vector<1x128xf32>
    %cst_109 = arith.constant 1.600000e+01 : f32
    %182 = vector.broadcast %cst_109 : f32 to vector<1x128xf32>
    %183 = arith.divf %181, %182 : vector<1x128xf32>
    %184 = arith.mulf %179, %179 : vector<16x128xf32>
    %cst_110 = arith.constant dense<0.000000e+00> : vector<128xf32>
    %185 = vector.multi_reduction <add>, %184, %cst_110 [0] : vector<16x128xf32> to vector<128xf32>
    %186 = vector.shape_cast %185 : vector<128xf32> to vector<1x128xf32>
    %cst_111 = arith.constant 1.600000e+01 : f32
    %187 = vector.broadcast %cst_111 : f32 to vector<1x128xf32>
    %188 = arith.divf %186, %187 : vector<1x128xf32>
    %189 = arith.mulf %183, %183 : vector<1x128xf32>
    %190 = arith.subf %188, %189 : vector<1x128xf32>
    %cst_112 = arith.constant 0.000000e+00 : f32
    %191 = vector.broadcast %cst_112 : f32 to vector<1x128xf32>
    %192 = arith.maximumf %190, %191 : vector<1x128xf32>
    %193 = vector.broadcast %183 : vector<1x128xf32> to vector<16x128xf32>
    %194 = arith.subf %179, %193 : vector<16x128xf32>
    %cst_113 = arith.constant 9.99999974E-6 : f32
    %195 = vector.broadcast %cst_113 : f32 to vector<1x128xf32>
    %196 = arith.addf %192, %195 : vector<1x128xf32>
    %197 = math.rsqrt %196 : vector<1x128xf32>
    %198 = vector.broadcast %197 : vector<1x128xf32> to vector<16x128xf32>
    %199 = arith.mulf %194, %198 : vector<16x128xf32>
    %200 = arith.addf %199, %61 : vector<16x128xf32>
    %cst_114 = arith.constant 0.000000e+00 : f32
    %201 = vector.broadcast %cst_114 : f32 to vector<16x128xf32>
    %202 = arith.maximumf %200, %201 : vector<16x128xf32>
    %c0_115 = arith.constant 0 : index
    %c0_116 = arith.constant 0 : index
    %203 = vector.load %arg10[%c0_115, %c0_116] : memref<128x128xbf16, #tpu.memory_space<vmem>>, vector<128x128xbf16>
    %204 = arith.truncf %202 : vector<16x128xf32> to vector<16x128xbf16>
    %cst_117 = arith.constant dense<0.000000e+00> : vector<16x128xf32>
    %205 = tpu.matmul %204, %203, %cst_117 {dimension_numbers = #tpu.dot_dimension_numbers<[1], [0], [0], [1], [0, 0, 1, 1], [], []>} : vector<16x128xbf16>, vector<128x128xbf16>, vector<16x128xf32> -> vector<16x128xf32>
    %cst_118 = arith.constant dense<0.000000e+00> : vector<128xf32>
    %206 = vector.multi_reduction <add>, %205, %cst_118 [0] : vector<16x128xf32> to vector<128xf32>
    %207 = vector.shape_cast %206 : vector<128xf32> to vector<1x128xf32>
    %cst_119 = arith.constant 1.600000e+01 : f32
    %208 = vector.broadcast %cst_119 : f32 to vector<1x128xf32>
    %209 = arith.divf %207, %208 : vector<1x128xf32>
    %210 = arith.mulf %205, %205 : vector<16x128xf32>
    %cst_120 = arith.constant dense<0.000000e+00> : vector<128xf32>
    %211 = vector.multi_reduction <add>, %210, %cst_120 [0] : vector<16x128xf32> to vector<128xf32>
    %212 = vector.shape_cast %211 : vector<128xf32> to vector<1x128xf32>
    %cst_121 = arith.constant 1.600000e+01 : f32
    %213 = vector.broadcast %cst_121 : f32 to vector<1x128xf32>
    %214 = arith.divf %212, %213 : vector<1x128xf32>
    %215 = arith.mulf %209, %209 : vector<1x128xf32>
    %216 = arith.subf %214, %215 : vector<1x128xf32>
    %cst_122 = arith.constant 0.000000e+00 : f32
    %217 = vector.broadcast %cst_122 : f32 to vector<1x128xf32>
    %218 = arith.maximumf %216, %217 : vector<1x128xf32>
    %219 = vector.broadcast %209 : vector<1x128xf32> to vector<16x128xf32>
    %220 = arith.subf %205, %219 : vector<16x128xf32>
    %cst_123 = arith.constant 9.99999974E-6 : f32
    %221 = vector.broadcast %cst_123 : f32 to vector<1x128xf32>
    %222 = arith.addf %218, %221 : vector<1x128xf32>
    %223 = math.rsqrt %222 : vector<1x128xf32>
    %224 = vector.broadcast %223 : vector<1x128xf32> to vector<16x128xf32>
    %225 = arith.mulf %220, %224 : vector<16x128xf32>
    %226 = arith.truncf %225 : vector<16x128xf32> to vector<16x128xbf16>
    %c0_124 = arith.constant 0 : index
    %c0_125 = arith.constant 0 : index
    %c0_126 = arith.constant 0 : index
    %227 = vector.load %arg11[%c0_124, %c0_125, %c0_126] : memref<9x16x16xbf16, #tpu.memory_space<vmem>>, vector<1x16x16xbf16>
    %228 = vector.shape_cast %227 : vector<1x16x16xbf16> to vector<16x16xbf16>
    %cst_127 = arith.constant dense<0.000000e+00> : vector<16x128xf32>
    %229 = tpu.matmul %228, %226, %cst_127 {dimension_numbers = #tpu.dot_dimension_numbers<[1], [0], [0], [1], [0, 0, 1, 1], [], []>} : vector<16x16xbf16>, vector<16x128xbf16>, vector<16x128xf32> -> vector<16x128xf32>
    %c0_128 = arith.constant 0 : index
    %c0_129 = arith.constant 0 : index
    %c0_130 = arith.constant 0 : index
    %230 = vector.load %arg12[%c0_128, %c0_129, %c0_130] : memref<9x128x128xbf16, #tpu.memory_space<vmem>>, vector<1x128x128xbf16>
    %231 = vector.shape_cast %230 : vector<1x128x128xbf16> to vector<128x128xbf16>
    %232 = arith.truncf %229 : vector<16x128xf32> to vector<16x128xbf16>
    %cst_131 = arith.constant dense<0.000000e+00> : vector<16x128xf32>
    %233 = tpu.matmul %232, %231, %cst_131 {dimension_numbers = #tpu.dot_dimension_numbers<[1], [0], [0], [1], [0, 0, 1, 1], [], []>} : vector<16x128xbf16>, vector<128x128xbf16>, vector<16x128xf32> -> vector<16x128xf32>
    %c1_132 = arith.constant 1 : index
    %c0_133 = arith.constant 0 : index
    %c0_134 = arith.constant 0 : index
    %234 = vector.load %arg11[%c1_132, %c0_133, %c0_134] : memref<9x16x16xbf16, #tpu.memory_space<vmem>>, vector<1x16x16xbf16>
    %235 = vector.shape_cast %234 : vector<1x16x16xbf16> to vector<16x16xbf16>
    %cst_135 = arith.constant dense<0.000000e+00> : vector<16x128xf32>
    %236 = tpu.matmul %235, %226, %cst_135 {dimension_numbers = #tpu.dot_dimension_numbers<[1], [0], [0], [1], [0, 0, 1, 1], [], []>} : vector<16x16xbf16>, vector<16x128xbf16>, vector<16x128xf32> -> vector<16x128xf32>
    %c1_136 = arith.constant 1 : index
    %c0_137 = arith.constant 0 : index
    %c0_138 = arith.constant 0 : index
    %237 = vector.load %arg12[%c1_136, %c0_137, %c0_138] : memref<9x128x128xbf16, #tpu.memory_space<vmem>>, vector<1x128x128xbf16>
    %238 = vector.shape_cast %237 : vector<1x128x128xbf16> to vector<128x128xbf16>
    %239 = arith.truncf %236 : vector<16x128xf32> to vector<16x128xbf16>
    %cst_139 = arith.constant dense<0.000000e+00> : vector<16x128xf32>
    %240 = tpu.matmul %239, %238, %cst_139 {dimension_numbers = #tpu.dot_dimension_numbers<[1], [0], [0], [1], [0, 0, 1, 1], [], []>} : vector<16x128xbf16>, vector<128x128xbf16>, vector<16x128xf32> -> vector<16x128xf32>
    %241 = arith.addf %233, %240 : vector<16x128xf32>
    %c2_140 = arith.constant 2 : index
    %c0_141 = arith.constant 0 : index
    %c0_142 = arith.constant 0 : index
    %242 = vector.load %arg11[%c2_140, %c0_141, %c0_142] : memref<9x16x16xbf16, #tpu.memory_space<vmem>>, vector<1x16x16xbf16>
    %243 = vector.shape_cast %242 : vector<1x16x16xbf16> to vector<16x16xbf16>
    %cst_143 = arith.constant dense<0.000000e+00> : vector<16x128xf32>
    %244 = tpu.matmul %243, %226, %cst_143 {dimension_numbers = #tpu.dot_dimension_numbers<[1], [0], [0], [1], [0, 0, 1, 1], [], []>} : vector<16x16xbf16>, vector<16x128xbf16>, vector<16x128xf32> -> vector<16x128xf32>
    %c2_144 = arith.constant 2 : index
    %c0_145 = arith.constant 0 : index
    %c0_146 = arith.constant 0 : index
    %245 = vector.load %arg12[%c2_144, %c0_145, %c0_146] : memref<9x128x128xbf16, #tpu.memory_space<vmem>>, vector<1x128x128xbf16>
    %246 = vector.shape_cast %245 : vector<1x128x128xbf16> to vector<128x128xbf16>
    %247 = arith.truncf %244 : vector<16x128xf32> to vector<16x128xbf16>
    %cst_147 = arith.constant dense<0.000000e+00> : vector<16x128xf32>
    %248 = tpu.matmul %247, %246, %cst_147 {dimension_numbers = #tpu.dot_dimension_numbers<[1], [0], [0], [1], [0, 0, 1, 1], [], []>} : vector<16x128xbf16>, vector<128x128xbf16>, vector<16x128xf32> -> vector<16x128xf32>
    %249 = arith.addf %241, %248 : vector<16x128xf32>
    %c3_148 = arith.constant 3 : index
    %c0_149 = arith.constant 0 : index
    %c0_150 = arith.constant 0 : index
    %250 = vector.load %arg11[%c3_148, %c0_149, %c0_150] : memref<9x16x16xbf16, #tpu.memory_space<vmem>>, vector<1x16x16xbf16>
    %251 = vector.shape_cast %250 : vector<1x16x16xbf16> to vector<16x16xbf16>
    %cst_151 = arith.constant dense<0.000000e+00> : vector<16x128xf32>
    %252 = tpu.matmul %251, %226, %cst_151 {dimension_numbers = #tpu.dot_dimension_numbers<[1], [0], [0], [1], [0, 0, 1, 1], [], []>} : vector<16x16xbf16>, vector<16x128xbf16>, vector<16x128xf32> -> vector<16x128xf32>
    %c3_152 = arith.constant 3 : index
    %c0_153 = arith.constant 0 : index
    %c0_154 = arith.constant 0 : index
    %253 = vector.load %arg12[%c3_152, %c0_153, %c0_154] : memref<9x128x128xbf16, #tpu.memory_space<vmem>>, vector<1x128x128xbf16>
    %254 = vector.shape_cast %253 : vector<1x128x128xbf16> to vector<128x128xbf16>
    %255 = arith.truncf %252 : vector<16x128xf32> to vector<16x128xbf16>
    %cst_155 = arith.constant dense<0.000000e+00> : vector<16x128xf32>
    %256 = tpu.matmul %255, %254, %cst_155 {dimension_numbers = #tpu.dot_dimension_numbers<[1], [0], [0], [1], [0, 0, 1, 1], [], []>} : vector<16x128xbf16>, vector<128x128xbf16>, vector<16x128xf32> -> vector<16x128xf32>
    %257 = arith.addf %249, %256 : vector<16x128xf32>
    %c4_156 = arith.constant 4 : index
    %c0_157 = arith.constant 0 : index
    %c0_158 = arith.constant 0 : index
    %258 = vector.load %arg11[%c4_156, %c0_157, %c0_158] : memref<9x16x16xbf16, #tpu.memory_space<vmem>>, vector<1x16x16xbf16>
    %259 = vector.shape_cast %258 : vector<1x16x16xbf16> to vector<16x16xbf16>
    %cst_159 = arith.constant dense<0.000000e+00> : vector<16x128xf32>
    %260 = tpu.matmul %259, %226, %cst_159 {dimension_numbers = #tpu.dot_dimension_numbers<[1], [0], [0], [1], [0, 0, 1, 1], [], []>} : vector<16x16xbf16>, vector<16x128xbf16>, vector<16x128xf32> -> vector<16x128xf32>
    %c4_160 = arith.constant 4 : index
    %c0_161 = arith.constant 0 : index
    %c0_162 = arith.constant 0 : index
    %261 = vector.load %arg12[%c4_160, %c0_161, %c0_162] : memref<9x128x128xbf16, #tpu.memory_space<vmem>>, vector<1x128x128xbf16>
    %262 = vector.shape_cast %261 : vector<1x128x128xbf16> to vector<128x128xbf16>
    %263 = arith.truncf %260 : vector<16x128xf32> to vector<16x128xbf16>
    %cst_163 = arith.constant dense<0.000000e+00> : vector<16x128xf32>
    %264 = tpu.matmul %263, %262, %cst_163 {dimension_numbers = #tpu.dot_dimension_numbers<[1], [0], [0], [1], [0, 0, 1, 1], [], []>} : vector<16x128xbf16>, vector<128x128xbf16>, vector<16x128xf32> -> vector<16x128xf32>
    %265 = arith.addf %257, %264 : vector<16x128xf32>
    %c5_164 = arith.constant 5 : index
    %c0_165 = arith.constant 0 : index
    %c0_166 = arith.constant 0 : index
    %266 = vector.load %arg11[%c5_164, %c0_165, %c0_166] : memref<9x16x16xbf16, #tpu.memory_space<vmem>>, vector<1x16x16xbf16>
    %267 = vector.shape_cast %266 : vector<1x16x16xbf16> to vector<16x16xbf16>
    %cst_167 = arith.constant dense<0.000000e+00> : vector<16x128xf32>
    %268 = tpu.matmul %267, %226, %cst_167 {dimension_numbers = #tpu.dot_dimension_numbers<[1], [0], [0], [1], [0, 0, 1, 1], [], []>} : vector<16x16xbf16>, vector<16x128xbf16>, vector<16x128xf32> -> vector<16x128xf32>
    %c5_168 = arith.constant 5 : index
    %c0_169 = arith.constant 0 : index
    %c0_170 = arith.constant 0 : index
    %269 = vector.load %arg12[%c5_168, %c0_169, %c0_170] : memref<9x128x128xbf16, #tpu.memory_space<vmem>>, vector<1x128x128xbf16>
    %270 = vector.shape_cast %269 : vector<1x128x128xbf16> to vector<128x128xbf16>
    %271 = arith.truncf %268 : vector<16x128xf32> to vector<16x128xbf16>
    %cst_171 = arith.constant dense<0.000000e+00> : vector<16x128xf32>
    %272 = tpu.matmul %271, %270, %cst_171 {dimension_numbers = #tpu.dot_dimension_numbers<[1], [0], [0], [1], [0, 0, 1, 1], [], []>} : vector<16x128xbf16>, vector<128x128xbf16>, vector<16x128xf32> -> vector<16x128xf32>
    %273 = arith.addf %265, %272 : vector<16x128xf32>
    %c6_172 = arith.constant 6 : index
    %c0_173 = arith.constant 0 : index
    %c0_174 = arith.constant 0 : index
    %274 = vector.load %arg11[%c6_172, %c0_173, %c0_174] : memref<9x16x16xbf16, #tpu.memory_space<vmem>>, vector<1x16x16xbf16>
    %275 = vector.shape_cast %274 : vector<1x16x16xbf16> to vector<16x16xbf16>
    %cst_175 = arith.constant dense<0.000000e+00> : vector<16x128xf32>
    %276 = tpu.matmul %275, %226, %cst_175 {dimension_numbers = #tpu.dot_dimension_numbers<[1], [0], [0], [1], [0, 0, 1, 1], [], []>} : vector<16x16xbf16>, vector<16x128xbf16>, vector<16x128xf32> -> vector<16x128xf32>
    %c6_176 = arith.constant 6 : index
    %c0_177 = arith.constant 0 : index
    %c0_178 = arith.constant 0 : index
    %277 = vector.load %arg12[%c6_176, %c0_177, %c0_178] : memref<9x128x128xbf16, #tpu.memory_space<vmem>>, vector<1x128x128xbf16>
    %278 = vector.shape_cast %277 : vector<1x128x128xbf16> to vector<128x128xbf16>
    %279 = arith.truncf %276 : vector<16x128xf32> to vector<16x128xbf16>
    %cst_179 = arith.constant dense<0.000000e+00> : vector<16x128xf32>
    %280 = tpu.matmul %279, %278, %cst_179 {dimension_numbers = #tpu.dot_dimension_numbers<[1], [0], [0], [1], [0, 0, 1, 1], [], []>} : vector<16x128xbf16>, vector<128x128xbf16>, vector<16x128xf32> -> vector<16x128xf32>
    %281 = arith.addf %273, %280 : vector<16x128xf32>
    %c7_180 = arith.constant 7 : index
    %c0_181 = arith.constant 0 : index
    %c0_182 = arith.constant 0 : index
    %282 = vector.load %arg11[%c7_180, %c0_181, %c0_182] : memref<9x16x16xbf16, #tpu.memory_space<vmem>>, vector<1x16x16xbf16>
    %283 = vector.shape_cast %282 : vector<1x16x16xbf16> to vector<16x16xbf16>
    %cst_183 = arith.constant dense<0.000000e+00> : vector<16x128xf32>
    %284 = tpu.matmul %283, %226, %cst_183 {dimension_numbers = #tpu.dot_dimension_numbers<[1], [0], [0], [1], [0, 0, 1, 1], [], []>} : vector<16x16xbf16>, vector<16x128xbf16>, vector<16x128xf32> -> vector<16x128xf32>
    %c7_184 = arith.constant 7 : index
    %c0_185 = arith.constant 0 : index
    %c0_186 = arith.constant 0 : index
    %285 = vector.load %arg12[%c7_184, %c0_185, %c0_186] : memref<9x128x128xbf16, #tpu.memory_space<vmem>>, vector<1x128x128xbf16>
    %286 = vector.shape_cast %285 : vector<1x128x128xbf16> to vector<128x128xbf16>
    %287 = arith.truncf %284 : vector<16x128xf32> to vector<16x128xbf16>
    %cst_187 = arith.constant dense<0.000000e+00> : vector<16x128xf32>
    %288 = tpu.matmul %287, %286, %cst_187 {dimension_numbers = #tpu.dot_dimension_numbers<[1], [0], [0], [1], [0, 0, 1, 1], [], []>} : vector<16x128xbf16>, vector<128x128xbf16>, vector<16x128xf32> -> vector<16x128xf32>
    %289 = arith.addf %281, %288 : vector<16x128xf32>
    %c8_188 = arith.constant 8 : index
    %c0_189 = arith.constant 0 : index
    %c0_190 = arith.constant 0 : index
    %290 = vector.load %arg11[%c8_188, %c0_189, %c0_190] : memref<9x16x16xbf16, #tpu.memory_space<vmem>>, vector<1x16x16xbf16>
    %291 = vector.shape_cast %290 : vector<1x16x16xbf16> to vector<16x16xbf16>
    %cst_191 = arith.constant dense<0.000000e+00> : vector<16x128xf32>
    %292 = tpu.matmul %291, %226, %cst_191 {dimension_numbers = #tpu.dot_dimension_numbers<[1], [0], [0], [1], [0, 0, 1, 1], [], []>} : vector<16x16xbf16>, vector<16x128xbf16>, vector<16x128xf32> -> vector<16x128xf32>
    %c8_192 = arith.constant 8 : index
    %c0_193 = arith.constant 0 : index
    %c0_194 = arith.constant 0 : index
    %293 = vector.load %arg12[%c8_192, %c0_193, %c0_194] : memref<9x128x128xbf16, #tpu.memory_space<vmem>>, vector<1x128x128xbf16>
    %294 = vector.shape_cast %293 : vector<1x128x128xbf16> to vector<128x128xbf16>
    %295 = arith.truncf %292 : vector<16x128xf32> to vector<16x128xbf16>
    %cst_195 = arith.constant dense<0.000000e+00> : vector<16x128xf32>
    %296 = tpu.matmul %295, %294, %cst_195 {dimension_numbers = #tpu.dot_dimension_numbers<[1], [0], [0], [1], [0, 0, 1, 1], [], []>} : vector<16x128xbf16>, vector<128x128xbf16>, vector<16x128xf32> -> vector<16x128xf32>
    %297 = arith.addf %289, %296 : vector<16x128xf32>
    %cst_196 = arith.constant dense<0.000000e+00> : vector<128xf32>
    %298 = vector.multi_reduction <add>, %297, %cst_196 [0] : vector<16x128xf32> to vector<128xf32>
    %299 = vector.shape_cast %298 : vector<128xf32> to vector<1x128xf32>
    %cst_197 = arith.constant 1.600000e+01 : f32
    %300 = vector.broadcast %cst_197 : f32 to vector<1x128xf32>
    %301 = arith.divf %299, %300 : vector<1x128xf32>
    %302 = arith.mulf %297, %297 : vector<16x128xf32>
    %cst_198 = arith.constant dense<0.000000e+00> : vector<128xf32>
    %303 = vector.multi_reduction <add>, %302, %cst_198 [0] : vector<16x128xf32> to vector<128xf32>
    %304 = vector.shape_cast %303 : vector<128xf32> to vector<1x128xf32>
    %cst_199 = arith.constant 1.600000e+01 : f32
    %305 = vector.broadcast %cst_199 : f32 to vector<1x128xf32>
    %306 = arith.divf %304, %305 : vector<1x128xf32>
    %307 = arith.mulf %301, %301 : vector<1x128xf32>
    %308 = arith.subf %306, %307 : vector<1x128xf32>
    %cst_200 = arith.constant 0.000000e+00 : f32
    %309 = vector.broadcast %cst_200 : f32 to vector<1x128xf32>
    %310 = arith.maximumf %308, %309 : vector<1x128xf32>
    %311 = vector.broadcast %301 : vector<1x128xf32> to vector<16x128xf32>
    %312 = arith.subf %297, %311 : vector<16x128xf32>
    %cst_201 = arith.constant 9.99999974E-6 : f32
    %313 = vector.broadcast %cst_201 : f32 to vector<1x128xf32>
    %314 = arith.addf %310, %313 : vector<1x128xf32>
    %315 = math.rsqrt %314 : vector<1x128xf32>
    %316 = vector.broadcast %315 : vector<1x128xf32> to vector<16x128xf32>
    %317 = arith.mulf %312, %316 : vector<16x128xf32>
    %c0_202 = arith.constant 0 : index
    %c0_203 = arith.constant 0 : index
    %318 = vector.load %arg13[%c0_202, %c0_203] : memref<128x128xbf16, #tpu.memory_space<vmem>>, vector<128x128xbf16>
    %319 = arith.truncf %317 : vector<16x128xf32> to vector<16x128xbf16>
    %cst_204 = arith.constant dense<0.000000e+00> : vector<16x128xf32>
    %320 = tpu.matmul %319, %318, %cst_204 {dimension_numbers = #tpu.dot_dimension_numbers<[1], [0], [0], [1], [0, 0, 1, 1], [], []>} : vector<16x128xbf16>, vector<128x128xbf16>, vector<16x128xf32> -> vector<16x128xf32>
    %cst_205 = arith.constant dense<0.000000e+00> : vector<128xf32>
    %321 = vector.multi_reduction <add>, %320, %cst_205 [0] : vector<16x128xf32> to vector<128xf32>
    %322 = vector.shape_cast %321 : vector<128xf32> to vector<1x128xf32>
    %cst_206 = arith.constant 1.600000e+01 : f32
    %323 = vector.broadcast %cst_206 : f32 to vector<1x128xf32>
    %324 = arith.divf %322, %323 : vector<1x128xf32>
    %325 = arith.mulf %320, %320 : vector<16x128xf32>
    %cst_207 = arith.constant dense<0.000000e+00> : vector<128xf32>
    %326 = vector.multi_reduction <add>, %325, %cst_207 [0] : vector<16x128xf32> to vector<128xf32>
    %327 = vector.shape_cast %326 : vector<128xf32> to vector<1x128xf32>
    %cst_208 = arith.constant 1.600000e+01 : f32
    %328 = vector.broadcast %cst_208 : f32 to vector<1x128xf32>
    %329 = arith.divf %327, %328 : vector<1x128xf32>
    %330 = arith.mulf %324, %324 : vector<1x128xf32>
    %331 = arith.subf %329, %330 : vector<1x128xf32>
    %cst_209 = arith.constant 0.000000e+00 : f32
    %332 = vector.broadcast %cst_209 : f32 to vector<1x128xf32>
    %333 = arith.maximumf %331, %332 : vector<1x128xf32>
    %334 = vector.broadcast %324 : vector<1x128xf32> to vector<16x128xf32>
    %335 = arith.subf %320, %334 : vector<16x128xf32>
    %cst_210 = arith.constant 9.99999974E-6 : f32
    %336 = vector.broadcast %cst_210 : f32 to vector<1x128xf32>
    %337 = arith.addf %333, %336 : vector<1x128xf32>
    %338 = math.rsqrt %337 : vector<1x128xf32>
    %339 = vector.broadcast %338 : vector<1x128xf32> to vector<16x128xf32>
    %340 = arith.mulf %335, %339 : vector<16x128xf32>
    %341 = arith.addf %340, %202 : vector<16x128xf32>
    %cst_211 = arith.constant 0.000000e+00 : f32
    %342 = vector.broadcast %cst_211 : f32 to vector<16x128xf32>
    %343 = arith.maximumf %341, %342 : vector<16x128xf32>
    %344 = arith.truncf %343 : vector<16x128xf32> to vector<16x128xbf16>
    %c0_212 = arith.constant 0 : index
    %c0_213 = arith.constant 0 : index
    %c0_214 = arith.constant 0 : index
    %345 = vector.load %arg14[%c0_212, %c0_213, %c0_214] : memref<9x128x128xbf16, #tpu.memory_space<vmem>>, vector<1x128x128xbf16>
    %346 = vector.shape_cast %345 : vector<1x128x128xbf16> to vector<128x128xbf16>
    %cst_215 = arith.constant dense<0.000000e+00> : vector<16x128xf32>
    %347 = tpu.matmul %344, %346, %cst_215 {dimension_numbers = #tpu.dot_dimension_numbers<[1], [0], [0], [1], [0, 0, 1, 1], [], []>} : vector<16x128xbf16>, vector<128x128xbf16>, vector<16x128xf32> -> vector<16x128xf32>
    %c0_216 = arith.constant 0 : index
    %c0_217 = arith.constant 0 : index
    %348 = vector.load %arg21[%c0_216, %c0_217] : memref<144x128xf32, #tpu.memory_space<vmem>>, vector<16x128xf32>
    tpu.vector_store %arg21[%c0_216, %c0_217], %347 {strides = array<i32>} : memref<144x128xf32, #tpu.memory_space<vmem>>, vector<16x128xf32>,
    %c1_218 = arith.constant 1 : index
    %c0_219 = arith.constant 0 : index
    %c0_220 = arith.constant 0 : index
    %349 = vector.load %arg14[%c1_218, %c0_219, %c0_220] : memref<9x128x128xbf16, #tpu.memory_space<vmem>>, vector<1x128x128xbf16>
    %350 = vector.shape_cast %349 : vector<1x128x128xbf16> to vector<128x128xbf16>
    %cst_221 = arith.constant dense<0.000000e+00> : vector<16x128xf32>
    %351 = tpu.matmul %344, %350, %cst_221 {dimension_numbers = #tpu.dot_dimension_numbers<[1], [0], [0], [1], [0, 0, 1, 1], [], []>} : vector<16x128xbf16>, vector<128x128xbf16>, vector<16x128xf32> -> vector<16x128xf32>
    %c16 = arith.constant 16 : index
    %c0_222 = arith.constant 0 : index
    %352 = vector.load %arg21[%c16, %c0_222] : memref<144x128xf32, #tpu.memory_space<vmem>>, vector<16x128xf32>
    tpu.vector_store %arg21[%c16, %c0_222], %351 {strides = array<i32>} : memref<144x128xf32, #tpu.memory_space<vmem>>, vector<16x128xf32>,
    %c2_223 = arith.constant 2 : index
    %c0_224 = arith.constant 0 : index
    %c0_225 = arith.constant 0 : index
    %353 = vector.load %arg14[%c2_223, %c0_224, %c0_225] : memref<9x128x128xbf16, #tpu.memory_space<vmem>>, vector<1x128x128xbf16>
    %354 = vector.shape_cast %353 : vector<1x128x128xbf16> to vector<128x128xbf16>
    %cst_226 = arith.constant dense<0.000000e+00> : vector<16x128xf32>
    %355 = tpu.matmul %344, %354, %cst_226 {dimension_numbers = #tpu.dot_dimension_numbers<[1], [0], [0], [1], [0, 0, 1, 1], [], []>} : vector<16x128xbf16>, vector<128x128xbf16>, vector<16x128xf32> -> vector<16x128xf32>
    %c32 = arith.constant 32 : index
    %c0_227 = arith.constant 0 : index
    %356 = vector.load %arg21[%c32, %c0_227] : memref<144x128xf32, #tpu.memory_space<vmem>>, vector<16x128xf32>
    tpu.vector_store %arg21[%c32, %c0_227], %355 {strides = array<i32>} : memref<144x128xf32, #tpu.memory_space<vmem>>, vector<16x128xf32>,
    %c3_228 = arith.constant 3 : index
    %c0_229 = arith.constant 0 : index
    %c0_230 = arith.constant 0 : index
    %357 = vector.load %arg14[%c3_228, %c0_229, %c0_230] : memref<9x128x128xbf16, #tpu.memory_space<vmem>>, vector<1x128x128xbf16>
    %358 = vector.shape_cast %357 : vector<1x128x128xbf16> to vector<128x128xbf16>
    %cst_231 = arith.constant dense<0.000000e+00> : vector<16x128xf32>
    %359 = tpu.matmul %344, %358, %cst_231 {dimension_numbers = #tpu.dot_dimension_numbers<[1], [0], [0], [1], [0, 0, 1, 1], [], []>} : vector<16x128xbf16>, vector<128x128xbf16>, vector<16x128xf32> -> vector<16x128xf32>
    %c48 = arith.constant 48 : index
    %c0_232 = arith.constant 0 : index
    %360 = vector.load %arg21[%c48, %c0_232] : memref<144x128xf32, #tpu.memory_space<vmem>>, vector<16x128xf32>
    tpu.vector_store %arg21[%c48, %c0_232], %359 {strides = array<i32>} : memref<144x128xf32, #tpu.memory_space<vmem>>, vector<16x128xf32>,
    %c4_233 = arith.constant 4 : index
    %c0_234 = arith.constant 0 : index
    %c0_235 = arith.constant 0 : index
    %361 = vector.load %arg14[%c4_233, %c0_234, %c0_235] : memref<9x128x128xbf16, #tpu.memory_space<vmem>>, vector<1x128x128xbf16>
    %362 = vector.shape_cast %361 : vector<1x128x128xbf16> to vector<128x128xbf16>
    %cst_236 = arith.constant dense<0.000000e+00> : vector<16x128xf32>
    %363 = tpu.matmul %344, %362, %cst_236 {dimension_numbers = #tpu.dot_dimension_numbers<[1], [0], [0], [1], [0, 0, 1, 1], [], []>} : vector<16x128xbf16>, vector<128x128xbf16>, vector<16x128xf32> -> vector<16x128xf32>
    %c64 = arith.constant 64 : index
    %c0_237 = arith.constant 0 : index
    %364 = vector.load %arg21[%c64, %c0_237] : memref<144x128xf32, #tpu.memory_space<vmem>>, vector<16x128xf32>
    tpu.vector_store %arg21[%c64, %c0_237], %363 {strides = array<i32>} : memref<144x128xf32, #tpu.memory_space<vmem>>, vector<16x128xf32>,
    %c5_238 = arith.constant 5 : index
    %c0_239 = arith.constant 0 : index
    %c0_240 = arith.constant 0 : index
    %365 = vector.load %arg14[%c5_238, %c0_239, %c0_240] : memref<9x128x128xbf16, #tpu.memory_space<vmem>>, vector<1x128x128xbf16>
    %366 = vector.shape_cast %365 : vector<1x128x128xbf16> to vector<128x128xbf16>
    %cst_241 = arith.constant dense<0.000000e+00> : vector<16x128xf32>
    %367 = tpu.matmul %344, %366, %cst_241 {dimension_numbers = #tpu.dot_dimension_numbers<[1], [0], [0], [1], [0, 0, 1, 1], [], []>} : vector<16x128xbf16>, vector<128x128xbf16>, vector<16x128xf32> -> vector<16x128xf32>
    %c80 = arith.constant 80 : index
    %c0_242 = arith.constant 0 : index
    %368 = vector.load %arg21[%c80, %c0_242] : memref<144x128xf32, #tpu.memory_space<vmem>>, vector<16x128xf32>
    tpu.vector_store %arg21[%c80, %c0_242], %367 {strides = array<i32>} : memref<144x128xf32, #tpu.memory_space<vmem>>, vector<16x128xf32>,
    %c6_243 = arith.constant 6 : index
    %c0_244 = arith.constant 0 : index
    %c0_245 = arith.constant 0 : index
    %369 = vector.load %arg14[%c6_243, %c0_244, %c0_245] : memref<9x128x128xbf16, #tpu.memory_space<vmem>>, vector<1x128x128xbf16>
    %370 = vector.shape_cast %369 : vector<1x128x128xbf16> to vector<128x128xbf16>
    %cst_246 = arith.constant dense<0.000000e+00> : vector<16x128xf32>
    %371 = tpu.matmul %344, %370, %cst_246 {dimension_numbers = #tpu.dot_dimension_numbers<[1], [0], [0], [1], [0, 0, 1, 1], [], []>} : vector<16x128xbf16>, vector<128x128xbf16>, vector<16x128xf32> -> vector<16x128xf32>
    %c96 = arith.constant 96 : index
    %c0_247 = arith.constant 0 : index
    %372 = vector.load %arg21[%c96, %c0_247] : memref<144x128xf32, #tpu.memory_space<vmem>>, vector<16x128xf32>
    tpu.vector_store %arg21[%c96, %c0_247], %371 {strides = array<i32>} : memref<144x128xf32, #tpu.memory_space<vmem>>, vector<16x128xf32>,
    %c7_248 = arith.constant 7 : index
    %c0_249 = arith.constant 0 : index
    %c0_250 = arith.constant 0 : index
    %373 = vector.load %arg14[%c7_248, %c0_249, %c0_250] : memref<9x128x128xbf16, #tpu.memory_space<vmem>>, vector<1x128x128xbf16>
    %374 = vector.shape_cast %373 : vector<1x128x128xbf16> to vector<128x128xbf16>
    %cst_251 = arith.constant dense<0.000000e+00> : vector<16x128xf32>
    %375 = tpu.matmul %344, %374, %cst_251 {dimension_numbers = #tpu.dot_dimension_numbers<[1], [0], [0], [1], [0, 0, 1, 1], [], []>} : vector<16x128xbf16>, vector<128x128xbf16>, vector<16x128xf32> -> vector<16x128xf32>
    %c112 = arith.constant 112 : index
    %c0_252 = arith.constant 0 : index
    %376 = vector.load %arg21[%c112, %c0_252] : memref<144x128xf32, #tpu.memory_space<vmem>>, vector<16x128xf32>
    tpu.vector_store %arg21[%c112, %c0_252], %375 {strides = array<i32>} : memref<144x128xf32, #tpu.memory_space<vmem>>, vector<16x128xf32>,
    %c8_253 = arith.constant 8 : index
    %c0_254 = arith.constant 0 : index
    %c0_255 = arith.constant 0 : index
    %377 = vector.load %arg14[%c8_253, %c0_254, %c0_255] : memref<9x128x128xbf16, #tpu.memory_space<vmem>>, vector<1x128x128xbf16>
    %378 = vector.shape_cast %377 : vector<1x128x128xbf16> to vector<128x128xbf16>
    %cst_256 = arith.constant dense<0.000000e+00> : vector<16x128xf32>
    %379 = tpu.matmul %344, %378, %cst_256 {dimension_numbers = #tpu.dot_dimension_numbers<[1], [0], [0], [1], [0, 0, 1, 1], [], []>} : vector<16x128xbf16>, vector<128x128xbf16>, vector<16x128xf32> -> vector<16x128xf32>
    %c128 = arith.constant 128 : index
    %c0_257 = arith.constant 0 : index
    %380 = vector.load %arg21[%c128, %c0_257] : memref<144x128xf32, #tpu.memory_space<vmem>>, vector<16x128xf32>
    tpu.vector_store %arg21[%c128, %c0_257], %379 {strides = array<i32>} : memref<144x128xf32, #tpu.memory_space<vmem>>, vector<16x128xf32>,
    %c0_258 = arith.constant 0 : index
    %c0_259 = arith.constant 0 : index
    %381 = vector.load %arg15[%c0_258, %c0_259] : memref<64x144xbf16, #tpu.memory_space<vmem>>, vector<64x144xbf16>
    %c0_260 = arith.constant 0 : index
    %c0_261 = arith.constant 0 : index
    %382 = vector.load %arg21[%c0_260, %c0_261] : memref<144x128xf32, #tpu.memory_space<vmem>>, vector<144x128xf32>
    %383 = arith.truncf %382 : vector<144x128xf32> to vector<144x128xbf16>
    %cst_262 = arith.constant dense<0.000000e+00> : vector<64x128xf32>
    %384 = tpu.matmul %381, %383, %cst_262 {dimension_numbers = #tpu.dot_dimension_numbers<[1], [0], [0], [1], [0, 0, 1, 1], [], []>} : vector<64x144xbf16>, vector<144x128xbf16>, vector<64x128xf32> -> vector<64x128xf32>
    %cst_263 = arith.constant dense<0.000000e+00> : vector<128xf32>
    %385 = vector.multi_reduction <add>, %384, %cst_263 [0] : vector<64x128xf32> to vector<128xf32>
    %386 = vector.shape_cast %385 : vector<128xf32> to vector<1x128xf32>
    %cst_264 = arith.constant 6.400000e+01 : f32
    %387 = vector.broadcast %cst_264 : f32 to vector<1x128xf32>
    %388 = arith.divf %386, %387 : vector<1x128xf32>
    %389 = arith.mulf %384, %384 : vector<64x128xf32>
    %cst_265 = arith.constant dense<0.000000e+00> : vector<128xf32>
    %390 = vector.multi_reduction <add>, %389, %cst_265 [0] : vector<64x128xf32> to vector<128xf32>
    %391 = vector.shape_cast %390 : vector<128xf32> to vector<1x128xf32>
    %cst_266 = arith.constant 6.400000e+01 : f32
    %392 = vector.broadcast %cst_266 : f32 to vector<1x128xf32>
    %393 = arith.divf %391, %392 : vector<1x128xf32>
    %394 = arith.mulf %388, %388 : vector<1x128xf32>
    %395 = arith.subf %393, %394 : vector<1x128xf32>
    %cst_267 = arith.constant 0.000000e+00 : f32
    %396 = vector.broadcast %cst_267 : f32 to vector<1x128xf32>
    %397 = arith.maximumf %395, %396 : vector<1x128xf32>
    %398 = vector.broadcast %388 : vector<1x128xf32> to vector<64x128xf32>
    %399 = arith.subf %384, %398 : vector<64x128xf32>
    %cst_268 = arith.constant 9.99999974E-6 : f32
    %400 = vector.broadcast %cst_268 : f32 to vector<1x128xf32>
    %401 = arith.addf %397, %400 : vector<1x128xf32>
    %402 = math.rsqrt %401 : vector<1x128xf32>
    %403 = vector.broadcast %402 : vector<1x128xf32> to vector<64x128xf32>
    %404 = arith.mulf %399, %403 : vector<64x128xf32>
    %cst_269 = arith.constant 0.000000e+00 : f32
    %405 = vector.broadcast %cst_269 : f32 to vector<64x128xf32>
    %406 = arith.maximumf %404, %405 : vector<64x128xf32>
    %407 = arith.truncf %406 : vector<64x128xf32> to vector<64x128xbf16>
    %c0_270 = arith.constant 0 : index
    %c0_271 = arith.constant 0 : index
    %c0_272 = arith.constant 0 : index
    %408 = vector.load %arg16[%c0_270, %c0_271, %c0_272] : memref<9x128x128xbf16, #tpu.memory_space<vmem>>, vector<1x128x128xbf16>
    %409 = vector.shape_cast %408 : vector<1x128x128xbf16> to vector<128x128xbf16>
    %cst_273 = arith.constant dense<0.000000e+00> : vector<64x128xf32>
    %410 = tpu.matmul %407, %409, %cst_273 {dimension_numbers = #tpu.dot_dimension_numbers<[1], [0], [0], [1], [0, 0, 1, 1], [], []>} : vector<64x128xbf16>, vector<128x128xbf16>, vector<64x128xf32> -> vector<64x128xf32>
    %c0_274 = arith.constant 0 : index
    %c0_275 = arith.constant 0 : index
    %411 = vector.load %arg22[%c0_274, %c0_275] : memref<576x128xf32, #tpu.memory_space<vmem>>, vector<64x128xf32>
    tpu.vector_store %arg22[%c0_274, %c0_275], %410 {strides = array<i32>} : memref<576x128xf32, #tpu.memory_space<vmem>>, vector<64x128xf32>,
    %c1_276 = arith.constant 1 : index
    %c0_277 = arith.constant 0 : index
    %c0_278 = arith.constant 0 : index
    %412 = vector.load %arg16[%c1_276, %c0_277, %c0_278] : memref<9x128x128xbf16, #tpu.memory_space<vmem>>, vector<1x128x128xbf16>
    %413 = vector.shape_cast %412 : vector<1x128x128xbf16> to vector<128x128xbf16>
    %cst_279 = arith.constant dense<0.000000e+00> : vector<64x128xf32>
    %414 = tpu.matmul %407, %413, %cst_279 {dimension_numbers = #tpu.dot_dimension_numbers<[1], [0], [0], [1], [0, 0, 1, 1], [], []>} : vector<64x128xbf16>, vector<128x128xbf16>, vector<64x128xf32> -> vector<64x128xf32>
    %c64_280 = arith.constant 64 : index
    %c0_281 = arith.constant 0 : index
    %415 = vector.load %arg22[%c64_280, %c0_281] : memref<576x128xf32, #tpu.memory_space<vmem>>, vector<64x128xf32>
    tpu.vector_store %arg22[%c64_280, %c0_281], %414 {strides = array<i32>} : memref<576x128xf32, #tpu.memory_space<vmem>>, vector<64x128xf32>,
    %c2_282 = arith.constant 2 : index
    %c0_283 = arith.constant 0 : index
    %c0_284 = arith.constant 0 : index
    %416 = vector.load %arg16[%c2_282, %c0_283, %c0_284] : memref<9x128x128xbf16, #tpu.memory_space<vmem>>, vector<1x128x128xbf16>
    %417 = vector.shape_cast %416 : vector<1x128x128xbf16> to vector<128x128xbf16>
    %cst_285 = arith.constant dense<0.000000e+00> : vector<64x128xf32>
    %418 = tpu.matmul %407, %417, %cst_285 {dimension_numbers = #tpu.dot_dimension_numbers<[1], [0], [0], [1], [0, 0, 1, 1], [], []>} : vector<64x128xbf16>, vector<128x128xbf16>, vector<64x128xf32> -> vector<64x128xf32>
    %c128_286 = arith.constant 128 : index
    %c0_287 = arith.constant 0 : index
    %419 = vector.load %arg22[%c128_286, %c0_287] : memref<576x128xf32, #tpu.memory_space<vmem>>, vector<64x128xf32>
    tpu.vector_store %arg22[%c128_286, %c0_287], %418 {strides = array<i32>} : memref<576x128xf32, #tpu.memory_space<vmem>>, vector<64x128xf32>,
    %c3_288 = arith.constant 3 : index
    %c0_289 = arith.constant 0 : index
    %c0_290 = arith.constant 0 : index
    %420 = vector.load %arg16[%c3_288, %c0_289, %c0_290] : memref<9x128x128xbf16, #tpu.memory_space<vmem>>, vector<1x128x128xbf16>
    %421 = vector.shape_cast %420 : vector<1x128x128xbf16> to vector<128x128xbf16>
    %cst_291 = arith.constant dense<0.000000e+00> : vector<64x128xf32>
    %422 = tpu.matmul %407, %421, %cst_291 {dimension_numbers = #tpu.dot_dimension_numbers<[1], [0], [0], [1], [0, 0, 1, 1], [], []>} : vector<64x128xbf16>, vector<128x128xbf16>, vector<64x128xf32> -> vector<64x128xf32>
    %c192 = arith.constant 192 : index
    %c0_292 = arith.constant 0 : index
    %423 = vector.load %arg22[%c192, %c0_292] : memref<576x128xf32, #tpu.memory_space<vmem>>, vector<64x128xf32>
    tpu.vector_store %arg22[%c192, %c0_292], %422 {strides = array<i32>} : memref<576x128xf32, #tpu.memory_space<vmem>>, vector<64x128xf32>,
    %c4_293 = arith.constant 4 : index
    %c0_294 = arith.constant 0 : index
    %c0_295 = arith.constant 0 : index
    %424 = vector.load %arg16[%c4_293, %c0_294, %c0_295] : memref<9x128x128xbf16, #tpu.memory_space<vmem>>, vector<1x128x128xbf16>
    %425 = vector.shape_cast %424 : vector<1x128x128xbf16> to vector<128x128xbf16>
    %cst_296 = arith.constant dense<0.000000e+00> : vector<64x128xf32>
    %426 = tpu.matmul %407, %425, %cst_296 {dimension_numbers = #tpu.dot_dimension_numbers<[1], [0], [0], [1], [0, 0, 1, 1], [], []>} : vector<64x128xbf16>, vector<128x128xbf16>, vector<64x128xf32> -> vector<64x128xf32>
    %c256 = arith.constant 256 : index
    %c0_297 = arith.constant 0 : index
    %427 = vector.load %arg22[%c256, %c0_297] : memref<576x128xf32, #tpu.memory_space<vmem>>, vector<64x128xf32>
    tpu.vector_store %arg22[%c256, %c0_297], %426 {strides = array<i32>} : memref<576x128xf32, #tpu.memory_space<vmem>>, vector<64x128xf32>,
    %c5_298 = arith.constant 5 : index
    %c0_299 = arith.constant 0 : index
    %c0_300 = arith.constant 0 : index
    %428 = vector.load %arg16[%c5_298, %c0_299, %c0_300] : memref<9x128x128xbf16, #tpu.memory_space<vmem>>, vector<1x128x128xbf16>
    %429 = vector.shape_cast %428 : vector<1x128x128xbf16> to vector<128x128xbf16>
    %cst_301 = arith.constant dense<0.000000e+00> : vector<64x128xf32>
    %430 = tpu.matmul %407, %429, %cst_301 {dimension_numbers = #tpu.dot_dimension_numbers<[1], [0], [0], [1], [0, 0, 1, 1], [], []>} : vector<64x128xbf16>, vector<128x128xbf16>, vector<64x128xf32> -> vector<64x128xf32>
    %c320 = arith.constant 320 : index
    %c0_302 = arith.constant 0 : index
    %431 = vector.load %arg22[%c320, %c0_302] : memref<576x128xf32, #tpu.memory_space<vmem>>, vector<64x128xf32>
    tpu.vector_store %arg22[%c320, %c0_302], %430 {strides = array<i32>} : memref<576x128xf32, #tpu.memory_space<vmem>>, vector<64x128xf32>,
    %c6_303 = arith.constant 6 : index
    %c0_304 = arith.constant 0 : index
    %c0_305 = arith.constant 0 : index
    %432 = vector.load %arg16[%c6_303, %c0_304, %c0_305] : memref<9x128x128xbf16, #tpu.memory_space<vmem>>, vector<1x128x128xbf16>
    %433 = vector.shape_cast %432 : vector<1x128x128xbf16> to vector<128x128xbf16>
    %cst_306 = arith.constant dense<0.000000e+00> : vector<64x128xf32>
    %434 = tpu.matmul %407, %433, %cst_306 {dimension_numbers = #tpu.dot_dimension_numbers<[1], [0], [0], [1], [0, 0, 1, 1], [], []>} : vector<64x128xbf16>, vector<128x128xbf16>, vector<64x128xf32> -> vector<64x128xf32>
    %c384 = arith.constant 384 : index
    %c0_307 = arith.constant 0 : index
    %435 = vector.load %arg22[%c384, %c0_307] : memref<576x128xf32, #tpu.memory_space<vmem>>, vector<64x128xf32>
    tpu.vector_store %arg22[%c384, %c0_307], %434 {strides = array<i32>} : memref<576x128xf32, #tpu.memory_space<vmem>>, vector<64x128xf32>,
    %c7_308 = arith.constant 7 : index
    %c0_309 = arith.constant 0 : index
    %c0_310 = arith.constant 0 : index
    %436 = vector.load %arg16[%c7_308, %c0_309, %c0_310] : memref<9x128x128xbf16, #tpu.memory_space<vmem>>, vector<1x128x128xbf16>
    %437 = vector.shape_cast %436 : vector<1x128x128xbf16> to vector<128x128xbf16>
    %cst_311 = arith.constant dense<0.000000e+00> : vector<64x128xf32>
    %438 = tpu.matmul %407, %437, %cst_311 {dimension_numbers = #tpu.dot_dimension_numbers<[1], [0], [0], [1], [0, 0, 1, 1], [], []>} : vector<64x128xbf16>, vector<128x128xbf16>, vector<64x128xf32> -> vector<64x128xf32>
    %c448 = arith.constant 448 : index
    %c0_312 = arith.constant 0 : index
    %439 = vector.load %arg22[%c448, %c0_312] : memref<576x128xf32, #tpu.memory_space<vmem>>, vector<64x128xf32>
    tpu.vector_store %arg22[%c448, %c0_312], %438 {strides = array<i32>} : memref<576x128xf32, #tpu.memory_space<vmem>>, vector<64x128xf32>,
    %c8_313 = arith.constant 8 : index
    %c0_314 = arith.constant 0 : index
    %c0_315 = arith.constant 0 : index
    %440 = vector.load %arg16[%c8_313, %c0_314, %c0_315] : memref<9x128x128xbf16, #tpu.memory_space<vmem>>, vector<1x128x128xbf16>
    %441 = vector.shape_cast %440 : vector<1x128x128xbf16> to vector<128x128xbf16>
    %cst_316 = arith.constant dense<0.000000e+00> : vector<64x128xf32>
    %442 = tpu.matmul %407, %441, %cst_316 {dimension_numbers = #tpu.dot_dimension_numbers<[1], [0], [0], [1], [0, 0, 1, 1], [], []>} : vector<64x128xbf16>, vector<128x128xbf16>, vector<64x128xf32> -> vector<64x128xf32>
    %c512 = arith.constant 512 : index
    %c0_317 = arith.constant 0 : index
    %443 = vector.load %arg22[%c512, %c0_317] : memref<576x128xf32, #tpu.memory_space<vmem>>, vector<64x128xf32>
    tpu.vector_store %arg22[%c512, %c0_317], %442 {strides = array<i32>} : memref<576x128xf32, #tpu.memory_space<vmem>>, vector<64x128xf32>,
    %c0_318 = arith.constant 0 : index
    %c0_319 = arith.constant 0 : index
    %444 = vector.load %arg17[%c0_318, %c0_319] : memref<256x576xbf16, #tpu.memory_space<vmem>>, vector<256x576xbf16>
    %c0_320 = arith.constant 0 : index
    %c0_321 = arith.constant 0 : index
    %445 = vector.load %arg22[%c0_320, %c0_321] : memref<576x128xf32, #tpu.memory_space<vmem>>, vector<576x128xf32>
    %446 = arith.truncf %445 : vector<576x128xf32> to vector<576x128xbf16>
    %cst_322 = arith.constant dense<0.000000e+00> : vector<256x128xf32>
    %447 = tpu.matmul %444, %446, %cst_322 {dimension_numbers = #tpu.dot_dimension_numbers<[1], [0], [0], [1], [0, 0, 1, 1], [], []>} : vector<256x576xbf16>, vector<576x128xbf16>, vector<256x128xf32> -> vector<256x128xf32>
    %cst_323 = arith.constant dense<0.000000e+00> : vector<128xf32>
    %448 = vector.multi_reduction <add>, %447, %cst_323 [0] : vector<256x128xf32> to vector<128xf32>
    %449 = vector.shape_cast %448 : vector<128xf32> to vector<1x128xf32>
    %cst_324 = arith.constant 2.560000e+02 : f32
    %450 = vector.broadcast %cst_324 : f32 to vector<1x128xf32>
    %451 = arith.divf %449, %450 : vector<1x128xf32>
    %452 = arith.mulf %447, %447 : vector<256x128xf32>
    %cst_325 = arith.constant dense<0.000000e+00> : vector<128xf32>
    %453 = vector.multi_reduction <add>, %452, %cst_325 [0] : vector<256x128xf32> to vector<128xf32>
    %454 = vector.shape_cast %453 : vector<128xf32> to vector<1x128xf32>
    %cst_326 = arith.constant 2.560000e+02 : f32
    %455 = vector.broadcast %cst_326 : f32 to vector<1x128xf32>
    %456 = arith.divf %454, %455 : vector<1x128xf32>
    %457 = arith.mulf %451, %451 : vector<1x128xf32>
    %458 = arith.subf %456, %457 : vector<1x128xf32>
    %cst_327 = arith.constant 0.000000e+00 : f32
    %459 = vector.broadcast %cst_327 : f32 to vector<1x128xf32>
    %460 = arith.maximumf %458, %459 : vector<1x128xf32>
    %461 = vector.broadcast %451 : vector<1x128xf32> to vector<256x128xf32>
    %462 = arith.subf %447, %461 : vector<256x128xf32>
    %cst_328 = arith.constant 9.99999974E-6 : f32
    %463 = vector.broadcast %cst_328 : f32 to vector<1x128xf32>
    %464 = arith.addf %460, %463 : vector<1x128xf32>
    %465 = math.rsqrt %464 : vector<1x128xf32>
    %466 = vector.broadcast %465 : vector<1x128xf32> to vector<256x128xf32>
    %467 = arith.mulf %462, %466 : vector<256x128xf32>
    %cst_329 = arith.constant 0.000000e+00 : f32
    %468 = vector.broadcast %cst_329 : f32 to vector<256x128xf32>
    %469 = arith.maximumf %467, %468 : vector<256x128xf32>
    %c0_330 = arith.constant 0 : index
    %c0_331 = arith.constant 0 : index
    %470 = vector.load %arg18[%c0_330, %c0_331] : memref<128x128xbf16, #tpu.memory_space<vmem>>, vector<128x128xbf16>
    %471 = arith.truncf %469 : vector<256x128xf32> to vector<256x128xbf16>
    %cst_332 = arith.constant dense<0.000000e+00> : vector<256x128xf32>
    %472 = tpu.matmul %471, %470, %cst_332 {dimension_numbers = #tpu.dot_dimension_numbers<[1], [0], [0], [1], [0, 0, 1, 1], [], []>} : vector<256x128xbf16>, vector<128x128xbf16>, vector<256x128xf32> -> vector<256x128xf32>
    %c0_333 = arith.constant 0 : index
    %c0_334 = arith.constant 0 : index
    %473 = vector.load %arg19[%c0_333, %c0_334] : memref<1x128xf32, #tpu.memory_space<vmem>>, vector<1x128xf32>
    %474 = vector.broadcast %473 : vector<1x128xf32> to vector<256x128xf32>
    %475 = arith.addf %472, %474 : vector<256x128xf32>
    %c0_335 = arith.constant 0 : index
    %c0_336 = arith.constant 0 : index
    %c0_337 = arith.constant 0 : index
    %476 = vector.load %arg20[%c0_335, %c0_336, %c0_337] : memref<1x256x128xf32, #tpu.memory_space<vmem>>, vector<1x256x128xf32>
    %477 = vector.shape_cast %476 : vector<1x256x128xf32> to vector<256x128xf32>
    %478 = vector.shape_cast %475 : vector<256x128xf32> to vector<1x256x128xf32>
    tpu.vector_store %arg20[%c0_335, %c0_336, %c0_337], %478 {strides = array<i32>} : memref<1x256x128xf32, #tpu.memory_space<vmem>>, vector<1x256x128xf32>,
    return
  }
  func.func @transform_0(%arg0: i32) -> (i32, i32, i32) {
    %c0_i32 = arith.constant 0 : i32
    %c0_i32_0 = arith.constant 0 : i32
    %c0_i32_1 = arith.constant 0 : i32
    return %arg0, %c0_i32, %c0_i32_0 : i32, i32, i32
  }
  func.func @transform_1(%arg0: i32) -> (i32, i32) {
    %c0_i32 = arith.constant 0 : i32
    %c0_i32_0 = arith.constant 0 : i32
    %c0_i32_1 = arith.constant 0 : i32
    return %c0_i32, %c0_i32_0 : i32, i32
  }
  func.func @transform_2(%arg0: i32) -> (i32, i32) {
    %c0_i32 = arith.constant 0 : i32
    %c0_i32_0 = arith.constant 0 : i32
    %c0_i32_1 = arith.constant 0 : i32
    return %c0_i32, %c0_i32_0 : i32, i32
  }
  func.func @transform_3(%arg0: i32) -> (i32, i32) {
    %c0_i32 = arith.constant 0 : i32
    %c0_i32_0 = arith.constant 0 : i32
    %c0_i32_1 = arith.constant 0 : i32
    return %c0_i32, %c0_i32_0 : i32, i32
  }
  func.func @transform_4(%arg0: i32) -> (i32, i32, i32) {
    %c0_i32 = arith.constant 0 : i32
    %c0_i32_0 = arith.constant 0 : i32
    %c0_i32_1 = arith.constant 0 : i32
    %c0_i32_2 = arith.constant 0 : i32
    return %c0_i32, %c0_i32_0, %c0_i32_1 : i32, i32, i32
  }
  func.func @transform_5(%arg0: i32) -> (i32, i32, i32) {
    %c0_i32 = arith.constant 0 : i32
    %c0_i32_0 = arith.constant 0 : i32
    %c0_i32_1 = arith.constant 0 : i32
    %c0_i32_2 = arith.constant 0 : i32
    return %c0_i32, %c0_i32_0, %c0_i32_1 : i32, i32, i32
  }
  func.func @transform_6(%arg0: i32) -> (i32, i32) {
    %c0_i32 = arith.constant 0 : i32
    %c0_i32_0 = arith.constant 0 : i32
    %c0_i32_1 = arith.constant 0 : i32
    return %c0_i32, %c0_i32_0 : i32, i32
  }
  func.func @transform_7(%arg0: i32) -> (i32, i32) {
    %c0_i32 = arith.constant 0 : i32
    %c0_i32_0 = arith.constant 0 : i32
    %c0_i32_1 = arith.constant 0 : i32
    return %c0_i32, %c0_i32_0 : i32, i32
  }
  func.func @transform_8(%arg0: i32) -> (i32, i32) {
    %c0_i32 = arith.constant 0 : i32
    %c0_i32_0 = arith.constant 0 : i32
    %c0_i32_1 = arith.constant 0 : i32
    return %c0_i32, %c0_i32_0 : i32, i32
  }
  func.func @transform_9(%arg0: i32) -> (i32, i32) {
    %c0_i32 = arith.constant 0 : i32
    %c0_i32_0 = arith.constant 0 : i32
    %c0_i32_1 = arith.constant 0 : i32
    return %c0_i32, %c0_i32_0 : i32, i32
  }
  func.func @transform_10(%arg0: i32) -> (i32, i32, i32) {
    %c0_i32 = arith.constant 0 : i32
    %c0_i32_0 = arith.constant 0 : i32
    %c0_i32_1 = arith.constant 0 : i32
    %c0_i32_2 = arith.constant 0 : i32
    return %c0_i32, %c0_i32_0, %c0_i32_1 : i32, i32, i32
  }
  func.func @transform_11(%arg0: i32) -> (i32, i32, i32) {
    %c0_i32 = arith.constant 0 : i32
    %c0_i32_0 = arith.constant 0 : i32
    %c0_i32_1 = arith.constant 0 : i32
    %c0_i32_2 = arith.constant 0 : i32
    return %c0_i32, %c0_i32_0, %c0_i32_1 : i32, i32, i32
  }
  func.func @transform_12(%arg0: i32) -> (i32, i32) {
    %c0_i32 = arith.constant 0 : i32
    %c0_i32_0 = arith.constant 0 : i32
    %c0_i32_1 = arith.constant 0 : i32
    return %c0_i32, %c0_i32_0 : i32, i32
  }
  func.func @transform_13(%arg0: i32) -> (i32, i32, i32) {
    %c0_i32 = arith.constant 0 : i32
    %c0_i32_0 = arith.constant 0 : i32
    %c0_i32_1 = arith.constant 0 : i32
    %c0_i32_2 = arith.constant 0 : i32
    return %c0_i32, %c0_i32_0, %c0_i32_1 : i32, i32, i32
  }
  func.func @transform_14(%arg0: i32) -> (i32, i32) {
    %c0_i32 = arith.constant 0 : i32
    %c0_i32_0 = arith.constant 0 : i32
    %c0_i32_1 = arith.constant 0 : i32
    return %c0_i32, %c0_i32_0 : i32, i32
  }
  func.func @transform_15(%arg0: i32) -> (i32, i32, i32) {
    %c0_i32 = arith.constant 0 : i32
    %c0_i32_0 = arith.constant 0 : i32
    %c0_i32_1 = arith.constant 0 : i32
    %c0_i32_2 = arith.constant 0 : i32
    return %c0_i32, %c0_i32_0, %c0_i32_1 : i32, i32, i32
  }
  func.func @transform_16(%arg0: i32) -> (i32, i32) {
    %c0_i32 = arith.constant 0 : i32
    %c0_i32_0 = arith.constant 0 : i32
    %c0_i32_1 = arith.constant 0 : i32
    return %c0_i32, %c0_i32_0 : i32, i32
  }
  func.func @transform_17(%arg0: i32) -> (i32, i32) {
    %c0_i32 = arith.constant 0 : i32
    %c0_i32_0 = arith.constant 0 : i32
    %c0_i32_1 = arith.constant 0 : i32
    return %c0_i32, %c0_i32_0 : i32, i32
  }
  func.func @transform_18(%arg0: i32) -> (i32, i32) {
    %c0_i32 = arith.constant 0 : i32
    %c0_i32_0 = arith.constant 0 : i32
    %c0_i32_1 = arith.constant 0 : i32
    return %c0_i32, %c0_i32_0 : i32, i32
  }
  func.func @transform_19(%arg0: i32) -> (i32, i32, i32) {
    %c0_i32 = arith.constant 0 : i32
    %c0_i32_0 = arith.constant 0 : i32
    %c0_i32_1 = arith.constant 0 : i32
    return %arg0, %c0_i32, %c0_i32_0 : i32, i32, i32
  }
}

</mosaic_0001>

<bundles_post_ra>
// kernel: im_generator_forward.1
= control target key start
LH: loop header
LB: loop body
LE: loop exit
PB: predicated region body
PF: predicated region fallthrough
CT: control target
= control target key end

     0   :  { %vm12738_vm0 = vmmov 0   ;;  %vm1158_vm1 = vcmask 523264   ;;  %vm3276_vm2 = vcmask 130048   ;;  %s16102_s1 = inlined_call_operand.vmem [shape: bf16[256,128], index: 1, kind: input, shape index: {}]   ;;  %s16103_s0 = inlined_call_operand.vmem [shape: bf16[1,256,256], index: 0, kind: input, shape index: {}]   ;;  %s16104_s2 = inlined_call_operand.vmem [shape: bf16[256,256], index: 2, kind: input, shape index: {}]   ;;  %s16105_s7 = inlined_call_operand.vmem [shape: bf16[16,64], index: 7, kind: input, shape index: {}]   ;;  %s16106_s3 = inlined_call_operand.vmem [shape: bf16[128,128], index: 3, kind: input, shape index: {}]   ;;  %s16107_s8 = inlined_call_operand.vmem [shape: bf16[128,128], index: 8, kind: input, shape index: {}]   ;;  %s16108_s4 = inlined_call_operand.vmem [shape: bf16[9,16,64], index: 4, kind: input, shape index: {}]   ;;  %s16109_s5 = inlined_call_operand.vmem [shape: bf16[9,128,128], index: 5, kind: input, shape index: {}]   ;;  %s16110_s6 = inlined_call_operand.vmem [shape: bf16[128,128], index: 6, kind: input, shape index: {}]   ;;  %s16111_s9 = inlined_call_operand.vmem [shape: bf16[128,128], index: 9, kind: input, shape index: {}]   ;;  %s16112_s10 = inlined_call_operand.vmem [shape: bf16[9,16,16], index: 10, kind: input, shape index: {}]   ;;  %s16113_s11 = inlined_call_operand.vmem [shape: bf16[9,128,128], index: 11, kind: input, shape index: {}]   ;;  %s16114_s12 = inlined_call_operand.vmem [shape: bf16[128,128], index: 12, kind: input, shape index: {}]   ;;  %s16115_s13 = inlined_call_operand.vmem [shape: bf16[9,128,128], index: 13, kind: input, shape index: {}]   ;;  %s16116_s14 = inlined_call_operand.vmem [shape: bf16[64,144], index: 14, kind: input, shape index: {}]   ;;  %s16117_s15 = inlined_call_operand.vmem [shape: bf16[9,128,128], index: 15, kind: input, shape index: {}]   ;;  %s16118_s16 = inlined_call_operand.vmem [shape: bf16[256,576], index: 16, kind: input, shape index: {}]   ;;  %s16119_s17 = inlined_call_operand.vmem [shape: bf16[128,128], index: 17, kind: input, shape index: {}]   ;;  %s16120_s18 = inlined_call_operand.vmem [shape: f32[1,128], index: 18, kind: input, shape index: {}]   ;;  %s16121_s19 = inlined_call_operand.vmem [shape: f32[1,256,128], index: 19, kind: output, shape index: {}]  }
   0x1   :  { %16125 = sst [smem:[#allocation14_spill]] %s16102_s1 }
   0x2   :  { %16126 = sst [smem:[#allocation15_spill]] %s16103_s0 }
   0x3   :  { %16127 = sst [smem:[#allocation16_spill]] %s16104_s2 }
   0x4   :  { %16128 = sst [smem:[#allocation17_spill]] %s16105_s7 }
   0x5   :  { %s16129_s20 = sld [smem:[#allocation14_spill]] }
   0x6   :  { %s16130_s26 = sld [smem:[#allocation15_spill]] }
   0x7   :  { %s16131_s30 = sld [smem:[#allocation16_spill]] }
   0x8   :  { %s16132_s24 = sld [smem:[#allocation17_spill]] }
   0xb   :  { %v12126_v0 = vld [vmem:[%s16129_s20 + $0x78] sm:$0xff]   ;;  %v12128_v2 = vld [vmem:[%s16129_s20 + $0x70] sm:$0xff]   ;;  %v12130_v4 = vld [vmem:[%s16129_s20 + $0x68] sm:$0xff]  }
   0xc   :  { %v12127_v1 = vld [vmem:[%s16129_s20 + $0x38] sm:$0xff]   ;;  %10042 = vmatprep.subr.bf16.mxu0 %v12126_v0  ;;  %v12129_v3 = vld [vmem:[%s16129_s20 + $0x30] sm:$0xff]   ;;  %v12131_v5 = vld [vmem:[%s16129_s20 + $0x28] sm:$0xff]  }
   0xd   :  { %10043 = vmatpush3.bf16.msra.mxu0 %v12127_v1  ;;  %v12132_v6 = vld [vmem:[%s16129_s20 + $0x60] sm:$0xff]   ;;  %v12134_v8 = vld [vmem:[%s16129_s20 + $0x58] sm:$0xff]   ;;  %v12136_v10 = vld [vmem:[%s16129_s20 + $0x50] sm:$0xff]  }
   0xe   :  { %10044 = vmatprep.subr.bf16.mxu0 %v12128_v2  ;;  %v12133_v7 = vld [vmem:[%s16129_s20 + $0x20] sm:$0xff]   ;;  %v12135_v9 = vld [vmem:[%s16129_s20 + $0x18] sm:$0xff]   ;;  %v12137_v12 = vld [vmem:[%s16129_s20 + $0x10] sm:$0xff]  }
   0xf   :  { %v12144_v11 = vld [vmem:[%s16130_s26 + $0x4] ss:$8 sps:$4 sm:$0xff]   ;;  %v12142_v17 = vld [vmem:[%s16130_s26] ss:$8 sps:$4 sm:$0xff]   ;;  %v12145_v18 = vld [vmem:[%s16130_s26 + $0x14] ss:$8 sps:$4 sm:$0xff]  }
  0x10   :  { %415 = vmatprep.mubr.bf16.mxu0 %v12144_v11  ;;  %v12138_v13 = vld [vmem:[%s16129_s20 + $0x48] sm:$0xff]   ;;  %v12140_v15 = vld [vmem:[%s16129_s20 + $0x40] sm:$0xff]   ;;  %v12147_v19 = vld [vmem:[%s16130_s26 + $0x10] ss:$8 sps:$4 sm:$0xff]  }
  0x11   :  { %10045 = vmatpush3.bf16.msra.mxu0 %v12129_v3  ;;  %v12139_v14 = vld [vmem:[%s16129_s20 + $0x8] sm:$0xff]   ;;  %v12141_v16 = vld [vmem:[%s16129_s20] sm:$0xff]   ;;  %v12151_v22 = vld [vmem:[%s16130_s26 + $0x34] ss:$8 sps:$4 sm:$0xff]  }
  0x12   :  { %10046 = vmatprep.subr.bf16.mxu0 %v12130_v4  ;;  %v12148_v20 = vld [vmem:[%s16130_s26 + $0x24] ss:$8 sps:$4 sm:$0xff]   ;;  %v12150_v21 = vld [vmem:[%s16130_s26 + $0x20] ss:$8 sps:$4 sm:$0xff]   ;;  %v12153_v23 = vld [vmem:[%s16130_s26 + $0x30] ss:$8 sps:$4 sm:$0xff]  }
  0x13   :  { %v12154_v24 = vld [vmem:[%s16130_s26 + $0x44] ss:$8 sps:$4 sm:$0xff]   ;;  %v12156_v25 = vld [vmem:[%s16130_s26 + $0x40] ss:$8 sps:$4 sm:$0xff]   ;;  %v12157_v26 = vld [vmem:[%s16130_s26 + $0x54] ss:$8 sps:$4 sm:$0xff]  }
  0x14   :  { %v12159_v27 = vld [vmem:[%s16130_s26 + $0x50] ss:$8 sps:$4 sm:$0xff]   ;;  %v12160_v28 = vld [vmem:[%s16130_s26 + $0x64] ss:$8 sps:$4 sm:$0xff]   ;;  %v12162_v29 = vld [vmem:[%s16130_s26 + $0x60] ss:$8 sps:$4 sm:$0xff]  }
  0x15   :  { %10047 = vmatpush3.bf16.msra.mxu0 %v12131_v5  ;;  %v12163_v30 = vld [vmem:[%s16130_s26 + $0x74] ss:$8 sps:$4 sm:$0xff]   ;;  %v12165_v31 = vld [vmem:[%s16130_s26 + $0x70] ss:$8 sps:$4 sm:$0xff]   ;;  %v12166_v32 = vld [vmem:[%s16130_s26 + $0x84] ss:$8 sps:$4 sm:$0xff]  }
  0x16   :  { %10048 = vmatprep.subr.bf16.mxu0 %v12132_v6  ;;  %v12168_v33 = vld [vmem:[%s16130_s26 + $0x80] ss:$8 sps:$4 sm:$0xff]   ;;  %v12169_v34 = vld [vmem:[%s16130_s26 + $0x94] ss:$8 sps:$4 sm:$0xff]   ;;  %v12171_v35 = vld [vmem:[%s16130_s26 + $0x90] ss:$8 sps:$4 sm:$0xff]  }
  0x17   :  { %v12172_v36 = vld [vmem:[%s16130_s26 + $0xa4] ss:$8 sps:$4 sm:$0xff]   ;;  %v12174_v37 = vld [vmem:[%s16130_s26 + $0xa0] ss:$8 sps:$4 sm:$0xff]   ;;  %v12175_v38 = vld [vmem:[%s16130_s26 + $0xb4] ss:$8 sps:$4 sm:$0xff]  }
  0x18   :  { %v12177_v39 = vld [vmem:[%s16130_s26 + $0xb0] ss:$8 sps:$4 sm:$0xff]   ;;  %v12178_v40 = vld [vmem:[%s16130_s26 + $0xc4] ss:$8 sps:$4 sm:$0xff]   ;;  %v12180_v41 = vld [vmem:[%s16130_s26 + $0xc0] ss:$8 sps:$4 sm:$0xff]  }
  0x19   :  { %10049 = vmatpush3.bf16.msra.mxu0 %v12133_v7  ;;  %v12181_v42 = vld [vmem:[%s16130_s26 + $0xd4] ss:$8 sps:$4 sm:$0xff]   ;;  %v12183_v43 = vld [vmem:[%s16130_s26 + $0xd0] ss:$8 sps:$4 sm:$0xff]   ;;  %v12184_v44 = vld [vmem:[%s16130_s26 + $0xe4] ss:$8 sps:$4 sm:$0xff]  }
  0x1a   :  { %10050 = vmatprep.subr.bf16.mxu0 %v12134_v8  ;;  %v12186_v45 = vld [vmem:[%s16130_s26 + $0xe0] ss:$8 sps:$4 sm:$0xff]   ;;  %v12187_v46 = vld [vmem:[%s16130_s26 + $0xf4] ss:$8 sps:$4 sm:$0xff]   ;;  %v12189_v47 = vld [vmem:[%s16130_s26 + $0xf0] ss:$8 sps:$4 sm:$0xff]  }
  0x1d   :  { %10051 = vmatpush3.bf16.msra.mxu0 %v12135_v9 }
  0x1e   :  { %10052 = vmatprep.subr.bf16.mxu0 %v12136_v10 }
  0x21   :  { %10053 = vmatpush3.bf16.msra.mxu0 %v12137_v12 }
  0x22   :  { %10054 = vmatprep.subr.bf16.mxu0 %v12138_v13 }
  0x25   :  { %10055 = vmatpush3.bf16.msra.mxu0 %v12139_v14 }
  0x26   :  { %10056 = vmatprep.subr.bf16.mxu0 %v12140_v15 }
  0x29   :  { %10057 = vmatpush3.bf16.msra.mxu0 %v12141_v16 }
  0x2c   :  { %416 = vmatmul.mubr.bf16.vlgmr.msra.gmra.mxu0 %v12142_v17 }
  0x2d   :  { %423 = vmatprep.mubr.bf16.mxu0 %v12145_v18 }
  0x34   :  { %424 = vmatmul.mubr.bf16.gmra.mxu0 %v12147_v19 }
  0x35   :  { %431 = vmatprep.mubr.bf16.mxu0 %v12148_v20 }
  0x3c   :  { %432 = vmatmul.mubr.bf16.gmra.mxu0 %v12150_v21 }
  0x3d   :  { %439 = vmatprep.mubr.bf16.mxu0 %v12151_v22 }
  0x44   :  { %440 = vmatmul.mubr.bf16.gmra.mxu0 %v12153_v23 }
  0x45   :  { %447 = vmatprep.mubr.bf16.mxu0 %v12154_v24 }
  0x4c   :  { %448 = vmatmul.mubr.bf16.gmra.mxu0 %v12156_v25 }
  0x4d   :  { %455 = vmatprep.mubr.bf16.mxu0 %v12157_v26 }
  0x54   :  { %456 = vmatmul.mubr.bf16.gmra.mxu0 %v12159_v27 }
  0x55   :  { %463 = vmatprep.mubr.bf16.mxu0 %v12160_v28 }
  0x5c   :  { %464 = vmatmul.mubr.bf16.gmra.mxu0 %v12162_v29 }
  0x5d   :  { %471 = vmatprep.mubr.bf16.mxu0 %v12163_v30 }
  0x64   :  { %472 = vmatmul.mubr.bf16.gmra.mxu0 %v12165_v31 }
  0x65   :  { %479 = vmatprep.mubr.bf16.mxu0 %v12166_v32 }
  0x6c   :  { %480 = vmatmul.mubr.bf16.gmra.mxu0 %v12168_v33 }
  0x6d   :  { %487 = vmatprep.mubr.bf16.mxu0 %v12169_v34 }
  0x74   :  { %488 = vmatmul.mubr.bf16.gmra.mxu0 %v12171_v35 }
  0x75   :  { %495 = vmatprep.mubr.bf16.mxu0 %v12172_v36 }
  0x7c   :  { %496 = vmatmul.mubr.bf16.gmra.mxu0 %v12174_v37 }
  0x7d   :  { %503 = vmatprep.mubr.bf16.mxu0 %v12175_v38 }
  0x84   :  { %504 = vmatmul.mubr.bf16.gmra.mxu0 %v12177_v39 }
  0x85   :  { %511 = vmatprep.mubr.bf16.mxu0 %v12178_v40 }
  0x8c   :  { %512 = vmatmul.mubr.bf16.gmra.mxu0 %v12180_v41 }
  0x8d   :  { %519 = vmatprep.mubr.bf16.mxu0 %v12181_v42 }
  0x94   :  { %520 = vmatmul.mubr.bf16.gmra.mxu0 %v12183_v43 }
  0x95   :  { %527 = vmatprep.mubr.bf16.mxu0 %v12184_v44  ;;  %v12192_v44 = vld [vmem:[%s16131_s30 + $0x4] ss:$8 sps:$4 sm:$0xff]  }
  0x96   :  { %994 = vmatprep.mubr.bf16.mxu1 %v12192_v44 }
  0x9c   :  { %528 = vmatmul.mubr.bf16.gmra.mxu0 %v12186_v45 }
  0x9d   :  { %535 = vmatprep.mubr.bf16.mxu0 %v12187_v46 }
  0xa4   :  { %536 = vmatmul.mubr.bf16.gmra.mxu0 %v12189_v47 }
  0xec   :  { %v10058_v48 = vpop.f32.mrf.mxu0 }
  0xee   :  { %v10059_v49 = vpop.f32.mrf.mxu0 }
  0xef   :  { %v12984_v50 = vadd.f32 %v10059_v49, %v10058_v48 }
  0xf0   :  { %v10061_v51 = vpop.f32.mrf.mxu0 }
  0xf1   :  { %v583_v24 = vmul.f32 %v12984_v50, %v12984_v50 }
  0xf2   :  { %v10062_v52 = vpop.f32.mrf.mxu0 }
  0xf3   :  { %v12998_v17 = vadd.f32 %v10062_v52, %v10061_v51 }
  0xf4   :  { %v10064_v53 = vpop.f32.mrf.mxu0 }
  0xf5   :  { %v584_v21 = vmul.f32 %v12998_v17, %v12998_v17  ;;  %v544_v25 = vadd.f32 %v12998_v17, %v12984_v50 }
  0xf6   :  { %v10065_v54 = vpop.f32.mrf.mxu0 }
  0xf7   :  { %v13002_v19 = vadd.f32 %v10065_v54, %v10064_v53  ;;  %v615_v29 = vadd.f32 %v584_v21, %v583_v24 }
  0xf8   :  { %v10067_v55 = vpop.f32.mrf.mxu0 }
  0xf9   :  { %v585_v26 = vmul.f32 %v13002_v19, %v13002_v19  ;;  %v545_v30 = vadd.f32 %v13002_v19, %v544_v25 }
  0xfa   :  { %v10068_v56 = vpop.f32.mrf.mxu0 }
  0xfb   :  { %v13008_v22 = vadd.f32 %v10068_v56, %v10067_v55  ;;  %v616_v34 = vadd.f32 %v615_v29, %v585_v26 }
  0xfc   :  { %v10070_v57 = vpop.f32.mrf.mxu0 }
  0xfd   :  { %v586_v31 = vmul.f32 %v13008_v22, %v13008_v22  ;;  %v546_v35 = vadd.f32 %v13008_v22, %v545_v30 }
  0xfe   :  { %v10071_v58 = vpop.f32.mrf.mxu0 }
  0xff   :  { %v13018_v27 = vadd.f32 %v10071_v58, %v10070_v57  ;;  %v617_v39 = vadd.f32 %v616_v34, %v586_v31 }
 0x100   :  { %v10073_v59 = vpop.f32.mrf.mxu0 }
 0x101   :  { %v587_v36 = vmul.f32 %v13018_v27, %v13018_v27  ;;  %v547_v40 = vadd.f32 %v13018_v27, %v546_v35 }
 0x102   :  { %v10074_v60 = vpop.f32.mrf.mxu0 }
 0x103   :  { %v13025_v32 = vadd.f32 %v10074_v60, %v10073_v59  ;;  %v618_v45 = vadd.f32 %v617_v39, %v587_v36 }
 0x104   :  { %v10076_v61 = vpop.f32.mrf.mxu0 }
 0x105   :  { %v588_v41 = vmul.f32 %v13025_v32, %v13025_v32  ;;  %v548_v46 = vadd.f32 %v13025_v32, %v547_v40 }
 0x106   :  { %v10077_v62 = vpop.f32.mrf.mxu0 }
 0x107   :  { %v13032_v37 = vadd.f32 %v10077_v62, %v10076_v61  ;;  %v619_v51 = vadd.f32 %v618_v45, %v588_v41 }
 0x108   :  { %v10079_v63 = vpop.f32.mrf.mxu0 }
 0x109   :  { %v589_v47 = vmul.f32 %v13032_v37, %v13032_v37  ;;  %v549_v52 = vadd.f32 %v13032_v37, %v548_v46 }
 0x10a   :  { %v10080_v0 = vpop.f32.mrf.mxu0 }
 0x10b   :  { %v13037_v42 = vadd.f32 %v10080_v0, %v10079_v63  ;;  %v620_v56 = vadd.f32 %v619_v51, %v589_v47 }
 0x10c   :  { %v10082_v1 = vpop.f32.mrf.mxu0 }
 0x10d   :  { %v590_v53 = vmul.f32 %v13037_v42, %v13037_v42  ;;  %v550_v57 = vadd.f32 %v13037_v42, %v549_v52 }
 0x10e   :  { %v10083_v2 = vpop.f32.mrf.mxu0 }
 0x10f   :  { %v13045_v48 = vadd.f32 %v10083_v2, %v10082_v1  ;;  %v621_v61 = vadd.f32 %v620_v56, %v590_v53 }
 0x110   :  { %v10085_v3 = vpop.f32.mrf.mxu0 }
 0x111   :  { %v591_v58 = vmul.f32 %v13045_v48, %v13045_v48  ;;  %v551_v62 = vadd.f32 %v13045_v48, %v550_v57 }
 0x112   :  { %v10086_v4 = vpop.f32.mrf.mxu0 }
 0x113   :  { %v13050_v54 = vadd.f32 %v10086_v4, %v10085_v3  ;;  %v622_v2 = vadd.f32 %v621_v61, %v591_v58 }
 0x114   :  { %v10088_v5 = vpop.f32.mrf.mxu0 }
 0x115   :  { %v592_v63 = vmul.f32 %v13050_v54, %v13050_v54  ;;  %v552_v3 = vadd.f32 %v13050_v54, %v551_v62 }
 0x116   :  { %v10089_v6 = vpop.f32.mrf.mxu0 }
 0x117   :  { %v13055_v59 = vadd.f32 %v10089_v6, %v10088_v5  ;;  %v623_v6 = vadd.f32 %v622_v2, %v592_v63 }
 0x118   :  { %v10091_v7 = vpop.f32.mrf.mxu0 }
 0x119   :  { %v593_v4 = vmul.f32 %v13055_v59, %v13055_v59  ;;  %v553_v24 = vadd.f32 %v13055_v59, %v552_v3 }
 0x11a   :  { %v10092_v8 = vpop.f32.mrf.mxu0 }
 0x11b   :  { %v13060_v0 = vadd.f32 %v10092_v8, %v10091_v7  ;;  %v624_v26 = vadd.f32 %v623_v6, %v593_v4 }
 0x11c   :  { %v10094_v9 = vpop.f32.mrf.mxu0 }
 0x11d   :  { %v594_v25 = vmul.f32 %v13060_v0, %v13060_v0  ;;  %v554_v29 = vadd.f32 %v13060_v0, %v553_v24 }
 0x11e   :  { %v10095_v10 = vpop.f32.mrf.mxu0 }
 0x11f   :  { %v13065_v21 = vadd.f32 %v10095_v10, %v10094_v9  ;;  %v625_v31 = vadd.f32 %v624_v26, %v594_v25 }
 0x120   :  { %v12986_v11 = vpop.f32.mrf.mxu0 }
 0x121   :  { %v595_v30 = vmul.f32 %v13065_v21, %v13065_v21  ;;  %v555_v34 = vadd.f32 %v13065_v21, %v554_v29 }
 0x122   :  { %v12988_v12 = vpop.f32.mrf.mxu0 }
 0x123   :  { %v13072_v7 = vadd.f32 %v12988_v12, %v12986_v11  ;;  %v626_v36 = vadd.f32 %v625_v31, %v595_v30 }
 0x124   :  { %v12990_v13 = vpop.f32.mrf.mxu0 }
 0x125   :  { %v596_v35 = vmul.f32 %v13072_v7, %v13072_v7  ;;  %v556_v39 = vadd.f32 %v13072_v7, %v555_v34 }
 0x126   :  { %v12992_v14 = vpop.f32.mrf.mxu0 }
 0x127   :  { %v13079_v9 = vadd.f32 %v12992_v14, %v12990_v13  ;;  %v627_v41 = vadd.f32 %v626_v36, %v596_v35 }
 0x128   :  { %v12994_v15 = vpop.f32.mrf.mxu0 }
 0x129   :  { %v597_v40 = vmul.f32 %v13079_v9, %v13079_v9  ;;  %v557_v44 = vadd.f32 %v13079_v9, %v556_v39 }
 0x12a   :  { %v12996_v16 = vpop.f32.mrf.mxu0 }
 0x12b   :  { %v13086_v11 = vadd.f32 %v12996_v16, %v12994_v15  ;;  %v628_v46 = vadd.f32 %v627_v41, %v597_v40 }
 0x12c   :  { %v13000_v18 = vpop.f32.mrf.mxu0 }
 0x12d   :  { %v598_v45 = vmul.f32 %v13086_v11, %v13086_v11  ;;  %v558_v47 = vadd.f32 %v13086_v11, %v557_v44 }
 0x12e   :  { %v13004_v20 = vpop.f32.mrf.mxu0 }
 0x12f   :  { %v13093_v13 = vadd.f32 %v13004_v20, %v13000_v18  ;;  %v629_v52 = vadd.f32 %v628_v46, %v598_v45 }
 0x130   :  { %v13010_v23 = vpop.f32.mrf.mxu0 }
 0x131   :  { %v599_v51 = vmul.f32 %v13093_v13, %v13093_v13  ;;  %v559_v53 = vadd.f32 %v13093_v13, %v558_v47 }
 0x132   :  { %v13020_v28 = vpop.f32.mrf.mxu0 }
 0x133   :  { %v13100_v15 = vadd.f32 %v13020_v28, %v13010_v23  ;;  %v630_v28 = vadd.f32 %v629_v52, %v599_v51 }
 0x134   :  { %v13027_v33 = vpop.f32.mrf.mxu0 }
 0x135   :  { %v600_v56 = vmul.f32 %v13100_v15, %v13100_v15  ;;  %v560_v58 = vadd.f32 %v13100_v15, %v559_v53 }
 0x136   :  { %v10113_v38 = vpop.f32.mrf.mxu0 }
 0x137   :  { %v13106_v18 = vadd.f32 %v10113_v38, %v13027_v33  ;;  %v631_v38 = vadd.f32 %v630_v28, %v600_v56 }
 0x138   :  { %v10115_v43 = vpop.f32.mrf.mxu0 }
 0x139   :  { %v601_v61 = vmul.f32 %v13106_v18, %v13106_v18  ;;  %v561_v63 = vadd.f32 %v13106_v18, %v560_v58 }
 0x13a   :  { %v10116_v49 = vpop.f32.mrf.mxu0 }
 0x13b   :  { %v13111_v57 = vadd.f32 %v10116_v49, %v10115_v43  ;;  %v632_v49 = vadd.f32 %v631_v38, %v601_v61 }
 0x13c   :  { %v10118_v55 = vpop.f32.mrf.mxu0 }
 0x13d   :  { %v602_v2 = vmul.f32 %v13111_v57, %v13111_v57  ;;  %v562_v4 = vadd.f32 %v13111_v57, %v561_v63 }
 0x13e   :  { %v10119_v60 = vpop.f32.mrf.mxu0 }
 0x13f   :  { %v13116_v62 = vadd.f32 %v10119_v60, %v10118_v55  ;;  %v633_v60 = vadd.f32 %v632_v49, %v602_v2 }
 0x140   :  { %v10121_v1 = vpop.f32.mrf.mxu0 }
 0x141   :  { %v603_v6 = vmul.f32 %v13116_v62, %v13116_v62  ;;  %v563_v25 = vadd.f32 %v13116_v62, %v562_v4 }
 0x142   :  { %v10122_v5 = vpop.f32.mrf.mxu0 }
 0x143   :  { %v13121_v3 = vadd.f32 %v10122_v5, %v10121_v1  ;;  %v634_v5 = vadd.f32 %v633_v60, %v603_v6 }
 0x144   :  { %v10124_v8 = vpop.f32.mrf.mxu0 }
 0x145   :  { %v604_v26 = vmul.f32 %v13121_v3, %v13121_v3  ;;  %v564_v30 = vadd.f32 %v13121_v3, %v563_v25 }
 0x146   :  { %v10125_v10 = vpop.f32.mrf.mxu0 }
 0x147   :  { %v13126_v24 = vadd.f32 %v10125_v10, %v10124_v8  ;;  %v635_v10 = vadd.f32 %v634_v5, %v604_v26 }
 0x148   :  { %v10127_v12 = vpop.f32.mrf.mxu0 }
 0x149   :  { %v605_v31 = vmul.f32 %v13126_v24, %v13126_v24  ;;  %v565_v35 = vadd.f32 %v13126_v24, %v564_v30 }
 0x14a   :  { %v10128_v14 = vpop.f32.mrf.mxu0 }
 0x14b   :  { %v13131_v29 = vadd.f32 %v10128_v14, %v10127_v12  ;;  %v636_v40 = vadd.f32 %v635_v10, %v605_v31 }
 0x14c   :  { %v10130_v16 = vpop.f32.mrf.mxu0 }
 0x14d   :  { %v606_v36 = vmul.f32 %v13131_v29, %v13131_v29  ;;  %v566_v14 = vadd.f32 %v13131_v29, %v565_v35 }
 0x14e   :  { %v10131_v20 = vpop.f32.mrf.mxu0 }
 0x14f   :  { %v13136_v34 = vadd.f32 %v10131_v20, %v10130_v16  ;;  %v637_v16 = vadd.f32 %v636_v40, %v606_v36 }
 0x150   :  { %v10133_v23 = vpop.f32.mrf.mxu0 }
 0x151   :  { %v607_v41 = vmul.f32 %v13136_v34, %v13136_v34  ;;  %v567_v46 = vadd.f32 %v13136_v34, %v566_v14 }
 0x152   :  { %v10134_v33 = vpop.f32.mrf.mxu0 }
 0x153   :  { %v13141_v39 = vadd.f32 %v10134_v33, %v10133_v23  ;;  %v638_v52 = vadd.f32 %v637_v16, %v607_v41 }
 0x154   :  { %v10136_v43 = vpop.f32.mrf.mxu0 }
 0x155   :  { %v608_v47 = vmul.f32 %v13141_v39, %v13141_v39  ;;  %v568_v53 = vadd.f32 %v13141_v39, %v567_v46 }
 0x156   :  { %v10137_v55 = vpop.f32.mrf.mxu0 }
 0x157   :  { %v13146_v44 = vadd.f32 %v10137_v55, %v10136_v43  ;;  %v639_v58 = vadd.f32 %v638_v52, %v608_v47 }
 0x158   :  { %v10139_v1 = vpop.f32.mrf.mxu0 }
 0x159   :  { %v609_v56 = vmul.f32 %v13146_v44, %v13146_v44  ;;  %v569_v61 = vadd.f32 %v13146_v44, %v568_v53 }
 0x15a   :  { %v10140_v8 = vpop.f32.mrf.mxu0 }
 0x15b   :  { %v13151_v51 = vadd.f32 %v10140_v8, %v10139_v1  ;;  %v640_v2 = vadd.f32 %v639_v58, %v609_v56 }
 0x15c   :  { %v10142_v12 = vpop.f32.mrf.mxu0 }
 0x15d   :  { %v610_v33 = vmul.f32 %v13151_v51, %v13151_v51  ;;  %v570_v43 = vadd.f32 %v13151_v51, %v569_v61 }
 0x15e   :  { %v10143_v45 = vpop.f32.mrf.mxu0 }
 0x15f   :  { %v13156_v23 = vadd.f32 %v10143_v45, %v10142_v12  ;;  %v641_v6 = vadd.f32 %v640_v2, %v610_v33 }
 0x160   :  { %v10145_v20 = vpop.f32.mrf.mxu0 }
 0x161   :  { %v611_v49 = vmul.f32 %v13156_v23, %v13156_v23  ;;  %v571_v55 = vadd.f32 %v13156_v23, %v570_v43 }
 0x162   :  { %v10146_v28 = vpop.f32.mrf.mxu0 }
 0x163   :  { %v13161_v38 = vadd.f32 %v10146_v28, %v10145_v20  ;;  %v642_v1 = vadd.f32 %v641_v6, %v611_v49 }
 0x164   :  { %v10148_v63 = vpop.f32.mrf.mxu0 }
 0x165   :  { %v612_v60 = vmul.f32 %v13161_v38, %v13161_v38  ;;  %v572_v5 = vadd.f32 %v13161_v38, %v571_v55 }
 0x166   :  { %v10149_v4 = vpop.f32.mrf.mxu0 }
 0x167   :  { %v10150_v25 = vadd.f32 %v10149_v4, %v10148_v63  ;;  %v643_v8 = vadd.f32 %v642_v1, %v612_v60 }
 0x168   :  { %v10151_v26 = vpop.f32.mrf.mxu0 }
 0x169   :  { %v613_v30 = vmul.f32 %v10150_v25, %v10150_v25  ;;  %v573_v10 = vadd.f32 %v10150_v25, %v572_v5 }
 0x16a   :  { %v10152_v31 = vpop.f32.mrf.mxu0 }
 0x16b   :  { %v10153_v35 = vadd.f32 %v10152_v31, %v10151_v26  ;;  %v644_v36 = vadd.f32 %v643_v8, %v613_v30 }
 0x16d   :  { %v574_v12 = vadd.f32 %v10153_v35, %v573_v10  ;;  %v614_v40 = vmul.f32 %v10153_v35, %v10153_v35 }
 0x16f   :  { %v575_v14 = vrot.slane %v574_v12, 4  ;;  %v645_v41 = vadd.f32 %v644_v36, %v614_v40 }
 0x171   :  { %v576_v45 = vadd.f32 %v575_v14, %v574_v12  ;;  %v646_v16 = vrot.slane %v645_v41, 4 }
 0x173   :  { %v577_v46 = vrot.slane %v576_v45, 2  ;;  %v647_v47 = vadd.f32 %v646_v16, %v645_v41 }
 0x175   :  { %v578_v20 = vadd.f32 %v577_v46, %v576_v45  ;;  %v648_v52 = vrot.slane %v647_v47, 2 }
 0x177   :  { %v579_v53 = vrot.slane %v578_v20, 1  ;;  %v649_v56 = vadd.f32 %v648_v52, %v647_v47 }
 0x179   :  { %v580_v28 = vadd.f32 %v579_v53, %v578_v20  ;;  %v650_v58 = vrot.slane %v649_v56, 1 }
 0x17b   :  { %v13170_v61 = vmul.f32 0.00390625, %v580_v28  ;;  %v651_v33 = vadd.f32 %v650_v58, %v649_v56 }
 0x17d   :  { %v652_v63 = vmul.f32 0.00390625, %v651_v33  ;;  %v653_v2 = vmul.f32 %v13170_v61, %v13170_v61  ;;  %v664_v6 = vsub.f32 %v13045_v48, %v13170_v61  ;;  %v665_v55 = vsub.f32 %v13050_v54, %v13170_v61 }
 0x17e   :  { %v666_v60 = vsub.f32 %v13055_v59, %v13170_v61  ;;  %v667_v26 = vsub.f32 %v13060_v0, %v13170_v61  ;;  %v668_v1 = vsub.f32 %v13065_v21, %v13170_v61  ;;  %v669_v5 = vsub.f32 %v13072_v7, %v13170_v61 }
 0x17f   :  { %v654_v43 = vsub.f32 %v652_v63, %v653_v2  ;;  %v670_v30 = vsub.f32 %v13079_v9, %v13170_v61  ;;  %v678_v48 = vsub.f32 %v13126_v24, %v13170_v61  ;;  %v680_v54 = vsub.f32 %v13136_v34, %v13170_v61 }
 0x180   :  { %v686_v59 = vsub.f32 %v10150_v25, %v13170_v61  ;;  %v687_v31 = vsub.f32 %v10153_v35, %v13170_v61  ;;  %v671_v0 = vsub.f32 %v13086_v11, %v13170_v61  ;;  %v682_v7 = vsub.f32 %v13146_v44, %v13170_v61 }
 0x181   :  { %v655_v49 = vmax.f32 %v654_v43, 0.0  ;;  %v683_v9 = vsub.f32 %v13151_v51, %v13170_v61  ;;  %v684_v24 = vsub.f32 %v13156_v23, %v13170_v61  ;;  %v685_v34 = vsub.f32 %v13161_v38, %v13170_v61 }
 0x182   :  { %v681_v14 = vsub.f32 %v13141_v39, %v13170_v61  ;;  %v679_v43 = vsub.f32 %v13131_v29, %v13170_v61 }
 0x183   :  { %v688_v4 = vadd.f32 1e-05, %v655_v49 }
 0x185   :  { %12717 = vrsqrt.f32 %v688_v4 }
 0x192   :  { %v13196_v21 = vpop.eup %12717 }
 0x193   :  { %v720_v25 = vmul.f32 %v13196_v21, %v686_v59  ;;  %v721_v8 = vmul.f32 %v13196_v21, %v687_v31  ;;  %v704_v11 = vmul.f32 %v13196_v21, %v670_v30  ;;  %v705_v10 = vmul.f32 %v13196_v21, %v671_v0 }
 0x194   :  { %v718_v35 = vmul.f32 %v13196_v21, %v684_v24  ;;  %v719_v44 = vmul.f32 %v13196_v21, %v685_v34  ;;  %v702_v51 = vmul.f32 %v13196_v21, %v668_v1  ;;  %v703_v36 = vmul.f32 %v13196_v21, %v669_v5 }
 0x195   :  { %v752_v23 = vmax.f32 %v720_v25, 0.0  ;;  %v753_v12 = vmax.f32 %v721_v8, 0.0  ;;  %v736_v40 = vmax.f32 %v704_v11, 0.0  ;;  %v737_v38 = vmax.f32 %v705_v10, 0.0 }
 0x196   :  { %v750_v41 = vmax.f32 %v718_v35, 0.0  ;;  %v751_v45 = vmax.f32 %v719_v44, 0.0  ;;  %v734_v16 = vmax.f32 %v702_v51, 0.0  ;;  %v716_v20 = vmul.f32 %v13196_v21, %v682_v7 }
 0x197   :  { %v801_v46 = vpack.c.bf16 %v753_v12, %v752_v23  ;;  %v793_v47 = vpack.c.bf16 %v737_v38, %v736_v40  ;;  %v717_v52 = vmul.f32 %v13196_v21, %v683_v9  ;;  %v735_v56 = vmax.f32 %v703_v36, 0.0 }
 0x198   :  { %v800_v53 = vpack.c.bf16 %v751_v45, %v750_v41  ;;  %v700_v28 = vmul.f32 %v13196_v21, %v666_v60  ;;  %v701_v58 = vmul.f32 %v13196_v21, %v667_v26  ;;  %v748_v33 = vmax.f32 %v716_v20, 0.0 }
 0x199   :  { %10154 = vmatprep.subr.bf16.mxu1 %v801_v46  ;;  %v749_v63 = vmax.f32 %v717_v52, 0.0  ;;  %v714_v39 = vmul.f32 %v13196_v21, %v680_v54  ;;  %v715_v2 = vmul.f32 %v13196_v21, %v681_v14  ;;  %v698_v1 = vmul.f32 %v13196_v21, %v664_v6 }
 0x19a   :  { %10155 = vmatpush3.bf16.msra.mxu1 %v793_v47  ;;  %v732_v49 = vmax.f32 %v700_v28, 0.0  ;;  %v733_v4 = vmax.f32 %v701_v58, 0.0  ;;  %v699_v60 = vmul.f32 %v13196_v21, %v665_v55  ;;  %v712_v26 = vmul.f32 %v13196_v21, %v678_v48 }
 0x19b   :  { %10156 = vmatprep.subr.bf16.mxu1 %v800_v53  ;;  %v662_v5 = vsub.f32 %v13032_v37, %v13170_v61  ;;  %v792_v30 = vpack.c.bf16 %v735_v56, %v734_v16  ;;  %v713_v54 = vmul.f32 %v13196_v21, %v679_v43  ;;  %v799_v59 = vpack.c.bf16 %v749_v63, %v748_v33 }
 0x19c   :  { %v746_v31 = vmax.f32 %v714_v39, 0.0  ;;  %v747_v0 = vmax.f32 %v715_v2, 0.0  ;;  %v744_v29 = vmax.f32 %v712_v26, 0.0  ;;  %v663_v7 = vsub.f32 %v13037_v42, %v13170_v61 }
 0x19d   :  { %v676_v6 = vsub.f32 %v13116_v62, %v13170_v61  ;;  %v677_v55 = vsub.f32 %v13121_v3, %v13170_v61  ;;  %v745_v48 = vmax.f32 %v713_v54, 0.0  ;;  %v791_v37 = vpack.c.bf16 %v733_v4, %v732_v49  ;;  %v12198_v54 = vld [vmem:[%s16131_s30 + $0x20] ss:$8 sps:$4 sm:$0xff]  }
 0x19e   :  { %10157 = vmatpush3.bf16.msra.mxu1 %v792_v30  ;;  %v730_v9 = vmax.f32 %v698_v1, 0.0  ;;  %v731_v24 = vmax.f32 %v699_v60, 0.0  ;;  %v696_v34 = vmul.f32 %v13196_v21, %v662_v5  ;;  %v697_v8 = vmul.f32 %v13196_v21, %v663_v7  ;;  %v12195_v5 = vld [vmem:[%s16131_s30 + $0x10] ss:$8 sps:$4 sm:$0xff]   ;;  %v12196_v30 = vld [vmem:[%s16131_s30 + $0x24] ss:$8 sps:$4 sm:$0xff]  }
 0x19f   :  { %10158 = vmatprep.subr.bf16.mxu1 %v799_v59  ;;  %v797_v25 = vpack.c.bf16 %v745_v48, %v744_v29  ;;  %v710_v11 = vmul.f32 %v13196_v21, %v676_v6  ;;  %v711_v42 = vmul.f32 %v13196_v21, %v677_v55  ;;  %v660_v62 = vsub.f32 %v13018_v27, %v13170_v61  ;;  %v12199_v59 = vld [vmem:[%s16131_s30 + $0x34] ss:$8 sps:$4 sm:$0xff]   ;;  %v12204_v29 = vld [vmem:[%s16131_s30 + $0x40] ss:$8 sps:$4 sm:$0xff]   ;;  %v12207_v6 = vld [vmem:[%s16131_s30 + $0x50] ss:$8 sps:$4 sm:$0xff]  }
 0x1a0   :  { %v661_v3 = vsub.f32 %v13025_v32, %v13170_v61  ;;  %v798_v10 = vpack.c.bf16 %v747_v0, %v746_v31  ;;  %v674_v35 = vsub.f32 %v13106_v18, %v13170_v61  ;;  %v675_v44 = vsub.f32 %v13111_v57, %v13170_v61  ;;  %v12201_v31 = vld [vmem:[%s16131_s30 + $0x30] ss:$8 sps:$4 sm:$0xff]   ;;  %v12202_v0 = vld [vmem:[%s16131_s30 + $0x44] ss:$8 sps:$4 sm:$0xff]   ;;  %v12205_v7 = vld [vmem:[%s16131_s30 + $0x54] ss:$8 sps:$4 sm:$0xff]  }
 0x1a1   :  { %v790_v51 = vpack.c.bf16 %v731_v24, %v730_v9  ;;  %v694_v36 = vmul.f32 %v13196_v21, %v660_v62  ;;  %v728_v12 = vmax.f32 %v696_v34, 0.0  ;;  %v729_v40 = vmax.f32 %v697_v8, 0.0  ;;  %v12208_v55 = vld [vmem:[%s16131_s30 + $0x64] ss:$8 sps:$4 sm:$0xff]   ;;  %v12210_v48 = vld [vmem:[%s16131_s30 + $0x60] ss:$8 sps:$4 sm:$0xff]  }
 0x1a2   :  { %10159 = vmatpush3.bf16.msra.mxu1 %v791_v37  ;;  %v695_v23 = vmul.f32 %v13196_v21, %v661_v3  ;;  %v742_v27 = vmax.f32 %v710_v11, 0.0  ;;  %v743_v38 = vmax.f32 %v711_v42, 0.0  ;;  %v708_v32 = vmul.f32 %v13196_v21, %v674_v35  ;;  %v12211_v37 = vld [vmem:[%s16131_s30 + $0x74] ss:$8 sps:$4 sm:$0xff]   ;;  %v12213_v9 = vld [vmem:[%s16131_s30 + $0x70] ss:$8 sps:$4 sm:$0xff]  }
 0x1a3   :  { %10160 = vmatprep.subr.bf16.mxu1 %v798_v10  ;;  %v709_v14 = vmul.f32 %v13196_v21, %v675_v44  ;;  %v658_v18 = vsub.f32 %v13002_v19, %v13170_v61  ;;  %v659_v57 = vsub.f32 %v13008_v22, %v13170_v61  ;;  %v672_v41 = vsub.f32 %v13093_v13, %v13170_v61  ;;  %v12214_v24 = vld [vmem:[%s16131_s30 + $0x84] ss:$8 sps:$4 sm:$0xff]   ;;  %v12216_v34 = vld [vmem:[%s16131_s30 + $0x80] ss:$8 sps:$4 sm:$0xff]   ;;  %v12219_v8 = vld [vmem:[%s16131_s30 + $0x90] ss:$8 sps:$4 sm:$0xff]  }
 0x1a4   :  { %v673_v45 = vsub.f32 %v13100_v15, %v13170_v61  ;;  %v726_v16 = vmax.f32 %v694_v36, 0.0  ;;  %v727_v46 = vmax.f32 %v695_v23, 0.0  ;;  %v789_v47 = vpack.c.bf16 %v729_v40, %v728_v12  ;;  %v12220_v11 = vld [vmem:[%s16131_s30 + $0xa4] ss:$8 sps:$4 sm:$0xff]   ;;  %v12222_v42 = vld [vmem:[%s16131_s30 + $0xa0] ss:$8 sps:$4 sm:$0xff]  }
 0x1a5   :  { %v796_v20 = vpack.c.bf16 %v743_v38, %v742_v27  ;;  %v692_v52 = vmul.f32 %v13196_v21, %v658_v18  ;;  %v693_v53 = vmul.f32 %v13196_v21, %v659_v57  ;;  %v740_v19 = vmax.f32 %v708_v32, 0.0  ;;  %v12223_v62 = vld [vmem:[%s16131_s30 + $0xb4] ss:$8 sps:$4 sm:$0xff]   ;;  %v12225_v3 = vld [vmem:[%s16131_s30 + $0xb0] ss:$8 sps:$4 sm:$0xff]  }
 0x1a6   :  { %10161 = vmatpush3.bf16.msra.mxu1 %v790_v51  ;;  %v741_v56 = vmax.f32 %v709_v14, 0.0  ;;  %v706_v22 = vmul.f32 %v13196_v21, %v672_v41  ;;  %v707_v28 = vmul.f32 %v13196_v21, %v673_v45  ;;  %v656_v13 = vsub.f32 %v12984_v50, %v13170_v61  ;;  %v12226_v10 = vld [vmem:[%s16131_s30 + $0xc4] ss:$8 sps:$4 sm:$0xff]   ;;  %v12228_v35 = vld [vmem:[%s16131_s30 + $0xc0] ss:$8 sps:$4 sm:$0xff]  }
 0x1a7   :  { %10162 = vmatprep.subr.bf16.mxu1 %v797_v25  ;;  %v657_v15 = vsub.f32 %v12998_v17, %v13170_v61  ;;  %v788_v58 = vpack.c.bf16 %v727_v46, %v726_v16  ;;  %v724_v33 = vmax.f32 %v692_v52, 0.0  ;;  %v725_v63 = vmax.f32 %v693_v53, 0.0  ;;  %v12190_v61 = vld [vmem:[%s16131_s30] ss:$8 sps:$4 sm:$0xff]   ;;  %v12217_v25 = vld [vmem:[%s16131_s30 + $0x94] ss:$8 sps:$4 sm:$0xff]  }
 0x1a8   :  { %v690_v39 = vmul.f32 %v13196_v21, %v656_v13  ;;  %v795_v43 = vpack.c.bf16 %v741_v56, %v740_v19  ;;  %v738_v49 = vmax.f32 %v706_v22, 0.0  ;;  %v739_v4 = vmax.f32 %v707_v28, 0.0  ;;  %v12229_v44 = vld [vmem:[%s16131_s30 + $0xd4] ss:$8 sps:$4 sm:$0xff]   ;;  %v12231_v51 = vld [vmem:[%s16131_s30 + $0xd0] ss:$8 sps:$4 sm:$0xff]  }
 0x1a9   :  { %v691_v2 = vmul.f32 %v13196_v21, %v657_v15  ;;  %v787_v1 = vpack.c.bf16 %v725_v63, %v724_v33  ;;  %v12193_v21 = vld [vmem:[%s16131_s30 + $0x14] ss:$8 sps:$4 sm:$0xff]   ;;  %v12232_v36 = vld [vmem:[%s16131_s30 + $0xe4] ss:$8 sps:$4 sm:$0xff]   ;;  %v12234_v23 = vld [vmem:[%s16131_s30 + $0xe0] ss:$8 sps:$4 sm:$0xff]  }
 0x1aa   :  { %10163 = vmatpush3.bf16.msra.mxu1 %v789_v47  ;;  %v722_v60 = vmax.f32 %v690_v39, 0.0  ;;  %v794_v26 = vpack.c.bf16 %v739_v4, %v738_v49  ;;  %v12235_v12 = vld [vmem:[%s16131_s30 + $0xf4] ss:$8 sps:$4 sm:$0xff]   ;;  %v12237_v40 = vld [vmem:[%s16131_s30 + $0xf0] ss:$8 sps:$4 sm:$0xff]   ;;  %v12737_v18 = vmov 0.0  }
 0x1ab   :  { %10164 = vmatprep.subr.bf16.mxu1 %v796_v20  ;;  %v723_v50 = vmax.f32 %v691_v2, 0.0  ;;  %11001 = vmatprep.subr.bf16.mxu0 %v12737_v18 }
 0x1ac   :  { %11009 = vmatprep.mubr.msk.bf16.mxu0 %vm12738_vm0, %v12737_v18 }
 0x1ad   :  { %v786_v17 = vpack.c.bf16 %v723_v50, %v722_v60 }
 0x1ae   :  { %10165 = vmatpush3.bf16.msra.mxu1 %v788_v58 }
 0x1af   :  { %10166 = vmatprep.subr.bf16.mxu1 %v795_v43 }
 0x1b2   :  { %10167 = vmatpush3.bf16.msra.mxu1 %v787_v1 }
 0x1b3   :  { %10168 = vmatprep.subr.bf16.mxu1 %v794_v26 }
 0x1b6   :  { %10169 = vmatpush3.bf16.msra.mxu1 %v786_v17 }
 0x1b7   :  { %11013 = vmatprep.subr.bf16.mxu1 %v12737_v18 }
 0x1b9   :  { %995 = vmatmul.mubr.bf16.vlgmr.msra.gmra.mxu1 %v12190_v61 }
 0x1ba   :  { %1002 = vmatprep.mubr.bf16.mxu1 %v12193_v21 }
 0x1c1   :  { %1003 = vmatmul.mubr.bf16.gmra.mxu1 %v12195_v5 }
 0x1c2   :  { %1010 = vmatprep.mubr.bf16.mxu1 %v12196_v30 }
 0x1c9   :  { %1011 = vmatmul.mubr.bf16.gmra.mxu1 %v12198_v54 }
 0x1ca   :  { %1018 = vmatprep.mubr.bf16.mxu1 %v12199_v59 }
 0x1d1   :  { %1019 = vmatmul.mubr.bf16.gmra.mxu1 %v12201_v31 }
 0x1d2   :  { %1026 = vmatprep.mubr.bf16.mxu1 %v12202_v0 }
 0x1d9   :  { %1027 = vmatmul.mubr.bf16.gmra.mxu1 %v12204_v29 }
 0x1da   :  { %1034 = vmatprep.mubr.bf16.mxu1 %v12205_v7 }
 0x1e1   :  { %1035 = vmatmul.mubr.bf16.gmra.mxu1 %v12207_v6 }
 0x1e2   :  { %1042 = vmatprep.mubr.bf16.mxu1 %v12208_v55 }
 0x1e9   :  { %1043 = vmatmul.mubr.bf16.gmra.mxu1 %v12210_v48 }
 0x1ea   :  { %1050 = vmatprep.mubr.bf16.mxu1 %v12211_v37 }
 0x1f1   :  { %1051 = vmatmul.mubr.bf16.gmra.mxu1 %v12213_v9 }
 0x1f2   :  { %1058 = vmatprep.mubr.bf16.mxu1 %v12214_v24 }
 0x1f9   :  { %1059 = vmatmul.mubr.bf16.gmra.mxu1 %v12216_v34 }
 0x1fa   :  { %1066 = vmatprep.mubr.bf16.mxu1 %v12217_v25 }
 0x201   :  { %1067 = vmatmul.mubr.bf16.gmra.mxu1 %v12219_v8 }
 0x202   :  { %1074 = vmatprep.mubr.bf16.mxu1 %v12220_v11 }
 0x209   :  { %1075 = vmatmul.mubr.bf16.gmra.mxu1 %v12222_v42 }
 0x20a   :  { %1082 = vmatprep.mubr.bf16.mxu1 %v12223_v62 }
 0x211   :  { %1083 = vmatmul.mubr.bf16.gmra.mxu1 %v12225_v3 }
 0x212   :  { %1090 = vmatprep.mubr.bf16.mxu1 %v12226_v10  ;;  %v12247_v10 = vld [vmem:[%s16107_s8 + $0x38] sm:$0xff]  }
 0x213   :  { %11014 = vmatpush3.bf16.msra.mxu1 %v12247_v10 }
 0x214   :  { %11015 = vmatprep.subr.bf16.mxu1 %v12737_v18 }
 0x219   :  { %1091 = vmatmul.mubr.bf16.gmra.mxu1 %v12228_v35 }
 0x21a   :  { %1098 = vmatprep.mubr.bf16.mxu1 %v12229_v44 }
 0x221   :  { %1099 = vmatmul.mubr.bf16.gmra.mxu1 %v12231_v51  ;;  %v12248_v51 = vld [vmem:[%s16107_s8 + $0x30] sm:$0xff]  }
 0x222   :  { %1106 = vmatprep.mubr.bf16.mxu1 %v12232_v36  ;;  %11016 = vmatpush3.bf16.msra.mxu1 %v12248_v51 }
 0x223   :  { %11017 = vmatprep.subr.bf16.mxu1 %v12737_v18 }
 0x229   :  { %1107 = vmatmul.mubr.bf16.gmra.mxu1 %v12234_v23 }
 0x22a   :  { %1114 = vmatprep.mubr.bf16.mxu1 %v12235_v12 }
 0x231   :  { %1115 = vmatmul.mubr.bf16.gmra.mxu1 %v12237_v40  ;;  %v12249_v40 = vld [vmem:[%s16107_s8 + $0x28] sm:$0xff]  }
 0x232   :  { %11029 = vmatprep.mubr.msk.bf16.mxu1 %vm12738_vm0, %v12737_v18  ;;  %11018 = vmatpush3.bf16.msra.mxu1 %v12249_v40 }
 0x233   :  { %11019 = vmatprep.subr.bf16.mxu1 %v12737_v18 }
 0x279   :  { %v10170_v27 = vpop.f32.mrf.mxu1 }
 0x27b   :  { %v10171_v38 = vpop.f32.mrf.mxu1 }
 0x27c   :  { %v13363_v32 = vadd.f32 %v10171_v38, %v10170_v27 }
 0x27d   :  { %v10173_v14 = vpop.f32.mrf.mxu1 }
 0x27f   :  { %v10174_v57 = vpop.f32.mrf.mxu1 }
 0x280   :  { %v13381_v4 = vadd.f32 %v10174_v57, %v10173_v14  ;;  %v12250_v14 = vld [vmem:[%s16107_s8 + $0x20] sm:$0xff]  }
 0x281   :  { %v10176_v41 = vpop.f32.mrf.mxu1  ;;  %11020 = vmatpush3.bf16.msra.mxu1 %v12250_v14 }
 0x282   :  { %11021 = vmatprep.subr.bf16.mxu1 %v12737_v18 }
 0x283   :  { %v10177_v45 = vpop.f32.mrf.mxu1 }
 0x284   :  { %v13367_v16 = vadd.f32 %v10177_v45, %v10176_v41  ;;  %v12251_v45 = vld [vmem:[%s16107_s8 + $0x18] sm:$0xff]  }
 0x285   :  { %v10179_v46 = vpop.f32.mrf.mxu1  ;;  %11022 = vmatpush3.bf16.msra.mxu1 %v12251_v45 }
 0x286   :  { %11023 = vmatprep.subr.bf16.mxu1 %v12737_v18 }
 0x287   :  { %v10180_v47 = vpop.f32.mrf.mxu1 }
 0x288   :  { %v13391_v30 = vadd.f32 %v10180_v47, %v10179_v46 }
 0x289   :  { %v10182_v20 = vpop.f32.mrf.mxu1 }
 0x28b   :  { %v10183_v52 = vpop.f32.mrf.mxu1 }
 0x28c   :  { %v13369_v53 = vadd.f32 %v10183_v52, %v10182_v20  ;;  %v12252_v20 = vld [vmem:[%s16107_s8 + $0x10] sm:$0xff]  }
 0x28d   :  { %v10185_v19 = vpop.f32.mrf.mxu1  ;;  %11024 = vmatpush3.bf16.msra.mxu1 %v12252_v20 }
 0x28e   :  { %11025 = vmatprep.subr.bf16.mxu1 %v12737_v18 }
 0x28f   :  { %v10186_v56 = vpop.f32.mrf.mxu1 }
 0x290   :  { %v13401_v48 = vadd.f32 %v10186_v56, %v10185_v19 }
 0x291   :  { %v10188_v22 = vpop.f32.mrf.mxu1 }
 0x293   :  { %v10189_v28 = vpop.f32.mrf.mxu1 }
 0x294   :  { %v13375_v13 = vadd.f32 %v10189_v28, %v10188_v22 }
 0x295   :  { %v10191_v15 = vpop.f32.mrf.mxu1 }
 0x297   :  { %v10192_v58 = vpop.f32.mrf.mxu1 }
 0x298   :  { %v13411_v62 = vadd.f32 %v10192_v58, %v10191_v15 }
 0x299   :  { %v10194_v33 = vpop.f32.mrf.mxu1 }
 0x29b   :  { %v10195_v63 = vpop.f32.mrf.mxu1 }
 0x29c   :  { %v13377_v39 = vadd.f32 %v10195_v63, %v10194_v33 }
 0x29d   :  { %v10197_v2 = vpop.f32.mrf.mxu1 }
 0x29e   :  { %v1123_v43 = vmax.f32 %v13363_v32, %v13377_v39 }
 0x29f   :  { %v10198_v49 = vpop.f32.mrf.mxu1 }
 0x2a0   :  { %v13383_v1 = vadd.f32 %v10198_v49, %v10197_v2 }
 0x2a1   :  { %v10200_v60 = vpop.f32.mrf.mxu1 }
 0x2a2   :  { %v1124_v50 = vmax.f32 %v13381_v4, %v13383_v1 }
 0x2a3   :  { %v10201_v26 = vpop.f32.mrf.mxu1 }
 0x2a4   :  { %v13387_v17 = vadd.f32 %v10201_v26, %v10200_v60 }
 0x2a5   :  { %v10203_v61 = vpop.f32.mrf.mxu1 }
 0x2a6   :  { %v1125_v21 = vmax.f32 %v13367_v16, %v13387_v17 }
 0x2a7   :  { %v10204_v5 = vpop.f32.mrf.mxu1 }
 0x2a8   :  { %v13393_v54 = vadd.f32 %v10204_v5, %v10203_v61 }
 0x2a9   :  { %v10206_v59 = vpop.f32.mrf.mxu1 }
 0x2aa   :  { %v1126_v31 = vmax.f32 %v13391_v30, %v13393_v54 }
 0x2ab   :  { %v10207_v0 = vpop.f32.mrf.mxu1 }
 0x2ac   :  { %v13397_v29 = vadd.f32 %v10207_v0, %v10206_v59 }
 0x2ad   :  { %v10209_v7 = vpop.f32.mrf.mxu1 }
 0x2ae   :  { %v1127_v6 = vmax.f32 %v13369_v53, %v13397_v29 }
 0x2af   :  { %v10210_v55 = vpop.f32.mrf.mxu1 }
 0x2b0   :  { %v13403_v37 = vadd.f32 %v10210_v55, %v10209_v7 }
 0x2b1   :  { %v10212_v9 = vpop.f32.mrf.mxu1 }
 0x2b2   :  { %v1128_v24 = vmax.f32 %v13401_v48, %v13403_v37  ;;  %v12240_v48 = vld [vmem:[%s16106_s3 + $0x30] sm:$0xff]   ;;  %v12241_v37 = vld [vmem:[%s16106_s3 + $0x28] sm:$0xff]  }
 0x2b3   :  { %v10213_v34 = vpop.f32.mrf.mxu1 }
 0x2b4   :  { %v13407_v25 = vadd.f32 %v10213_v34, %v10212_v9 }
 0x2b5   :  { %v10215_v8 = vpop.f32.mrf.mxu1 }
 0x2b6   :  { %v1129_v11 = vmax.f32 %v13375_v13, %v13407_v25  ;;  %v12238_v13 = vld [vmem:[%s16132_s24] sm:$0xff]   ;;  %v12243_v25 = vld [vmem:[%s16106_s3 + $0x18] sm:$0xff]  }
 0x2b7   :  { %v10216_v42 = vpop.f32.mrf.mxu1 }
 0x2b8   :  { %v13413_v3 = vadd.f32 %v10216_v42, %v10215_v8 }
 0x2b9   :  { %v10218_v35 = vpop.f32.mrf.mxu1 }
 0x2ba   :  { %v1130_v44 = vmax.f32 %v13411_v62, %v13413_v3  ;;  %v12245_v62 = vld [vmem:[%s16106_s3 + $0x8] sm:$0xff]   ;;  %v12246_v3 = vld [vmem:[%s16106_s3] sm:$0xff]  }
 0x2bb   :  { %v10219_v36 = vpop.f32.mrf.mxu1 }
 0x2bc   :  { %v10220_v23 = vadd.f32 %v10219_v36, %v10218_v35 }
 0x2bd   :  { %v10221_v12 = vpop.f32.mrf.mxu1 }
 0x2bf   :  { %v10222_v27 = vpop.f32.mrf.mxu1 }
 0x2c0   :  { %v10223_v61 = vadd.f32 %v10222_v27, %v10221_v12 }
 0x2c1   :  { %v10224_v38 = vpop.f32.mrf.mxu1 }
 0x2c3   :  { %v10225_v57 = vpop.f32.mrf.mxu1 }
 0x2c4   :  { %v10226_v42 = vadd.f32 %v10225_v57, %v10224_v38 }
 0x2c5   :  { %v10227_v41 = vpop.f32.mrf.mxu1 }
 0x2c7   :  { %v10228_v46 = vpop.f32.mrf.mxu1 }
 0x2c8   :  { %v10229_v51 = vadd.f32 %v10228_v46, %v10227_v41 }
 0x2c9   :  { %v10230_v47 = vpop.f32.mrf.mxu1 }
 0x2cb   :  { %v10231_v52 = vpop.f32.mrf.mxu1 }
 0x2cd   :  { %v10233_v19 = vpop.f32.mrf.mxu1 }
 0x2cf   :  { %v10234_v56 = vpop.f32.mrf.mxu1 }
 0x2d0   :  { %v10235_v14 = vadd.f32 %v10234_v56, %v10233_v19 }
 0x2d1   :  { %v10236_v22 = vpop.f32.mrf.mxu1 }
 0x2d3   :  { %v10237_v28 = vpop.f32.mrf.mxu1 }
 0x2d4   :  { %v10238_v54 = vadd.f32 %v10237_v28, %v10236_v22  ;;  %v12254_v22 = vld [vmem:[%s16107_s8] sm:$0xff]  }
 0x2d5   :  { %v10239_v15 = vpop.f32.mrf.mxu1 }
 0x2d7   :  { %v10240_v58 = vpop.f32.mrf.mxu1 }
 0x2d9   :  { %v10242_v33 = vpop.f32.mrf.mxu1 }
 0x2db   :  { %v10243_v63 = vpop.f32.mrf.mxu1 }
 0x2dc   :  { %v10244_v2 = vadd.f32 %v10243_v63, %v10242_v33 }
 0x2dd   :  { %v10245_v49 = vpop.f32.mrf.mxu1 }
 0x2de   :  { %v1131_v60 = vmax.f32 %v10220_v23, %v10244_v2 }
 0x2df   :  { %v10246_v26 = vpop.f32.mrf.mxu1 }
 0x2e0   :  { %v1139_v5 = vmax.f32 %v1123_v43, %v1131_v60  ;;  %v10247_v59 = vadd.f32 %v10246_v26, %v10245_v49 }
 0x2e1   :  { %v10248_v0 = vpop.f32.mrf.mxu1 }
 0x2e2   :  { %v1132_v7 = vmax.f32 %v10223_v61, %v10247_v59 }
 0x2e3   :  { %v10249_v55 = vpop.f32.mrf.mxu1 }
 0x2e4   :  { %v1140_v9 = vmax.f32 %v1124_v50, %v1132_v7  ;;  %v10250_v34 = vadd.f32 %v10249_v55, %v10248_v0  ;;  %v10232_v50 = vadd.f32 %v10231_v52, %v10230_v47  ;;  %v10241_v52 = vadd.f32 %v10240_v58, %v10239_v15 }
 0x2e5   :  { %v10251_v8 = vpop.f32.mrf.mxu1 }
 0x2e6   :  { %v1149_v10 = vpack.c.bf16 %v1140_v9, %v1139_v5  ;;  %v1133_v36 = vmax.f32 %v10226_v42, %v10250_v34 }
 0x2e7   :  { %v10252_v35 = vpop.f32.mrf.mxu1 }
 0x2e8   :  { %v10253_v23 = vadd.f32 %v10252_v35, %v10251_v8  ;;  %v1141_v39 = vmax.f32 %v1125_v21, %v1133_v36 }
 0x2e9   :  { %v10254_v12 = vpop.f32.mrf.mxu1 }
 0x2ea   :  { %v1134_v40 = vmax.f32 %v10229_v51, %v10253_v23 }
 0x2eb   :  { %v10255_v32 = vpop.f32.mrf.mxu1 }
 0x2ec   :  { %v1142_v43 = vmax.f32 %v1126_v31, %v1134_v40  ;;  %v10256_v4 = vadd.f32 %v10255_v32, %v10254_v12 }
 0x2ed   :  { %v10257_v1 = vpop.f32.mrf.mxu1 }
 0x2ee   :  { %v1150_v27 = vpack.c.bf16 %v1142_v43, %v1141_v39  ;;  %v1135_v57 = vmax.f32 %v10232_v50, %v10256_v4 }
 0x2ef   :  { %v10258_v38 = vpop.f32.mrf.mxu1 }
 0x2f0   :  { %v10259_v41 = vadd.f32 %v10258_v38, %v10257_v1  ;;  %v1143_v16 = vmax.f32 %v1127_v6, %v1135_v57  ;;  %v12239_v6 = vld [vmem:[%s16106_s3 + $0x38] sm:$0xff]  }
 0x2f1   :  { %v10260_v45 = vpop.f32.mrf.mxu1 }
 0x2f2   :  { %v1136_v46 = vmax.f32 %v10235_v14, %v10259_v41 }
 0x2f3   :  { %v10261_v20 = vpop.f32.mrf.mxu1 }
 0x2f4   :  { %v1144_v17 = vmax.f32 %v1128_v24, %v1136_v46  ;;  %v10262_v21 = vadd.f32 %v10261_v20, %v10260_v45  ;;  %v12242_v24 = vld [vmem:[%s16106_s3 + $0x20] sm:$0xff]  }
 0x2f5   :  { %v10263_v30 = vpop.f32.mrf.mxu1 }
 0x2f6   :  { %v1151_v31 = vpack.c.bf16 %v1144_v17, %v1143_v16  ;;  %v1137_v19 = vmax.f32 %v10238_v54, %v10262_v21 }
 0x2f7   :  { %v10264_v47 = vpop.f32.mrf.mxu1 }
 0x2f8   :  { %v10265_v56 = vadd.f32 %v10264_v47, %v10263_v30  ;;  %v1145_v63 = vmax.f32 %v1129_v11, %v1137_v19  ;;  %v12244_v11 = vld [vmem:[%s16106_s3 + $0x10] sm:$0xff]  }
 0x2fa   :  { %v1138_v33 = vmax.f32 %v10241_v52, %v10265_v56 }
 0x2fc   :  { %v1146_v53 = vmax.f32 %v1130_v44, %v1138_v33  ;;  %v12253_v44 = vld [vmem:[%s16107_s8 + $0x8] sm:$0xff]  }
 0x2fd   :  { %11026 = vmatpush3.bf16.msra.mxu1 %v12253_v44 }
 0x2fe   :  { %v1152_v29 = vpack.c.bf16 %v1146_v53, %v1145_v63  ;;  %11027 = vmatprep.subr.bf16.mxu1 %v12737_v18 }
 0x300   :  { %11002 = vmatpush3.bf16.msra.mxu0 %v1152_v29 }
 0x301   :  { %11003 = vmatprep.subr.bf16.mxu0 %v12737_v18  ;;  %11028 = vmatpush3.bf16.msra.mxu1 %v12254_v22 }
 0x302   :  { %11057 = vmatprep.subr.bf16.mxu1 %v12737_v18 }
 0x304   :  { %11004 = vmatpush3.bf16.msra.mxu0 %v1151_v31 }
 0x305   :  { %11005 = vmatprep.subr.bf16.mxu0 %v12737_v18 }
 0x308   :  { %11006 = vmatpush3.bf16.msra.mxu0 %v1150_v27 }
 0x309   :  { %11007 = vmatprep.subr.bf16.mxu0 %v12737_v18 }
 0x30c   :  { %11008 = vmatpush3.bf16.msra.mxu0 %v1149_v10 }
 0x30d   :  { %11033 = vmatprep.subr.bf16.mxu0 %v12239_v6 }
 0x30f   :  { %11010 = vmatmul.mubr.msk.bf16.vlgmr.msra.gmra.mxu0 %vm1158_vm1, %v12238_v13 }
 0x310   :  { %11034 = vmatpush3.bf16.msra.mxu0 %v12239_v6  ;;  %11049 = vmatprep.mubr.bf16.mxu0 %v1149_v10 }
 0x311   :  { %11035 = vmatprep.subr.bf16.mxu0 %v12240_v48 }
 0x314   :  { %11036 = vmatpush3.bf16.msra.mxu0 %v12240_v48 }
 0x315   :  { %11037 = vmatprep.subr.bf16.mxu0 %v12241_v37 }
 0x318   :  { %11038 = vmatpush3.bf16.msra.mxu0 %v12241_v37 }
 0x319   :  { %11039 = vmatprep.subr.bf16.mxu0 %v12242_v24 }
 0x31c   :  { %11040 = vmatpush3.bf16.msra.mxu0 %v12242_v24 }
 0x31d   :  { %11041 = vmatprep.subr.bf16.mxu0 %v12243_v25 }
 0x320   :  { %11042 = vmatpush3.bf16.msra.mxu0 %v12243_v25 }
 0x321   :  { %11043 = vmatprep.subr.bf16.mxu0 %v12244_v11 }
 0x324   :  { %11044 = vmatpush3.bf16.msra.mxu0 %v12244_v11 }
 0x325   :  { %11045 = vmatprep.subr.bf16.mxu0 %v12245_v62 }
 0x328   :  { %11046 = vmatpush3.bf16.msra.mxu0 %v12245_v62 }
 0x329   :  { %11047 = vmatprep.subr.bf16.mxu0 %v12246_v3 }
 0x32c   :  { %11048 = vmatpush3.bf16.msra.mxu0 %v12246_v3 }
 0x32d   :  { %11081 = vmatprep.subr.bf16.mxu0 %v12737_v18 }
 0x32f   :  { %11050 = vmatmul.mubr.bf16.vlgmr.msra.gmra.mxu0 %v1150_v27 }
 0x330   :  { %11053 = vmatprep.mubr.bf16.mxu0 %v1151_v31 }
 0x337   :  { %11054 = vmatmul.mubr.bf16.gmra.mxu0 %v1152_v29 }
 0x338   :  { %11097 = vmatprep.mubr.msk.bf16.mxu0 %vm12738_vm0, %v12737_v18 }
 0x3cf   :  { %v1196_v28 = vpop.f32.mrf.mxu0 }
 0x3d1   :  { %v11011_v15 = vpop.f32.mrf.mxu0 }
 0x3d3   :  { %v1199_v58 = vpop.f32.mrf.mxu0 }
 0x3d4   :  { %v1219_v2 = vpack.c.bf16 %v1199_v58, %v1196_v28 }
 0x3d5   :  { %v11012_v49 = vpop.f32.mrf.mxu0 }
 0x3d6   :  { %11030 = vmatmul.mubr.bf16.vlgmr.msra.gmra.mxu1 %v1219_v2 }
 0x3d7   :  { %11065 = vmatprep.mubr.msk.bf16.mxu1 %vm12738_vm0, %v12737_v18 }
 0x3ef   :  { %v13509_v60 = vpop.f32.mrf.mxu0 }
 0x3f0   :  { %v1483_v9 = vmul.f32 %v13509_v60, %v13509_v60 }
 0x3f1   :  { %v13511_v26 = vpop.f32.mrf.mxu0 }
 0x3f2   :  { %v1481_v59 = vmul.f32 %v13511_v26, %v13511_v26 }
 0x3f3   :  { %v13513_v61 = vpop.f32.mrf.mxu0 }
 0x3f4   :  { %v1484_v10 = vmul.f32 %v13513_v61, %v13513_v61 }
 0x3f5   :  { %v13515_v5 = vpop.f32.mrf.mxu0 }
 0x3f6   :  { %v1466_v0 = vadd.f32 %v13515_v5, %v13511_v26  ;;  %v1482_v7 = vmul.f32 %v13515_v5, %v13515_v5 }
 0x3f7   :  { %v11055_v55 = vpop.f32.mrf.mxu0 }
 0x3f8   :  { %v1489_v34 = vadd.f32 %v1482_v7, %v1481_v59  ;;  %v1467_v8 = vadd.f32 %v13509_v60, %v1466_v0  ;;  %v1487_v1 = vmul.f32 %v11055_v55, %v11055_v55 }
 0x3f9   :  { %v1451_v42 = vpop.f32.mrf.mxu0 }
 0x3fa   :  { %v1468_v35 = vadd.f32 %v13513_v61, %v1467_v8  ;;  %v1490_v51 = vadd.f32 %v1489_v34, %v1483_v9  ;;  %v1485_v12 = vmul.f32 %v1451_v42, %v1451_v42  ;;  %v12255_v9 = vld [vmem:[%s16108_s4] sm:$0xff]   ;;  %v12256_v34 = vld [vmem:[%s16108_s4 + $0x8] sm:$0xff]  }
 0x3fb   :  { %v11056_v36 = vpop.f32.mrf.mxu0  ;;  %v12259_v8 = vld [vmem:[%s16109_s5 + $0x68] sm:$0xff]  }
 0x3fc   :  { %v1469_v23 = vadd.f32 %v1468_v35, %v1451_v42  ;;  %v1491_v40 = vadd.f32 %v1490_v51, %v1484_v10  ;;  %v1488_v38 = vmul.f32 %v11056_v36, %v11056_v36  ;;  %v12261_v10 = vld [vmem:[%s16109_s5 + $0x58] sm:$0xff]   ;;  %v12265_v51 = vld [vmem:[%s16109_s5 + $0x30] sm:$0xff]  }
 0x3fd   :  { %v1454_v32 = vpop.f32.mrf.mxu0  ;;  %v12263_v35 = vld [vmem:[%s16109_s5 + $0x38] sm:$0xff]  }
 0x3fe   :  { %v1492_v39 = vadd.f32 %v1491_v40, %v1485_v12  ;;  %v1470_v43 = vadd.f32 %v1469_v23, %v1454_v32  ;;  %v1486_v4 = vmul.f32 %v1454_v32, %v1454_v32  ;;  %v12262_v23 = vld [vmem:[%s16109_s5 + $0x50] sm:$0xff]   ;;  %v12268_v12 = vld [vmem:[%s16109_s5 + $0x20] sm:$0xff]   ;;  %v12264_v40 = vld [vmem:[%s16109_s5 + $0x48] sm:$0xff]  }
 0x400   :  { %v1471_v50 = vadd.f32 %v11055_v55, %v1470_v43  ;;  %v1493_v27 = vadd.f32 %v1492_v39, %v1486_v4  ;;  %v12270_v39 = vld [vmem:[%s16109_s5 + $0x10] sm:$0xff]   ;;  %v12271_v43 = vld [vmem:[%s16109_s5 + $0x8] sm:$0xff]   ;;  %v12266_v4 = vld [vmem:[%s16109_s5 + $0x40] sm:$0xff]  }
 0x402   :  { %v1472_v14 = vadd.f32 %v11056_v36, %v1471_v50  ;;  %v1494_v57 = vadd.f32 %v1493_v27, %v1487_v1  ;;  %v12273_v1 = vld [vmem:[%s16109_s5] sm:$0xff]  }
 0x404   :  { %v1473_v41 = vrot.slane %v1472_v14, 4  ;;  %v1495_v45 = vadd.f32 %v1494_v57, %v1488_v38 }
 0x406   :  { %v1474_v46 = vadd.f32 %v1473_v41, %v1472_v14  ;;  %v1496_v20 = vrot.slane %v1495_v45, 4 }
 0x408   :  { %v1475_v16 = vrot.slane %v1474_v46, 2  ;;  %v1497_v17 = vadd.f32 %v1496_v20, %v1495_v45 }
 0x40a   :  { %v1476_v21 = vadd.f32 %v1475_v16, %v1474_v46  ;;  %v1498_v30 = vrot.slane %v1497_v17, 2 }
 0x40c   :  { %v1477_v54 = vrot.slane %v1476_v21, 1  ;;  %v1499_v31 = vadd.f32 %v1498_v30, %v1497_v17 }
 0x40e   :  { %v1478_v47 = vadd.f32 %v1477_v54, %v1476_v21  ;;  %v1500_v52 = vrot.slane %v1499_v31, 1 }
 0x410   :  { %v1480_v19 = vmul.f32 0.015625, %v1478_v47  ;;  %v1501_v56 = vadd.f32 %v1500_v52, %v1499_v31 }
 0x412   :  { %v1502_v33 = vmul.f32 0.015625, %v1501_v56  ;;  %v1503_v63 = vmul.f32 %v1480_v19, %v1480_v19  ;;  %v1512_v13 = vsub.f32 %v11055_v55, %v1480_v19  ;;  %v1513_v48 = vsub.f32 %v11056_v36, %v1480_v19  ;;  %v12267_v36 = vld [vmem:[%s16109_s5 + $0x28] sm:$0xff]  }
 0x413   :  { %v1510_v24 = vsub.f32 %v1451_v42, %v1480_v19  ;;  %v1511_v25 = vsub.f32 %v1454_v32, %v1480_v19  ;;  %v1508_v28 = vsub.f32 %v13509_v60, %v1480_v19  ;;  %v1509_v15 = vsub.f32 %v13513_v61, %v1480_v19  ;;  %v12260_v42 = vld [vmem:[%s16109_s5 + $0x60] sm:$0xff]   ;;  %v12269_v32 = vld [vmem:[%s16109_s5 + $0x18] sm:$0xff]  }
 0x414   :  { %v1504_v53 = vsub.f32 %v1502_v33, %v1503_v63  ;;  %v1506_v59 = vsub.f32 %v13511_v26, %v1480_v19  ;;  %v1507_v0 = vsub.f32 %v13515_v5, %v1480_v19  ;;  %v12257_v26 = vld [vmem:[%s16109_s5 + $0x78] sm:$0xff]   ;;  %v12258_v5 = vld [vmem:[%s16109_s5 + $0x70] sm:$0xff]  }
 0x415   :  { %11082 = vmatpush3.bf16.msra.mxu0 %v12257_v26 }
 0x416   :  { %v1505_v29 = vmax.f32 %v1504_v53, 0.0  ;;  %11083 = vmatprep.subr.bf16.mxu0 %v12737_v18 }
 0x418   :  { %v1514_v6 = vadd.f32 1e-05, %v1505_v29 }
 0x419   :  { %11084 = vmatpush3.bf16.msra.mxu0 %v12258_v5 }
 0x41a   :  { %12719 = vrsqrt.f32 %v1514_v6  ;;  %11085 = vmatprep.subr.bf16.mxu0 %v12737_v18 }
 0x41d   :  { %11086 = vmatpush3.bf16.msra.mxu0 %v12259_v8 }
 0x41e   :  { %11087 = vmatprep.subr.bf16.mxu0 %v12737_v18 }
 0x421   :  { %11088 = vmatpush3.bf16.msra.mxu0 %v12260_v42  ;;  %v12272_v42 = vld [vmem:[%s16108_s4 + $0x10] sm:$0xff]  }
 0x422   :  { %11089 = vmatprep.subr.bf16.mxu0 %v12737_v18 }
 0x425   :  { %11090 = vmatpush3.bf16.msra.mxu0 %v12261_v10  ;;  %v12274_v10 = vld [vmem:[%s16108_s4 + $0x18] sm:$0xff]  }
 0x426   :  { %11091 = vmatprep.subr.bf16.mxu0 %v12737_v18 }
 0x427   :  { %v12720_v37 = vpop.eup %12719 }
 0x428   :  { %v1522_v11 = vmul.f32 %v12720_v37, %v1512_v13  ;;  %v1523_v62 = vmul.f32 %v12720_v37, %v1513_v48  ;;  %v1520_v3 = vmul.f32 %v12720_v37, %v1510_v24  ;;  %v1521_v44 = vmul.f32 %v12720_v37, %v1511_v25 }
 0x429   :  { %v1518_v2 = vmul.f32 %v12720_v37, %v1508_v28  ;;  %v1519_v49 = vmul.f32 %v12720_v37, %v1509_v15  ;;  %v1516_v55 = vmul.f32 %v12720_v37, %v1506_v59  ;;  %v1517_v60 = vmul.f32 %v12720_v37, %v1507_v0  ;;  %11092 = vmatpush3.bf16.msra.mxu0 %v12262_v23  ;;  %v12275_v15 = vld [vmem:[%s16109_s5 + $0xb8] sm:$0xff]   ;;  %v12276_v59 = vld [vmem:[%s16109_s5 + $0xb0] sm:$0xff]   ;;  %v12277_v0 = vld [vmem:[%s16109_s5 + $0xa8] sm:$0xff]  }
 0x42a   :  { %v13529_v22 = vpack.c.bf16 %v1523_v62, %v1522_v11  ;;  %v13535_v58 = vpack.c.bf16 %v1521_v44, %v1520_v3  ;;  %11093 = vmatprep.subr.bf16.mxu0 %v12737_v18  ;;  %v12283_v23 = vld [vmem:[%s16109_s5 + $0x88] sm:$0xff]  }
 0x42b   :  { %v13541_v7 = vpack.c.bf16 %v1519_v49, %v1518_v2  ;;  %v13545_v61 = vpack.c.bf16 %v1517_v60, %v1516_v55  ;;  %v12278_v60 = vld [vmem:[%s16109_s5 + $0xa0] sm:$0xff]  }
 0x42c   :  { %11058 = vmatpush3.bf16.msra.mxu1 %v13529_v22 }
 0x42d   :  { %11059 = vmatprep.subr.bf16.mxu1 %v12737_v18  ;;  %11094 = vmatpush3.bf16.msra.mxu0 %v12264_v40  ;;  %v12285_v40 = vld [vmem:[%s16109_s5 + $0x80] sm:$0xff]  }
 0x42e   :  { %11095 = vmatprep.subr.bf16.mxu0 %v12737_v18 }
 0x430   :  { %11060 = vmatpush3.bf16.msra.mxu1 %v13535_v58 }
 0x431   :  { %11061 = vmatprep.subr.bf16.mxu1 %v12737_v18  ;;  %11096 = vmatpush3.bf16.msra.mxu0 %v12266_v4  ;;  %v12289_v4 = vld [vmem:[%s16109_s5 + $0xc8] sm:$0xff]  }
 0x432   :  { %11121 = vmatprep.subr.bf16.mxu0 %v12737_v18 }
 0x434   :  { %11062 = vmatpush3.bf16.msra.mxu1 %v13541_v7 }
 0x435   :  { %11063 = vmatprep.subr.bf16.mxu1 %v12737_v18 }
 0x438   :  { %11064 = vmatpush3.bf16.msra.mxu1 %v13545_v61 }
 0x439   :  { %11069 = vmatprep.subr.bf16.mxu1 %v12737_v18 }
 0x43b   :  { %11066 = vmatmul.mubr.msk.bf16.vlgmr.msra.gmra.mxu1 %vm1158_vm1, %v12255_v9 }
 0x43c   :  { %11070 = vmatpush3.bf16.msra.mxu1 %v13529_v22  ;;  %11077 = vmatprep.mubr.msk.bf16.mxu1 %vm12738_vm0, %v12737_v18 }
 0x43d   :  { %11071 = vmatprep.subr.bf16.mxu1 %v12737_v18 }
 0x440   :  { %11072 = vmatpush3.bf16.msra.mxu1 %v13535_v58 }
 0x441   :  { %11073 = vmatprep.subr.bf16.mxu1 %v12737_v18 }
 0x444   :  { %11074 = vmatpush3.bf16.msra.mxu1 %v13541_v7 }
 0x445   :  { %11075 = vmatprep.subr.bf16.mxu1 %v12737_v18 }
 0x448   :  { %11076 = vmatpush3.bf16.msra.mxu1 %v13545_v61 }
 0x449   :  { %11101 = vmatprep.subr.bf16.mxu1 %v12737_v18 }
 0x44b   :  { %11078 = vmatmul.mubr.msk.bf16.vlgmr.msra.gmra.mxu1 %vm1158_vm1, %v12256_v34  ;;  %v12279_v34 = vld [vmem:[%s16109_s5 + $0x98] sm:$0xff]  }
 0x44c   :  { %11117 = vmatprep.mubr.msk.bf16.mxu1 %vm12738_vm0, %v12737_v18  ;;  %11102 = vmatpush3.bf16.msra.mxu1 %v12263_v35  ;;  %v12280_v35 = vld [vmem:[%s16109_s5 + $0xf8] sm:$0xff]  }
 0x44d   :  { %11103 = vmatprep.subr.bf16.mxu1 %v12737_v18 }
 0x450   :  { %11104 = vmatpush3.bf16.msra.mxu1 %v12265_v51  ;;  %v12281_v51 = vld [vmem:[%s16109_s5 + $0x90] sm:$0xff]  }
 0x451   :  { %11105 = vmatprep.subr.bf16.mxu1 %v12737_v18 }
 0x454   :  { %11106 = vmatpush3.bf16.msra.mxu1 %v12267_v36  ;;  %v12282_v36 = vld [vmem:[%s16109_s5 + $0xf0] sm:$0xff]  }
 0x455   :  { %11107 = vmatprep.subr.bf16.mxu1 %v12737_v18 }
 0x458   :  { %11108 = vmatpush3.bf16.msra.mxu1 %v12268_v12  ;;  %v12284_v12 = vld [vmem:[%s16109_s5 + $0xe8] sm:$0xff]  }
 0x459   :  { %11109 = vmatprep.subr.bf16.mxu1 %v12737_v18 }
 0x45c   :  { %11110 = vmatpush3.bf16.msra.mxu1 %v12269_v32  ;;  %v12286_v32 = vld [vmem:[%s16109_s5 + $0xe0] sm:$0xff]  }
 0x45d   :  { %11111 = vmatprep.subr.bf16.mxu1 %v12737_v18 }
 0x460   :  { %11112 = vmatpush3.bf16.msra.mxu1 %v12270_v39  ;;  %v12287_v39 = vld [vmem:[%s16109_s5 + $0xd8] sm:$0xff]  }
 0x461   :  { %11113 = vmatprep.subr.bf16.mxu1 %v12737_v18 }
 0x464   :  { %11114 = vmatpush3.bf16.msra.mxu1 %v12271_v43  ;;  %v12288_v43 = vld [vmem:[%s16109_s5 + $0xd0] sm:$0xff]  }
 0x465   :  { %11115 = vmatprep.subr.bf16.mxu1 %v12737_v18 }
 0x468   :  { %11116 = vmatpush3.bf16.msra.mxu1 %v12273_v1  ;;  %v12290_v1 = vld [vmem:[%s16109_s5 + $0xc0] sm:$0xff]  }
 0x469   :  { %11133 = vmatprep.subr.bf16.mxu1 %v12737_v18 }
 0x496   :  { %v1302_v50 = vpop.f32.mrf.mxu1 }
 0x497   :  { %v1318_v14 = vmul.f32 %v1302_v50, %v1302_v50 }
 0x498   :  { %v11031_v27 = vpop.f32.mrf.mxu1 }
 0x49a   :  { %v1305_v38 = vpop.f32.mrf.mxu1 }
 0x49b   :  { %v1309_v57 = vadd.f32 %v1305_v38, %v1302_v50  ;;  %v1319_v41 = vmul.f32 %v1305_v38, %v1305_v38 }
 0x49c   :  { %v11032_v45 = vpop.f32.mrf.mxu1 }
 0x49d   :  { %v1310_v46 = vrot.slane %v1309_v57, 4  ;;  %v1320_v20 = vadd.f32 %v1319_v41, %v1318_v14 }
 0x49f   :  { %v1311_v16 = vadd.f32 %v1310_v46, %v1309_v57  ;;  %v1321_v17 = vrot.slane %v1320_v20, 4 }
 0x4a1   :  { %v1312_v21 = vrot.slane %v1311_v16, 2  ;;  %v1322_v30 = vadd.f32 %v1321_v17, %v1320_v20 }
 0x4a3   :  { %v1313_v54 = vadd.f32 %v1312_v21, %v1311_v16  ;;  %v1323_v31 = vrot.slane %v1322_v30, 2 }
 0x4a5   :  { %v1314_v47 = vrot.slane %v1313_v54, 1  ;;  %v1324_v52 = vadd.f32 %v1323_v31, %v1322_v30 }
 0x4a7   :  { %v1315_v19 = vadd.f32 %v1314_v47, %v1313_v54  ;;  %v1325_v56 = vrot.slane %v1324_v52, 1 }
 0x4a9   :  { %v1317_v33 = vmul.f32 0.0625, %v1315_v19  ;;  %v1326_v63 = vadd.f32 %v1325_v56, %v1324_v52  ;;  %v12291_v19 = vld [vmem:[%s16108_s4 + $0x20] sm:$0xff]  }
 0x4ab   :  { %v1327_v53 = vmul.f32 0.0625, %v1326_v63  ;;  %v1328_v29 = vmul.f32 %v1317_v33, %v1317_v33  ;;  %v1331_v6 = vsub.f32 %v1302_v50, %v1317_v33  ;;  %v1332_v13 = vsub.f32 %v1305_v38, %v1317_v33  ;;  %v12293_v63 = vld [vmem:[%s16109_s5 + $0x138] sm:$0xff]  }
 0x4ad   :  { %v1329_v48 = vsub.f32 %v1327_v53, %v1328_v29  ;;  %v12294_v29 = vld [vmem:[%s16109_s5 + $0x130] sm:$0xff]  }
 0x4af   :  { %v1330_v37 = vmax.f32 %v1329_v48, 0.0  ;;  %v12296_v48 = vld [vmem:[%s16109_s5 + $0x120] sm:$0xff]  }
 0x4b1   :  { %v1333_v24 = vadd.f32 1e-05, %v1330_v37  ;;  %v12297_v37 = vld [vmem:[%s16109_s5 + $0x118] sm:$0xff]  }
 0x4b3   :  { %12721 = vrsqrt.f32 %v1333_v24  ;;  %v12298_v24 = vld [vmem:[%s16109_s5 + $0x178] sm:$0xff]  }
 0x4c0   :  { %v12722_v25 = vpop.eup %12721 }
 0x4c1   :  { %v13633_v11 = vmul.f32 %v12722_v25, %v1332_v13  ;;  %v13635_v62 = vmul.f32 %v12722_v25, %v1331_v6  ;;  %v12295_v6 = vld [vmem:[%s16109_s5 + $0x128] sm:$0xff]   ;;  %v12300_v25 = vld [vmem:[%s16109_s5 + $0x170] sm:$0xff]  }
 0x4c2   :  { %v12292_v13 = vld [vmem:[%s16108_s4 + $0x28] sm:$0xff]  }
 0x4fb   :  { %v1572_v3 = vpop.f32.mrf.mxu1 }
 0x4fd   :  { %v11067_v44 = vpop.f32.mrf.mxu1 }
 0x4fe   :  { %v12302_v44 = vld [vmem:[%s16109_s5 + $0x168] sm:$0xff]  }
 0x4ff   :  { %v1575_v28 = vpop.f32.mrf.mxu1 }
 0x500   :  { %v1595_v2 = vpack.c.bf16 %v1575_v28, %v1572_v3  ;;  %v12299_v3 = vld [vmem:[%s16109_s5 + $0x110] sm:$0xff]   ;;  %v12301_v28 = vld [vmem:[%s16109_s5 + $0x108] sm:$0xff]  }
 0x501   :  { %v11068_v49 = vpop.f32.mrf.mxu1 }
 0x502   :  { %11118 = vmatmul.mubr.bf16.vlgmr.msra.gmra.mxu1 %v1595_v2  ;;  %v12304_v2 = vld [vmem:[%s16109_s5 + $0x160] sm:$0xff]   ;;  %v12305_v49 = vld [vmem:[%s16109_s5 + $0x158] sm:$0xff]  }
 0x503   :  { %11134 = vmatpush3.bf16.msra.mxu1 %v12275_v15  ;;  %11149 = vmatprep.mubr.msk.bf16.mxu1 %vm12738_vm0, %v12737_v18  ;;  %v12303_v15 = vld [vmem:[%s16109_s5 + $0x100] sm:$0xff]  }
 0x504   :  { %11135 = vmatprep.subr.bf16.mxu1 %v12737_v18 }
 0x507   :  { %11136 = vmatpush3.bf16.msra.mxu1 %v12276_v59  ;;  %v12306_v59 = vld [vmem:[%s16109_s5 + $0x150] sm:$0xff]  }
 0x508   :  { %11137 = vmatprep.subr.bf16.mxu1 %v12737_v18 }
 0x50b   :  { %v1641_v55 = vpop.f32.mrf.mxu1  ;;  %11138 = vmatpush3.bf16.msra.mxu1 %v12277_v0  ;;  %v12307_v0 = vld [vmem:[%s16109_s5 + $0x148] sm:$0xff]  }
 0x50c   :  { %11139 = vmatprep.subr.bf16.mxu1 %v12737_v18 }
 0x50d   :  { %v11079_v9 = vpop.f32.mrf.mxu1 }
 0x50f   :  { %v1644_v26 = vpop.f32.mrf.mxu1  ;;  %11140 = vmatpush3.bf16.msra.mxu1 %v12278_v60 }
 0x510   :  { %v1665_v5 = vpack.c.bf16 %v1644_v26, %v1641_v55  ;;  %11141 = vmatprep.subr.bf16.mxu1 %v12737_v18  ;;  %v12308_v55 = vld [vmem:[%s16109_s5 + $0x140] sm:$0xff]  }
 0x511   :  { %v11080_v8 = vpop.f32.mrf.mxu1 }
 0x512   :  { %11098 = vmatmul.mubr.bf16.vlgmr.msra.gmra.mxu0 %v1665_v5 }
 0x513   :  { %11122 = vmatpush3.bf16.msra.mxu0 %v13529_v22  ;;  %11129 = vmatprep.mubr.msk.bf16.mxu0 %vm12738_vm0, %v12737_v18 }
 0x514   :  { %11123 = vmatprep.subr.bf16.mxu0 %v12737_v18  ;;  %11142 = vmatpush3.bf16.msra.mxu1 %v12279_v34 }
 0x515   :  { %11143 = vmatprep.subr.bf16.mxu1 %v12737_v18 }
 0x517   :  { %11124 = vmatpush3.bf16.msra.mxu0 %v13535_v58 }
 0x518   :  { %11125 = vmatprep.subr.bf16.mxu0 %v12737_v18  ;;  %11144 = vmatpush3.bf16.msra.mxu1 %v12281_v51 }
 0x519   :  { %11145 = vmatprep.subr.bf16.mxu1 %v12737_v18 }
 0x51b   :  { %11126 = vmatpush3.bf16.msra.mxu0 %v13541_v7 }
 0x51c   :  { %11127 = vmatprep.subr.bf16.mxu0 %v12737_v18  ;;  %11146 = vmatpush3.bf16.msra.mxu1 %v12283_v23 }
 0x51d   :  { %11147 = vmatprep.subr.bf16.mxu1 %v12737_v18 }
 0x51f   :  { %11128 = vmatpush3.bf16.msra.mxu0 %v13545_v61 }
 0x520   :  { %11153 = vmatprep.subr.bf16.mxu0 %v12737_v18  ;;  %11148 = vmatpush3.bf16.msra.mxu1 %v12285_v40 }
 0x521   :  { %11185 = vmatprep.subr.bf16.mxu1 %v12737_v18 }
 0x522   :  { %11130 = vmatmul.mubr.msk.bf16.vlgmr.msra.gmra.mxu0 %vm1158_vm1, %v12272_v42 }
 0x523   :  { %11154 = vmatpush3.bf16.msra.mxu0 %v13529_v22  ;;  %11161 = vmatprep.mubr.msk.bf16.mxu0 %vm12738_vm0, %v12737_v18 }
 0x524   :  { %11155 = vmatprep.subr.bf16.mxu0 %v12737_v18 }
 0x527   :  { %11156 = vmatpush3.bf16.msra.mxu0 %v13535_v58 }
 0x528   :  { %11157 = vmatprep.subr.bf16.mxu0 %v12737_v18 }
 0x52b   :  { %11158 = vmatpush3.bf16.msra.mxu0 %v13541_v7 }
 0x52c   :  { %11159 = vmatprep.subr.bf16.mxu0 %v12737_v18 }
 0x52f   :  { %11160 = vmatpush3.bf16.msra.mxu0 %v13545_v61 }
 0x530   :  { %11165 = vmatprep.subr.bf16.mxu0 %v12737_v18 }
 0x532   :  { %11162 = vmatmul.mubr.msk.bf16.vlgmr.msra.gmra.mxu0 %vm1158_vm1, %v12274_v10 }
 0x533   :  { %11166 = vmatpush3.bf16.msra.mxu0 %v12280_v35  ;;  %11181 = vmatprep.mubr.msk.bf16.mxu0 %vm12738_vm0, %v12737_v18 }
 0x534   :  { %11167 = vmatprep.subr.bf16.mxu0 %v12737_v18 }
 0x537   :  { %11168 = vmatpush3.bf16.msra.mxu0 %v12282_v36 }
 0x538   :  { %11169 = vmatprep.subr.bf16.mxu0 %v12737_v18 }
 0x53b   :  { %11170 = vmatpush3.bf16.msra.mxu0 %v12284_v12 }
 0x53c   :  { %11171 = vmatprep.subr.bf16.mxu0 %v12737_v18 }
 0x53f   :  { %11172 = vmatpush3.bf16.msra.mxu0 %v12286_v32 }
 0x540   :  { %11173 = vmatprep.subr.bf16.mxu0 %v12737_v18 }
 0x543   :  { %11174 = vmatpush3.bf16.msra.mxu0 %v12287_v39 }
 0x544   :  { %11175 = vmatprep.subr.bf16.mxu0 %v12737_v18 }
 0x547   :  { %11176 = vmatpush3.bf16.msra.mxu0 %v12288_v43 }
 0x548   :  { %11177 = vmatprep.subr.bf16.mxu0 %v12737_v18 }
 0x54b   :  { %11178 = vmatpush3.bf16.msra.mxu0 %v12289_v4 }
 0x54c   :  { %11179 = vmatprep.subr.bf16.mxu0 %v12737_v18 }
 0x54f   :  { %11180 = vmatpush3.bf16.msra.mxu0 %v12290_v1 }
 0x550   :  { %11217 = vmatprep.subr.bf16.mxu0 %v12737_v18 }
 0x5c2   :  { %v1837_v50 = vpop.f32.mrf.mxu1 }
 0x5c4   :  { %v11119_v27 = vpop.f32.mrf.mxu1 }
 0x5c6   :  { %v1840_v38 = vpop.f32.mrf.mxu1 }
 0x5c8   :  { %v11120_v14 = vpop.f32.mrf.mxu1 }
 0x5c9   :  { %v12311_v14 = vld [vmem:[%s16109_s5 + $0x1b8] sm:$0xff]  }
 0x5d2   :  { %v1748_v57 = vpop.f32.mrf.mxu0 }
 0x5d3   :  { %v13733_v41 = vadd.f32 %v1837_v50, %v1748_v57  ;;  %v12309_v50 = vld [vmem:[%s16108_s4 + $0x30] sm:$0xff]  }
 0x5d4   :  { %v11099_v45 = vpop.f32.mrf.mxu0 }
 0x5d5   :  { %v12313_v45 = vld [vmem:[%s16109_s5 + $0x1a8] sm:$0xff]  }
 0x5d6   :  { %v1751_v46 = vpop.f32.mrf.mxu0 }
 0x5d7   :  { %v13735_v20 = vadd.f32 %v1840_v38, %v1751_v46  ;;  %v12310_v46 = vld [vmem:[%s16108_s4 + $0x38] sm:$0xff]  }
 0x5d8   :  { %v11100_v16 = vpop.f32.mrf.mxu0 }
 0x5d9   :  { %v12315_v16 = vld [vmem:[%s16109_s5 + $0x198] sm:$0xff]  }
 0x5e2   :  { %v1889_v17 = vpop.f32.mrf.mxu0 }
 0x5e4   :  { %v11131_v21 = vpop.f32.mrf.mxu0 }
 0x5e5   :  { %v12318_v21 = vld [vmem:[%s16109_s5 + $0x1f0] sm:$0xff]  }
 0x5e6   :  { %v1892_v30 = vpop.f32.mrf.mxu0 }
 0x5e7   :  { %v1913_v54 = vpack.c.bf16 %v1892_v30, %v1889_v17  ;;  %v12316_v17 = vld [vmem:[%s16109_s5 + $0x1f8] sm:$0xff]   ;;  %v12317_v30 = vld [vmem:[%s16109_s5 + $0x190] sm:$0xff]  }
 0x5e8   :  { %v11132_v31 = vpop.f32.mrf.mxu0 }
 0x5e9   :  { %11150 = vmatmul.mubr.bf16.vlgmr.msra.gmra.mxu1 %v1913_v54  ;;  %v12319_v54 = vld [vmem:[%s16109_s5 + $0x188] sm:$0xff]  }
 0x5ea   :  { %11186 = vmatpush3.bf16.msra.mxu1 %v13529_v22  ;;  %11193 = vmatprep.mubr.msk.bf16.mxu1 %vm12738_vm0, %v12737_v18  ;;  %v12320_v31 = vld [vmem:[%s16109_s5 + $0x1e8] sm:$0xff]  }
 0x5eb   :  { %11187 = vmatprep.subr.bf16.mxu1 %v12737_v18 }
 0x5ee   :  { %11188 = vmatpush3.bf16.msra.mxu1 %v13535_v58 }
 0x5ef   :  { %11189 = vmatprep.subr.bf16.mxu1 %v12737_v18 }
 0x5f2   :  { %11190 = vmatpush3.bf16.msra.mxu1 %v13541_v7  ;;  %v2050_v47 = vpop.f32.mrf.mxu0 }
 0x5f3   :  { %11191 = vmatprep.subr.bf16.mxu1 %v12737_v18 }
 0x5f4   :  { %v11163_v52 = vpop.f32.mrf.mxu0 }
 0x5f5   :  { %v12322_v52 = vld [vmem:[%s16109_s5 + $0x1e0] sm:$0xff]  }
 0x5f6   :  { %11192 = vmatpush3.bf16.msra.mxu1 %v13545_v61  ;;  %v2053_v56 = vpop.f32.mrf.mxu0 }
 0x5f7   :  { %v2074_v33 = vpack.c.bf16 %v2053_v56, %v2050_v47  ;;  %11197 = vmatprep.subr.bf16.mxu1 %v12737_v18  ;;  %v12321_v47 = vld [vmem:[%s16109_s5 + $0x180] sm:$0xff]   ;;  %v12324_v56 = vld [vmem:[%s16109_s5 + $0x1d0] sm:$0xff]  }
 0x5f8   :  { %v11164_v53 = vpop.f32.mrf.mxu0 }
 0x5f9   :  { %11194 = vmatmul.mubr.msk.bf16.vlgmr.msra.gmra.mxu1 %vm1158_vm1, %v12291_v19  ;;  %11182 = vmatmul.mubr.bf16.vlgmr.msra.gmra.mxu0 %v2074_v33  ;;  %v12323_v19 = vld [vmem:[%s16109_s5 + $0x1d8] sm:$0xff]   ;;  %v12325_v33 = vld [vmem:[%s16109_s5 + $0x1c8] sm:$0xff]  }
 0x5fa   :  { %11218 = vmatpush3.bf16.msra.mxu0 %v13529_v22  ;;  %11225 = vmatprep.mubr.msk.bf16.mxu0 %vm12738_vm0, %v12737_v18 }
 0x5fb   :  { %11219 = vmatprep.subr.bf16.mxu0 %v12737_v18  ;;  %11198 = vmatpush3.bf16.msra.mxu1 %v12293_v63  ;;  %v12326_v63 = vld [vmem:[%s16109_s5 + $0x1c0] sm:$0xff]  }
 0x5fc   :  { %11199 = vmatprep.subr.bf16.mxu1 %v12737_v18  ;;  %11213 = vmatprep.mubr.msk.bf16.mxu1 %vm12738_vm0, %v12737_v18 }
 0x5fe   :  { %11220 = vmatpush3.bf16.msra.mxu0 %v13535_v58 }
 0x5ff   :  { %11221 = vmatprep.subr.bf16.mxu0 %v12737_v18  ;;  %11200 = vmatpush3.bf16.msra.mxu1 %v12294_v29 }
 0x600   :  { %11201 = vmatprep.subr.bf16.mxu1 %v12737_v18 }
 0x602   :  { %11222 = vmatpush3.bf16.msra.mxu0 %v13541_v7 }
 0x603   :  { %11223 = vmatprep.subr.bf16.mxu0 %v12737_v18  ;;  %11202 = vmatpush3.bf16.msra.mxu1 %v12295_v6 }
 0x604   :  { %11203 = vmatprep.subr.bf16.mxu1 %v12737_v18 }
 0x606   :  { %11224 = vmatpush3.bf16.msra.mxu0 %v13545_v61 }
 0x607   :  { %11229 = vmatprep.subr.bf16.mxu0 %v12737_v18  ;;  %11204 = vmatpush3.bf16.msra.mxu1 %v12296_v48 }
 0x608   :  { %11205 = vmatprep.subr.bf16.mxu1 %v12737_v18 }
 0x609   :  { %11226 = vmatmul.mubr.msk.bf16.vlgmr.msra.gmra.mxu0 %vm1158_vm1, %v12292_v13 }
 0x60a   :  { %11245 = vmatprep.mubr.msk.bf16.mxu0 %vm12738_vm0, %v12737_v18  ;;  %11230 = vmatpush3.bf16.msra.mxu0 %v12298_v24 }
 0x60b   :  { %11206 = vmatpush3.bf16.msra.mxu1 %v12297_v37  ;;  %11231 = vmatprep.subr.bf16.mxu0 %v12737_v18 }
 0x60c   :  { %11207 = vmatprep.subr.bf16.mxu1 %v12737_v18 }
 0x60e   :  { %11232 = vmatpush3.bf16.msra.mxu0 %v12300_v25 }
 0x60f   :  { %11208 = vmatpush3.bf16.msra.mxu1 %v12299_v3  ;;  %11233 = vmatprep.subr.bf16.mxu0 %v12737_v18 }
 0x610   :  { %11209 = vmatprep.subr.bf16.mxu1 %v12737_v18 }
 0x612   :  { %11234 = vmatpush3.bf16.msra.mxu0 %v12302_v44 }
 0x613   :  { %11210 = vmatpush3.bf16.msra.mxu1 %v12301_v28  ;;  %11235 = vmatprep.subr.bf16.mxu0 %v12737_v18 }
 0x614   :  { %11211 = vmatprep.subr.bf16.mxu1 %v12737_v18 }
 0x616   :  { %11236 = vmatpush3.bf16.msra.mxu0 %v12304_v2 }
 0x617   :  { %11212 = vmatpush3.bf16.msra.mxu1 %v12303_v15  ;;  %11237 = vmatprep.subr.bf16.mxu0 %v12737_v18 }
 0x618   :  { %11249 = vmatprep.subr.bf16.mxu1 %v12737_v18 }
 0x61a   :  { %11238 = vmatpush3.bf16.msra.mxu0 %v12305_v49 }
 0x61b   :  { %11239 = vmatprep.subr.bf16.mxu0 %v12737_v18 }
 0x61e   :  { %11240 = vmatpush3.bf16.msra.mxu0 %v12306_v59 }
 0x61f   :  { %11241 = vmatprep.subr.bf16.mxu0 %v12737_v18 }
 0x622   :  { %11242 = vmatpush3.bf16.msra.mxu0 %v12307_v0 }
 0x623   :  { %11243 = vmatprep.subr.bf16.mxu0 %v12737_v18 }
 0x626   :  { %11244 = vmatpush3.bf16.msra.mxu0 %v12308_v55 }
 0x627   :  { %11281 = vmatprep.subr.bf16.mxu0 %v12737_v18 }
 0x6a9   :  { %v1996_v60 = vpop.f32.mrf.mxu1 }
 0x6aa   :  { %v2003_v9 = vadd.f32 %v1996_v60, %v13733_v41  ;;  %v12312_v41 = vld [vmem:[%s16109_s5 + $0x1b0] sm:$0xff]  }
 0x6ab   :  { %v11151_v26 = vpop.f32.mrf.mxu1 }
 0x6ac   :  { %v12327_v26 = vld [vmem:[%s16108_s4 + $0x40] sm:$0xff]  }
 0x6ad   :  { %v1999_v5 = vpop.f32.mrf.mxu1 }
 0x6ae   :  { %v2004_v34 = vadd.f32 %v1999_v5, %v13735_v20  ;;  %v12314_v20 = vld [vmem:[%s16109_s5 + $0x1a0] sm:$0xff]   ;;  %v12328_v5 = vld [vmem:[%s16109_s5 + $0x238] sm:$0xff]  }
 0x6af   :  { %v11152_v8 = vpop.f32.mrf.mxu1 }
 0x6b0   :  { %v12331_v8 = vld [vmem:[%s16109_s5 + $0x220] sm:$0xff]  }
 0x6b9   :  { %v2211_v42 = vpop.f32.mrf.mxu1  ;;  %v2157_v10 = vpop.f32.mrf.mxu0 }
 0x6ba   :  { %v13835_v35 = vadd.f32 %v2157_v10, %v2003_v9  ;;  %v12333_v10 = vld [vmem:[%s16109_s5 + $0x210] sm:$0xff]  }
 0x6bb   :  { %v11195_v51 = vpop.f32.mrf.mxu1  ;;  %v11183_v36 = vpop.f32.mrf.mxu0 }
 0x6bc   :  { %v12335_v51 = vld [vmem:[%s16109_s5 + $0x200] sm:$0xff]  }
 0x6bd   :  { %v2214_v23 = vpop.f32.mrf.mxu1  ;;  %v2160_v12 = vpop.f32.mrf.mxu0 }
 0x6be   :  { %v2235_v40 = vpack.c.bf16 %v2214_v23, %v2211_v42  ;;  %v13837_v32 = vadd.f32 %v2160_v12, %v2004_v34  ;;  %v12332_v42 = vld [vmem:[%s16109_s5 + $0x218] sm:$0xff]  }
 0x6bf   :  { %v11184_v39 = vpop.f32.mrf.mxu0  ;;  %v11196_v43 = vpop.f32.mrf.mxu1 }
 0x6c0   :  { %11214 = vmatmul.mubr.bf16.vlgmr.msra.gmra.mxu1 %v2235_v40 }
 0x6c1   :  { %11250 = vmatpush3.bf16.msra.mxu1 %v13529_v22  ;;  %11257 = vmatprep.mubr.msk.bf16.mxu1 %vm12738_vm0, %v12737_v18 }
 0x6c2   :  { %11251 = vmatprep.subr.bf16.mxu1 %v12737_v18 }
 0x6c5   :  { %11252 = vmatpush3.bf16.msra.mxu1 %v13535_v58 }
 0x6c6   :  { %11253 = vmatprep.subr.bf16.mxu1 %v12737_v18 }
 0x6c9   :  { %11254 = vmatpush3.bf16.msra.mxu1 %v13541_v7  ;;  %v2372_v4 = vpop.f32.mrf.mxu0 }
 0x6ca   :  { %11255 = vmatprep.subr.bf16.mxu1 %v12737_v18 }
 0x6cb   :  { %v11227_v1 = vpop.f32.mrf.mxu0 }
 0x6cd   :  { %11256 = vmatpush3.bf16.msra.mxu1 %v13545_v61  ;;  %v2375_v27 = vpop.f32.mrf.mxu0 }
 0x6ce   :  { %v2396_v38 = vpack.c.bf16 %v2375_v27, %v2372_v4  ;;  %11261 = vmatprep.subr.bf16.mxu1 %v12737_v18 }
 0x6cf   :  { %v11228_v57 = vpop.f32.mrf.mxu0 }
 0x6d0   :  { %11258 = vmatmul.mubr.msk.bf16.vlgmr.msra.gmra.mxu1 %vm1158_vm1, %v12309_v50  ;;  %11246 = vmatmul.mubr.bf16.vlgmr.msra.gmra.mxu0 %v2396_v38 }
 0x6d1   :  { %11282 = vmatpush3.bf16.msra.mxu0 %v13529_v22  ;;  %11289 = vmatprep.mubr.msk.bf16.mxu0 %vm12738_vm0, %v12737_v18 }
 0x6d2   :  { %11283 = vmatprep.subr.bf16.mxu0 %v12737_v18  ;;  %11262 = vmatpush3.bf16.msra.mxu1 %v12311_v14 }
 0x6d3   :  { %11263 = vmatprep.subr.bf16.mxu1 %v12737_v18  ;;  %11277 = vmatprep.mubr.msk.bf16.mxu1 %vm12738_vm0, %v12737_v18 }
 0x6d5   :  { %11284 = vmatpush3.bf16.msra.mxu0 %v13535_v58 }
 0x6d6   :  { %11285 = vmatprep.subr.bf16.mxu0 %v12737_v18  ;;  %11264 = vmatpush3.bf16.msra.mxu1 %v12312_v41 }
 0x6d7   :  { %11265 = vmatprep.subr.bf16.mxu1 %v12737_v18 }
 0x6d9   :  { %11286 = vmatpush3.bf16.msra.mxu0 %v13541_v7 }
 0x6da   :  { %11287 = vmatprep.subr.bf16.mxu0 %v12737_v18  ;;  %11266 = vmatpush3.bf16.msra.mxu1 %v12313_v45 }
 0x6db   :  { %11267 = vmatprep.subr.bf16.mxu1 %v12737_v18 }
 0x6dd   :  { %11288 = vmatpush3.bf16.msra.mxu0 %v13545_v61 }
 0x6de   :  { %11293 = vmatprep.subr.bf16.mxu0 %v12737_v18  ;;  %11268 = vmatpush3.bf16.msra.mxu1 %v12314_v20  ;;  %v12336_v20 = vld [vmem:[%s16110_s6 + $0x38] sm:$0xff]  }
 0x6df   :  { %11269 = vmatprep.subr.bf16.mxu1 %v12737_v18 }
 0x6e0   :  { %11290 = vmatmul.mubr.msk.bf16.vlgmr.msra.gmra.mxu0 %vm1158_vm1, %v12310_v46 }
 0x6e1   :  { %11309 = vmatprep.mubr.msk.bf16.mxu0 %vm12738_vm0, %v12737_v18  ;;  %11294 = vmatpush3.bf16.msra.mxu0 %v12316_v17  ;;  %v12338_v17 = vld [vmem:[%s16110_s6 + $0x28] sm:$0xff]  }
 0x6e2   :  { %11270 = vmatpush3.bf16.msra.mxu1 %v12315_v16  ;;  %11295 = vmatprep.subr.bf16.mxu0 %v12737_v18  ;;  %v12337_v16 = vld [vmem:[%s16110_s6 + $0x30] sm:$0xff]  }
 0x6e3   :  { %11271 = vmatprep.subr.bf16.mxu1 %v12737_v18 }
 0x6e5   :  { %11296 = vmatpush3.bf16.msra.mxu0 %v12318_v21  ;;  %v12339_v21 = vld [vmem:[%s16110_s6 + $0x20] sm:$0xff]  }
 0x6e6   :  { %11272 = vmatpush3.bf16.msra.mxu1 %v12317_v30  ;;  %11297 = vmatprep.subr.bf16.mxu0 %v12737_v18  ;;  %v12340_v30 = vld [vmem:[%s16110_s6 + $0x18] sm:$0xff]  }
 0x6e7   :  { %11273 = vmatprep.subr.bf16.mxu1 %v12737_v18 }
 0x6e9   :  { %11298 = vmatpush3.bf16.msra.mxu0 %v12320_v31  ;;  %v12342_v31 = vld [vmem:[%s16110_s6 + $0x8] sm:$0xff]  }
 0x6ea   :  { %11274 = vmatpush3.bf16.msra.mxu1 %v12319_v54  ;;  %11299 = vmatprep.subr.bf16.mxu0 %v12737_v18  ;;  %v12341_v54 = vld [vmem:[%s16110_s6 + $0x10] sm:$0xff]  }
 0x6eb   :  { %11275 = vmatprep.subr.bf16.mxu1 %v12737_v18 }
 0x6ed   :  { %11300 = vmatpush3.bf16.msra.mxu0 %v12322_v52 }
 0x6ee   :  { %11276 = vmatpush3.bf16.msra.mxu1 %v12321_v47  ;;  %11301 = vmatprep.subr.bf16.mxu0 %v12737_v18  ;;  %v12343_v47 = vld [vmem:[%s16110_s6] sm:$0xff]  }
 0x6ef   :  { %11313 = vmatprep.subr.bf16.mxu1 %v12737_v18 }
 0x6f1   :  { %11302 = vmatpush3.bf16.msra.mxu0 %v12323_v19 }
 0x6f2   :  { %11303 = vmatprep.subr.bf16.mxu0 %v12737_v18 }
 0x6f5   :  { %11304 = vmatpush3.bf16.msra.mxu0 %v12324_v56 }
 0x6f6   :  { %11305 = vmatprep.subr.bf16.mxu0 %v12737_v18 }
 0x6f9   :  { %11306 = vmatpush3.bf16.msra.mxu0 %v12325_v33 }
 0x6fa   :  { %11307 = vmatprep.subr.bf16.mxu0 %v12737_v18 }
 0x6fd   :  { %11308 = vmatpush3.bf16.msra.mxu0 %v12326_v63 }
 0x6fe   :  { %11345 = vmatprep.subr.bf16.mxu0 %v12737_v18 }
 0x780   :  { %v2318_v53 = vpop.f32.mrf.mxu1 }
 0x781   :  { %v2325_v29 = vadd.f32 %v2318_v53, %v13835_v35  ;;  %v12334_v35 = vld [vmem:[%s16109_s5 + $0x208] sm:$0xff]  }
 0x782   :  { %v11215_v6 = vpop.f32.mrf.mxu1 }
 0x784   :  { %v2321_v13 = vpop.f32.mrf.mxu1 }
 0x785   :  { %v2326_v48 = vadd.f32 %v2321_v13, %v13837_v32 }
 0x786   :  { %v11216_v37 = vpop.f32.mrf.mxu1 }
 0x790   :  { %v2533_v24 = vpop.f32.mrf.mxu1  ;;  %v2479_v25 = vpop.f32.mrf.mxu0 }
 0x791   :  { %v2486_v3 = vadd.f32 %v2479_v25, %v2325_v29 }
 0x792   :  { %v11259_v44 = vpop.f32.mrf.mxu1  ;;  %v11247_v28 = vpop.f32.mrf.mxu0 }
 0x794   :  { %v2536_v15 = vpop.f32.mrf.mxu1  ;;  %v2482_v2 = vpop.f32.mrf.mxu0 }
 0x795   :  { %v2557_v49 = vpack.c.bf16 %v2536_v15, %v2533_v24  ;;  %v2487_v59 = vadd.f32 %v2482_v2, %v2326_v48 }
 0x796   :  { %v11248_v0 = vpop.f32.mrf.mxu0  ;;  %v11260_v55 = vpop.f32.mrf.mxu1 }
 0x797   :  { %11278 = vmatmul.mubr.bf16.vlgmr.msra.gmra.mxu1 %v2557_v49 }
 0x798   :  { %11314 = vmatpush3.bf16.msra.mxu1 %v13529_v22  ;;  %11321 = vmatprep.mubr.msk.bf16.mxu1 %vm12738_vm0, %v12737_v18 }
 0x799   :  { %11315 = vmatprep.subr.bf16.mxu1 %v12737_v18 }
 0x79c   :  { %11316 = vmatpush3.bf16.msra.mxu1 %v13535_v58 }
 0x79d   :  { %11317 = vmatprep.subr.bf16.mxu1 %v12737_v18 }
 0x7a0   :  { %11318 = vmatpush3.bf16.msra.mxu1 %v13541_v7  ;;  %v2694_v60 = vpop.f32.mrf.mxu0  ;;  %v12329_v7 = vld [vmem:[%s16109_s5 + $0x230] sm:$0xff]  }
 0x7a1   :  { %11319 = vmatprep.subr.bf16.mxu1 %v12737_v18 }
 0x7a2   :  { %v11291_v9 = vpop.f32.mrf.mxu0 }
 0x7a4   :  { %11320 = vmatpush3.bf16.msra.mxu1 %v13545_v61  ;;  %v2697_v22 = vpop.f32.mrf.mxu0  ;;  %v12330_v61 = vld [vmem:[%s16109_s5 + $0x228] sm:$0xff]  }
 0x7a5   :  { %v2718_v58 = vpack.c.bf16 %v2697_v22, %v2694_v60  ;;  %11325 = vmatprep.subr.bf16.mxu1 %v12737_v18 }
 0x7a6   :  { %v11292_v34 = vpop.f32.mrf.mxu0 }
 0x7a7   :  { %11322 = vmatmul.mubr.msk.bf16.vlgmr.msra.gmra.mxu1 %vm1158_vm1, %v12327_v26  ;;  %11310 = vmatmul.mubr.bf16.vlgmr.msra.gmra.mxu0 %v2718_v58 }
 0x7a8   :  { %11326 = vmatpush3.bf16.msra.mxu1 %v12328_v5  ;;  %11341 = vmatprep.mubr.msk.bf16.mxu1 %vm12738_vm0, %v12737_v18 }
 0x7a9   :  { %11327 = vmatprep.subr.bf16.mxu1 %v12737_v18  ;;  %11361 = vmatprep.mubr.msk.bf16.mxu0 %vm12738_vm0, %v12737_v18 }
 0x7aa   :  { %11346 = vmatpush3.bf16.msra.mxu0 %v12336_v20 }
 0x7ab   :  { %11347 = vmatprep.subr.bf16.mxu0 %v12737_v18 }
 0x7ac   :  { %11328 = vmatpush3.bf16.msra.mxu1 %v12329_v7 }
 0x7ad   :  { %11329 = vmatprep.subr.bf16.mxu1 %v12737_v18 }
 0x7ae   :  { %11348 = vmatpush3.bf16.msra.mxu0 %v12337_v16 }
 0x7af   :  { %11349 = vmatprep.subr.bf16.mxu0 %v12737_v18 }
 0x7b0   :  { %11330 = vmatpush3.bf16.msra.mxu1 %v12330_v61 }
 0x7b1   :  { %11331 = vmatprep.subr.bf16.mxu1 %v12737_v18 }
 0x7b2   :  { %11350 = vmatpush3.bf16.msra.mxu0 %v12338_v17 }
 0x7b3   :  { %11351 = vmatprep.subr.bf16.mxu0 %v12737_v18 }
 0x7b4   :  { %11332 = vmatpush3.bf16.msra.mxu1 %v12331_v8 }
 0x7b5   :  { %11333 = vmatprep.subr.bf16.mxu1 %v12737_v18 }
 0x7b6   :  { %11352 = vmatpush3.bf16.msra.mxu0 %v12339_v21 }
 0x7b7   :  { %11353 = vmatprep.subr.bf16.mxu0 %v12737_v18 }
 0x7b8   :  { %11334 = vmatpush3.bf16.msra.mxu1 %v12332_v42 }
 0x7b9   :  { %11335 = vmatprep.subr.bf16.mxu1 %v12737_v18 }
 0x7ba   :  { %11354 = vmatpush3.bf16.msra.mxu0 %v12340_v30 }
 0x7bb   :  { %11355 = vmatprep.subr.bf16.mxu0 %v12737_v18 }
 0x7bc   :  { %11336 = vmatpush3.bf16.msra.mxu1 %v12333_v10 }
 0x7bd   :  { %11337 = vmatprep.subr.bf16.mxu1 %v12737_v18 }
 0x7be   :  { %11356 = vmatpush3.bf16.msra.mxu0 %v12341_v54 }
 0x7bf   :  { %11357 = vmatprep.subr.bf16.mxu0 %v12737_v18 }
 0x7c0   :  { %11338 = vmatpush3.bf16.msra.mxu1 %v12334_v35  ;;  %v12344_v35 = vld [vmem:[%s16111_s9 + $0x38] sm:$0xff]  }
 0x7c1   :  { %11339 = vmatprep.subr.bf16.mxu1 %v12737_v18 }
 0x7c2   :  { %11358 = vmatpush3.bf16.msra.mxu0 %v12342_v31 }
 0x7c3   :  { %11359 = vmatprep.subr.bf16.mxu0 %v12737_v18 }
 0x7c4   :  { %11340 = vmatpush3.bf16.msra.mxu1 %v12335_v51  ;;  %v12345_v51 = vld [vmem:[%s16111_s9 + $0x30] sm:$0xff]  }
 0x7c5   :  { %11365 = vmatprep.subr.bf16.mxu1 %v12737_v18 }
 0x7c6   :  { %11360 = vmatpush3.bf16.msra.mxu0 %v12343_v47 }
 0x7c7   :  { %11385 = vmatprep.subr.bf16.mxu0 %v12737_v18 }
 0x857   :  { %v2640_v36 = vpop.f32.mrf.mxu1 }
 0x858   :  { %v2647_v23 = vadd.f32 %v2640_v36, %v2486_v3  ;;  %v12346_v36 = vld [vmem:[%s16111_s9 + $0x28] sm:$0xff]  }
 0x859   :  { %v11279_v12 = vpop.f32.mrf.mxu1 }
 0x85a   :  { %v12348_v12 = vld [vmem:[%s16111_s9 + $0x18] sm:$0xff]  }
 0x85b   :  { %v2643_v40 = vpop.f32.mrf.mxu1 }
 0x85c   :  { %v2648_v32 = vadd.f32 %v2643_v40, %v2487_v59  ;;  %v12349_v40 = vld [vmem:[%s16111_s9 + $0x10] sm:$0xff]  }
 0x85d   :  { %v11280_v39 = vpop.f32.mrf.mxu1 }
 0x85e   :  { %v12351_v39 = vld [vmem:[%s16111_s9] sm:$0xff]  }
 0x867   :  { %v2855_v43 = vpop.f32.mrf.mxu1  ;;  %v2801_v4 = vpop.f32.mrf.mxu0 }
 0x868   :  { %v2808_v1 = vadd.f32 %v2801_v4, %v2647_v23  ;;  %v12347_v23 = vld [vmem:[%s16111_s9 + $0x20] sm:$0xff]  }
 0x869   :  { %v11323_v50 = vpop.f32.mrf.mxu1  ;;  %v11311_v27 = vpop.f32.mrf.mxu0 }
 0x86b   :  { %v2858_v38 = vpop.f32.mrf.mxu1  ;;  %v2804_v14 = vpop.f32.mrf.mxu0 }
 0x86c   :  { %v2879_v57 = vpack.c.bf16 %v2858_v38, %v2855_v43  ;;  %v2809_v41 = vadd.f32 %v2804_v14, %v2648_v32  ;;  %v12350_v32 = vld [vmem:[%s16111_s9 + $0x8] sm:$0xff]  }
 0x86d   :  { %v11324_v45 = vpop.f32.mrf.mxu1  ;;  %v11312_v46 = vpop.f32.mrf.mxu0 }
 0x86e   :  { %11342 = vmatmul.mubr.bf16.vlgmr.msra.gmra.mxu1 %v2879_v57 }
 0x86f   :  { %11381 = vmatprep.mubr.msk.bf16.mxu1 %vm12738_vm0, %v12737_v18  ;;  %11366 = vmatpush3.bf16.msra.mxu1 %v12344_v35 }
 0x870   :  { %11367 = vmatprep.subr.bf16.mxu1 %v12737_v18 }
 0x873   :  { %11368 = vmatpush3.bf16.msra.mxu1 %v12345_v51 }
 0x874   :  { %11369 = vmatprep.subr.bf16.mxu1 %v12737_v18 }
 0x877   :  { %11370 = vmatpush3.bf16.msra.mxu1 %v12346_v36 }
 0x878   :  { %11371 = vmatprep.subr.bf16.mxu1 %v12737_v18 }
 0x87b   :  { %11372 = vmatpush3.bf16.msra.mxu1 %v12347_v23 }
 0x87c   :  { %11373 = vmatprep.subr.bf16.mxu1 %v12737_v18 }
 0x87f   :  { %11374 = vmatpush3.bf16.msra.mxu1 %v12348_v12 }
 0x880   :  { %11375 = vmatprep.subr.bf16.mxu1 %v12737_v18 }
 0x883   :  { %11376 = vmatpush3.bf16.msra.mxu1 %v12349_v40 }
 0x884   :  { %11377 = vmatprep.subr.bf16.mxu1 %v12737_v18 }
 0x887   :  { %11378 = vmatpush3.bf16.msra.mxu1 %v12350_v32 }
 0x888   :  { %11379 = vmatprep.subr.bf16.mxu1 %v12737_v18 }
 0x88b   :  { %11380 = vmatpush3.bf16.msra.mxu1 %v12351_v39 }
 0x88c   :  { %11417 = vmatprep.subr.bf16.mxu1 %v12737_v18 }
 0x92e   :  { %v2962_v52 = vpop.f32.mrf.mxu1 }
 0x92f   :  { %v2969_v56 = vadd.f32 %v2962_v52, %v2808_v1 }
 0x930   :  { %v11343_v19 = vpop.f32.mrf.mxu1 }
 0x931   :  { %v2979_v29 = vmul.f32 %v2969_v56, %v2969_v56 }
 0x932   :  { %v2965_v33 = vpop.f32.mrf.mxu1 }
 0x933   :  { %v2970_v63 = vadd.f32 %v2965_v33, %v2809_v41 }
 0x934   :  { %v11344_v53 = vpop.f32.mrf.mxu1 }
 0x935   :  { %v2971_v6 = vadd.f32 %v2970_v63, %v2969_v56  ;;  %v2980_v13 = vmul.f32 %v2970_v63, %v2970_v63 }
 0x937   :  { %v2972_v48 = vrot.slane %v2971_v6, 4  ;;  %v2981_v37 = vadd.f32 %v2980_v13, %v2979_v29 }
 0x939   :  { %v2973_v24 = vadd.f32 %v2972_v48, %v2971_v6  ;;  %v2982_v25 = vrot.slane %v2981_v37, 4 }
 0x93b   :  { %v2974_v3 = vrot.slane %v2973_v24, 2  ;;  %v2983_v44 = vadd.f32 %v2982_v25, %v2981_v37 }
 0x93d   :  { %v2975_v28 = vadd.f32 %v2974_v3, %v2973_v24  ;;  %v2984_v15 = vrot.slane %v2983_v44, 2 }
 0x93f   :  { %v2976_v2 = vrot.slane %v2975_v28, 1  ;;  %v2985_v49 = vadd.f32 %v2984_v15, %v2983_v44 }
 0x941   :  { %v2977_v59 = vadd.f32 %v2976_v2, %v2975_v28  ;;  %v2986_v0 = vrot.slane %v2985_v49, 1 }
 0x943   :  { %v2978_v55 = vmul.f32 0.0625, %v2977_v59  ;;  %v2987_v60 = vadd.f32 %v2986_v0, %v2985_v49 }
 0x945   :  { %v2988_v9 = vmul.f32 0.0625, %v2987_v60  ;;  %v2989_v26 = vmul.f32 %v2978_v55, %v2978_v55  ;;  %v2993_v22 = vsub.f32 %v2970_v63, %v2978_v55  ;;  %v2992_v5 = vsub.f32 %v2969_v56, %v2978_v55 }
 0x947   :  { %v2990_v58 = vsub.f32 %v2988_v9, %v2989_v26 }
 0x949   :  { %v2991_v34 = vmax.f32 %v2990_v58, 0.0 }
 0x94b   :  { %v2994_v7 = vadd.f32 1e-05, %v2991_v34 }
 0x94d   :  { %12723 = vrsqrt.f32 %v2994_v7 }
 0x95a   :  { %v12724_v61 = vpop.eup %12723 }
 0x95b   :  { %v2997_v8 = vmul.f32 %v12724_v61, %v2993_v22  ;;  %v2996_v42 = vmul.f32 %v12724_v61, %v2992_v5 }
 0x95d   :  { %v3014_v10 = vpack.c.bf16 %v2997_v8, %v2996_v42 }
 0x95f   :  { %11362 = vmatmul.mubr.bf16.vlgmr.msra.gmra.mxu0 %v3014_v10 }
 0x960   :  { %11387 = vmatprep.mubr.msk.bf16.mxu0 %vm12738_vm0, %v12737_v18 }
 0xa1f   :  { %v3097_v43 = vpop.f32.mrf.mxu0 }
 0xa20   :  { %v3112_v50 = vmul.f32 %v3097_v43, %v3097_v43 }
 0xa21   :  { %v11363_v4 = vpop.f32.mrf.mxu0 }
 0xa23   :  { %v3100_v1 = vpop.f32.mrf.mxu0 }
 0xa24   :  { %v3104_v27 = vadd.f32 %v3100_v1, %v3097_v43  ;;  %v3113_v38 = vmul.f32 %v3100_v1, %v3100_v1 }
 0xa25   :  { %v11364_v14 = vpop.f32.mrf.mxu0 }
 0xa26   :  { %v3105_v57 = vrot.slane %v3104_v27, 4  ;;  %v3114_v41 = vadd.f32 %v3113_v38, %v3112_v50  ;;  %v12352_v38 = vld [vmem:[%s16112_s10] sm:$0xff]   ;;  %v12353_v14 = vld [vmem:[%s16112_s10 + $0x8] sm:$0xff]  }
 0xa28   :  { %v3106_v45 = vadd.f32 %v3105_v57, %v3104_v27  ;;  %v3115_v46 = vrot.slane %v3114_v41, 4  ;;  %v12354_v57 = vld [vmem:[%s16113_s11 + $0x78] sm:$0xff]  }
 0xa2a   :  { %v3107_v20 = vrot.slane %v3106_v45, 2  ;;  %v3116_v16 = vadd.f32 %v3115_v46, %v3114_v41  ;;  %v12355_v41 = vld [vmem:[%s16113_s11 + $0x70] sm:$0xff]   ;;  %v12357_v46 = vld [vmem:[%s16113_s11 + $0x60] sm:$0xff]  }
 0xa2c   :  { %v3108_v17 = vadd.f32 %v3107_v20, %v3106_v45  ;;  %v3117_v21 = vrot.slane %v3116_v16, 2  ;;  %v12356_v45 = vld [vmem:[%s16113_s11 + $0x68] sm:$0xff]   ;;  %v12358_v20 = vld [vmem:[%s16113_s11 + $0x58] sm:$0xff]  }
 0xa2e   :  { %v3109_v30 = vrot.slane %v3108_v17, 1  ;;  %v3118_v54 = vadd.f32 %v3117_v21, %v3116_v16  ;;  %v12362_v16 = vld [vmem:[%s16113_s11 + $0x38] sm:$0xff]   ;;  %v12364_v21 = vld [vmem:[%s16113_s11 + $0x28] sm:$0xff]  }
 0xa30   :  { %v3110_v31 = vadd.f32 %v3109_v30, %v3108_v17  ;;  %v3119_v47 = vrot.slane %v3118_v54, 1  ;;  %v12363_v17 = vld [vmem:[%s16113_s11 + $0x30] sm:$0xff]   ;;  %v12366_v30 = vld [vmem:[%s16113_s11 + $0x20] sm:$0xff]  }
 0xa32   :  { %v3111_v52 = vmul.f32 0.0625, %v3110_v31  ;;  %v3120_v19 = vadd.f32 %v3119_v47, %v3118_v54  ;;  %v12359_v54 = vld [vmem:[%s16113_s11 + $0x50] sm:$0xff]   ;;  %v12367_v31 = vld [vmem:[%s16113_s11 + $0x18] sm:$0xff]   ;;  %v12360_v47 = vld [vmem:[%s16113_s11 + $0x48] sm:$0xff]  }
 0xa34   :  { %v3121_v56 = vmul.f32 0.0625, %v3120_v19  ;;  %v3122_v33 = vmul.f32 %v3111_v52, %v3111_v52  ;;  %v3125_v6 = vsub.f32 %v3097_v43, %v3111_v52  ;;  %v3126_v13 = vsub.f32 %v3100_v1, %v3111_v52  ;;  %v12369_v52 = vld [vmem:[%s16113_s11 + $0x10] sm:$0xff]   ;;  %v12361_v19 = vld [vmem:[%s16113_s11 + $0x40] sm:$0xff]  }
 0xa36   :  { %v3123_v63 = vsub.f32 %v3121_v56, %v3122_v33  ;;  %v12370_v56 = vld [vmem:[%s16113_s11 + $0x8] sm:$0xff]   ;;  %v12371_v33 = vld [vmem:[%s16113_s11] sm:$0xff]  }
 0xa38   :  { %v3124_v53 = vmax.f32 %v3123_v63, 0.0 }
 0xa3a   :  { %v3127_v29 = vadd.f32 1e-05, %v3124_v53 }
 0xa3c   :  { %12725 = vrsqrt.f32 %v3127_v29 }
 0xa49   :  { %v12726_v48 = vpop.eup %12725 }
 0xa4a   :  { %v3130_v37 = vmul.f32 %v12726_v48, %v3126_v13  ;;  %v3129_v24 = vmul.f32 %v12726_v48, %v3125_v6  ;;  %v12372_v6 = vld [vmem:[%s16113_s11 + $0xb8] sm:$0xff]  }
 0xa4c   :  { %v14056_v25 = vadd.f32 %v3130_v37, %v13633_v11  ;;  %v14059_v3 = vadd.f32 %v3129_v24, %v13635_v62  ;;  %v12373_v24 = vld [vmem:[%s16113_s11 + $0xb0] sm:$0xff]  }
 0xa4e   :  { %v3134_v44 = vmax.f32 %v14056_v25, 0.0  ;;  %v3133_v28 = vmax.f32 %v14059_v3, 0.0  ;;  %v12459_v25 = vld [vmem:[%s16115_s13 + $0xb0] sm:$0xff]  }
 0xa4f   :  { %v12460_v3 = vld [vmem:[%s16115_s13 + $0xf0] sm:$0xff]  }
 0xa50   :  { %v3151_v15 = vpack.c.bf16 %v3134_v44, %v3133_v28 }
 0xa52   :  { %11382 = vmatmul.mubr.bf16.vlgmr.msra.gmra.mxu1 %v3151_v15 }
 0xa53   :  { %11433 = vmatprep.mubr.msk.bf16.mxu1 %vm12738_vm0, %v12737_v18  ;;  %11418 = vmatpush3.bf16.msra.mxu1 %v12362_v16 }
 0xa54   :  { %11419 = vmatprep.subr.bf16.mxu1 %v12737_v18 }
 0xa57   :  { %11420 = vmatpush3.bf16.msra.mxu1 %v12363_v17 }
 0xa58   :  { %11421 = vmatprep.subr.bf16.mxu1 %v12737_v18 }
 0xa5b   :  { %11422 = vmatpush3.bf16.msra.mxu1 %v12364_v21  ;;  %v12392_v21 = vld [vmem:[%s16113_s11 + $0x128] sm:$0xff]  }
 0xa5c   :  { %11423 = vmatprep.subr.bf16.mxu1 %v12737_v18 }
 0xa5f   :  { %11424 = vmatpush3.bf16.msra.mxu1 %v12366_v30 }
 0xa60   :  { %11425 = vmatprep.subr.bf16.mxu1 %v12737_v18 }
 0xa63   :  { %11426 = vmatpush3.bf16.msra.mxu1 %v12367_v31  ;;  %v12389_v31 = vld [vmem:[%s16112_s10 + $0x28] sm:$0xff]  }
 0xa64   :  { %11427 = vmatprep.subr.bf16.mxu1 %v12737_v18 }
 0xa67   :  { %11428 = vmatpush3.bf16.msra.mxu1 %v12369_v52  ;;  %v12394_v52 = vld [vmem:[%s16113_s11 + $0x120] sm:$0xff]  }
 0xa68   :  { %11429 = vmatprep.subr.bf16.mxu1 %v12737_v18 }
 0xa6b   :  { %11430 = vmatpush3.bf16.msra.mxu1 %v12370_v56  ;;  %v12396_v56 = vld [vmem:[%s16113_s11 + $0x118] sm:$0xff]  }
 0xa6c   :  { %11431 = vmatprep.subr.bf16.mxu1 %v12737_v18 }
 0xa6f   :  { %11432 = vmatpush3.bf16.msra.mxu1 %v12371_v33  ;;  %v12397_v33 = vld [vmem:[%s16113_s11 + $0x168] sm:$0xff]  }
 0xa70   :  { %11443 = vmatprep.subr.bf16.mxu1 %v12737_v18 }
 0xb12   :  { %v3234_v2 = vpop.f32.mrf.mxu1 }
 0xb13   :  { %v3249_v59 = vmul.f32 %v3234_v2, %v3234_v2 }
 0xb14   :  { %v11383_v49 = vpop.f32.mrf.mxu1 }
 0xb16   :  { %v3237_v11 = vpop.f32.mrf.mxu1 }
 0xb17   :  { %v3241_v0 = vadd.f32 %v3237_v11, %v3234_v2  ;;  %v3250_v62 = vmul.f32 %v3237_v11, %v3237_v11 }
 0xb18   :  { %v11384_v55 = vpop.f32.mrf.mxu1 }
 0xb19   :  { %v3242_v60 = vrot.slane %v3241_v0, 4  ;;  %v3251_v9 = vadd.f32 %v3250_v62, %v3249_v59  ;;  %v12365_v62 = vld [vmem:[%s16112_s10 + $0x10] sm:$0xff]   ;;  %v12368_v55 = vld [vmem:[%s16112_s10 + $0x18] sm:$0xff]  }
 0xb1b   :  { %v3243_v26 = vadd.f32 %v3242_v60, %v3241_v0  ;;  %v3252_v22 = vrot.slane %v3251_v9, 4  ;;  %v12377_v0 = vld [vmem:[%s16113_s11 + $0xa0] sm:$0xff]   ;;  %v12374_v60 = vld [vmem:[%s16113_s11 + $0xf8] sm:$0xff]  }
 0xb1d   :  { %v3244_v5 = vrot.slane %v3243_v26, 2  ;;  %v3253_v58 = vadd.f32 %v3252_v22, %v3251_v9  ;;  %v12376_v9 = vld [vmem:[%s16113_s11 + $0xf0] sm:$0xff]   ;;  %v12379_v22 = vld [vmem:[%s16113_s11 + $0x98] sm:$0xff]  }
 0xb1f   :  { %v3245_v34 = vadd.f32 %v3244_v5, %v3243_v26  ;;  %v3254_v7 = vrot.slane %v3253_v58, 2  ;;  %v12378_v26 = vld [vmem:[%s16113_s11 + $0xe8] sm:$0xff]   ;;  %v12380_v5 = vld [vmem:[%s16113_s11 + $0xe0] sm:$0xff]  }
 0xb21   :  { %v3246_v61 = vrot.slane %v3245_v34, 1  ;;  %v3255_v8 = vadd.f32 %v3254_v7, %v3253_v58  ;;  %v12381_v58 = vld [vmem:[%s16113_s11 + $0x90] sm:$0xff]   ;;  %v12383_v7 = vld [vmem:[%s16113_s11 + $0x88] sm:$0xff]  }
 0xb23   :  { %v3247_v42 = vadd.f32 %v3246_v61, %v3245_v34  ;;  %v3256_v10 = vrot.slane %v3255_v8, 1  ;;  %v12382_v34 = vld [vmem:[%s16113_s11 + $0xd8] sm:$0xff]   ;;  %v12384_v61 = vld [vmem:[%s16113_s11 + $0xd0] sm:$0xff]  }
 0xb25   :  { %v3248_v35 = vmul.f32 0.0625, %v3247_v42  ;;  %v3257_v51 = vadd.f32 %v3256_v10, %v3255_v8  ;;  %v12385_v8 = vld [vmem:[%s16113_s11 + $0x80] sm:$0xff]   ;;  %v12386_v42 = vld [vmem:[%s16113_s11 + $0xc8] sm:$0xff]  }
 0xb26   :  { %v12387_v10 = vld [vmem:[%s16113_s11 + $0xc0] sm:$0xff]  }
 0xb27   :  { %v3258_v36 = vmul.f32 0.0625, %v3257_v51  ;;  %v3259_v23 = vmul.f32 %v3248_v35, %v3248_v35  ;;  %v3262_v39 = vsub.f32 %v3234_v2, %v3248_v35  ;;  %v3263_v43 = vsub.f32 %v3237_v11, %v3248_v35  ;;  %v12375_v11 = vld [vmem:[%s16113_s11 + $0xa8] sm:$0xff]  }
 0xb29   :  { %v3260_v12 = vsub.f32 %v3258_v36, %v3259_v23 }
 0xb2b   :  { %v3261_v40 = vmax.f32 %v3260_v12, 0.0 }
 0xb2d   :  { %v3264_v32 = vadd.f32 1e-05, %v3261_v40 }
 0xb2f   :  { %12727 = vrsqrt.f32 %v3264_v32 }
 0xb3c   :  { %v12728_v4 = vpop.eup %12727 }
 0xb3d   :  { %v3266_v1 = vmul.f32 %v12728_v4, %v3262_v39  ;;  %v3267_v50 = vmul.f32 %v12728_v4, %v3263_v43 }
 0xb3f   :  { %v14069_v27 = vpack.c.bf16 %v3267_v50, %v3266_v1 }
 0xb41   :  { %11386 = vmatpush3.bf16.msra.mxu0 %v14069_v27 }
 0xb42   :  { %11391 = vmatprep.subr.bf16.mxu0 %v12737_v18 }
 0xb44   :  { %11388 = vmatmul.mubr.msk.bf16.vlgmr.msra.gmra.mxu0 %vm3276_vm2, %v12352_v38 }
 0xb45   :  { %11392 = vmatpush3.bf16.msra.mxu0 %v14069_v27  ;;  %11393 = vmatprep.mubr.msk.bf16.mxu0 %vm12738_vm0, %v12737_v18 }
 0xb46   :  { %11397 = vmatprep.subr.bf16.mxu0 %v12737_v18 }
 0xb4c   :  { %11394 = vmatmul.mubr.msk.bf16.vlgmr.msra.gmra.mxu0 %vm3276_vm2, %v12353_v14  ;;  %v12390_v14 = vld [vmem:[%s16113_s11 + $0x138] sm:$0xff]  }
 0xb4d   :  { %11398 = vmatpush3.bf16.msra.mxu0 %v12354_v57  ;;  %11413 = vmatprep.mubr.msk.bf16.mxu0 %vm12738_vm0, %v12737_v18 }
 0xb4e   :  { %11399 = vmatprep.subr.bf16.mxu0 %v12737_v18 }
 0xb51   :  { %11400 = vmatpush3.bf16.msra.mxu0 %v12355_v41 }
 0xb52   :  { %11401 = vmatprep.subr.bf16.mxu0 %v12737_v18 }
 0xb55   :  { %11402 = vmatpush3.bf16.msra.mxu0 %v12356_v45 }
 0xb56   :  { %11403 = vmatprep.subr.bf16.mxu0 %v12737_v18 }
 0xb59   :  { %11404 = vmatpush3.bf16.msra.mxu0 %v12357_v46  ;;  %v12391_v46 = vld [vmem:[%s16113_s11 + $0x130] sm:$0xff]  }
 0xb5a   :  { %11405 = vmatprep.subr.bf16.mxu0 %v12737_v18 }
 0xb5d   :  { %11406 = vmatpush3.bf16.msra.mxu0 %v12358_v20 }
 0xb5e   :  { %11407 = vmatprep.subr.bf16.mxu0 %v12737_v18 }
 0xb61   :  { %11408 = vmatpush3.bf16.msra.mxu0 %v12359_v54  ;;  %v12388_v54 = vld [vmem:[%s16112_s10 + $0x20] sm:$0xff]  }
 0xb62   :  { %11409 = vmatprep.subr.bf16.mxu0 %v12737_v18 }
 0xb65   :  { %11410 = vmatpush3.bf16.msra.mxu0 %v12360_v47  ;;  %v12393_v47 = vld [vmem:[%s16113_s11 + $0x178] sm:$0xff]  }
 0xb66   :  { %11411 = vmatprep.subr.bf16.mxu0 %v12737_v18 }
 0xb69   :  { %11412 = vmatpush3.bf16.msra.mxu0 %v12361_v19  ;;  %v12395_v19 = vld [vmem:[%s16113_s11 + $0x170] sm:$0xff]  }
 0xb6a   :  { %11437 = vmatprep.subr.bf16.mxu0 %v12737_v18 }
 0xc04   :  { %v3314_v63 = vpop.f32.mrf.mxu0 }
 0xc06   :  { %v11389_v53 = vpop.f32.mrf.mxu0 }
 0xc07   :  { %v12399_v53 = vld [vmem:[%s16113_s11 + $0x160] sm:$0xff]  }
 0xc08   :  { %v3317_v29 = vpop.f32.mrf.mxu0 }
 0xc09   :  { %v3337_v13 = vpack.c.bf16 %v3317_v29, %v3314_v63  ;;  %v12398_v63 = vld [vmem:[%s16113_s11 + $0x110] sm:$0xff]   ;;  %v12400_v29 = vld [vmem:[%s16113_s11 + $0x108] sm:$0xff]  }
 0xc0a   :  { %v11390_v48 = vpop.f32.mrf.mxu0 }
 0xc0b   :  { %11434 = vmatmul.mubr.bf16.vlgmr.msra.gmra.mxu1 %v3337_v13  ;;  %v12402_v13 = vld [vmem:[%s16113_s11 + $0x100] sm:$0xff]   ;;  %v12403_v48 = vld [vmem:[%s16113_s11 + $0x150] sm:$0xff]  }
 0xc0c   :  { %v3383_v37 = vpop.f32.mrf.mxu0  ;;  %11444 = vmatpush3.bf16.msra.mxu1 %v12372_v6  ;;  %11459 = vmatprep.mubr.msk.bf16.mxu1 %vm12738_vm0, %v12737_v18  ;;  %v12401_v6 = vld [vmem:[%s16113_s11 + $0x158] sm:$0xff]  }
 0xc0d   :  { %11445 = vmatprep.subr.bf16.mxu1 %v12737_v18 }
 0xc0e   :  { %v11395_v15 = vpop.f32.mrf.mxu0 }
 0xc10   :  { %v3386_v2 = vpop.f32.mrf.mxu0  ;;  %11446 = vmatpush3.bf16.msra.mxu1 %v12373_v24  ;;  %v12405_v24 = vld [vmem:[%s16113_s11 + $0x140] sm:$0xff]  }
 0xc11   :  { %v3407_v49 = vpack.c.bf16 %v3386_v2, %v3383_v37  ;;  %11447 = vmatprep.subr.bf16.mxu1 %v12737_v18  ;;  %v12404_v37 = vld [vmem:[%s16113_s11 + $0x148] sm:$0xff]  }
 0xc12   :  { %v11396_v59 = vpop.f32.mrf.mxu0 }
 0xc13   :  { %11414 = vmatmul.mubr.bf16.vlgmr.msra.gmra.mxu0 %v3407_v49 }
 0xc14   :  { %11438 = vmatpush3.bf16.msra.mxu0 %v14069_v27  ;;  %11439 = vmatprep.mubr.msk.bf16.mxu0 %vm12738_vm0, %v12737_v18 }
 0xc15   :  { %11463 = vmatprep.subr.bf16.mxu0 %v12737_v18  ;;  %11448 = vmatpush3.bf16.msra.mxu1 %v12375_v11 }
 0xc16   :  { %11449 = vmatprep.subr.bf16.mxu1 %v12737_v18 }
 0xc19   :  { %11450 = vmatpush3.bf16.msra.mxu1 %v12377_v0 }
 0xc1a   :  { %11451 = vmatprep.subr.bf16.mxu1 %v12737_v18 }
 0xc1b   :  { %11440 = vmatmul.mubr.msk.bf16.vlgmr.msra.gmra.mxu0 %vm3276_vm2, %v12365_v62 }
 0xc1c   :  { %11464 = vmatpush3.bf16.msra.mxu0 %v14069_v27  ;;  %11465 = vmatprep.mubr.msk.bf16.mxu0 %vm12738_vm0, %v12737_v18 }
 0xc1d   :  { %11469 = vmatprep.subr.bf16.mxu0 %v12737_v18  ;;  %11452 = vmatpush3.bf16.msra.mxu1 %v12379_v22 }
 0xc1e   :  { %11453 = vmatprep.subr.bf16.mxu1 %v12737_v18 }
 0xc21   :  { %11454 = vmatpush3.bf16.msra.mxu1 %v12381_v58 }
 0xc22   :  { %11455 = vmatprep.subr.bf16.mxu1 %v12737_v18 }
 0xc23   :  { %11466 = vmatmul.mubr.msk.bf16.vlgmr.msra.gmra.mxu0 %vm3276_vm2, %v12368_v55 }
 0xc24   :  { %11470 = vmatpush3.bf16.msra.mxu0 %v12374_v60  ;;  %11485 = vmatprep.mubr.msk.bf16.mxu0 %vm12738_vm0, %v12737_v18 }
 0xc25   :  { %11471 = vmatprep.subr.bf16.mxu0 %v12737_v18  ;;  %11456 = vmatpush3.bf16.msra.mxu1 %v12383_v7 }
 0xc26   :  { %11457 = vmatprep.subr.bf16.mxu1 %v12737_v18 }
 0xc28   :  { %11472 = vmatpush3.bf16.msra.mxu0 %v12376_v9 }
 0xc29   :  { %11473 = vmatprep.subr.bf16.mxu0 %v12737_v18  ;;  %11458 = vmatpush3.bf16.msra.mxu1 %v12385_v8 }
 0xc2a   :  { %11495 = vmatprep.subr.bf16.mxu1 %v12737_v18 }
 0xc2c   :  { %11474 = vmatpush3.bf16.msra.mxu0 %v12378_v26 }
 0xc2d   :  { %11475 = vmatprep.subr.bf16.mxu0 %v12737_v18 }
 0xc30   :  { %11476 = vmatpush3.bf16.msra.mxu0 %v12380_v5 }
 0xc31   :  { %11477 = vmatprep.subr.bf16.mxu0 %v12737_v18 }
 0xc34   :  { %11478 = vmatpush3.bf16.msra.mxu0 %v12382_v34 }
 0xc35   :  { %11479 = vmatprep.subr.bf16.mxu0 %v12737_v18 }
 0xc38   :  { %11480 = vmatpush3.bf16.msra.mxu0 %v12384_v61 }
 0xc39   :  { %11481 = vmatprep.subr.bf16.mxu0 %v12737_v18 }
 0xc3c   :  { %11482 = vmatpush3.bf16.msra.mxu0 %v12386_v42 }
 0xc3d   :  { %11483 = vmatprep.subr.bf16.mxu0 %v12737_v18 }
 0xc40   :  { %11484 = vmatpush3.bf16.msra.mxu0 %v12387_v10  ;;  %v12406_v10 = vld [vmem:[%s16112_s10 + $0x30] sm:$0xff]  }
 0xc41   :  { %11489 = vmatprep.subr.bf16.mxu0 %v12737_v18 }
 0xccb   :  { %v3579_v35 = vpop.f32.mrf.mxu1 }
 0xccd   :  { %v11435_v51 = vpop.f32.mrf.mxu1 }
 0xccf   :  { %v3582_v36 = vpop.f32.mrf.mxu1 }
 0xcd1   :  { %v11436_v23 = vpop.f32.mrf.mxu1 }
 0xcd3   :  { %v3490_v12 = vpop.f32.mrf.mxu0 }
 0xcd4   :  { %v14235_v40 = vadd.f32 %v3579_v35, %v3490_v12  ;;  %v12409_v12 = vld [vmem:[%s16113_s11 + $0x1b0] sm:$0xff]  }
 0xcd5   :  { %v11415_v32 = vpop.f32.mrf.mxu0 }
 0xcd6   :  { %v12411_v32 = vld [vmem:[%s16113_s11 + $0x1f8] sm:$0xff]  }
 0xcd7   :  { %v3493_v39 = vpop.f32.mrf.mxu0 }
 0xcd8   :  { %v14237_v43 = vadd.f32 %v3582_v36, %v3493_v39  ;;  %v12408_v36 = vld [vmem:[%s16113_s11 + $0x1b8] sm:$0xff]   ;;  %v12410_v39 = vld [vmem:[%s16113_s11 + $0x1a8] sm:$0xff]  }
 0xcd9   :  { %v11416_v4 = vpop.f32.mrf.mxu0 }
 0xcda   :  { %v12412_v4 = vld [vmem:[%s16113_s11 + $0x1a0] sm:$0xff]  }
 0xcdb   :  { %v3631_v1 = vpop.f32.mrf.mxu0 }
 0xcdd   :  { %v11441_v50 = vpop.f32.mrf.mxu0 }
 0xcde   :  { %v12415_v50 = vld [vmem:[%s16113_s11 + $0x1e8] sm:$0xff]  }
 0xcdf   :  { %v3634_v38 = vpop.f32.mrf.mxu0 }
 0xce0   :  { %v3655_v57 = vpack.c.bf16 %v3634_v38, %v3631_v1  ;;  %v12414_v1 = vld [vmem:[%s16113_s11 + $0x198] sm:$0xff]   ;;  %v12416_v38 = vld [vmem:[%s16113_s11 + $0x190] sm:$0xff]  }
 0xce1   :  { %v11442_v41 = vpop.f32.mrf.mxu0 }
 0xce2   :  { %11460 = vmatmul.mubr.bf16.vlgmr.msra.gmra.mxu1 %v3655_v57  ;;  %v12418_v57 = vld [vmem:[%s16113_s11 + $0x188] sm:$0xff]   ;;  %v12419_v41 = vld [vmem:[%s16113_s11 + $0x1d8] sm:$0xff]  }
 0xce3   :  { %v3792_v45 = vpop.f32.mrf.mxu0  ;;  %11496 = vmatpush3.bf16.msra.mxu1 %v12390_v14  ;;  %11511 = vmatprep.mubr.msk.bf16.mxu1 %vm12738_vm0, %v12737_v18  ;;  %v12417_v14 = vld [vmem:[%s16113_s11 + $0x1e0] sm:$0xff]  }
 0xce4   :  { %11497 = vmatprep.subr.bf16.mxu1 %v12737_v18 }
 0xce5   :  { %v11467_v20 = vpop.f32.mrf.mxu0 }
 0xce6   :  { %v12422_v20 = vld [vmem:[%s16113_s11 + $0x1c8] sm:$0xff]  }
 0xce7   :  { %v3795_v16 = vpop.f32.mrf.mxu0  ;;  %11498 = vmatpush3.bf16.msra.mxu1 %v12391_v46  ;;  %v12421_v46 = vld [vmem:[%s16113_s11 + $0x1d0] sm:$0xff]  }
 0xce8   :  { %v3816_v17 = vpack.c.bf16 %v3795_v16, %v3792_v45  ;;  %11499 = vmatprep.subr.bf16.mxu1 %v12737_v18  ;;  %v12420_v45 = vld [vmem:[%s16113_s11 + $0x180] sm:$0xff]  }
 0xce9   :  { %v11468_v30 = vpop.f32.mrf.mxu0  ;;  %v12423_v16 = vld [vmem:[%s16113_s11 + $0x1c0] sm:$0xff]  }
 0xcea   :  { %11486 = vmatmul.mubr.bf16.vlgmr.msra.gmra.mxu0 %v3816_v17 }
 0xceb   :  { %11490 = vmatpush3.bf16.msra.mxu0 %v14069_v27  ;;  %11491 = vmatprep.mubr.msk.bf16.mxu0 %vm12738_vm0, %v12737_v18 }
 0xcec   :  { %11515 = vmatprep.subr.bf16.mxu0 %v12737_v18  ;;  %11500 = vmatpush3.bf16.msra.mxu1 %v12392_v21 }
 0xced   :  { %11501 = vmatprep.subr.bf16.mxu1 %v12737_v18 }
 0xcf0   :  { %11502 = vmatpush3.bf16.msra.mxu1 %v12394_v52 }
 0xcf1   :  { %11503 = vmatprep.subr.bf16.mxu1 %v12737_v18 }
 0xcf2   :  { %11492 = vmatmul.mubr.msk.bf16.vlgmr.msra.gmra.mxu0 %vm3276_vm2, %v12388_v54 }
 0xcf3   :  { %11516 = vmatpush3.bf16.msra.mxu0 %v14069_v27  ;;  %11517 = vmatprep.mubr.msk.bf16.mxu0 %vm12738_vm0, %v12737_v18 }
 0xcf4   :  { %11521 = vmatprep.subr.bf16.mxu0 %v12737_v18  ;;  %11504 = vmatpush3.bf16.msra.mxu1 %v12396_v56 }
 0xcf5   :  { %11505 = vmatprep.subr.bf16.mxu1 %v12737_v18 }
 0xcf8   :  { %11506 = vmatpush3.bf16.msra.mxu1 %v12398_v63 }
 0xcf9   :  { %11507 = vmatprep.subr.bf16.mxu1 %v12737_v18 }
 0xcfa   :  { %11518 = vmatmul.mubr.msk.bf16.vlgmr.msra.gmra.mxu0 %vm3276_vm2, %v12389_v31 }
 0xcfb   :  { %11522 = vmatpush3.bf16.msra.mxu0 %v12393_v47  ;;  %11537 = vmatprep.mubr.msk.bf16.mxu0 %vm12738_vm0, %v12737_v18 }
 0xcfc   :  { %11523 = vmatprep.subr.bf16.mxu0 %v12737_v18  ;;  %11508 = vmatpush3.bf16.msra.mxu1 %v12400_v29 }
 0xcfd   :  { %11509 = vmatprep.subr.bf16.mxu1 %v12737_v18 }
 0xcff   :  { %11524 = vmatpush3.bf16.msra.mxu0 %v12395_v19 }
 0xd00   :  { %11525 = vmatprep.subr.bf16.mxu0 %v12737_v18  ;;  %11510 = vmatpush3.bf16.msra.mxu1 %v12402_v13 }
 0xd01   :  { %11541 = vmatprep.subr.bf16.mxu1 %v12737_v18 }
 0xd03   :  { %11526 = vmatpush3.bf16.msra.mxu0 %v12397_v33 }
 0xd04   :  { %11527 = vmatprep.subr.bf16.mxu0 %v12737_v18 }
 0xd07   :  { %11528 = vmatpush3.bf16.msra.mxu0 %v12399_v53 }
 0xd08   :  { %11529 = vmatprep.subr.bf16.mxu0 %v12737_v18 }
 0xd0b   :  { %11530 = vmatpush3.bf16.msra.mxu0 %v12401_v6 }
 0xd0c   :  { %11531 = vmatprep.subr.bf16.mxu0 %v12737_v18 }
 0xd0f   :  { %11532 = vmatpush3.bf16.msra.mxu0 %v12403_v48 }
 0xd10   :  { %11533 = vmatprep.subr.bf16.mxu0 %v12737_v18 }
 0xd13   :  { %11534 = vmatpush3.bf16.msra.mxu0 %v12404_v37 }
 0xd14   :  { %11535 = vmatprep.subr.bf16.mxu0 %v12737_v18 }
 0xd17   :  { %11536 = vmatpush3.bf16.msra.mxu0 %v12405_v24 }
 0xd18   :  { %11567 = vmatprep.subr.bf16.mxu0 %v12737_v18 }
 0xda2   :  { %v3738_v15 = vpop.f32.mrf.mxu1 }
 0xda3   :  { %v3745_v2 = vadd.f32 %v3738_v15, %v14235_v40  ;;  %v12407_v40 = vld [vmem:[%s16112_s10 + $0x38] sm:$0xff]  }
 0xda4   :  { %v11461_v49 = vpop.f32.mrf.mxu1 }
 0xda6   :  { %v3741_v11 = vpop.f32.mrf.mxu1 }
 0xda7   :  { %v3746_v59 = vadd.f32 %v3741_v11, %v14237_v43  ;;  %v12413_v43 = vld [vmem:[%s16113_s11 + $0x1f0] sm:$0xff]   ;;  %v12425_v11 = vld [vmem:[%s16113_s11 + $0x238] sm:$0xff]  }
 0xda8   :  { %v11462_v0 = vpop.f32.mrf.mxu1 }
 0xdaa   :  { %v3899_v62 = vpop.f32.mrf.mxu0 }
 0xdab   :  { %v14325_v55 = vadd.f32 %v3899_v62, %v3745_v2  ;;  %v12424_v2 = vld [vmem:[%s16112_s10 + $0x40] sm:$0xff]   ;;  %v12427_v62 = vld [vmem:[%s16113_s11 + $0x228] sm:$0xff]  }
 0xdac   :  { %v11487_v60 = vpop.f32.mrf.mxu0 }
 0xdad   :  { %v12429_v60 = vld [vmem:[%s16113_s11 + $0x218] sm:$0xff]  }
 0xdae   :  { %v3902_v9 = vpop.f32.mrf.mxu0 }
 0xdaf   :  { %v14327_v26 = vadd.f32 %v3902_v9, %v3746_v59  ;;  %v12430_v9 = vld [vmem:[%s16113_s11 + $0x210] sm:$0xff]  }
 0xdb0   :  { %v11488_v22 = vpop.f32.mrf.mxu0 }
 0xdb1   :  { %v12432_v22 = vld [vmem:[%s16113_s11 + $0x200] sm:$0xff]  }
 0xdb2   :  { %v3953_v5 = vpop.f32.mrf.mxu0 }
 0xdb4   :  { %v11493_v58 = vpop.f32.mrf.mxu0 }
 0xdb6   :  { %v3956_v34 = vpop.f32.mrf.mxu0 }
 0xdb7   :  { %v3977_v7 = vpack.c.bf16 %v3956_v34, %v3953_v5 }
 0xdb8   :  { %v11494_v61 = vpop.f32.mrf.mxu0 }
 0xdb9   :  { %11512 = vmatmul.mubr.bf16.vlgmr.msra.gmra.mxu1 %v3977_v7 }
 0xdba   :  { %11542 = vmatpush3.bf16.msra.mxu1 %v14069_v27  ;;  %v4114_v8 = vpop.f32.mrf.mxu0  ;;  %11543 = vmatprep.mubr.msk.bf16.mxu1 %vm12738_vm0, %v12737_v18 }
 0xdbb   :  { %11547 = vmatprep.subr.bf16.mxu1 %v12737_v18 }
 0xdbc   :  { %v11519_v42 = vpop.f32.mrf.mxu0 }
 0xdbe   :  { %v4117_v35 = vpop.f32.mrf.mxu0 }
 0xdbf   :  { %v4138_v51 = vpack.c.bf16 %v4117_v35, %v4114_v8 }
 0xdc0   :  { %v11520_v23 = vpop.f32.mrf.mxu0 }
 0xdc1   :  { %11538 = vmatmul.mubr.bf16.vlgmr.msra.gmra.mxu0 %v4138_v51  ;;  %11544 = vmatmul.mubr.msk.bf16.vlgmr.msra.gmra.mxu1 %vm3276_vm2, %v12406_v10 }
 0xdc2   :  { %11568 = vmatpush3.bf16.msra.mxu0 %v14069_v27  ;;  %11569 = vmatprep.mubr.msk.bf16.mxu0 %vm12738_vm0, %v12737_v18 }
 0xdc3   :  { %11548 = vmatpush3.bf16.msra.mxu1 %v12408_v36  ;;  %11573 = vmatprep.subr.bf16.mxu0 %v12737_v18 }
 0xdc4   :  { %11549 = vmatprep.subr.bf16.mxu1 %v12737_v18  ;;  %11563 = vmatprep.mubr.msk.bf16.mxu1 %vm12738_vm0, %v12737_v18 }
 0xdc7   :  { %11550 = vmatpush3.bf16.msra.mxu1 %v12409_v12 }
 0xdc8   :  { %11551 = vmatprep.subr.bf16.mxu1 %v12737_v18 }
 0xdc9   :  { %11570 = vmatmul.mubr.msk.bf16.vlgmr.msra.gmra.mxu0 %vm3276_vm2, %v12407_v40 }
 0xdca   :  { %11574 = vmatpush3.bf16.msra.mxu0 %v12411_v32  ;;  %11589 = vmatprep.mubr.msk.bf16.mxu0 %vm12738_vm0, %v12737_v18 }
 0xdcb   :  { %11552 = vmatpush3.bf16.msra.mxu1 %v12410_v39  ;;  %11575 = vmatprep.subr.bf16.mxu0 %v12737_v18 }
 0xdcc   :  { %11553 = vmatprep.subr.bf16.mxu1 %v12737_v18 }
 0xdce   :  { %11576 = vmatpush3.bf16.msra.mxu0 %v12413_v43 }
 0xdcf   :  { %11554 = vmatpush3.bf16.msra.mxu1 %v12412_v4  ;;  %11577 = vmatprep.subr.bf16.mxu0 %v12737_v18  ;;  %v12433_v4 = vld [vmem:[%s16114_s12 + $0x38] sm:$0xff]  }
 0xdd0   :  { %11555 = vmatprep.subr.bf16.mxu1 %v12737_v18 }
 0xdd2   :  { %11578 = vmatpush3.bf16.msra.mxu0 %v12415_v50  ;;  %v12435_v50 = vld [vmem:[%s16114_s12 + $0x28] sm:$0xff]  }
 0xdd3   :  { %11556 = vmatpush3.bf16.msra.mxu1 %v12414_v1  ;;  %11579 = vmatprep.subr.bf16.mxu0 %v12737_v18  ;;  %v12434_v1 = vld [vmem:[%s16114_s12 + $0x30] sm:$0xff]  }
 0xdd4   :  { %11557 = vmatprep.subr.bf16.mxu1 %v12737_v18 }
 0xdd6   :  { %11580 = vmatpush3.bf16.msra.mxu0 %v12417_v14  ;;  %v12437_v14 = vld [vmem:[%s16114_s12 + $0x18] sm:$0xff]  }
 0xdd7   :  { %11558 = vmatpush3.bf16.msra.mxu1 %v12416_v38  ;;  %11581 = vmatprep.subr.bf16.mxu0 %v12737_v18  ;;  %v12436_v38 = vld [vmem:[%s16114_s12 + $0x20] sm:$0xff]  }
 0xdd8   :  { %11559 = vmatprep.subr.bf16.mxu1 %v12737_v18 }
 0xdda   :  { %11582 = vmatpush3.bf16.msra.mxu0 %v12419_v41  ;;  %v12439_v41 = vld [vmem:[%s16114_s12 + $0x8] sm:$0xff]  }
 0xddb   :  { %11560 = vmatpush3.bf16.msra.mxu1 %v12418_v57  ;;  %11583 = vmatprep.subr.bf16.mxu0 %v12737_v18  ;;  %v12438_v57 = vld [vmem:[%s16114_s12 + $0x10] sm:$0xff]  }
 0xddc   :  { %11561 = vmatprep.subr.bf16.mxu1 %v12737_v18 }
 0xdde   :  { %11584 = vmatpush3.bf16.msra.mxu0 %v12421_v46 }
 0xddf   :  { %11562 = vmatpush3.bf16.msra.mxu1 %v12420_v45  ;;  %11585 = vmatprep.subr.bf16.mxu0 %v12737_v18  ;;  %v12440_v45 = vld [vmem:[%s16114_s12] sm:$0xff]  }
 0xde0   :  { %11593 = vmatprep.subr.bf16.mxu1 %v12737_v18 }
 0xde2   :  { %11586 = vmatpush3.bf16.msra.mxu0 %v12422_v20 }
 0xde3   :  { %11587 = vmatprep.subr.bf16.mxu0 %v12737_v18 }
 0xde6   :  { %11588 = vmatpush3.bf16.msra.mxu0 %v12423_v16 }
 0xde7   :  { %11619 = vmatprep.subr.bf16.mxu0 %v12737_v18 }
 0xe79   :  { %v4060_v17 = vpop.f32.mrf.mxu1 }
 0xe7a   :  { %v4067_v21 = vadd.f32 %v4060_v17, %v14325_v55  ;;  %v12428_v55 = vld [vmem:[%s16113_s11 + $0x220] sm:$0xff]  }
 0xe7b   :  { %v11513_v30 = vpop.f32.mrf.mxu1 }
 0xe7d   :  { %v4063_v54 = vpop.f32.mrf.mxu1 }
 0xe7e   :  { %v4068_v31 = vadd.f32 %v4063_v54, %v14327_v26  ;;  %v12431_v26 = vld [vmem:[%s16113_s11 + $0x208] sm:$0xff]  }
 0xe7f   :  { %v11514_v47 = vpop.f32.mrf.mxu1 }
 0xe81   :  { %v4221_v52 = vpop.f32.mrf.mxu0  ;;  %v4275_v19 = vpop.f32.mrf.mxu1 }
 0xe82   :  { %v4228_v56 = vadd.f32 %v4221_v52, %v4067_v21 }
 0xe83   :  { %v11539_v33 = vpop.f32.mrf.mxu0  ;;  %v11545_v63 = vpop.f32.mrf.mxu1 }
 0xe85   :  { %v4224_v53 = vpop.f32.mrf.mxu0  ;;  %v4278_v29 = vpop.f32.mrf.mxu1 }
 0xe86   :  { %v4229_v6 = vadd.f32 %v4224_v53, %v4068_v31  ;;  %v4299_v13 = vpack.c.bf16 %v4278_v29, %v4275_v19 }
 0xe87   :  { %v11540_v48 = vpop.f32.mrf.mxu0  ;;  %v11546_v37 = vpop.f32.mrf.mxu1 }
 0xe88   :  { %11564 = vmatmul.mubr.bf16.vlgmr.msra.gmra.mxu1 %v4299_v13 }
 0xe89   :  { %11594 = vmatpush3.bf16.msra.mxu1 %v14069_v27  ;;  %v4436_v24 = vpop.f32.mrf.mxu0  ;;  %11595 = vmatprep.mubr.msk.bf16.mxu1 %vm12738_vm0, %v12737_v18  ;;  %v12426_v27 = vld [vmem:[%s16113_s11 + $0x230] sm:$0xff]  }
 0xe8a   :  { %11599 = vmatprep.subr.bf16.mxu1 %v12737_v18 }
 0xe8b   :  { %v11571_v15 = vpop.f32.mrf.mxu0 }
 0xe8d   :  { %v4439_v49 = vpop.f32.mrf.mxu0 }
 0xe8e   :  { %v4460_v59 = vpack.c.bf16 %v4439_v49, %v4436_v24 }
 0xe8f   :  { %v11572_v0 = vpop.f32.mrf.mxu0 }
 0xe90   :  { %11590 = vmatmul.mubr.bf16.vlgmr.msra.gmra.mxu0 %v4460_v59  ;;  %11596 = vmatmul.mubr.msk.bf16.vlgmr.msra.gmra.mxu1 %vm3276_vm2, %v12424_v2 }
 0xe91   :  { %11600 = vmatpush3.bf16.msra.mxu1 %v12425_v11  ;;  %11615 = vmatprep.mubr.msk.bf16.mxu1 %vm12738_vm0, %v12737_v18 }
 0xe92   :  { %11601 = vmatprep.subr.bf16.mxu1 %v12737_v18  ;;  %11635 = vmatprep.mubr.msk.bf16.mxu0 %vm12738_vm0, %v12737_v18 }
 0xe93   :  { %11620 = vmatpush3.bf16.msra.mxu0 %v12433_v4 }
 0xe94   :  { %11621 = vmatprep.subr.bf16.mxu0 %v12737_v18 }
 0xe95   :  { %11602 = vmatpush3.bf16.msra.mxu1 %v12426_v27 }
 0xe96   :  { %11603 = vmatprep.subr.bf16.mxu1 %v12737_v18 }
 0xe97   :  { %11622 = vmatpush3.bf16.msra.mxu0 %v12434_v1 }
 0xe98   :  { %11623 = vmatprep.subr.bf16.mxu0 %v12737_v18 }
 0xe99   :  { %11604 = vmatpush3.bf16.msra.mxu1 %v12427_v62 }
 0xe9a   :  { %11605 = vmatprep.subr.bf16.mxu1 %v12737_v18 }
 0xe9b   :  { %11624 = vmatpush3.bf16.msra.mxu0 %v12435_v50 }
 0xe9c   :  { %11625 = vmatprep.subr.bf16.mxu0 %v12737_v18 }
 0xe9d   :  { %11606 = vmatpush3.bf16.msra.mxu1 %v12428_v55 }
 0xe9e   :  { %11607 = vmatprep.subr.bf16.mxu1 %v12737_v18 }
 0xe9f   :  { %11626 = vmatpush3.bf16.msra.mxu0 %v12436_v38 }
 0xea0   :  { %11627 = vmatprep.subr.bf16.mxu0 %v12737_v18 }
 0xea1   :  { %11608 = vmatpush3.bf16.msra.mxu1 %v12429_v60 }
 0xea2   :  { %11609 = vmatprep.subr.bf16.mxu1 %v12737_v18 }
 0xea3   :  { %11628 = vmatpush3.bf16.msra.mxu0 %v12437_v14 }
 0xea4   :  { %11629 = vmatprep.subr.bf16.mxu0 %v12737_v18 }
 0xea5   :  { %11610 = vmatpush3.bf16.msra.mxu1 %v12430_v9 }
 0xea6   :  { %11611 = vmatprep.subr.bf16.mxu1 %v12737_v18 }
 0xea7   :  { %11630 = vmatpush3.bf16.msra.mxu0 %v12438_v57 }
 0xea8   :  { %11631 = vmatprep.subr.bf16.mxu0 %v12737_v18 }
 0xea9   :  { %11612 = vmatpush3.bf16.msra.mxu1 %v12431_v26 }
 0xeaa   :  { %11613 = vmatprep.subr.bf16.mxu1 %v12737_v18 }
 0xeab   :  { %11632 = vmatpush3.bf16.msra.mxu0 %v12439_v41 }
 0xeac   :  { %11633 = vmatprep.subr.bf16.mxu0 %v12737_v18 }
 0xead   :  { %11614 = vmatpush3.bf16.msra.mxu1 %v12432_v22 }
 0xeae   :  { %11639 = vmatprep.subr.bf16.mxu1 %v12737_v18 }
 0xeaf   :  { %11634 = vmatpush3.bf16.msra.mxu0 %v12440_v45 }
 0xeb0   :  { %11659 = vmatprep.subr.bf16.mxu0 %v12737_v18 }
 0xf48   :  { %v4382_v5 = vpop.f32.mrf.mxu1 }
 0xf49   :  { %v4389_v58 = vadd.f32 %v4382_v5, %v4228_v56  ;;  %v12441_v5 = vld [vmem:[%s16115_s13 + $0x38] sm:$0xff]  }
 0xf4a   :  { %v11565_v34 = vpop.f32.mrf.mxu1 }
 0xf4b   :  { %v12443_v34 = vld [vmem:[%s16115_s13 + $0x30] sm:$0xff]  }
 0xf4c   :  { %v4385_v7 = vpop.f32.mrf.mxu1 }
 0xf4d   :  { %v4390_v61 = vadd.f32 %v4385_v7, %v4229_v6  ;;  %v12444_v7 = vld [vmem:[%s16115_s13 + $0x70] sm:$0xff]  }
 0xf4e   :  { %v11566_v8 = vpop.f32.mrf.mxu1 }
 0xf4f   :  { %v12446_v8 = vld [vmem:[%s16115_s13 + $0x68] sm:$0xff]  }
 0xf50   :  { %v4543_v42 = vpop.f32.mrf.mxu0  ;;  %v4597_v10 = vpop.f32.mrf.mxu1 }
 0xf51   :  { %v4550_v35 = vadd.f32 %v4543_v42, %v4389_v58  ;;  %v12442_v58 = vld [vmem:[%s16115_s13 + $0x78] sm:$0xff]   ;;  %v12447_v42 = vld [vmem:[%s16115_s13 + $0x20] sm:$0xff]  }
 0xf52   :  { %v11591_v51 = vpop.f32.mrf.mxu0  ;;  %v11597_v36 = vpop.f32.mrf.mxu1 }
 0xf53   :  { %v12450_v51 = vld [vmem:[%s16115_s13 + $0x58] sm:$0xff]   ;;  %v12451_v36 = vld [vmem:[%s16115_s13 + $0x10] sm:$0xff]  }
 0xf54   :  { %v4546_v23 = vpop.f32.mrf.mxu0  ;;  %v4600_v12 = vpop.f32.mrf.mxu1 }
 0xf55   :  { %v4551_v40 = vadd.f32 %v4546_v23, %v4390_v61  ;;  %v4621_v32 = vpack.c.bf16 %v4600_v12, %v4597_v10  ;;  %v12445_v61 = vld [vmem:[%s16115_s13 + $0x28] sm:$0xff]   ;;  %v12448_v10 = vld [vmem:[%s16115_s13 + $0x60] sm:$0xff]   ;;  %v12452_v23 = vld [vmem:[%s16115_s13 + $0x50] sm:$0xff]  }
 0xf56   :  { %v11598_v39 = vpop.f32.mrf.mxu1  ;;  %v11592_v43 = vpop.f32.mrf.mxu0  ;;  %v12453_v12 = vld [vmem:[%s16115_s13 + $0x8] sm:$0xff]  }
 0xf57   :  { %11616 = vmatmul.mubr.bf16.vlgmr.msra.gmra.mxu1 %v4621_v32  ;;  %v12455_v32 = vld [vmem:[%s16115_s13] sm:$0xff]  }
 0xf58   :  { %11655 = vmatprep.mubr.msk.bf16.mxu1 %vm12738_vm0, %v12737_v18  ;;  %11640 = vmatpush3.bf16.msra.mxu1 %v12441_v5  ;;  %v12456_v39 = vld [vmem:[%s16115_s13 + $0x40] sm:$0xff]   ;;  %v12468_v5 = vld [vmem:[%s16115_s13 + $0xd0] sm:$0xff]  }
 0xf59   :  { %11641 = vmatprep.subr.bf16.mxu1 %v12737_v18 }
 0xf5c   :  { %11642 = vmatpush3.bf16.msra.mxu1 %v12443_v34  ;;  %v12470_v34 = vld [vmem:[%s16115_s13 + $0xc8] sm:$0xff]  }
 0xf5d   :  { %11643 = vmatprep.subr.bf16.mxu1 %v12737_v18 }
 0xf60   :  { %11644 = vmatpush3.bf16.msra.mxu1 %v12445_v61  ;;  %v12472_v61 = vld [vmem:[%s16115_s13 + $0xc0] sm:$0xff]  }
 0xf61   :  { %11645 = vmatprep.subr.bf16.mxu1 %v12737_v18 }
 0xf64   :  { %11646 = vmatpush3.bf16.msra.mxu1 %v12447_v42  ;;  %v12474_v42 = vld [vmem:[%s16115_s13 + $0x178] sm:$0xff]  }
 0xf65   :  { %11647 = vmatprep.subr.bf16.mxu1 %v12737_v18 }
0x1017   :  { %v4704_v46 = vpop.f32.mrf.mxu1 }
0x1018   :  { %v4711_v16 = vadd.f32 %v4704_v46, %v4550_v35  ;;  %v12449_v35 = vld [vmem:[%s16115_s13 + $0x18] sm:$0xff]  }
0x1019   :  { %v11617_v20 = vpop.f32.mrf.mxu1  ;;  %11648 = vmatpush3.bf16.msra.mxu1 %v12449_v35  ;;  %v12476_v35 = vld [vmem:[%s16115_s13 + $0x170] sm:$0xff]  }
0x101a   :  { %v4721_v54 = vmul.f32 %v4711_v16, %v4711_v16  ;;  %11649 = vmatprep.subr.bf16.mxu1 %v12737_v18 }
0x101b   :  { %v4707_v17 = vpop.f32.mrf.mxu1 }
0x101c   :  { %v4712_v21 = vadd.f32 %v4707_v17, %v4551_v40  ;;  %v12454_v40 = vld [vmem:[%s16115_s13 + $0x48] sm:$0xff]  }
0x101d   :  { %v11618_v30 = vpop.f32.mrf.mxu1  ;;  %11650 = vmatpush3.bf16.msra.mxu1 %v12451_v36  ;;  %v12478_v36 = vld [vmem:[%s16115_s13 + $0x168] sm:$0xff]  }
0x101e   :  { %v4713_v31 = vadd.f32 %v4712_v21, %v4711_v16  ;;  %v4722_v47 = vmul.f32 %v4712_v21, %v4712_v21  ;;  %11651 = vmatprep.subr.bf16.mxu1 %v12737_v18 }
0x1020   :  { %v4714_v52 = vrot.slane %v4713_v31, 4  ;;  %v4723_v19 = vadd.f32 %v4722_v47, %v4721_v54 }
0x1021   :  { %11652 = vmatpush3.bf16.msra.mxu1 %v12453_v12  ;;  %v12480_v12 = vld [vmem:[%s16115_s13 + $0x160] sm:$0xff]  }
0x1022   :  { %v4715_v56 = vadd.f32 %v4714_v52, %v4713_v31  ;;  %v4724_v33 = vrot.slane %v4723_v19, 4  ;;  %11653 = vmatprep.subr.bf16.mxu1 %v12737_v18 }
0x1024   :  { %v4716_v63 = vrot.slane %v4715_v56, 2  ;;  %v4725_v53 = vadd.f32 %v4724_v33, %v4723_v19 }
0x1025   :  { %11654 = vmatpush3.bf16.msra.mxu1 %v12455_v32  ;;  %v12482_v32 = vld [vmem:[%s16115_s13 + $0x158] sm:$0xff]  }
0x1026   :  { %v4717_v29 = vadd.f32 %v4716_v63, %v4715_v56  ;;  %v4726_v6 = vrot.slane %v4725_v53, 2  ;;  %11679 = vmatprep.subr.bf16.mxu1 %v12737_v18 }
0x1028   :  { %v4718_v13 = vrot.slane %v4717_v29, 1  ;;  %v4727_v48 = vadd.f32 %v4726_v6, %v4725_v53 }
0x102a   :  { %v4719_v37 = vadd.f32 %v4718_v13, %v4717_v29  ;;  %v4728_v24 = vrot.slane %v4727_v48, 1 }
0x102c   :  { %v4720_v15 = vmul.f32 0.0625, %v4719_v37  ;;  %v4729_v2 = vadd.f32 %v4728_v24, %v4727_v48 }
0x102e   :  { %v4730_v49 = vmul.f32 0.0625, %v4729_v2  ;;  %v4731_v11 = vmul.f32 %v4720_v15, %v4720_v15  ;;  %v4734_v59 = vsub.f32 %v4711_v16, %v4720_v15  ;;  %v4735_v0 = vsub.f32 %v4712_v21, %v4720_v15 }
0x1030   :  { %v4732_v27 = vsub.f32 %v4730_v49, %v4731_v11 }
0x1032   :  { %v4733_v62 = vmax.f32 %v4732_v27, 0.0  ;;  %v12458_v27 = vld [vmem:[%s16115_s13 + $0xf8] sm:$0xff]  }
0x1034   :  { %v4736_v55 = vadd.f32 1e-05, %v4733_v62 }
0x1036   :  { %12729 = vrsqrt.f32 %v4736_v55  ;;  %v12463_v55 = vld [vmem:[%s16115_s13 + $0xa0] sm:$0xff]  }
0x1043   :  { %v12730_v60 = vpop.eup %12729 }
0x1044   :  { %v4738_v9 = vmul.f32 %v12730_v60, %v4734_v59  ;;  %v4739_v26 = vmul.f32 %v12730_v60, %v4735_v0  ;;  %v12457_v0 = vld [vmem:[%s16115_s13 + $0xb8] sm:$0xff]   ;;  %v12464_v60 = vld [vmem:[%s16115_s13 + $0xe0] sm:$0xff]  }
0x1046   :  { %v4756_v22 = vpack.c.bf16 %v4739_v26, %v4738_v9  ;;  %v12465_v9 = vld [vmem:[%s16115_s13 + $0x98] sm:$0xff]  }
0x1047   :  { %v12466_v26 = vld [vmem:[%s16115_s13 + $0xd8] sm:$0xff]  }
0x1048   :  { %11636 = vmatmul.mubr.bf16.vlgmr.msra.gmra.mxu0 %v4756_v22  ;;  %v12467_v22 = vld [vmem:[%s16115_s13 + $0x90] sm:$0xff]  }
0x1049   :  { %11675 = vmatprep.mubr.msk.bf16.mxu0 %vm12738_vm0, %v12737_v18  ;;  %11660 = vmatpush3.bf16.msra.mxu0 %v12442_v58  ;;  %v12469_v58 = vld [vmem:[%s16115_s13 + $0x88] sm:$0xff]  }
0x104a   :  { %11661 = vmatprep.subr.bf16.mxu0 %v12737_v18 }
0x104d   :  { %11662 = vmatpush3.bf16.msra.mxu0 %v12444_v7  ;;  %v12471_v7 = vld [vmem:[%s16115_s13 + $0x80] sm:$0xff]  }
0x104e   :  { %11663 = vmatprep.subr.bf16.mxu0 %v12737_v18 }
0x1051   :  { %11664 = vmatpush3.bf16.msra.mxu0 %v12446_v8  ;;  %v12473_v8 = vld [vmem:[%s16115_s13 + $0x138] sm:$0xff]  }
0x1052   :  { %11665 = vmatprep.subr.bf16.mxu0 %v12737_v18 }
0x1055   :  { %11666 = vmatpush3.bf16.msra.mxu0 %v12448_v10  ;;  %v12475_v10 = vld [vmem:[%s16115_s13 + $0x130] sm:$0xff]  }
0x1056   :  { %11667 = vmatprep.subr.bf16.mxu0 %v12737_v18 }
0x1059   :  { %11668 = vmatpush3.bf16.msra.mxu0 %v12450_v51  ;;  %v12477_v51 = vld [vmem:[%s16115_s13 + $0x128] sm:$0xff]  }
0x105a   :  { %11669 = vmatprep.subr.bf16.mxu0 %v12737_v18 }
0x105d   :  { %11670 = vmatpush3.bf16.msra.mxu0 %v12452_v23  ;;  %v12479_v23 = vld [vmem:[%s16115_s13 + $0x120] sm:$0xff]  }
0x105e   :  { %11671 = vmatprep.subr.bf16.mxu0 %v12737_v18 }
0x1061   :  { %11672 = vmatpush3.bf16.msra.mxu0 %v12454_v40  ;;  %v12481_v40 = vld [vmem:[%s16115_s13 + $0x118] sm:$0xff]  }
0x1062   :  { %11673 = vmatprep.subr.bf16.mxu0 %v12737_v18 }
0x1065   :  { %11674 = vmatpush3.bf16.msra.mxu0 %v12456_v39  ;;  %v12483_v39 = vld [vmem:[%s16115_s13 + $0x110] sm:$0xff]  }
0x1066   :  { %11699 = vmatprep.subr.bf16.mxu0 %v12737_v18 }
0x1108   :  { %v4839_v43 = vpop.f32.mrf.mxu0 }
0x1109   :  { %v4854_v50 = vmul.f32 %v4839_v43, %v4839_v43 }
0x110a   :  { %v11637_v4 = vpop.f32.mrf.mxu0 }
0x110b   :  { %v12485_v4 = vld [vmem:[%s16115_s13 + $0x108] sm:$0xff]  }
0x110c   :  { %v4842_v1 = vpop.f32.mrf.mxu0 }
0x110d   :  { %v4846_v38 = vadd.f32 %v4842_v1, %v4839_v43  ;;  %v4855_v14 = vmul.f32 %v4842_v1, %v4842_v1 }
0x110e   :  { %v11638_v57 = vpop.f32.mrf.mxu0 }
0x110f   :  { %v4847_v41 = vrot.slane %v4846_v38, 4  ;;  %v4856_v45 = vadd.f32 %v4855_v14, %v4854_v50  ;;  %v12487_v50 = vld [vmem:[%s16115_s13 + $0x100] sm:$0xff]   ;;  %v12489_v14 = vld [vmem:[%s16115_s13 + $0x1b8] sm:$0xff]  }
0x1110   :  { %v12490_v57 = vld [vmem:[%s16115_s13 + $0x1f8] sm:$0xff]  }
0x1111   :  { %v4848_v46 = vadd.f32 %v4847_v41, %v4846_v38  ;;  %v4857_v20 = vrot.slane %v4856_v45, 4  ;;  %v12488_v38 = vld [vmem:[%s16115_s13 + $0x140] sm:$0xff]   ;;  %v12491_v41 = vld [vmem:[%s16115_s13 + $0x1b0] sm:$0xff]  }
0x1113   :  { %v4849_v16 = vrot.slane %v4848_v46, 2  ;;  %v4858_v17 = vadd.f32 %v4857_v20, %v4856_v45  ;;  %v12492_v45 = vld [vmem:[%s16115_s13 + $0x1f0] sm:$0xff]   ;;  %v12494_v20 = vld [vmem:[%s16115_s13 + $0x1e8] sm:$0xff]  }
0x1115   :  { %v4850_v21 = vadd.f32 %v4849_v16, %v4848_v46  ;;  %v4859_v30 = vrot.slane %v4858_v17, 2  ;;  %v12493_v46 = vld [vmem:[%s16115_s13 + $0x1a8] sm:$0xff]   ;;  %v12495_v16 = vld [vmem:[%s16115_s13 + $0x1a0] sm:$0xff]  }
0x1117   :  { %v4851_v54 = vrot.slane %v4850_v21, 1  ;;  %v4860_v31 = vadd.f32 %v4859_v30, %v4858_v17  ;;  %v12496_v17 = vld [vmem:[%s16115_s13 + $0x1e0] sm:$0xff]   ;;  %v12498_v30 = vld [vmem:[%s16115_s13 + $0x1d8] sm:$0xff]  }
0x1119   :  { %v4852_v47 = vadd.f32 %v4851_v54, %v4850_v21  ;;  %v4861_v52 = vrot.slane %v4860_v31, 1  ;;  %v12497_v21 = vld [vmem:[%s16115_s13 + $0x198] sm:$0xff]   ;;  %v12499_v54 = vld [vmem:[%s16115_s13 + $0x190] sm:$0xff]  }
0x111b   :  { %v4853_v19 = vmul.f32 0.0625, %v4852_v47  ;;  %v4862_v56 = vadd.f32 %v4861_v52, %v4860_v31  ;;  %v12500_v31 = vld [vmem:[%s16115_s13 + $0x1d0] sm:$0xff]   ;;  %v12501_v47 = vld [vmem:[%s16115_s13 + $0x188] sm:$0xff]  }
0x111c   :  { %v12502_v52 = vld [vmem:[%s16115_s13 + $0x1c8] sm:$0xff]  }
0x111d   :  { %v4863_v33 = vmul.f32 0.0625, %v4862_v56  ;;  %v4864_v63 = vmul.f32 %v4853_v19, %v4853_v19  ;;  %v4867_v13 = vsub.f32 %v4839_v43, %v4853_v19  ;;  %v4868_v48 = vsub.f32 %v4842_v1, %v4853_v19  ;;  %v12484_v43 = vld [vmem:[%s16115_s13 + $0x150] sm:$0xff]   ;;  %v12486_v1 = vld [vmem:[%s16115_s13 + $0x148] sm:$0xff]   ;;  %v12503_v19 = vld [vmem:[%s16115_s13 + $0x180] sm:$0xff]  }
0x111e   :  { %v12504_v56 = vld [vmem:[%s16115_s13 + $0x1c0] sm:$0xff]  }
0x111f   :  { %v4865_v53 = vsub.f32 %v4863_v33, %v4864_v63  ;;  %v12505_v33 = vld [vmem:[%s16115_s13 + $0x238] sm:$0xff]   ;;  %v12506_v63 = vld [vmem:[%s16115_s13 + $0x230] sm:$0xff]  }
0x1121   :  { %v4866_v29 = vmax.f32 %v4865_v53, 0.0  ;;  %v12507_v53 = vld [vmem:[%s16115_s13 + $0x228] sm:$0xff]  }
0x1123   :  { %v4869_v6 = vadd.f32 1e-05, %v4866_v29  ;;  %v12508_v29 = vld [vmem:[%s16115_s13 + $0x220] sm:$0xff]  }
0x1125   :  { %12731 = vrsqrt.f32 %v4869_v6  ;;  %v12509_v6 = vld [vmem:[%s16115_s13 + $0x218] sm:$0xff]  }
0x1132   :  { %v12732_v37 = vpop.eup %12731 }
0x1133   :  { %v4871_v24 = vmul.f32 %v12732_v37, %v4867_v13  ;;  %v4872_v15 = vmul.f32 %v12732_v37, %v4868_v48  ;;  %v12510_v13 = vld [vmem:[%s16115_s13 + $0x210] sm:$0xff]   ;;  %v12511_v48 = vld [vmem:[%s16115_s13 + $0x208] sm:$0xff]   ;;  %v12512_v37 = vld [vmem:[%s16115_s13 + $0x200] sm:$0xff]  }
0x1135   :  { %v4873_v2 = vadd.f32 %v4871_v24, %v3133_v28  ;;  %v4874_v49 = vadd.f32 %v4872_v15, %v3134_v44  ;;  %v12461_v44 = vld [vmem:[%s16115_s13 + $0xa8] sm:$0xff]   ;;  %v12739_v24 = vmov 0  }
0x1136   :  { %v12462_v28 = vld [vmem:[%s16115_s13 + $0xe8] sm:$0xff]  }
0x1137   :  { %v4875_v11 = vmax.f32 %v4873_v2, 0.0  ;;  %v4876_v59 = vmax.f32 %v4874_v49, 0.0 }
0x1139   :  { %v14569_v62 = vpack.c.bf16 %v4876_v59, %v4875_v11 }
0x113b   :  { %11656 = vmatmul.mubr.bf16.vlgmr.msra.gmra.mxu1 %v14569_v62  ;;  %11676 = vmatmul.mubr.bf16.vlgmr.msra.gmra.mxu0 %v14569_v62 }
0x113c   :  { %11680 = vmatpush3.bf16.msra.mxu1 %v12457_v0  ;;  %11700 = vmatpush3.bf16.msra.mxu0 %v12458_v27 }
0x113d   :  { %11681 = vmatprep.subr.bf16.mxu1 %v12737_v18  ;;  %11701 = vmatprep.subr.bf16.mxu0 %v12737_v18 }
0x113e   :  { %11695 = vmatprep.mubr.msk.bf16.mxu1 %vm12738_vm0, %v12737_v18  ;;  %11715 = vmatprep.mubr.msk.bf16.mxu0 %vm12738_vm0, %v12737_v18 }
0x1140   :  { %11682 = vmatpush3.bf16.msra.mxu1 %v12459_v25  ;;  %11702 = vmatpush3.bf16.msra.mxu0 %v12460_v3 }
0x1141   :  { %11683 = vmatprep.subr.bf16.mxu1 %v12737_v18  ;;  %11703 = vmatprep.subr.bf16.mxu0 %v12737_v18 }
0x1144   :  { %11684 = vmatpush3.bf16.msra.mxu1 %v12461_v44  ;;  %11704 = vmatpush3.bf16.msra.mxu0 %v12462_v28  ;;  %v12515_v28 = vld [vmem:[%s16116_s14 + $0x4] ss:$8 sps:$4 sm:$0xff]  }
0x1145   :  { %11685 = vmatprep.subr.bf16.mxu1 %v12737_v18  ;;  %11705 = vmatprep.subr.bf16.mxu0 %v12737_v18 }
0x1148   :  { %11686 = vmatpush3.bf16.msra.mxu1 %v12463_v55  ;;  %11706 = vmatpush3.bf16.msra.mxu0 %v12464_v60 }
0x1149   :  { %11687 = vmatprep.subr.bf16.mxu1 %v12737_v18  ;;  %11707 = vmatprep.subr.bf16.mxu0 %v12737_v18 }
0x114c   :  { %11688 = vmatpush3.bf16.msra.mxu1 %v12465_v9  ;;  %11708 = vmatpush3.bf16.msra.mxu0 %v12466_v26 }
0x114d   :  { %11689 = vmatprep.subr.bf16.mxu1 %v12737_v18  ;;  %11709 = vmatprep.subr.bf16.mxu0 %v12737_v18 }
0x1150   :  { %11690 = vmatpush3.bf16.msra.mxu1 %v12467_v22  ;;  %11710 = vmatpush3.bf16.msra.mxu0 %v12468_v5 }
0x1151   :  { %11691 = vmatprep.subr.bf16.mxu1 %v12737_v18  ;;  %11711 = vmatprep.subr.bf16.mxu0 %v12737_v18 }
0x1154   :  { %11692 = vmatpush3.bf16.msra.mxu1 %v12469_v58  ;;  %11712 = vmatpush3.bf16.msra.mxu0 %v12470_v34 }
0x1155   :  { %11693 = vmatprep.subr.bf16.mxu1 %v12737_v18  ;;  %11713 = vmatprep.subr.bf16.mxu0 %v12737_v18 }
0x1158   :  { %11694 = vmatpush3.bf16.msra.mxu1 %v12471_v7  ;;  %11714 = vmatpush3.bf16.msra.mxu0 %v12472_v61 }
0x1159   :  { %11719 = vmatprep.subr.bf16.mxu1 %v12737_v18  ;;  %11739 = vmatprep.subr.bf16.mxu0 %v12737_v18 }
0x115b   :  { %11696 = vmatmul.mubr.bf16.vlgmr.msra.gmra.mxu1 %v14569_v62  ;;  %11716 = vmatmul.mubr.bf16.vlgmr.msra.gmra.mxu0 %v14569_v62 }
0x115c   :  { %11720 = vmatpush3.bf16.msra.mxu1 %v12473_v8  ;;  %11740 = vmatpush3.bf16.msra.mxu0 %v12474_v42 }
0x115d   :  { %11721 = vmatprep.subr.bf16.mxu1 %v12737_v18  ;;  %11741 = vmatprep.subr.bf16.mxu0 %v12737_v18 }
0x115e   :  { %11735 = vmatprep.mubr.msk.bf16.mxu1 %vm12738_vm0, %v12737_v18  ;;  %11755 = vmatprep.mubr.msk.bf16.mxu0 %vm12738_vm0, %v12737_v18 }
0x1160   :  { %11722 = vmatpush3.bf16.msra.mxu1 %v12475_v10  ;;  %11742 = vmatpush3.bf16.msra.mxu0 %v12476_v35 }
0x1161   :  { %11723 = vmatprep.subr.bf16.mxu1 %v12737_v18  ;;  %11743 = vmatprep.subr.bf16.mxu0 %v12737_v18 }
0x1164   :  { %11724 = vmatpush3.bf16.msra.mxu1 %v12477_v51  ;;  %11744 = vmatpush3.bf16.msra.mxu0 %v12478_v36 }
0x1165   :  { %11725 = vmatprep.subr.bf16.mxu1 %v12737_v18  ;;  %11745 = vmatprep.subr.bf16.mxu0 %v12737_v18 }
0x1168   :  { %11726 = vmatpush3.bf16.msra.mxu1 %v12479_v23  ;;  %11746 = vmatpush3.bf16.msra.mxu0 %v12480_v12 }
0x1169   :  { %11727 = vmatprep.subr.bf16.mxu1 %v12737_v18  ;;  %11747 = vmatprep.subr.bf16.mxu0 %v12737_v18 }
0x116c   :  { %11728 = vmatpush3.bf16.msra.mxu1 %v12481_v40  ;;  %11748 = vmatpush3.bf16.msra.mxu0 %v12482_v32 }
0x116d   :  { %11729 = vmatprep.subr.bf16.mxu1 %v12737_v18  ;;  %11749 = vmatprep.subr.bf16.mxu0 %v12737_v18 }
0x1170   :  { %11730 = vmatpush3.bf16.msra.mxu1 %v12483_v39  ;;  %11750 = vmatpush3.bf16.msra.mxu0 %v12484_v43 }
0x1171   :  { %11731 = vmatprep.subr.bf16.mxu1 %v12737_v18  ;;  %11751 = vmatprep.subr.bf16.mxu0 %v12737_v18 }
0x1174   :  { %11732 = vmatpush3.bf16.msra.mxu1 %v12485_v4  ;;  %11752 = vmatpush3.bf16.msra.mxu0 %v12486_v1 }
0x1175   :  { %11733 = vmatprep.subr.bf16.mxu1 %v12737_v18  ;;  %11753 = vmatprep.subr.bf16.mxu0 %v12737_v18 }
0x1178   :  { %11734 = vmatpush3.bf16.msra.mxu1 %v12487_v50  ;;  %11754 = vmatpush3.bf16.msra.mxu0 %v12488_v38 }
0x1179   :  { %11759 = vmatprep.subr.bf16.mxu1 %v12737_v18  ;;  %11779 = vmatprep.subr.bf16.mxu0 %v12737_v18 }
0x117b   :  { %11736 = vmatmul.mubr.bf16.vlgmr.msra.gmra.mxu1 %v14569_v62  ;;  %11756 = vmatmul.mubr.bf16.vlgmr.msra.gmra.mxu0 %v14569_v62 }
0x117c   :  { %11760 = vmatpush3.bf16.msra.mxu1 %v12489_v14  ;;  %11780 = vmatpush3.bf16.msra.mxu0 %v12490_v57 }
0x117d   :  { %11761 = vmatprep.subr.bf16.mxu1 %v12737_v18  ;;  %11781 = vmatprep.subr.bf16.mxu0 %v12737_v18 }
0x117e   :  { %11775 = vmatprep.mubr.msk.bf16.mxu1 %vm12738_vm0, %v12737_v18  ;;  %11795 = vmatprep.mubr.msk.bf16.mxu0 %vm12738_vm0, %v12737_v18 }
0x1180   :  { %11762 = vmatpush3.bf16.msra.mxu1 %v12491_v41  ;;  %11782 = vmatpush3.bf16.msra.mxu0 %v12492_v45 }
0x1181   :  { %11763 = vmatprep.subr.bf16.mxu1 %v12737_v18  ;;  %11783 = vmatprep.subr.bf16.mxu0 %v12737_v18 }
0x1184   :  { %11764 = vmatpush3.bf16.msra.mxu1 %v12493_v46  ;;  %11784 = vmatpush3.bf16.msra.mxu0 %v12494_v20 }
0x1185   :  { %11765 = vmatprep.subr.bf16.mxu1 %v12737_v18  ;;  %11785 = vmatprep.subr.bf16.mxu0 %v12737_v18 }
0x1188   :  { %11766 = vmatpush3.bf16.msra.mxu1 %v12495_v16  ;;  %11786 = vmatpush3.bf16.msra.mxu0 %v12496_v17  ;;  %v12513_v17 = vld [vmem:[%s16116_s14] ss:$8 sps:$4 sm:$0xff]  }
0x1189   :  { %11767 = vmatprep.subr.bf16.mxu1 %v12737_v18  ;;  %11787 = vmatprep.subr.bf16.mxu0 %v12737_v18 }
0x118c   :  { %11768 = vmatpush3.bf16.msra.mxu1 %v12497_v21  ;;  %11788 = vmatpush3.bf16.msra.mxu0 %v12498_v30  ;;  %v12516_v21 = vld [vmem:[%s16116_s14 + $0x14] ss:$8 sps:$4 sm:$0xff]   ;;  %v12518_v30 = vld [vmem:[%s16116_s14 + $0x10] ss:$8 sps:$4 sm:$0xff]  }
0x118d   :  { %11769 = vmatprep.subr.bf16.mxu1 %v12737_v18  ;;  %11789 = vmatprep.subr.bf16.mxu0 %v12737_v18 }
0x1190   :  { %11770 = vmatpush3.bf16.msra.mxu1 %v12499_v54  ;;  %11790 = vmatpush3.bf16.msra.mxu0 %v12500_v31  ;;  %v12519_v54 = vld [vmem:[%s16116_s14 + $0x24] ss:$8 sps:$4 sm:$0xff]   ;;  %v12521_v31 = vld [vmem:[%s16116_s14 + $0x20] ss:$8 sps:$4 sm:$0xff]  }
0x1191   :  { %11771 = vmatprep.subr.bf16.mxu1 %v12737_v18  ;;  %11791 = vmatprep.subr.bf16.mxu0 %v12737_v18 }
0x1194   :  { %11772 = vmatpush3.bf16.msra.mxu1 %v12501_v47  ;;  %11792 = vmatpush3.bf16.msra.mxu0 %v12502_v52  ;;  %v12522_v47 = vld [vmem:[%s16116_s14 + $0x34] ss:$8 sps:$4 sm:$0xff]   ;;  %v12524_v52 = vld [vmem:[%s16116_s14 + $0x30] ss:$8 sps:$4 sm:$0xff]  }
0x1195   :  { %11773 = vmatprep.subr.bf16.mxu1 %v12737_v18  ;;  %11793 = vmatprep.subr.bf16.mxu0 %v12737_v18 }
0x1198   :  { %11774 = vmatpush3.bf16.msra.mxu1 %v12503_v19  ;;  %11794 = vmatpush3.bf16.msra.mxu0 %v12504_v56  ;;  %v12525_v19 = vld [vmem:[%s16117_s15 + $0x38] sm:$0xff]  }
0x1199   :  { %11799 = vmatprep.subr.bf16.mxu1 %v12737_v18  ;;  %5932 = vmatprep.subr.bf16.mxu0 %v12739_v24  ;;  %v12526_v56 = vld [vmem:[%s16117_s15 + $0x78] sm:$0xff]  }
0x119b   :  { %11776 = vmatmul.mubr.bf16.vlgmr.msra.gmra.mxu1 %v14569_v62  ;;  %11796 = vmatmul.mubr.bf16.vlgmr.msra.gmra.mxu0 %v14569_v62 }
0x119c   :  { %11800 = vmatpush3.bf16.msra.mxu1 %v12505_v33  ;;  %11815 = vmatprep.mubr.msk.bf16.mxu1 %vm12738_vm0, %v12737_v18  ;;  %v12527_v33 = vld [vmem:[%s16117_s15 + $0x30] sm:$0xff]  }
0x119d   :  { %11801 = vmatprep.subr.bf16.mxu1 %v12737_v18  ;;  %9733 = vmatprep.mubr.msk.bf16.mxu0 %vm3276_vm2, %v12515_v28 }
0x11a0   :  { %11802 = vmatpush3.bf16.msra.mxu1 %v12506_v63  ;;  %v12528_v63 = vld [vmem:[%s16117_s15 + $0x70] sm:$0xff]  }
0x11a1   :  { %11803 = vmatprep.subr.bf16.mxu1 %v12737_v18 }
0x11a4   :  { %11804 = vmatpush3.bf16.msra.mxu1 %v12507_v53  ;;  %v12529_v53 = vld [vmem:[%s16117_s15 + $0x28] sm:$0xff]  }
0x11a5   :  { %11805 = vmatprep.subr.bf16.mxu1 %v12737_v18 }
0x11a8   :  { %11806 = vmatpush3.bf16.msra.mxu1 %v12508_v29  ;;  %v12530_v29 = vld [vmem:[%s16117_s15 + $0x68] sm:$0xff]  }
0x11a9   :  { %11807 = vmatprep.subr.bf16.mxu1 %v12737_v18 }
0x11ac   :  { %11808 = vmatpush3.bf16.msra.mxu1 %v12509_v6  ;;  %v12531_v6 = vld [vmem:[%s16117_s15 + $0x20] sm:$0xff]  }
0x11ad   :  { %11809 = vmatprep.subr.bf16.mxu1 %v12737_v18 }
0x11b0   :  { %11810 = vmatpush3.bf16.msra.mxu1 %v12510_v13  ;;  %v12532_v13 = vld [vmem:[%s16117_s15 + $0x60] sm:$0xff]  }
0x11b1   :  { %11811 = vmatprep.subr.bf16.mxu1 %v12737_v18 }
0x11b4   :  { %11812 = vmatpush3.bf16.msra.mxu1 %v12511_v48  ;;  %v12533_v48 = vld [vmem:[%s16117_s15 + $0x18] sm:$0xff]  }
0x11b5   :  { %11813 = vmatprep.subr.bf16.mxu1 %v12737_v18 }
0x11b8   :  { %11814 = vmatpush3.bf16.msra.mxu1 %v12512_v37  ;;  %v12534_v37 = vld [vmem:[%s16117_s15 + $0x58] sm:$0xff]  }
0x11b9   :  { %11819 = vmatprep.subr.bf16.mxu1 %v12525_v19 }
0x11bb   :  { %11816 = vmatmul.mubr.bf16.vlgmr.msra.gmra.mxu1 %v14569_v62 }
0x11bc   :  { %11820 = vmatpush3.bf16.msra.mxu1 %v12525_v19 }
0x11bd   :  { %11821 = vmatprep.subr.bf16.mxu1 %v12527_v33 }
0x11c0   :  { %11822 = vmatpush3.bf16.msra.mxu1 %v12527_v33 }
0x11c1   :  { %11823 = vmatprep.subr.bf16.mxu1 %v12529_v53 }
0x11c4   :  { %11824 = vmatpush3.bf16.msra.mxu1 %v12529_v53 }
0x11c5   :  { %11825 = vmatprep.subr.bf16.mxu1 %v12531_v6 }
0x11c8   :  { %11826 = vmatpush3.bf16.msra.mxu1 %v12531_v6 }
0x11c9   :  { %11827 = vmatprep.subr.bf16.mxu1 %v12533_v48 }
0x11cc   :  { %11828 = vmatpush3.bf16.msra.mxu1 %v12533_v48 }
0x11fb   :  { %v4976_v15 = vpop.f32.mrf.mxu1  ;;  %v5084_v2 = vpop.f32.mrf.mxu0 }
0x11fd   :  { %v11657_v49 = vpop.f32.mrf.mxu1  ;;  %v11677_v11 = vpop.f32.mrf.mxu0 }
0x11fe   :  { %v12538_v49 = vld [vmem:[%s16117_s15 + $0x48] sm:$0xff]   ;;  %v12539_v11 = vld [vmem:[%s16117_s15] sm:$0xff]  }
0x11ff   :  { %v4979_v59 = vpop.f32.mrf.mxu1  ;;  %v5087_v0 = vpop.f32.mrf.mxu0 }
0x1200   :  { %v5875_v27 = vpack.c.bf16 %v4979_v59, %v4976_v15  ;;  %v5876_v25 = vpack.c.bf16 %v5087_v0, %v5084_v2  ;;  %v12536_v15 = vld [vmem:[%s16117_s15 + $0x50] sm:$0xff]   ;;  %v12537_v2 = vld [vmem:[%s16117_s15 + $0x8] sm:$0xff]   ;;  %v12540_v59 = vld [vmem:[%s16117_s15 + $0x40] sm:$0xff]  }
0x1201   :  { %v11658_v3 = vpop.f32.mrf.mxu1  ;;  %v11678_v44 = vpop.f32.mrf.mxu0  ;;  %v14889_v0 = vld [vmem:[%s16117_s15 + $0xb8] sm:$0xff]  }
0x121b   :  { %v5192_v18 = vpop.f32.mrf.mxu1  ;;  %v5300_v62 = vpop.f32.mrf.mxu0 }
0x121d   :  { %v11697_v55 = vpop.f32.mrf.mxu1  ;;  %v11717_v60 = vpop.f32.mrf.mxu0 }
0x121f   :  { %v5195_v9 = vpop.f32.mrf.mxu1  ;;  %v5303_v26 = vpop.f32.mrf.mxu0 }
0x1220   :  { %v5877_v22 = vpack.c.bf16 %v5195_v9, %v5192_v18  ;;  %v5878_v5 = vpack.c.bf16 %v5303_v26, %v5300_v62 }
0x1221   :  { %v11698_v58 = vpop.f32.mrf.mxu1  ;;  %v11718_v34 = vpop.f32.mrf.mxu0 }
0x123b   :  { %v5408_v7 = vpop.f32.mrf.mxu1  ;;  %v5516_v61 = vpop.f32.mrf.mxu0 }
0x123d   :  { %v11737_v8 = vpop.f32.mrf.mxu1  ;;  %v11757_v42 = vpop.f32.mrf.mxu0 }
0x123f   :  { %v5411_v10 = vpop.f32.mrf.mxu1  ;;  %v5519_v35 = vpop.f32.mrf.mxu0 }
0x1240   :  { %v5880_v14 = vpack.c.bf16 %v5519_v35, %v5516_v61  ;;  %v5879_v57 = vpack.c.bf16 %v5411_v10, %v5408_v7 }
0x1241   :  { %v11738_v51 = vpop.f32.mrf.mxu1  ;;  %v11758_v36 = vpop.f32.mrf.mxu0 }
0x125b   :  { %v5624_v23 = vpop.f32.mrf.mxu1  ;;  %v5732_v12 = vpop.f32.mrf.mxu0 }
0x125d   :  { %v11777_v40 = vpop.f32.mrf.mxu1  ;;  %v11797_v32 = vpop.f32.mrf.mxu0 }
0x125f   :  { %v5627_v39 = vpop.f32.mrf.mxu1  ;;  %v5735_v43 = vpop.f32.mrf.mxu0 }
0x1260   :  { %v5882_v4 = vpack.c.bf16 %v5735_v43, %v5732_v12  ;;  %v5881_v38 = vpack.c.bf16 %v5627_v39, %v5624_v23 }
0x1261   :  { %v11778_v1 = vpop.f32.mrf.mxu1  ;;  %v11798_v50 = vpop.f32.mrf.mxu0 }
0x1262   :  { %5933 = vmatpush1.bf16.msra.mxu0 %v5882_v4 }
0x1263   :  { %5934 = vmatprep.subr.bf16.mxu0 %v12739_v24 }
0x1266   :  { %5935 = vmatpush1.bf16.msra.mxu0 %v5881_v38 }
0x1267   :  { %5936 = vmatprep.subr.bf16.mxu0 %v12739_v24 }
0x126a   :  { %5937 = vmatpush1.bf16.msra.mxu0 %v5880_v14 }
0x126b   :  { %5938 = vmatprep.subr.bf16.mxu0 %v12739_v24 }
0x126e   :  { %5939 = vmatpush1.bf16.msra.mxu0 %v5879_v57 }
0x126f   :  { %5940 = vmatprep.subr.bf16.mxu0 %v12739_v24 }
0x1272   :  { %5941 = vmatpush1.bf16.msra.mxu0 %v5878_v5 }
0x1273   :  { %5942 = vmatprep.subr.bf16.mxu0 %v12739_v24 }
0x1276   :  { %5943 = vmatpush1.bf16.msra.mxu0 %v5877_v22 }
0x1277   :  { %5944 = vmatprep.subr.bf16.mxu0 %v12739_v24 }
0x127a   :  { %5945 = vmatpush1.bf16.msra.mxu0 %v5876_v25 }
0x127b   :  { %v5840_v41 = vpop.f32.mrf.mxu1  ;;  %5946 = vmatprep.subr.bf16.mxu0 %v12739_v24 }
0x127d   :  { %v11817_v45 = vpop.f32.mrf.mxu1 }
0x127e   :  { %5947 = vmatpush1.bf16.msra.mxu0 %v5875_v27  ;;  %v14894_v27 = vld [vmem:[%s16117_s15 + $0xf8] sm:$0xff]  }
0x127f   :  { %v5843_v46 = vpop.f32.mrf.mxu1  ;;  %5962 = vmatprep.subr.bf16.mxu0 %v12739_v24  ;;  %v12535_v24 = vld [vmem:[%s16117_s15 + $0x10] sm:$0xff]  }
0x1280   :  { %v5883_v20 = vpack.c.bf16 %v5843_v46, %v5840_v41  ;;  %11829 = vmatprep.subr.bf16.mxu1 %v12535_v24 }
0x1281   :  { %v11818_v16 = vpop.f32.mrf.mxu1  ;;  %11830 = vmatpush3.bf16.msra.mxu1 %v12535_v24 }
0x1282   :  { %5963 = vmatpush2.bf16.msra.mxu0 %v5883_v20  ;;  %11831 = vmatprep.subr.bf16.mxu1 %v12537_v2 }
0x1283   :  { %11843 = vmatprep.subr.bf16.mxu0 %v12526_v56 }
0x1285   :  { %5965 = vmatmul.mubr.bf16.vlgmr.msra.gmra.mxu0 %v12513_v17  ;;  %11832 = vmatpush3.bf16.msra.mxu1 %v12537_v2 }
0x1286   :  { %9734 = vmatprep.mubr.msk.bf16.mxu0 %vm3276_vm2, %v12516_v21  ;;  %11844 = vmatpush3.bf16.msra.mxu0 %v12526_v56 }
0x1287   :  { %11845 = vmatprep.subr.bf16.mxu0 %v12528_v63  ;;  %11833 = vmatprep.subr.bf16.mxu1 %v12539_v11 }
0x1289   :  { %11834 = vmatpush3.bf16.msra.mxu1 %v12539_v11 }
0x128a   :  { %11846 = vmatpush3.bf16.msra.mxu0 %v12528_v63  ;;  %11867 = vmatprep.subr.bf16.mxu1 %v14889_v0 }
0x128b   :  { %11847 = vmatprep.subr.bf16.mxu0 %v12530_v29 }
0x128d   :  { %5973 = vmatmul.mubr.bf16.gmra.mxu0 %v12518_v30 }
0x128e   :  { %9735 = vmatprep.mubr.msk.bf16.mxu0 %vm3276_vm2, %v12519_v54  ;;  %11848 = vmatpush3.bf16.msra.mxu0 %v12530_v29 }
0x128f   :  { %11849 = vmatprep.subr.bf16.mxu0 %v12532_v13 }
0x1292   :  { %11850 = vmatpush3.bf16.msra.mxu0 %v12532_v13 }
0x1293   :  { %11851 = vmatprep.subr.bf16.mxu0 %v12534_v37 }
0x1295   :  { %5981 = vmatmul.mubr.bf16.gmra.mxu0 %v12521_v31 }
0x1296   :  { %9736 = vmatprep.mubr.msk.bf16.mxu0 %vm3276_vm2, %v12522_v47  ;;  %11852 = vmatpush3.bf16.msra.mxu0 %v12534_v37 }
0x1297   :  { %11853 = vmatprep.subr.bf16.mxu0 %v12536_v15 }
0x129a   :  { %11854 = vmatpush3.bf16.msra.mxu0 %v12536_v15 }
0x129b   :  { %11855 = vmatprep.subr.bf16.mxu0 %v12538_v49 }
0x129d   :  { %5989 = vmatmul.mubr.bf16.gmra.mxu0 %v12524_v52 }
0x129e   :  { %11856 = vmatpush3.bf16.msra.mxu0 %v12538_v49 }
0x129f   :  { %11857 = vmatprep.subr.bf16.mxu0 %v12540_v59 }
0x12a2   :  { %11858 = vmatpush3.bf16.msra.mxu0 %v12540_v59 }
0x12a3   :  { %11891 = vmatprep.subr.bf16.mxu0 %v14894_v27 }
0x1345   :  { %v14898_v25 = vpop.f32.mrf.mxu0 }
0x1346   :  { %v6011_v22 = vmul.f32 %v14898_v25, %v14898_v25 }
0x1347   :  { %v5968_v3 = vpop.f32.mrf.mxu0 }
0x1349   :  { %v14900_v44 = vpop.f32.mrf.mxu0 }
0x134a   :  { %v6012_v9 = vmul.f32 %v14900_v44, %v14900_v44  ;;  %v5997_v5 = vadd.f32 %v14900_v44, %v14898_v25 }
0x134b   :  { %v5971_v28 = vpop.f32.mrf.mxu0 }
0x134c   :  { %v6019_v7 = vadd.f32 %v6012_v9, %v6011_v22 }
0x134d   :  { %v14902_v18 = vpop.f32.mrf.mxu0 }
0x134e   :  { %v6013_v58 = vmul.f32 %v14902_v18, %v14902_v18  ;;  %v5998_v61 = vadd.f32 %v5997_v5, %v14902_v18 }
0x134f   :  { %v5976_v62 = vpop.f32.mrf.mxu0 }
0x1350   :  { %v6020_v10 = vadd.f32 %v6019_v7, %v6013_v58 }
0x1351   :  { %v5977_v55 = vpop.f32.mrf.mxu0 }
0x1352   :  { %v6014_v8 = vmul.f32 %v5977_v55, %v5977_v55  ;;  %v5999_v35 = vadd.f32 %v5998_v61, %v5977_v55 }
0x1353   :  { %v5979_v60 = vpop.f32.mrf.mxu0 }
0x1354   :  { %v6021_v23 = vadd.f32 %v6020_v10, %v6014_v8 }
0x1355   :  { %v5982_v26 = vpop.f32.mrf.mxu0 }
0x1356   :  { %v6015_v51 = vmul.f32 %v5982_v26, %v5982_v26  ;;  %v6000_v12 = vadd.f32 %v5999_v35, %v5982_v26 }
0x1357   :  { %v5984_v34 = vpop.f32.mrf.mxu0 }
0x1358   :  { %v6022_v39 = vadd.f32 %v6021_v23, %v6015_v51  ;;  %v12544_v51 = vld [vmem:[%s16117_s15 + $0xf0] sm:$0xff]  }
0x1359   :  { %v5985_v42 = vpop.f32.mrf.mxu0 }
0x135a   :  { %v6016_v40 = vmul.f32 %v5985_v42, %v5985_v42  ;;  %v6001_v43 = vadd.f32 %v6000_v12, %v5985_v42 }
0x135b   :  { %v5987_v36 = vpop.f32.mrf.mxu0 }
0x135c   :  { %v6023_v50 = vadd.f32 %v6022_v39, %v6016_v40  ;;  %v12545_v40 = vld [vmem:[%s16117_s15 + $0xa8] sm:$0xff]   ;;  %v12548_v39 = vld [vmem:[%s16117_s15 + $0xe0] sm:$0xff]  }
0x135d   :  { %v5990_v32 = vpop.f32.mrf.mxu0 }
0x135e   :  { %v6017_v4 = vmul.f32 %v5990_v32, %v5990_v32  ;;  %v6002_v38 = vadd.f32 %v6001_v43, %v5990_v32  ;;  %v12549_v43 = vld [vmem:[%s16117_s15 + $0x98] sm:$0xff]  }
0x135f   :  { %v5992_v1 = vpop.f32.mrf.mxu0 }
0x1360   :  { %v6024_v57 = vadd.f32 %v6023_v50, %v6017_v4  ;;  %v12550_v4 = vld [vmem:[%s16117_s15 + $0xd8] sm:$0xff]   ;;  %v12551_v1 = vld [vmem:[%s16117_s15 + $0x90] sm:$0xff]  }
0x1361   :  { %v5993_v14 = vpop.f32.mrf.mxu0  ;;  %v12552_v50 = vld [vmem:[%s16117_s15 + $0xd0] sm:$0xff]  }
0x1362   :  { %v6003_v41 = vadd.f32 %v6002_v38, %v5993_v14  ;;  %v6018_v45 = vmul.f32 %v5993_v14, %v5993_v14  ;;  %v12553_v38 = vld [vmem:[%s16117_s15 + $0x88] sm:$0xff]  }
0x1363   :  { %v5995_v46 = vpop.f32.mrf.mxu0 }
0x1364   :  { %v6004_v20 = vrot.slane %v6003_v41, 4  ;;  %v6025_v16 = vadd.f32 %v6024_v57, %v6018_v45  ;;  %v12555_v57 = vld [vmem:[%s16117_s15 + $0x80] sm:$0xff]   ;;  %v12557_v45 = vld [vmem:[%s16117_s15 + $0x138] sm:$0xff]  }
0x1365   :  { %v12558_v46 = vld [vmem:[%s16117_s15 + $0x178] sm:$0xff]  }
0x1366   :  { %v6005_v17 = vadd.f32 %v6004_v20, %v6003_v41  ;;  %v6026_v21 = vrot.slane %v6025_v16, 4  ;;  %v12556_v41 = vld [vmem:[%s16117_s15 + $0xc0] sm:$0xff]   ;;  %v12559_v20 = vld [vmem:[%s16117_s15 + $0x130] sm:$0xff]  }
0x1368   :  { %v6006_v30 = vrot.slane %v6005_v17, 2  ;;  %v6027_v54 = vadd.f32 %v6026_v21, %v6025_v16  ;;  %v12560_v16 = vld [vmem:[%s16117_s15 + $0x170] sm:$0xff]   ;;  %v12562_v21 = vld [vmem:[%s16117_s15 + $0x168] sm:$0xff]  }
0x136a   :  { %v6007_v31 = vadd.f32 %v6006_v30, %v6005_v17  ;;  %v6028_v47 = vrot.slane %v6027_v54, 2  ;;  %v12561_v17 = vld [vmem:[%s16117_s15 + $0x128] sm:$0xff]   ;;  %v12563_v30 = vld [vmem:[%s16117_s15 + $0x120] sm:$0xff]  }
0x136c   :  { %v6008_v52 = vrot.slane %v6007_v31, 1  ;;  %v6029_v19 = vadd.f32 %v6028_v47, %v6027_v54  ;;  %v12564_v54 = vld [vmem:[%s16117_s15 + $0x160] sm:$0xff]   ;;  %v12566_v47 = vld [vmem:[%s16117_s15 + $0x158] sm:$0xff]  }
0x136e   :  { %v6009_v56 = vadd.f32 %v6008_v52, %v6007_v31  ;;  %v6030_v33 = vrot.slane %v6029_v19, 1  ;;  %v12565_v31 = vld [vmem:[%s16117_s15 + $0x118] sm:$0xff]   ;;  %v12567_v52 = vld [vmem:[%s16117_s15 + $0x110] sm:$0xff]  }
0x1370   :  { %v6010_v63 = vmul.f32 0.015625, %v6009_v56  ;;  %v6031_v53 = vadd.f32 %v6030_v33, %v6029_v19  ;;  %v12568_v19 = vld [vmem:[%s16117_s15 + $0x150] sm:$0xff]   ;;  %v12569_v56 = vld [vmem:[%s16117_s15 + $0x108] sm:$0xff]  }
0x1371   :  { %v12570_v33 = vld [vmem:[%s16117_s15 + $0x148] sm:$0xff]  }
0x1372   :  { %v6032_v29 = vmul.f32 0.015625, %v6031_v53  ;;  %v6033_v6 = vmul.f32 %v6010_v63, %v6010_v63  ;;  %v6036_v24 = vsub.f32 %v14898_v25, %v6010_v63  ;;  %v6037_v15 = vsub.f32 %v14900_v44, %v6010_v63  ;;  %v12572_v53 = vld [vmem:[%s16117_s15 + $0x140] sm:$0xff]  }
0x1373   :  { %v6038_v49 = vsub.f32 %v14902_v18, %v6010_v63  ;;  %v6039_v11 = vsub.f32 %v5977_v55, %v6010_v63  ;;  %v6040_v59 = vsub.f32 %v5982_v26, %v6010_v63  ;;  %v6041_v3 = vsub.f32 %v5985_v42, %v6010_v63  ;;  %v12543_v42 = vld [vmem:[%s16117_s15 + $0xb0] sm:$0xff]  }
0x1374   :  { %v6034_v13 = vsub.f32 %v6032_v29, %v6033_v6  ;;  %v6042_v58 = vsub.f32 %v5990_v32, %v6010_v63  ;;  %v6043_v34 = vsub.f32 %v5993_v14, %v6010_v63  ;;  %v12546_v32 = vld [vmem:[%s16117_s15 + $0xe8] sm:$0xff]   ;;  %v12571_v63 = vld [vmem:[%s16117_s15 + $0x100] sm:$0xff]   ;;  %v12573_v29 = vld [vmem:[%s16117_s15 + $0x1b8] sm:$0xff]  }
0x1375   :  { %v12554_v14 = vld [vmem:[%s16117_s15 + $0xc8] sm:$0xff]   ;;  %v12574_v6 = vld [vmem:[%s16117_s15 + $0x1f8] sm:$0xff]  }
0x1376   :  { %v6035_v48 = vmax.f32 %v6034_v13, 0.0  ;;  %v12575_v13 = vld [vmem:[%s16117_s15 + $0x1b0] sm:$0xff]  }
0x1378   :  { %v6044_v37 = vadd.f32 1e-05, %v6035_v48  ;;  %v12576_v48 = vld [vmem:[%s16117_s15 + $0x1f0] sm:$0xff]  }
0x137a   :  { %12733 = vrsqrt.f32 %v6044_v37  ;;  %v12577_v37 = vld [vmem:[%s16117_s15 + $0x1a8] sm:$0xff]  }
0x1387   :  { %v12734_v2 = vpop.eup %12733 }
0x1388   :  { %v6046_v28 = vmul.f32 %v12734_v2, %v6036_v24  ;;  %v6047_v62 = vmul.f32 %v12734_v2, %v6037_v15  ;;  %v6048_v60 = vmul.f32 %v12734_v2, %v6038_v49  ;;  %v6049_v9 = vmul.f32 %v12734_v2, %v6039_v11  ;;  %v12578_v24 = vld [vmem:[%s16117_s15 + $0x1e8] sm:$0xff]   ;;  %v12579_v15 = vld [vmem:[%s16117_s15 + $0x1a0] sm:$0xff]   ;;  %v12581_v49 = vld [vmem:[%s16117_s15 + $0x198] sm:$0xff]  }
0x1389   :  { %v6050_v22 = vmul.f32 %v12734_v2, %v6040_v59  ;;  %v6051_v5 = vmul.f32 %v12734_v2, %v6041_v3  ;;  %v6052_v18 = vmul.f32 %v12734_v2, %v6042_v58  ;;  %v6053_v55 = vmul.f32 %v12734_v2, %v6043_v34  ;;  %v12580_v2 = vld [vmem:[%s16117_s15 + $0x1e0] sm:$0xff]   ;;  %v12582_v11 = vld [vmem:[%s16117_s15 + $0x1d8] sm:$0xff]   ;;  %v12583_v59 = vld [vmem:[%s16117_s15 + $0x190] sm:$0xff]  }
0x138a   :  { %v6054_v7 = vmax.f32 %v6046_v28, 0.0  ;;  %v6055_v61 = vmax.f32 %v6047_v62, 0.0  ;;  %v6056_v8 = vmax.f32 %v6048_v60, 0.0  ;;  %v6057_v25 = vmax.f32 %v6049_v9, 0.0  ;;  %v12584_v3 = vld [vmem:[%s16117_s15 + $0x1d0] sm:$0xff]   ;;  %v12585_v28 = vld [vmem:[%s16117_s15 + $0x188] sm:$0xff]  }
0x138b   :  { %v6058_v10 = vmax.f32 %v6050_v22, 0.0  ;;  %v6059_v44 = vmax.f32 %v6051_v5, 0.0  ;;  %v6060_v23 = vmax.f32 %v6052_v18, 0.0  ;;  %v6061_v12 = vmax.f32 %v6053_v55, 0.0  ;;  %v12586_v62 = vld [vmem:[%s16117_s15 + $0x1c8] sm:$0xff]   ;;  %v12587_v60 = vld [vmem:[%s16117_s15 + $0x180] sm:$0xff]  }
0x138c   :  { %v14916_v35 = vpack.c.bf16 %v6055_v61, %v6054_v7  ;;  %v14918_v26 = vpack.c.bf16 %v6057_v25, %v6056_v8  ;;  %v12588_v9 = vld [vmem:[%s16117_s15 + $0x1c0] sm:$0xff]   ;;  %v12589_v22 = vld [vmem:[%s16117_s15 + $0x238] sm:$0xff]   ;;  %v12590_v5 = vld [vmem:[%s16117_s15 + $0x230] sm:$0xff]  }
0x138d   :  { %v14930_v36 = vpack.c.bf16 %v6059_v44, %v6058_v10  ;;  %v12591_v58 = vld [vmem:[%s16117_s15 + $0x228] sm:$0xff]   ;;  %v12592_v34 = vld [vmem:[%s16117_s15 + $0x220] sm:$0xff]   ;;  %v12593_v7 = vld [vmem:[%s16117_s15 + $0x218] sm:$0xff]  }
0x138e   :  { %11835 = vmatprep.mubr.bf16.mxu1 %v14916_v35  ;;  %11859 = vmatprep.mubr.bf16.mxu0 %v14916_v35  ;;  %v12594_v61 = vld [vmem:[%s16117_s15 + $0x210] sm:$0xff]   ;;  %v12595_v8 = vld [vmem:[%s16117_s15 + $0x208] sm:$0xff]   ;;  %v12596_v25 = vld [vmem:[%s16117_s15 + $0x200] sm:$0xff]  }
0x138f   :  { %11836 = vmatmul.mubr.bf16.vlgmr.msra.gmra.mxu1 %v14918_v26  ;;  %11860 = vmatmul.mubr.bf16.vlgmr.msra.gmra.mxu0 %v14918_v26  ;;  %v12599_v10 = vld [vmem:[%s16118_s16 + $0x4] ss:$20 sps:$4 sm:$0xff]  }
0x1390   :  { %11868 = vmatpush3.bf16.msra.mxu1 %v14889_v0  ;;  %11892 = vmatpush3.bf16.msra.mxu0 %v14894_v27  ;;  %v14942_v0 = vpack.c.bf16 %v6061_v12, %v6060_v23  ;;  %v12547_v27 = vld [vmem:[%s16117_s15 + $0xa0] sm:$0xff]  }
0x1391   :  { %11839 = vmatprep.mubr.bf16.mxu1 %v14930_v36  ;;  %11863 = vmatprep.mubr.bf16.mxu0 %v14930_v36 }
0x1392   :  { %11869 = vmatprep.subr.bf16.mxu1 %v12543_v42  ;;  %11893 = vmatprep.subr.bf16.mxu0 %v12544_v51 }
0x1394   :  { %11870 = vmatpush3.bf16.msra.mxu1 %v12543_v42  ;;  %11894 = vmatpush3.bf16.msra.mxu0 %v12544_v51 }
0x1395   :  { %11871 = vmatprep.subr.bf16.mxu1 %v12545_v40  ;;  %11895 = vmatprep.subr.bf16.mxu0 %v12546_v32 }
0x1397   :  { %11840 = vmatmul.mubr.bf16.gmra.mxu1 %v14942_v0  ;;  %11864 = vmatmul.mubr.bf16.gmra.mxu0 %v14942_v0 }
0x1398   :  { %11872 = vmatpush3.bf16.msra.mxu1 %v12545_v40  ;;  %11896 = vmatpush3.bf16.msra.mxu0 %v12546_v32  ;;  %v12626_v40 = vld [vmem:[%s16118_s16 + $0xc] ss:$20 sps:$4 sm:$0xff]  }
0x1399   :  { %11883 = vmatprep.mubr.bf16.mxu1 %v14916_v35  ;;  %11907 = vmatprep.mubr.bf16.mxu0 %v14916_v35 }
0x139a   :  { %11873 = vmatprep.subr.bf16.mxu1 %v12547_v27  ;;  %11897 = vmatprep.subr.bf16.mxu0 %v12548_v39 }
0x139c   :  { %11874 = vmatpush3.bf16.msra.mxu1 %v12547_v27  ;;  %11898 = vmatpush3.bf16.msra.mxu0 %v12548_v39 }
0x139d   :  { %11875 = vmatprep.subr.bf16.mxu1 %v12549_v43  ;;  %11899 = vmatprep.subr.bf16.mxu0 %v12550_v4 }
0x13a0   :  { %11876 = vmatpush3.bf16.msra.mxu1 %v12549_v43  ;;  %11900 = vmatpush3.bf16.msra.mxu0 %v12550_v4 }
0x13a1   :  { %11877 = vmatprep.subr.bf16.mxu1 %v12551_v1  ;;  %11901 = vmatprep.subr.bf16.mxu0 %v12552_v50 }
0x13a4   :  { %11878 = vmatpush3.bf16.msra.mxu1 %v12551_v1  ;;  %11902 = vmatpush3.bf16.msra.mxu0 %v12552_v50 }
0x13a5   :  { %11879 = vmatprep.subr.bf16.mxu1 %v12553_v38  ;;  %11903 = vmatprep.subr.bf16.mxu0 %v12554_v14 }
0x13a8   :  { %11880 = vmatpush3.bf16.msra.mxu1 %v12553_v38  ;;  %11904 = vmatpush3.bf16.msra.mxu0 %v12554_v14 }
0x13a9   :  { %11881 = vmatprep.subr.bf16.mxu1 %v12555_v57  ;;  %11905 = vmatprep.subr.bf16.mxu0 %v12556_v41 }
0x13ac   :  { %11882 = vmatpush3.bf16.msra.mxu1 %v12555_v57  ;;  %11906 = vmatpush3.bf16.msra.mxu0 %v12556_v41 }
0x13ad   :  { %11915 = vmatprep.subr.bf16.mxu1 %v12557_v45  ;;  %11939 = vmatprep.subr.bf16.mxu0 %v12558_v46 }
0x13af   :  { %11884 = vmatmul.mubr.bf16.vlgmr.msra.gmra.mxu1 %v14918_v26  ;;  %11908 = vmatmul.mubr.bf16.vlgmr.msra.gmra.mxu0 %v14918_v26 }
0x13b0   :  { %11887 = vmatprep.mubr.bf16.mxu1 %v14930_v36  ;;  %11911 = vmatprep.mubr.bf16.mxu0 %v14930_v36 }
0x13b1   :  { %11916 = vmatpush3.bf16.msra.mxu1 %v12557_v45  ;;  %11940 = vmatpush3.bf16.msra.mxu0 %v12558_v46 }
0x13b2   :  { %11917 = vmatprep.subr.bf16.mxu1 %v12559_v20  ;;  %11941 = vmatprep.subr.bf16.mxu0 %v12560_v16 }
0x13b5   :  { %11918 = vmatpush3.bf16.msra.mxu1 %v12559_v20  ;;  %11942 = vmatpush3.bf16.msra.mxu0 %v12560_v16 }
0x13b6   :  { %11919 = vmatprep.subr.bf16.mxu1 %v12561_v17  ;;  %11943 = vmatprep.subr.bf16.mxu0 %v12562_v21 }
0x13b7   :  { %11888 = vmatmul.mubr.bf16.gmra.mxu1 %v14942_v0  ;;  %11912 = vmatmul.mubr.bf16.gmra.mxu0 %v14942_v0 }
0x13b8   :  { %11931 = vmatprep.mubr.bf16.mxu1 %v14916_v35  ;;  %11955 = vmatprep.mubr.bf16.mxu0 %v14916_v35 }
0x13b9   :  { %11920 = vmatpush3.bf16.msra.mxu1 %v12561_v17  ;;  %11944 = vmatpush3.bf16.msra.mxu0 %v12562_v21 }
0x13ba   :  { %11921 = vmatprep.subr.bf16.mxu1 %v12563_v30  ;;  %11945 = vmatprep.subr.bf16.mxu0 %v12564_v54 }
0x13bd   :  { %11922 = vmatpush3.bf16.msra.mxu1 %v12563_v30  ;;  %11946 = vmatpush3.bf16.msra.mxu0 %v12564_v54 }
0x13be   :  { %11923 = vmatprep.subr.bf16.mxu1 %v12565_v31  ;;  %11947 = vmatprep.subr.bf16.mxu0 %v12566_v47 }
0x13c1   :  { %11924 = vmatpush3.bf16.msra.mxu1 %v12565_v31  ;;  %11948 = vmatpush3.bf16.msra.mxu0 %v12566_v47 }
0x13c2   :  { %11925 = vmatprep.subr.bf16.mxu1 %v12567_v52  ;;  %11949 = vmatprep.subr.bf16.mxu0 %v12568_v19 }
0x13c5   :  { %11926 = vmatpush3.bf16.msra.mxu1 %v12567_v52  ;;  %11950 = vmatpush3.bf16.msra.mxu0 %v12568_v19 }
0x13c6   :  { %11927 = vmatprep.subr.bf16.mxu1 %v12569_v56  ;;  %11951 = vmatprep.subr.bf16.mxu0 %v12570_v33 }
0x13c9   :  { %11928 = vmatpush3.bf16.msra.mxu1 %v12569_v56  ;;  %11952 = vmatpush3.bf16.msra.mxu0 %v12570_v33 }
0x13ca   :  { %11929 = vmatprep.subr.bf16.mxu1 %v12571_v63  ;;  %11953 = vmatprep.subr.bf16.mxu0 %v12572_v53 }
0x13cd   :  { %11930 = vmatpush3.bf16.msra.mxu1 %v12571_v63  ;;  %11954 = vmatpush3.bf16.msra.mxu0 %v12572_v53 }
0x13ce   :  { %11963 = vmatprep.subr.bf16.mxu1 %v12573_v29  ;;  %11987 = vmatprep.subr.bf16.mxu0 %v12574_v6 }
0x13d0   :  { %11932 = vmatmul.mubr.bf16.vlgmr.msra.gmra.mxu1 %v14918_v26  ;;  %11956 = vmatmul.mubr.bf16.vlgmr.msra.gmra.mxu0 %v14918_v26 }
0x13d1   :  { %11935 = vmatprep.mubr.bf16.mxu1 %v14930_v36  ;;  %11959 = vmatprep.mubr.bf16.mxu0 %v14930_v36 }
0x13d2   :  { %11964 = vmatpush3.bf16.msra.mxu1 %v12573_v29  ;;  %11988 = vmatpush3.bf16.msra.mxu0 %v12574_v6 }
0x13d3   :  { %11965 = vmatprep.subr.bf16.mxu1 %v12575_v13  ;;  %11989 = vmatprep.subr.bf16.mxu0 %v12576_v48 }
0x13d6   :  { %11966 = vmatpush3.bf16.msra.mxu1 %v12575_v13  ;;  %11990 = vmatpush3.bf16.msra.mxu0 %v12576_v48 }
0x13d7   :  { %11967 = vmatprep.subr.bf16.mxu1 %v12577_v37  ;;  %11991 = vmatprep.subr.bf16.mxu0 %v12578_v24 }
0x13d8   :  { %11936 = vmatmul.mubr.bf16.gmra.mxu1 %v14942_v0  ;;  %11960 = vmatmul.mubr.bf16.gmra.mxu0 %v14942_v0 }
0x13d9   :  { %11979 = vmatprep.mubr.bf16.mxu1 %v14916_v35  ;;  %12003 = vmatprep.mubr.bf16.mxu0 %v14916_v35 }
0x13da   :  { %11968 = vmatpush3.bf16.msra.mxu1 %v12577_v37  ;;  %11992 = vmatpush3.bf16.msra.mxu0 %v12578_v24 }
0x13db   :  { %11969 = vmatprep.subr.bf16.mxu1 %v12579_v15  ;;  %11993 = vmatprep.subr.bf16.mxu0 %v12580_v2 }
0x13de   :  { %11970 = vmatpush3.bf16.msra.mxu1 %v12579_v15  ;;  %11994 = vmatpush3.bf16.msra.mxu0 %v12580_v2 }
0x13df   :  { %11971 = vmatprep.subr.bf16.mxu1 %v12581_v49  ;;  %11995 = vmatprep.subr.bf16.mxu0 %v12582_v11 }
0x13e2   :  { %11972 = vmatpush3.bf16.msra.mxu1 %v12581_v49  ;;  %11996 = vmatpush3.bf16.msra.mxu0 %v12582_v11 }
0x13e3   :  { %11973 = vmatprep.subr.bf16.mxu1 %v12583_v59  ;;  %11997 = vmatprep.subr.bf16.mxu0 %v12584_v3 }
0x13e6   :  { %11974 = vmatpush3.bf16.msra.mxu1 %v12583_v59  ;;  %11998 = vmatpush3.bf16.msra.mxu0 %v12584_v3 }
0x13e7   :  { %11975 = vmatprep.subr.bf16.mxu1 %v12585_v28  ;;  %11999 = vmatprep.subr.bf16.mxu0 %v12586_v62 }
0x13ea   :  { %11976 = vmatpush3.bf16.msra.mxu1 %v12585_v28  ;;  %12000 = vmatpush3.bf16.msra.mxu0 %v12586_v62 }
0x13eb   :  { %11977 = vmatprep.subr.bf16.mxu1 %v12587_v60  ;;  %12001 = vmatprep.subr.bf16.mxu0 %v12588_v9 }
0x13ee   :  { %11978 = vmatpush3.bf16.msra.mxu1 %v12587_v60  ;;  %12002 = vmatpush3.bf16.msra.mxu0 %v12588_v9  ;;  %v12597_v60 = vld [vmem:[%s16118_s16] ss:$20 sps:$4 sm:$0xff]  }
0x13ef   :  { %12011 = vmatprep.subr.bf16.mxu1 %v12589_v22 }
0x13f1   :  { %11980 = vmatmul.mubr.bf16.vlgmr.msra.gmra.mxu1 %v14918_v26  ;;  %12004 = vmatmul.mubr.bf16.vlgmr.msra.gmra.mxu0 %v14918_v26 }
0x13f2   :  { %11983 = vmatprep.mubr.bf16.mxu1 %v14930_v36  ;;  %12007 = vmatprep.mubr.bf16.mxu0 %v14930_v36 }
0x13f3   :  { %12012 = vmatpush3.bf16.msra.mxu1 %v12589_v22 }
0x13f4   :  { %12013 = vmatprep.subr.bf16.mxu1 %v12590_v5 }
0x13f7   :  { %12014 = vmatpush3.bf16.msra.mxu1 %v12590_v5  ;;  %v12602_v5 = vld [vmem:[%s16118_s16 + $0x2c] ss:$20 sps:$4 sm:$0xff]  }
0x13f8   :  { %12015 = vmatprep.subr.bf16.mxu1 %v12591_v58 }
0x13f9   :  { %11984 = vmatmul.mubr.bf16.gmra.mxu1 %v14942_v0  ;;  %12008 = vmatmul.mubr.bf16.gmra.mxu0 %v14942_v0 }
0x13fa   :  { %12027 = vmatprep.mubr.bf16.mxu1 %v14916_v35  ;;  %7991 = vmatprep.mubr.bf16.mxu0 %v12599_v10 }
0x13fb   :  { %12016 = vmatpush3.bf16.msra.mxu1 %v12591_v58 }
0x13fc   :  { %12017 = vmatprep.subr.bf16.mxu1 %v12592_v34 }
0x13ff   :  { %12018 = vmatpush3.bf16.msra.mxu1 %v12592_v34 }
0x1400   :  { %12019 = vmatprep.subr.bf16.mxu1 %v12593_v7 }
0x1403   :  { %12020 = vmatpush3.bf16.msra.mxu1 %v12593_v7  ;;  %v12600_v7 = vld [vmem:[%s16118_s16 + $0x28] ss:$20 sps:$4 sm:$0xff]  }
0x1404   :  { %12021 = vmatprep.subr.bf16.mxu1 %v12594_v61 }
0x1407   :  { %12022 = vmatpush3.bf16.msra.mxu1 %v12594_v61 }
0x1408   :  { %12023 = vmatprep.subr.bf16.mxu1 %v12595_v8 }
0x140b   :  { %12024 = vmatpush3.bf16.msra.mxu1 %v12595_v8 }
0x140c   :  { %12025 = vmatprep.subr.bf16.mxu1 %v12596_v25 }
0x140f   :  { %12026 = vmatpush3.bf16.msra.mxu1 %v12596_v25  ;;  %v12605_v25 = vld [vmem:[%s16118_s16 + $0x54] ss:$20 sps:$4 sm:$0xff]  }
0x1412   :  { %12028 = vmatmul.mubr.bf16.vlgmr.msra.gmra.mxu1 %v14918_v26 }
0x1413   :  { %12031 = vmatprep.mubr.bf16.mxu1 %v14930_v36 }
0x141a   :  { %12032 = vmatmul.mubr.bf16.gmra.mxu1 %v14942_v0 }
0x141b   :  { %8152 = vmatprep.mubr.bf16.mxu1 %v12626_v40 }
0x144f   :  { %v15127_v44 = vpop.f32.mrf.mxu1  ;;  %v11861_v35 = vpop.f32.mrf.mxu0 }
0x1451   :  { %v15129_v18 = vpop.f32.mrf.mxu1  ;;  %v6302_v55 = vpop.f32.mrf.mxu0 }
0x1453   :  { %v11838_v42 = vpop.f32.mrf.mxu1  ;;  %v11862_v51 = vpop.f32.mrf.mxu0 }
0x1454   :  { %v7480_v33 = vpack.c.bf16 %v11862_v51, %v11861_v35  ;;  %v7476_v11 = vpack.c.bf16 %v11838_v42, %v15127_v44  ;;  %v12603_v35 = vld [vmem:[%s16118_s16 + $0x50] ss:$20 sps:$4 sm:$0xff]  }
0x1455   :  { %v15131_v23 = vpop.f32.mrf.mxu1  ;;  %v6305_v26 = vpop.f32.mrf.mxu0  ;;  %v12608_v42 = vld [vmem:[%s16118_s16 + $0x7c] ss:$20 sps:$4 sm:$0xff]  }
0x1456   :  { %v7479_v29 = vpack.c.bf16 %v6305_v26, %v6302_v55  ;;  %v7475_v62 = vpack.c.bf16 %v15131_v23, %v15129_v18 }
0x1457   :  { %v11841_v12 = vpop.f32.mrf.mxu1  ;;  %v11865_v36 = vpop.f32.mrf.mxu0 }
0x1459   :  { %v6180_v32 = vpop.f32.mrf.mxu1  ;;  %v6318_v0 = vpop.f32.mrf.mxu0 }
0x145b   :  { %v11842_v27 = vpop.f32.mrf.mxu1  ;;  %v11866_v39 = vpop.f32.mrf.mxu0 }
0x145c   :  { %v7482_v30 = vpack.c.bf16 %v11866_v39, %v11865_v36  ;;  %v7478_v48 = vpack.c.bf16 %v11842_v27, %v11841_v12  ;;  %v12606_v36 = vld [vmem:[%s16118_s16 + $0x78] ss:$20 sps:$4 sm:$0xff]  }
0x145d   :  { %v6183_v43 = vpop.f32.mrf.mxu1  ;;  %v6321_v4 = vpop.f32.mrf.mxu0 }
0x145e   :  { %v7481_v52 = vpack.c.bf16 %v6321_v4, %v6318_v0  ;;  %v7477_v24 = vpack.c.bf16 %v6183_v43, %v6180_v32  ;;  %v12611_v32 = vld [vmem:[%s16118_s16 + $0xa4] ss:$20 sps:$4 sm:$0xff]  }
0x146f   :  { %v11885_v1 = vpop.f32.mrf.mxu1  ;;  %v11909_v50 = vpop.f32.mrf.mxu0 }
0x1471   :  { %v6578_v38 = vpop.f32.mrf.mxu0  ;;  %v6440_v14 = vpop.f32.mrf.mxu1 }
0x1473   :  { %v11910_v57 = vpop.f32.mrf.mxu0  ;;  %v11886_v45 = vpop.f32.mrf.mxu1 }
0x1474   :  { %v7488_v19 = vpack.c.bf16 %v11910_v57, %v11909_v50  ;;  %v7484_v15 = vpack.c.bf16 %v11886_v45, %v11885_v1  ;;  %v12609_v1 = vld [vmem:[%s16118_s16 + $0xa0] ss:$20 sps:$4 sm:$0xff]  }
0x1475   :  { %v6581_v41 = vpop.f32.mrf.mxu0  ;;  %v6443_v16 = vpop.f32.mrf.mxu1 }
0x1476   :  { %v7487_v63 = vpack.c.bf16 %v6581_v41, %v6578_v38  ;;  %v7483_v59 = vpack.c.bf16 %v6443_v16, %v6440_v14  ;;  %v12614_v38 = vld [vmem:[%s16118_s16 + $0xcc] ss:$20 sps:$4 sm:$0xff]  }
0x1477   :  { %v11913_v46 = vpop.f32.mrf.mxu0  ;;  %v11889_v47 = vpop.f32.mrf.mxu1 }
0x1479   :  { %v6594_v20 = vpop.f32.mrf.mxu0  ;;  %v6456_v56 = vpop.f32.mrf.mxu1 }
0x147b   :  { %v11914_v17 = vpop.f32.mrf.mxu0  ;;  %v11890_v53 = vpop.f32.mrf.mxu1 }
0x147c   :  { %v7490_v21 = vpack.c.bf16 %v11914_v17, %v11913_v46  ;;  %v7486_v6 = vpack.c.bf16 %v11890_v53, %v11889_v47  ;;  %v12612_v17 = vld [vmem:[%s16118_s16 + $0xc8] ss:$20 sps:$4 sm:$0xff]  }
0x147d   :  { %v6597_v54 = vpop.f32.mrf.mxu0  ;;  %v6459_v13 = vpop.f32.mrf.mxu1 }
0x147e   :  { %v7489_v31 = vpack.c.bf16 %v6597_v54, %v6594_v20  ;;  %10733 = vmatprep.subr.bf16.mxu0 %v7490_v21  ;;  %v7485_v37 = vpack.c.bf16 %v6459_v13, %v6456_v56  ;;  %v12615_v56 = vld [vmem:[%s16118_s16 + $0xf0] ss:$20 sps:$4 sm:$0xff]  }
0x147f   :  { %10734 = vmatpush3.bf16.msra.mxu0 %v7482_v30  ;;  %v12617_v30 = vld [vmem:[%s16118_s16 + $0xf4] ss:$20 sps:$4 sm:$0xff]  }
0x1480   :  { %10735 = vmatprep.subr.bf16.mxu0 %v7489_v31 }
0x1483   :  { %10736 = vmatpush3.bf16.msra.mxu0 %v7481_v52 }
0x1484   :  { %10737 = vmatprep.subr.bf16.mxu0 %v7488_v19 }
0x1487   :  { %10738 = vmatpush3.bf16.msra.mxu0 %v7480_v33 }
0x1488   :  { %10739 = vmatprep.subr.bf16.mxu0 %v7487_v63  ;;  %v12620_v63 = vld [vmem:[%s16118_s16 + $0x11c] ss:$20 sps:$4 sm:$0xff]  }
0x148b   :  { %10740 = vmatpush3.bf16.msra.mxu0 %v7479_v29 }
0x148c   :  { %10741 = vmatprep.subr.bf16.mxu0 %v7486_v6 }
0x148f   :  { %10742 = vmatpush3.bf16.msra.mxu0 %v7478_v48 }
0x1490   :  { %10743 = vmatprep.subr.bf16.mxu0 %v7485_v37  ;;  %v15136_v2 = vpop.f32.mrf.mxu1  ;;  %v15138_v49 = vpop.f32.mrf.mxu0  ;;  %v12618_v37 = vld [vmem:[%s16118_s16 + $0x118] ss:$20 sps:$4 sm:$0xff]  }
0x1492   :  { %v15141_v3 = vpop.f32.mrf.mxu1  ;;  %v15143_v28 = vpop.f32.mrf.mxu0 }
0x1493   :  { %10744 = vmatpush3.bf16.msra.mxu0 %v7477_v24 }
0x1494   :  { %10745 = vmatprep.subr.bf16.mxu0 %v7484_v15  ;;  %v15150_v9 = vpop.f32.mrf.mxu1  ;;  %v11958_v22 = vpop.f32.mrf.mxu0  ;;  %v12623_v15 = vld [vmem:[%s16118_s16 + $0x144] ss:$20 sps:$4 sm:$0xff]  }
0x1495   :  { %v7496_v47 = vpack.c.bf16 %v11958_v22, %v15138_v49 }
0x1496   :  { %v15155_v58 = vpop.f32.mrf.mxu1  ;;  %v15157_v34 = vpop.f32.mrf.mxu0 }
0x1497   :  { %10746 = vmatpush3.bf16.msra.mxu0 %v7476_v11  ;;  %v7495_v33 = vpack.c.bf16 %v15157_v34, %v15143_v28  ;;  %v7492_v28 = vpack.c.bf16 %v15150_v9, %v15136_v2  ;;  %v7491_v34 = vpack.c.bf16 %v15155_v58, %v15141_v3  ;;  %v12624_v2 = vld [vmem:[%s16118_s16 + $0x8] ss:$20 sps:$4 sm:$0xff]  }
0x1498   :  { %10747 = vmatprep.subr.bf16.mxu0 %v7483_v59  ;;  %v15162_v61 = vpop.f32.mrf.mxu1  ;;  %v11961_v8 = vpop.f32.mrf.mxu0  ;;  %v12632_v9 = vld [vmem:[%s16118_s16 + $0x34] ss:$20 sps:$4 sm:$0xff]  }
0x1499   :  { %v12627_v58 = vld [vmem:[%s16118_s16 + $0x168] ss:$20 sps:$4 sm:$0xff]  }
0x149a   :  { %v15167_v10 = vpop.f32.mrf.mxu1  ;;  %v6870_v44 = vpop.f32.mrf.mxu0 }
0x149b   :  { %10748 = vmatpush3.bf16.msra.mxu0 %v7475_v62 }
0x149c   :  { %v11938_v18 = vpop.f32.mrf.mxu1  ;;  %v11962_v55 = vpop.f32.mrf.mxu0 }
0x149d   :  { %v7498_v45 = vpack.c.bf16 %v11962_v55, %v11961_v8  ;;  %v7494_v6 = vpack.c.bf16 %v11938_v18, %v15162_v61  ;;  %v12638_v55 = vld [vmem:[%s16118_s16 + $0x5c] ss:$20 sps:$4 sm:$0xff]  }
0x149e   :  { %7992 = vmatmul.mubr.bf16.vlgmr.msra.gmra.mxu0 %v12597_v60  ;;  %v15175_v51 = vpop.f32.mrf.mxu1  ;;  %v6873_v23 = vpop.f32.mrf.mxu0 }
0x149f   :  { %7999 = vmatprep.mubr.bf16.mxu0 %v12602_v5  ;;  %v7497_v21 = vpack.c.bf16 %v6873_v23, %v6870_v44  ;;  %v7493_v24 = vpack.c.bf16 %v15175_v51, %v15167_v10  ;;  %v12621_v5 = vld [vmem:[%s16118_s16 + $0x140] ss:$20 sps:$4 sm:$0xff]   ;;  %v12630_v44 = vld [vmem:[%s16118_s16 + $0x30] ss:$20 sps:$4 sm:$0xff]   ;;  %v12636_v23 = vld [vmem:[%s16118_s16 + $0x58] ss:$20 sps:$4 sm:$0xff]  }
0x14a0   :  { %v12633_v51 = vld [vmem:[%s16118_s16 + $0x190] ss:$20 sps:$4 sm:$0xff]  }
0x14a6   :  { %8000 = vmatmul.mubr.bf16.gmra.mxu0 %v12600_v7  ;;  %v12629_v7 = vld [vmem:[%s16118_s16 + $0x16c] ss:$20 sps:$4 sm:$0xff]  }
0x14a7   :  { %8007 = vmatprep.mubr.bf16.mxu0 %v12605_v25 }
0x14ae   :  { %8008 = vmatmul.mubr.bf16.gmra.mxu0 %v12603_v35  ;;  %v12635_v35 = vld [vmem:[%s16118_s16 + $0x194] ss:$20 sps:$4 sm:$0xff]  }
0x14af   :  { %8015 = vmatprep.mubr.bf16.mxu0 %v12608_v42 }
0x14b1   :  { %v11981_v26 = vpop.f32.mrf.mxu1  ;;  %v12005_v12 = vpop.f32.mrf.mxu0 }
0x14b3   :  { %v7130_v40 = vpop.f32.mrf.mxu0  ;;  %v15183_v0 = vpop.f32.mrf.mxu1 }
0x14b5   :  { %v12006_v27 = vpop.f32.mrf.mxu0  ;;  %v11982_v43 = vpop.f32.mrf.mxu1 }
0x14b6   :  { %8016 = vmatmul.mubr.bf16.gmra.mxu0 %v12606_v36  ;;  %v7504_v54 = vpack.c.bf16 %v12006_v27, %v12005_v12  ;;  %v7500_v49 = vpack.c.bf16 %v11982_v43, %v11981_v26  ;;  %v12641_v26 = vld [vmem:[%s16118_s16 + $0x1bc] ss:$20 sps:$4 sm:$0xff]   ;;  %v12644_v12 = vld [vmem:[%s16118_s16 + $0x84] ss:$20 sps:$4 sm:$0xff]   ;;  %v12645_v27 = vld [vmem:[%s16118_s16 + $0x1e0] ss:$20 sps:$4 sm:$0xff]  }
0x14b7   :  { %v7133_v39 = vpop.f32.mrf.mxu0  ;;  %8023 = vmatprep.mubr.bf16.mxu0 %v12611_v32  ;;  %v6995_v14 = vpop.f32.mrf.mxu1  ;;  %v12639_v36 = vld [vmem:[%s16118_s16 + $0x1b8] ss:$20 sps:$4 sm:$0xff]  }
0x14b8   :  { %v7503_v52 = vpack.c.bf16 %v7133_v39, %v7130_v40  ;;  %v7499_v62 = vpack.c.bf16 %v6995_v14, %v15183_v0  ;;  %v12642_v40 = vld [vmem:[%s16118_s16 + $0x80] ss:$20 sps:$4 sm:$0xff]   ;;  %v12647_v32 = vld [vmem:[%s16118_s16 + $0x1e4] ss:$20 sps:$4 sm:$0xff]   ;;  %v12648_v39 = vld [vmem:[%s16118_s16 + $0xa8] ss:$20 sps:$4 sm:$0xff]  }
0x14b9   :  { %v12009_v4 = vpop.f32.mrf.mxu0  ;;  %v11985_v16 = vpop.f32.mrf.mxu1  ;;  %v12650_v0 = vld [vmem:[%s16118_s16 + $0xac] ss:$20 sps:$4 sm:$0xff]   ;;  %v12662_v14 = vld [vmem:[%s16118_s16 + $0xfc] ss:$20 sps:$4 sm:$0xff]  }
0x14ba   :  { %v12653_v43 = vld [vmem:[%s16118_s16 + $0x20c] ss:$20 sps:$4 sm:$0xff]  }
0x14bb   :  { %v7146_v50 = vpop.f32.mrf.mxu0  ;;  %v7008_v31 = vpop.f32.mrf.mxu1 }
0x14bd   :  { %v12010_v57 = vpop.f32.mrf.mxu0  ;;  %v11986_v19 = vpop.f32.mrf.mxu1 }
0x14be   :  { %v7506_v41 = vpack.c.bf16 %v12010_v57, %v12009_v4  ;;  %8024 = vmatmul.mubr.bf16.gmra.mxu0 %v12609_v1  ;;  %v7502_v53 = vpack.c.bf16 %v11986_v19, %v11985_v16  ;;  %v12656_v4 = vld [vmem:[%s16118_s16 + $0xd4] ss:$20 sps:$4 sm:$0xff]   ;;  %v12657_v57 = vld [vmem:[%s16118_s16 + $0x230] ss:$20 sps:$4 sm:$0xff]  }
0x14bf   :  { %v7149_v46 = vpop.f32.mrf.mxu0  ;;  %8031 = vmatprep.mubr.bf16.mxu0 %v12614_v38  ;;  %v7011_v29 = vpop.f32.mrf.mxu1  ;;  %v12651_v1 = vld [vmem:[%s16118_s16 + $0x208] ss:$20 sps:$4 sm:$0xff]   ;;  %v12666_v16 = vld [vmem:[%s16118_s16 + $0x120] ss:$20 sps:$4 sm:$0xff]   ;;  %v12674_v19 = vld [vmem:[%s16118_s16 + $0x170] ss:$20 sps:$4 sm:$0xff]  }
0x14c0   :  { %v7505_v20 = vpack.c.bf16 %v7149_v46, %v7146_v50  ;;  %10845 = vmatprep.subr.bf16.mxu1 %v7506_v41  ;;  %v7501_v13 = vpack.c.bf16 %v7011_v29, %v7008_v31  ;;  %v12654_v50 = vld [vmem:[%s16118_s16 + $0xd0] ss:$20 sps:$4 sm:$0xff]   ;;  %v12659_v38 = vld [vmem:[%s16118_s16 + $0x234] ss:$20 sps:$4 sm:$0xff]   ;;  %v12660_v41 = vld [vmem:[%s16118_s16 + $0xf8] ss:$20 sps:$4 sm:$0xff]  }
0x14c1   :  { %10846 = vmatpush3.bf16.msra.mxu1 %v7498_v45  ;;  %v12665_v45 = vld [vmem:[%s16118_s16 + $0x25c] ss:$20 sps:$4 sm:$0xff]   ;;  %v12668_v46 = vld [vmem:[%s16118_s16 + $0x124] ss:$20 sps:$4 sm:$0xff]   ;;  %v12677_v31 = vld [vmem:[%s16118_s16 + $0x60] ss:$20 sps:$4 sm:$0xff]  }
0x14c2   :  { %10847 = vmatprep.subr.bf16.mxu1 %v7505_v20  ;;  %v12663_v20 = vld [vmem:[%s16118_s16 + $0x258] ss:$20 sps:$4 sm:$0xff]   ;;  %v12687_v29 = vld [vmem:[%s16118_s16 + $0x100] ss:$20 sps:$4 sm:$0xff]  }
0x14c5   :  { %10848 = vmatpush3.bf16.msra.mxu1 %v7497_v21  ;;  %v12671_v21 = vld [vmem:[%s16118_s16 + $0x14c] ss:$20 sps:$4 sm:$0xff]  }
0x14c6   :  { %10849 = vmatprep.subr.bf16.mxu1 %v7504_v54  ;;  %8032 = vmatmul.mubr.bf16.gmra.mxu0 %v12612_v17  ;;  %v12672_v17 = vld [vmem:[%s16118_s16 + $0x10] ss:$20 sps:$4 sm:$0xff]   ;;  %v12669_v54 = vld [vmem:[%s16118_s16 + $0x148] ss:$20 sps:$4 sm:$0xff]  }
0x14c7   :  { %8039 = vmatprep.mubr.bf16.mxu0 %v12617_v30  ;;  %v12673_v30 = vld [vmem:[%s16118_s16 + $0x38] ss:$20 sps:$4 sm:$0xff]  }
0x14c9   :  { %10850 = vmatpush3.bf16.msra.mxu1 %v7496_v47  ;;  %v12676_v47 = vld [vmem:[%s16118_s16 + $0x174] ss:$20 sps:$4 sm:$0xff]  }
0x14ca   :  { %10851 = vmatprep.subr.bf16.mxu1 %v7503_v52  ;;  %v12678_v52 = vld [vmem:[%s16118_s16 + $0x88] ss:$20 sps:$4 sm:$0xff]  }
0x14cd   :  { %10852 = vmatpush3.bf16.msra.mxu1 %v7495_v33  ;;  %v12681_v33 = vld [vmem:[%s16118_s16 + $0x19c] ss:$20 sps:$4 sm:$0xff]  }
0x14ce   :  { %10853 = vmatprep.subr.bf16.mxu1 %v7502_v53  ;;  %8040 = vmatmul.mubr.bf16.gmra.mxu0 %v12615_v56  ;;  %v12682_v56 = vld [vmem:[%s16118_s16 + $0xb0] ss:$20 sps:$4 sm:$0xff]   ;;  %v12679_v53 = vld [vmem:[%s16118_s16 + $0x198] ss:$20 sps:$4 sm:$0xff]  }
0x14cf   :  { %8047 = vmatprep.mubr.bf16.mxu0 %v12620_v63  ;;  %v12683_v63 = vld [vmem:[%s16118_s16 + $0xd8] ss:$20 sps:$4 sm:$0xff]  }
0x14d1   :  { %10854 = vmatpush3.bf16.msra.mxu1 %v7494_v6  ;;  %v12686_v6 = vld [vmem:[%s16118_s16 + $0x1c4] ss:$20 sps:$4 sm:$0xff]  }
0x14d2   :  { %v12029_v48 = vpop.f32.mrf.mxu1  ;;  %10855 = vmatprep.subr.bf16.mxu1 %v7501_v13  ;;  %v12688_v13 = vld [vmem:[%s16118_s16 + $0x128] ss:$20 sps:$4 sm:$0xff]  }
0x14d4   :  { %v7268_v11 = vpop.f32.mrf.mxu1 }
0x14d5   :  { %10856 = vmatpush3.bf16.msra.mxu1 %v7493_v24  ;;  %v12691_v24 = vld [vmem:[%s16118_s16 + $0x1ec] ss:$20 sps:$4 sm:$0xff]  }
0x14d6   :  { %v12030_v59 = vpop.f32.mrf.mxu1  ;;  %10857 = vmatprep.subr.bf16.mxu1 %v7500_v49  ;;  %8048 = vmatmul.mubr.bf16.gmra.mxu0 %v12618_v37  ;;  %v12692_v37 = vld [vmem:[%s16118_s16 + $0x150] ss:$20 sps:$4 sm:$0xff]   ;;  %v12689_v49 = vld [vmem:[%s16118_s16 + $0x1e8] ss:$20 sps:$4 sm:$0xff]  }
0x14d7   :  { %8055 = vmatprep.mubr.bf16.mxu0 %v12623_v15  ;;  %v7508_v18 = vpack.c.bf16 %v12030_v59, %v12029_v48  ;;  %v12684_v48 = vld [vmem:[%s16118_s16 + $0x1c0] ss:$20 sps:$4 sm:$0xff]   ;;  %v12693_v15 = vld [vmem:[%s16118_s16 + $0x178] ss:$20 sps:$4 sm:$0xff]  }
0x14d8   :  { %v7271_v60 = vpop.f32.mrf.mxu1  ;;  %v12696_v59 = vld [vmem:[%s16118_s16 + $0x214] ss:$20 sps:$4 sm:$0xff]  }
0x14d9   :  { %10858 = vmatpush3.bf16.msra.mxu1 %v7492_v28  ;;  %v7507_v42 = vpack.c.bf16 %v7271_v60, %v7268_v11  ;;  %v12697_v11 = vld [vmem:[%s16118_s16 + $0x1a0] ss:$20 sps:$4 sm:$0xff]   ;;  %v12698_v28 = vld [vmem:[%s16118_s16 + $0x1c8] ss:$20 sps:$4 sm:$0xff]   ;;  %v12702_v60 = vld [vmem:[%s16118_s16 + $0x1f0] ss:$20 sps:$4 sm:$0xff]  }
0x14da   :  { %v12033_v22 = vpop.f32.mrf.mxu1  ;;  %10859 = vmatprep.subr.bf16.mxu1 %v7499_v62  ;;  %v12694_v62 = vld [vmem:[%s16118_s16 + $0x210] ss:$20 sps:$4 sm:$0xff]  }
0x14dc   :  { %v7284_v61 = vpop.f32.mrf.mxu1 }
0x14dd   :  { %10860 = vmatpush3.bf16.msra.mxu1 %v7491_v34  ;;  %v12699_v34 = vld [vmem:[%s16118_s16 + $0x238] ss:$20 sps:$4 sm:$0xff]  }
0x14de   :  { %v12034_v8 = vpop.f32.mrf.mxu1  ;;  %8056 = vmatmul.mubr.bf16.gmra.mxu0 %v12621_v5  ;;  %v12703_v5 = vld [vmem:[%s16118_s16 + $0x218] ss:$20 sps:$4 sm:$0xff]  }
0x14df   :  { %v7510_v25 = vpack.c.bf16 %v12034_v8, %v12033_v22  ;;  %8063 = vmatprep.mubr.bf16.mxu0 %v12629_v7  ;;  %v12701_v22 = vld [vmem:[%s16118_s16 + $0x23c] ss:$20 sps:$4 sm:$0xff]   ;;  %v12707_v7 = vld [vmem:[%s16118_s16 + $0x240] ss:$20 sps:$4 sm:$0xff]  }
0x14e0   :  { %v7287_v10 = vpop.f32.mrf.mxu1  ;;  %8153 = vmatmul.mubr.bf16.vlgmr.msra.gmra.mxu1 %v12624_v2  ;;  %v12708_v2 = vld [vmem:[%s16118_s16 + $0x268] ss:$20 sps:$4 sm:$0xff]  }
0x14e1   :  { %v7509_v3 = vpack.c.bf16 %v7287_v10, %v7284_v61  ;;  %12035 = vmatprep.subr.bf16.mxu0 %v7510_v25  ;;  %8160 = vmatprep.mubr.bf16.mxu1 %v12632_v9  ;;  %v12706_v61 = vld [vmem:[%s16118_s16 + $0x264] ss:$20 sps:$4 sm:$0xff]   ;;  %v12704_v9 = vld [vmem:[%s16118_s16 + $0x260] ss:$20 sps:$4 sm:$0xff]  }
0x14e2   :  { %12036 = vmatpush3.bf16.msra.mxu0 %v7510_v25 }
0x14e3   :  { %12037 = vmatprep.subr.bf16.mxu0 %v7509_v3 }
0x14e6   :  { %12038 = vmatpush3.bf16.msra.mxu0 %v7509_v3 }
0x14e7   :  { %12039 = vmatprep.subr.bf16.mxu0 %v7508_v18  ;;  %8064 = vmatmul.mubr.bf16.gmra.mxu0 %v12627_v58 }
0x14e8   :  { %8161 = vmatmul.mubr.bf16.gmra.mxu1 %v12630_v44  ;;  %8071 = vmatprep.mubr.bf16.mxu0 %v12635_v35 }
0x14e9   :  { %8168 = vmatprep.mubr.bf16.mxu1 %v12638_v55 }
0x14ea   :  { %12040 = vmatpush3.bf16.msra.mxu0 %v7508_v18 }
0x14eb   :  { %12041 = vmatprep.subr.bf16.mxu0 %v7507_v42 }
0x14ee   :  { %12042 = vmatpush3.bf16.msra.mxu0 %v7507_v42 }
0x14ef   :  { %8072 = vmatmul.mubr.bf16.gmra.mxu0 %v12633_v51 }
0x14f0   :  { %8169 = vmatmul.mubr.bf16.gmra.mxu1 %v12636_v23  ;;  %8079 = vmatprep.mubr.bf16.mxu0 %v12641_v26 }
0x14f1   :  { %8176 = vmatprep.mubr.bf16.mxu1 %v12644_v12 }
0x14f7   :  { %8080 = vmatmul.mubr.bf16.gmra.mxu0 %v12639_v36 }
0x14f8   :  { %8177 = vmatmul.mubr.bf16.gmra.mxu1 %v12642_v40  ;;  %8087 = vmatprep.mubr.bf16.mxu0 %v12647_v32 }
0x14f9   :  { %8184 = vmatprep.mubr.bf16.mxu1 %v12650_v0 }
0x14ff   :  { %8088 = vmatmul.mubr.bf16.gmra.mxu0 %v12645_v27 }
0x1500   :  { %8185 = vmatmul.mubr.bf16.gmra.mxu1 %v12648_v39  ;;  %8095 = vmatprep.mubr.bf16.mxu0 %v12653_v43 }
0x1501   :  { %8192 = vmatprep.mubr.bf16.mxu1 %v12656_v4 }
0x1507   :  { %8096 = vmatmul.mubr.bf16.gmra.mxu0 %v12651_v1 }
0x1508   :  { %8193 = vmatmul.mubr.bf16.gmra.mxu1 %v12654_v50  ;;  %8103 = vmatprep.mubr.bf16.mxu0 %v12659_v38 }
0x1509   :  { %8200 = vmatprep.mubr.bf16.mxu1 %v12662_v14 }
0x150f   :  { %8104 = vmatmul.mubr.bf16.gmra.mxu0 %v12657_v57 }
0x1510   :  { %8201 = vmatmul.mubr.bf16.gmra.mxu1 %v12660_v41  ;;  %8111 = vmatprep.mubr.bf16.mxu0 %v12665_v45 }
0x1511   :  { %8208 = vmatprep.mubr.bf16.mxu1 %v12668_v46 }
0x1517   :  { %8112 = vmatmul.mubr.bf16.gmra.mxu0 %v12663_v20 }
0x1518   :  { %8209 = vmatmul.mubr.bf16.gmra.mxu1 %v12666_v16  ;;  %12043 = vmatprep.mubr.msk.bf16.mxu0 %vm1158_vm1, %v12672_v17 }
0x1519   :  { %8216 = vmatprep.mubr.bf16.mxu1 %v12671_v21 }
0x151f   :  { %12044 = vmatmul.mubr.msk.bf16.vlgmr.msra.gmra.mxu0 %vm1158_vm1, %v12673_v30 }
0x1520   :  { %8217 = vmatmul.mubr.bf16.gmra.mxu1 %v12669_v54  ;;  %12047 = vmatprep.mubr.msk.bf16.mxu0 %vm1158_vm1, %v12677_v31 }
0x1521   :  { %8224 = vmatprep.mubr.bf16.mxu1 %v12676_v47 }
0x1527   :  { %12048 = vmatmul.mubr.msk.bf16.gmra.mxu0 %vm1158_vm1, %v12678_v52 }
0x1528   :  { %8225 = vmatmul.mubr.bf16.gmra.mxu1 %v12674_v19  ;;  %12051 = vmatprep.mubr.msk.bf16.mxu0 %vm1158_vm1, %v12682_v56 }
0x1529   :  { %8232 = vmatprep.mubr.bf16.mxu1 %v12681_v33 }
0x152f   :  { %12052 = vmatmul.mubr.msk.bf16.gmra.mxu0 %vm1158_vm1, %v12683_v63 }
0x1530   :  { %8233 = vmatmul.mubr.bf16.gmra.mxu1 %v12679_v53  ;;  %12055 = vmatprep.mubr.msk.bf16.mxu0 %vm1158_vm1, %v12687_v29 }
0x1531   :  { %8240 = vmatprep.mubr.bf16.mxu1 %v12686_v6 }
0x1537   :  { %12056 = vmatmul.mubr.msk.bf16.gmra.mxu0 %vm1158_vm1, %v12688_v13 }
0x1538   :  { %8241 = vmatmul.mubr.bf16.gmra.mxu1 %v12684_v48  ;;  %12059 = vmatprep.mubr.msk.bf16.mxu0 %vm1158_vm1, %v12692_v37 }
0x1539   :  { %8248 = vmatprep.mubr.bf16.mxu1 %v12691_v24 }
0x153f   :  { %12060 = vmatmul.mubr.msk.bf16.gmra.mxu0 %vm1158_vm1, %v12693_v15 }
0x1540   :  { %8249 = vmatmul.mubr.bf16.gmra.mxu1 %v12689_v49  ;;  %12063 = vmatprep.mubr.msk.bf16.mxu0 %vm1158_vm1, %v12697_v11 }
0x1541   :  { %8256 = vmatprep.mubr.bf16.mxu1 %v12696_v59 }
0x1547   :  { %12064 = vmatmul.mubr.msk.bf16.gmra.mxu0 %vm1158_vm1, %v12698_v28 }
0x1548   :  { %8257 = vmatmul.mubr.bf16.gmra.mxu1 %v12694_v62  ;;  %12067 = vmatprep.mubr.msk.bf16.mxu0 %vm1158_vm1, %v12702_v60 }
0x1549   :  { %8264 = vmatprep.mubr.bf16.mxu1 %v12701_v22 }
0x154f   :  { %12068 = vmatmul.mubr.msk.bf16.gmra.mxu0 %vm1158_vm1, %v12703_v5 }
0x1550   :  { %8265 = vmatmul.mubr.bf16.gmra.mxu1 %v12699_v34  ;;  %12071 = vmatprep.mubr.msk.bf16.mxu0 %vm1158_vm1, %v12707_v7 }
0x1551   :  { %8272 = vmatprep.mubr.bf16.mxu1 %v12706_v61 }
0x1557   :  { %12072 = vmatmul.mubr.msk.bf16.gmra.mxu0 %vm1158_vm1, %v12708_v2 }
0x1558   :  { %8273 = vmatmul.mubr.bf16.gmra.mxu1 %v12704_v9 }
0x155e   :  { %v10749_v8 = vpop.f32.mrf.mxu0 }
0x1560   :  { %v10750_v25 = vpop.f32.mrf.mxu0 }
0x1561   :  { %v10751_v10 = vadd.f32 %v10750_v25, %v10749_v8 }
0x1562   :  { %v10752_v3 = vpop.f32.mrf.mxu0 }
0x1564   :  { %v10753_v58 = vpop.f32.mrf.mxu0 }
0x1565   :  { %v15422_v44 = vadd.f32 %v10753_v58, %v10752_v3 }
0x1566   :  { %v10755_v35 = vpop.f32.mrf.mxu0 }
0x1568   :  { %v10756_v18 = vpop.f32.mrf.mxu0 }
0x1569   :  { %v15424_v55 = vadd.f32 %v10756_v18, %v10755_v35 }
0x156a   :  { %v10758_v42 = vpop.f32.mrf.mxu0 }
0x156c   :  { %v10759_v51 = vpop.f32.mrf.mxu0 }
0x156d   :  { %v15426_v23 = vadd.f32 %v10759_v51, %v10758_v42 }
0x156e   :  { %v10761_v26 = vpop.f32.mrf.mxu0 }
0x1570   :  { %v10762_v12 = vpop.f32.mrf.mxu0 }
0x1571   :  { %v15428_v36 = vadd.f32 %v10762_v12, %v10761_v26 }
0x1572   :  { %v10764_v40 = vpop.f32.mrf.mxu0 }
0x1574   :  { %v10765_v32 = vpop.f32.mrf.mxu0 }
0x1575   :  { %v15430_v0 = vadd.f32 %v10765_v32, %v10764_v40 }
0x1576   :  { %v10767_v27 = vpop.f32.mrf.mxu0 }
0x1578   :  { %v10768_v39 = vpop.f32.mrf.mxu0 }
0x1579   :  { %v15432_v43 = vadd.f32 %v10768_v39, %v10767_v27 }
0x157a   :  { %v10770_v4 = vpop.f32.mrf.mxu0 }
0x157c   :  { %v10771_v1 = vpop.f32.mrf.mxu0 }
0x157d   :  { %v15434_v50 = vadd.f32 %v10771_v1, %v10770_v4 }
0x157e   :  { %v10773_v38 = vpop.f32.mrf.mxu0 }
0x1580   :  { %v10774_v14 = vpop.f32.mrf.mxu0 }
0x1581   :  { %v15436_v57 = vadd.f32 %v10774_v14, %v10773_v38 }
0x1582   :  { %v10776_v41 = vpop.f32.mrf.mxu0 }
0x1584   :  { %v10777_v45 = vpop.f32.mrf.mxu0 }
0x1585   :  { %v15438_v46 = vadd.f32 %v10777_v45, %v10776_v41  ;;  %v12709_v41 = vld [vmem:[%s16119_s17 + $0x38] sm:$0xff]  }
0x1586   :  { %v10779_v20 = vpop.f32.mrf.mxu0  ;;  %12075 = vmatprep.subr.bf16.mxu1 %v12709_v41 }
0x1587   :  { %12076 = vmatpush3.bf16.msra.mxu1 %v12709_v41 }
0x1588   :  { %v10780_v16 = vpop.f32.mrf.mxu0 }
0x1589   :  { %v15440_v17 = vadd.f32 %v10780_v16, %v10779_v20 }
0x158a   :  { %v10782_v21 = vpop.f32.mrf.mxu0 }
0x158c   :  { %v10783_v30 = vpop.f32.mrf.mxu0 }
0x158d   :  { %v15442_v54 = vadd.f32 %v10783_v30, %v10782_v21 }
0x158e   :  { %v10785_v31 = vpop.f32.mrf.mxu0 }
0x1590   :  { %v10786_v47 = vpop.f32.mrf.mxu0 }
0x1591   :  { %v15444_v52 = vadd.f32 %v10786_v47, %v10785_v31  ;;  %v12710_v31 = vld [vmem:[%s16119_s17 + $0x30] sm:$0xff]  }
0x1592   :  { %v10788_v19 = vpop.f32.mrf.mxu0  ;;  %12077 = vmatprep.subr.bf16.mxu1 %v12710_v31 }
0x1593   :  { %12078 = vmatpush3.bf16.msra.mxu1 %v12710_v31 }
0x1594   :  { %v10789_v56 = vpop.f32.mrf.mxu0 }
0x1595   :  { %v15446_v33 = vadd.f32 %v10789_v56, %v10788_v19 }
0x1596   :  { %v10791_v63 = vpop.f32.mrf.mxu0 }
0x1598   :  { %v10792_v53 = vpop.f32.mrf.mxu0 }
0x1599   :  { %v15448_v29 = vadd.f32 %v10792_v53, %v10791_v63 }
0x159a   :  { %v10794_v6 = vpop.f32.mrf.mxu0 }
0x159c   :  { %v10795_v13 = vpop.f32.mrf.mxu0 }
0x159d   :  { %v15450_v48 = vadd.f32 %v10795_v13, %v10794_v6  ;;  %v12711_v6 = vld [vmem:[%s16119_s17 + $0x28] sm:$0xff]  }
0x159e   :  { %v10797_v37 = vpop.f32.mrf.mxu0  ;;  %12079 = vmatprep.subr.bf16.mxu1 %v12711_v6 }
0x159f   :  { %12080 = vmatpush3.bf16.msra.mxu1 %v12711_v6 }
0x15a0   :  { %v10861_v24 = vpop.f32.mrf.mxu1  ;;  %v10798_v15 = vpop.f32.mrf.mxu0 }
0x15a1   :  { %v15452_v49 = vadd.f32 %v10798_v15, %v10797_v37 }
0x15a2   :  { %v10862_v11 = vpop.f32.mrf.mxu1  ;;  %v10800_v59 = vpop.f32.mrf.mxu0 }
0x15a3   :  { %v10863_v28 = vadd.f32 %v10862_v11, %v10861_v24 }
0x15a4   :  { %v15454_v62 = vpop.f32.mrf.mxu1  ;;  %v10801_v60 = vpop.f32.mrf.mxu0 }
0x15a5   :  { %v15456_v22 = vadd.f32 %v10801_v60, %v10800_v59  ;;  %v15458_v5 = vadd.f32 %v10863_v28, %v10751_v10  ;;  %v12712_v59 = vld [vmem:[%s16119_s17 + $0x20] sm:$0xff]  }
0x15a6   :  { %v15460_v34 = vpop.f32.mrf.mxu1  ;;  %12081 = vmatprep.subr.bf16.mxu1 %v12712_v59 }
0x15a7   :  { %v10803_v7 = vpop.f32.mrf.mxu0  ;;  %12082 = vmatpush3.bf16.msra.mxu1 %v12712_v59 }
0x15a8   :  { %v15462_v61 = vpop.f32.mrf.mxu1 }
0x15a9   :  { %v10804_v2 = vpop.f32.mrf.mxu0 }
0x15aa   :  { %v15464_v9 = vadd.f32 %v10804_v2, %v10803_v7  ;;  %v15466_v8 = vpop.f32.mrf.mxu1 }
0x15ab   :  { %v10806_v25 = vpop.f32.mrf.mxu0 }
0x15ac   :  { %v15468_v3 = vpop.f32.mrf.mxu1 }
0x15ad   :  { %v10807_v58 = vpop.f32.mrf.mxu0 }
0x15ae   :  { %v15470_v35 = vadd.f32 %v10807_v58, %v10806_v25  ;;  %v15472_v18 = vpop.f32.mrf.mxu1  ;;  %v12713_v58 = vld [vmem:[%s16119_s17 + $0x18] sm:$0xff]  }
0x15af   :  { %v10809_v10 = vpop.f32.mrf.mxu0  ;;  %12083 = vmatprep.subr.bf16.mxu1 %v12713_v58 }
0x15b0   :  { %v15474_v42 = vpop.f32.mrf.mxu1  ;;  %12084 = vmatpush3.bf16.msra.mxu1 %v12713_v58 }
0x15b1   :  { %v10810_v51 = vpop.f32.mrf.mxu0 }
0x15b2   :  { %v15476_v26 = vadd.f32 %v10810_v51, %v10809_v10  ;;  %v15478_v12 = vpop.f32.mrf.mxu1 }
0x15b3   :  { %v10812_v40 = vpop.f32.mrf.mxu0 }
0x15b4   :  { %v15480_v32 = vpop.f32.mrf.mxu1 }
0x15b5   :  { %v10813_v27 = vpop.f32.mrf.mxu0 }
0x15b6   :  { %v15482_v39 = vadd.f32 %v10813_v27, %v10812_v40  ;;  %v15484_v4 = vpop.f32.mrf.mxu1 }
0x15b7   :  { %v10815_v1 = vpop.f32.mrf.mxu0 }
0x15b8   :  { %16133 = vst [vmem:[#allocation4_spill] sm:$0xff] %v15482_v39  ;;  %v15486_v38 = vpop.f32.mrf.mxu1 }
0x15b9   :  { %v10816_v14 = vpop.f32.mrf.mxu0 }
0x15ba   :  { %v15491_v45 = vadd.f32 %v10816_v14, %v10815_v1  ;;  %v15493_v20 = vpop.f32.mrf.mxu1  ;;  %v12714_v14 = vld [vmem:[%s16119_s17 + $0x10] sm:$0xff]  }
0x15bb   :  { %v10818_v16 = vpop.f32.mrf.mxu0  ;;  %12085 = vmatprep.subr.bf16.mxu1 %v12714_v14 }
0x15bc   :  { %v15495_v21 = vpop.f32.mrf.mxu1  ;;  %12086 = vmatpush3.bf16.msra.mxu1 %v12714_v14 }
0x15bd   :  { %v10819_v30 = vpop.f32.mrf.mxu0 }
0x15be   :  { %v15500_v47 = vadd.f32 %v10819_v30, %v10818_v16  ;;  %v15502_v19 = vpop.f32.mrf.mxu1 }
0x15bf   :  { %v10821_v56 = vpop.f32.mrf.mxu0 }
0x15c0   :  { %16134 = vst [vmem:[#allocation5_spill] sm:$0xff] %v15500_v47  ;;  %v15504_v63 = vpop.f32.mrf.mxu1 }
0x15c1   :  { %v10822_v53 = vpop.f32.mrf.mxu0 }
0x15c2   :  { %v15509_v13 = vadd.f32 %v10822_v53, %v10821_v56  ;;  %v15511_v37 = vpop.f32.mrf.mxu1  ;;  %v12715_v53 = vld [vmem:[%s16119_s17 + $0x8] sm:$0xff]  }
0x15c3   :  { %v10824_v24 = vpop.f32.mrf.mxu0  ;;  %12087 = vmatprep.subr.bf16.mxu1 %v12715_v53 }
0x15c4   :  { %16135 = vst [vmem:[#allocation6_spill] sm:$0xff] %v15509_v13  ;;  %v15513_v15 = vpop.f32.mrf.mxu1  ;;  %12088 = vmatpush3.bf16.msra.mxu1 %v12715_v53 }
0x15c5   :  { %v10825_v11 = vpop.f32.mrf.mxu0 }
0x15c6   :  { %v15518_v28 = vadd.f32 %v10825_v11, %v10824_v24  ;;  %v15520_v60 = vpop.f32.mrf.mxu1  ;;  %v12716_v11 = vld [vmem:[%s16119_s17] sm:$0xff]  }
0x15c7   :  { %v10827_v7 = vpop.f32.mrf.mxu0  ;;  %12089 = vmatprep.subr.bf16.mxu1 %v12716_v11 }
0x15c8   :  { %16136 = vst [vmem:[#allocation7_spill] sm:$0xff] %v15518_v28  ;;  %v15522_v2 = vpop.f32.mrf.mxu1  ;;  %12090 = vmatpush3.bf16.msra.mxu1 %v12716_v11  ;;  %v10869_v11 = vadd.f32 %v15466_v8, %v15462_v61 }
0x15c9   :  { %v10828_v25 = vpop.f32.mrf.mxu0 }
0x15ca   :  { %v15527_v10 = vadd.f32 %v10828_v25, %v10827_v7  ;;  %v15529_v51 = vpop.f32.mrf.mxu1 }
0x15cb   :  { %v10830_v40 = vpop.f32.mrf.mxu0 }
0x15cc   :  { %16137 = vst [vmem:[#allocation8_spill] sm:$0xff] %v15527_v10  ;;  %v15531_v27 = vpop.f32.mrf.mxu1 }
0x15cd   :  { %v10831_v1 = vpop.f32.mrf.mxu0 }
0x15ce   :  { %v15536_v41 = vadd.f32 %v10831_v1, %v10830_v40  ;;  %v15538_v16 = vpop.f32.mrf.mxu1 }
0x15cf   :  { %v10833_v30 = vpop.f32.mrf.mxu0 }
0x15d0   :  { %16138 = vst [vmem:[#allocation9_spill] sm:$0xff] %v15536_v41  ;;  %v15540_v31 = vpop.f32.mrf.mxu1 }
0x15d1   :  { %v10834_v56 = vpop.f32.mrf.mxu0 }
0x15d2   :  { %v15545_v6 = vadd.f32 %v10834_v56, %v10833_v30  ;;  %v15547_v24 = vpop.f32.mrf.mxu1 }
0x15d3   :  { %v10836_v59 = vpop.f32.mrf.mxu0 }
0x15d4   :  { %16139 = vst [vmem:[#allocation10_spill] sm:$0xff] %v15545_v6  ;;  %v15552_v7 = vpop.f32.mrf.mxu1 }
0x15d5   :  { %v10837_v25 = vpop.f32.mrf.mxu0 }
0x15d6   :  { %v15554_v58 = vadd.f32 %v10837_v25, %v10836_v59  ;;  %v15556_v40 = vpop.f32.mrf.mxu1  ;;  %v10866_v25 = vadd.f32 %v15460_v34, %v15454_v62 }
0x15d7   :  { %v10839_v1 = vpop.f32.mrf.mxu0 }
0x15d8   :  { %16140 = vst [vmem:[#allocation11_spill] sm:$0xff] %v15554_v58  ;;  %v15558_v14 = vpop.f32.mrf.mxu1  ;;  %v8158_v34 = vadd.f32 %v10866_v25, %v15422_v44 }
0x15d9   :  { %v10840_v30 = vpop.f32.mrf.mxu0 }
0x15da   :  { %v15560_v56 = vadd.f32 %v10840_v30, %v10839_v1  ;;  %v15562_v6 = vpop.f32.mrf.mxu1  ;;  %v10872_v30 = vadd.f32 %v15472_v18, %v15468_v3 }
0x15db   :  { %v10842_v41 = vpop.f32.mrf.mxu0 }
0x15dc   :  { %16141 = vst [vmem:[#allocation12_spill] sm:$0xff] %v15560_v56  ;;  %v15564_v28 = vpop.f32.mrf.mxu1  ;;  %v8166_v3 = vadd.f32 %v10872_v30, %v15426_v23  ;;  %v10887_v30 = vadd.f32 %v15511_v37, %v15504_v63 }
0x15dd   :  { %v10843_v10 = vpop.f32.mrf.mxu0 }
0x15de   :  { %v15566_v53 = vadd.f32 %v10843_v10, %v10842_v41  ;;  %v15568_v13 = vpop.f32.mrf.mxu1  ;;  %v10875_v10 = vadd.f32 %v15478_v12, %v15474_v42  ;;  %v10878_v42 = vadd.f32 %v15484_v4, %v15480_v32  ;;  %v10884_v32 = vadd.f32 %v15502_v19, %v15495_v21 }
0x15df   :  { %v12045_v59 = vpop.f32.mrf.mxu0 }
0x15e0   :  { %16142 = vst [vmem:[#allocation13_spill] sm:$0xff] %v15566_v53  ;;  %v15574_v58 = vpop.f32.mrf.mxu1  ;;  %v8163_v53 = vadd.f32 %v10869_v11, %v15424_v55  ;;  %v10881_v55 = vadd.f32 %v15493_v20, %v15486_v38  ;;  %v8171_v12 = vadd.f32 %v10875_v10, %v15428_v36 }
0x15e1   :  { %v8315_v1 = vpop.f32.mrf.mxu0 }
0x15e2   :  { %v15578_v56 = vpop.f32.mrf.mxu1  ;;  %v15584_v47 = vadd.f32 %v8315_v1, %v15458_v5  ;;  %v15589_v8 = vadd.f32 %v12045_v59, %v8163_v53  ;;  %v8179_v10 = vadd.f32 %v10881_v55, %v15432_v43 }
0x15e3   :  { %v12046_v41 = vpop.f32.mrf.mxu0 }
0x15e4   :  { %v15586_v62 = vpop.f32.mrf.mxu1  ;;  %v8480_v44 = vmul.f32 %v15584_v47, %v15584_v47  ;;  %v15603_v53 = vadd.f32 %v12046_v41, %v8166_v3  ;;  %v8482_v36 = vmul.f32 %v15589_v8, %v15589_v8  ;;  %v8174_v3 = vadd.f32 %v10878_v42, %v15430_v0 }
0x15e5   :  { %v8318_v61 = vpop.f32.mrf.mxu0  ;;  %v10893_v0 = vadd.f32 %v15529_v51, %v15522_v2 }
0x15e6   :  { %v15592_v18 = vpop.f32.mrf.mxu1  ;;  %v15594_v39 = vadd.f32 %v8318_v61, %v8158_v34  ;;  %v8483_v21 = vmul.f32 %v15603_v53, %v15603_v53 }
0x15e7   :  { %v12049_v5 = vpop.f32.mrf.mxu0 }
0x15e8   :  { %v8442_v23 = vadd.f32 %v15594_v39, %v15584_v47  ;;  %v8481_v59 = vmul.f32 %v15594_v39, %v15594_v39  ;;  %v15609_v25 = vpop.f32.mrf.mxu1 }
0x15e9   :  { %v8331_v4 = vpop.f32.mrf.mxu0 }
0x15ea   :  { %v8443_v38 = vadd.f32 %v8442_v23, %v15589_v8  ;;  %v8512_v20 = vadd.f32 %v8481_v59, %v8480_v44  ;;  %v15616_v11 = vpop.f32.mrf.mxu1  ;;  %v15618_v1 = vadd.f32 %v8331_v4, %v8171_v12  ;;  %v15629_v44 = vadd.f32 %v12049_v5, %v8179_v10 }
0x15eb   :  { %v12050_v41 = vpop.f32.mrf.mxu0  ;;  %v8182_v12 = vadd.f32 %v10884_v32, %v15434_v50  ;;  %v10890_v4 = vadd.f32 %v15520_v60, %v15513_v15  ;;  %v8187_v50 = vadd.f32 %v10887_v30, %v15436_v57  ;;  %v10896_v10 = vadd.f32 %v15538_v16, %v15531_v27 }
0x15ec   :  { %v8513_v19 = vadd.f32 %v8512_v20, %v8482_v36  ;;  %v8444_v34 = vadd.f32 %v8443_v38, %v15603_v53  ;;  %v15626_v61 = vpop.f32.mrf.mxu1  ;;  %v8484_v43 = vmul.f32 %v15618_v1, %v15618_v1  ;;  %v8486_v60 = vmul.f32 %v15629_v44, %v15629_v44 }
0x15ed   :  { %v8334_v23 = vpop.f32.mrf.mxu0  ;;  %v15644_v32 = vadd.f32 %v12050_v41, %v8182_v12  ;;  %v10899_v41 = vadd.f32 %v15547_v24, %v15540_v31  ;;  %v8190_v12 = vadd.f32 %v10890_v4, %v15438_v46  ;;  %v10905_v46 = vadd.f32 %v15562_v6, %v15558_v14 }
0x15ee   :  { %v8445_v63 = vadd.f32 %v8444_v34, %v15618_v1  ;;  %v8514_v37 = vadd.f32 %v8513_v19, %v8483_v21  ;;  %v15635_v55 = vpop.f32.mrf.mxu1  ;;  %v15637_v59 = vadd.f32 %v8334_v23, %v8174_v3  ;;  %v8195_v21 = vadd.f32 %v10893_v0, %v15440_v17 }
0x15ef   :  { %v12053_v42 = vpop.f32.mrf.mxu0  ;;  %v8487_v27 = vmul.f32 %v15644_v32, %v15644_v32 }
0x15f0   :  { %v8515_v5 = vadd.f32 %v8514_v37, %v8484_v43  ;;  %v8446_v36 = vadd.f32 %v8445_v63, %v15637_v59  ;;  %v8485_v38 = vmul.f32 %v15637_v59, %v15637_v59  ;;  %v15649_v20 = vpop.f32.mrf.mxu1  ;;  %v15669_v23 = vadd.f32 %v12053_v42, %v8195_v21 }
0x15f1   :  { %v8347_v15 = vpop.f32.mrf.mxu0  ;;  %v8198_v63 = vadd.f32 %v10896_v10, %v15442_v54  ;;  %v8203_v54 = vadd.f32 %v10899_v41, %v15444_v52 }
0x15f2   :  { %v8447_v2 = vadd.f32 %v8446_v36, %v15629_v44  ;;  %v8516_v57 = vadd.f32 %v8515_v5, %v8485_v38  ;;  %v15656_v51 = vpop.f32.mrf.mxu1  ;;  %v15658_v30 = vadd.f32 %v8347_v15, %v8187_v50  ;;  %v10902_v50 = vadd.f32 %v15556_v40, %v15552_v7 }
0x15f3   :  { %v12054_v19 = vpop.f32.mrf.mxu0  ;;  %v10908_v15 = vadd.f32 %v15568_v13, %v15564_v28  ;;  %v8490_v7 = vmul.f32 %v15669_v23, %v15669_v23 }
0x15f4   :  { %v8517_v16 = vadd.f32 %v8516_v57, %v8486_v60  ;;  %v8448_v34 = vadd.f32 %v8447_v2, %v15644_v32  ;;  %v15666_v3 = vpop.f32.mrf.mxu1  ;;  %v8488_v17 = vmul.f32 %v15658_v30, %v15658_v30  ;;  %v15684_v5 = vadd.f32 %v12054_v19, %v8198_v63 }
0x15f5   :  { %v8350_v43 = vpop.f32.mrf.mxu0  ;;  %v10911_v2 = vadd.f32 %v15578_v56, %v15574_v58  ;;  %v8211_v57 = vadd.f32 %v10905_v46, %v15448_v29 }
0x15f6   :  { %v8449_v31 = vadd.f32 %v8448_v34, %v15658_v30  ;;  %v8518_v24 = vadd.f32 %v8517_v16, %v8487_v27  ;;  %v15675_v37 = vpop.f32.mrf.mxu1  ;;  %v15677_v0 = vadd.f32 %v8350_v43, %v8190_v12  ;;  %v8491_v21 = vmul.f32 %v15684_v5, %v15684_v5 }
0x15f7   :  { %v12057_v4 = vpop.f32.mrf.mxu0  ;;  %v8206_v27 = vadd.f32 %v10902_v50, %v15446_v33  ;;  %v8214_v34 = vadd.f32 %v10908_v15, %v15450_v48  ;;  %v10917_v33 = vadd.f32 %v15616_v11, %v15609_v25 }
0x15f8   :  { %v8519_v42 = vadd.f32 %v8518_v24, %v8488_v17  ;;  %v8450_v36 = vadd.f32 %v8449_v31, %v15677_v0  ;;  %v8489_v38 = vmul.f32 %v15677_v0, %v15677_v0  ;;  %v10927_v10 = vpop.f32.mrf.mxu1  ;;  %v15703_v16 = vadd.f32 %v12057_v4, %v8211_v57 }
0x15f9   :  { %v8363_v60 = vpop.f32.mrf.mxu0  ;;  %v10914_v31 = vadd.f32 %v15592_v18, %v15586_v62  ;;  %v8219_v24 = vadd.f32 %v10911_v2, %v15452_v49  ;;  %v8227_v15 = vadd.f32 %v10917_v33, %v15464_v9 }
0x15fa   :  { %v8451_v6 = vadd.f32 %v8450_v36, %v15669_v23  ;;  %v8520_v40 = vadd.f32 %v8519_v42, %v8489_v38  ;;  %v10928_v52 = vpop.f32.mrf.mxu1  ;;  %v15694_v14 = vadd.f32 %v8363_v60, %v8203_v54  ;;  %v10920_v42 = vadd.f32 %v15635_v55, %v15626_v61 }
0x15fb   :  { %v12058_v41 = vpop.f32.mrf.mxu0  ;;  %v8494_v62 = vmul.f32 %v15703_v16, %v15703_v16  ;;  %v10923_v38 = vadd.f32 %v15656_v51, %v15649_v20 }
0x15fc   :  { %v8521_v13 = vadd.f32 %v8520_v40, %v8490_v7  ;;  %v8452_v28 = vadd.f32 %v8451_v6, %v15684_v5  ;;  %v10930_v19 = vpop.f32.mrf.mxu1  ;;  %v8492_v29 = vmul.f32 %v15694_v14, %v15694_v14  ;;  %v15716_v50 = vadd.f32 %v12058_v41, %v8214_v34 }
0x15fd   :  { %v8366_v12 = vpop.f32.mrf.mxu0  ;;  %v8222_v40 = vadd.f32 %v10914_v31, %v15456_v22  ;;  %v8230_v57 = vadd.f32 %v10920_v42, %v15470_v35  ;;  %v8235_v22 = vadd.f32 %v10923_v38, %v15476_v26  ;;  %v16143_v42 = vld [vmem:[#allocation4_spill] sm:$0xff] }
0x15fe   :  { %v8453_v63 = vadd.f32 %v8452_v28, %v15694_v14  ;;  %v8522_v58 = vadd.f32 %v8521_v13, %v8491_v21  ;;  %v10931_v56 = vpop.f32.mrf.mxu1  ;;  %v15709_v43 = vadd.f32 %v8366_v12, %v8206_v27  ;;  %v8495_v7 = vmul.f32 %v15716_v50, %v15716_v50 }
0x15ff   :  { %v12061_v17 = vpop.f32.mrf.mxu0  ;;  %v10926_v28 = vadd.f32 %v15675_v37, %v15666_v3  ;;  %v10929_v27 = vadd.f32 %v10928_v52, %v10927_v10  ;;  %v10932_v31 = vadd.f32 %v10931_v56, %v10930_v19 }
0x1600   :  { %v8523_v48 = vadd.f32 %v8522_v58, %v8492_v29  ;;  %v8454_v46 = vadd.f32 %v8453_v63, %v15709_v43  ;;  %v8493_v4 = vmul.f32 %v15709_v43, %v15709_v43  ;;  %v10933_v54 = vpop.f32.mrf.mxu1  ;;  %v15735_v2 = vadd.f32 %v12061_v17, %v8227_v15 }
0x1601   :  { %v8379_v36 = vpop.f32.mrf.mxu0 }
0x1602   :  { %v8455_v18 = vadd.f32 %v8454_v46, %v15703_v16  ;;  %v8524_v25 = vadd.f32 %v8523_v48, %v8493_v4  ;;  %v10934_v49 = vpop.f32.mrf.mxu1  ;;  %v15726_v11 = vadd.f32 %v8379_v36, %v8219_v24  ;;  %v8498_v17 = vmul.f32 %v15735_v2, %v15735_v2 }
0x1603   :  { %v12062_v60 = vpop.f32.mrf.mxu0  ;;  %v10935_v26 = vadd.f32 %v10934_v49, %v10933_v54  ;;  %v8243_v24 = vadd.f32 %v10929_v27, %v15491_v45  ;;  %v8238_v36 = vadd.f32 %v10926_v28, %v16143_v42 }
0x1604   :  { %v8525_v61 = vadd.f32 %v8524_v25, %v8494_v62  ;;  %v8456_v55 = vadd.f32 %v8455_v18, %v15716_v50  ;;  %v10936_v6 = vpop.f32.mrf.mxu1  ;;  %v8496_v9 = vmul.f32 %v15726_v11, %v15726_v11  ;;  %v15746_v63 = vadd.f32 %v12062_v60, %v8230_v57  ;;  %v16144_v18 = vld [vmem:[#allocation5_spill] sm:$0xff] }
0x1605   :  { %v8382_v41 = vpop.f32.mrf.mxu0  ;;  %v8246_v25 = vadd.f32 %v10932_v31, %v16144_v18 }
0x1606   :  { %v8457_v21 = vadd.f32 %v8456_v55, %v15726_v11  ;;  %v8526_v20 = vadd.f32 %v8525_v61, %v8495_v7  ;;  %v10937_v51 = vpop.f32.mrf.mxu1  ;;  %v15741_v13 = vadd.f32 %v8382_v41, %v8222_v40  ;;  %v8499_v46 = vmul.f32 %v15746_v63, %v15746_v63  ;;  %v16145_v40 = vld [vmem:[#allocation6_spill] sm:$0xff] }
0x1607   :  { %v12065_v34 = vpop.f32.mrf.mxu0  ;;  %v10938_v7 = vadd.f32 %v10937_v51, %v10936_v6  ;;  %v8251_v57 = vadd.f32 %v10935_v26, %v16145_v40  ;;  %v16147_v26 = vld [vmem:[#allocation7_spill] sm:$0xff] }
0x1608   :  { %v8527_v12 = vadd.f32 %v8526_v20, %v8496_v9  ;;  %v8458_v35 = vadd.f32 %v8457_v21, %v15741_v13  ;;  %v8497_v29 = vmul.f32 %v15741_v13, %v15741_v13  ;;  %v10939_v58 = vpop.f32.mrf.mxu1  ;;  %v15761_v62 = vadd.f32 %v12065_v34, %v8243_v24 }
0x1609   :  { %v8395_v33 = vpop.f32.mrf.mxu0  ;;  %v8254_v24 = vadd.f32 %v10938_v7, %v16147_v26 }
0x160a   :  { %v8459_v3 = vadd.f32 %v8458_v35, %v15735_v2  ;;  %v8528_v37 = vadd.f32 %v8527_v12, %v8497_v29  ;;  %v10940_v10 = vpop.f32.mrf.mxu1  ;;  %v15754_v52 = vadd.f32 %v8395_v33, %v8235_v22  ;;  %v8502_v22 = vmul.f32 %v15761_v62, %v15761_v62  ;;  %v16146_v29 = vld [vmem:[#allocation8_spill] sm:$0xff] }
0x160b   :  { %v12066_v48 = vpop.f32.mrf.mxu0  ;;  %v10941_v61 = vadd.f32 %v10940_v10, %v10939_v58 }
0x160c   :  { %v8529_v4 = vadd.f32 %v8528_v37, %v8498_v17  ;;  %v8460_v19 = vadd.f32 %v8459_v3, %v15746_v63  ;;  %v10942_v56 = vpop.f32.mrf.mxu1  ;;  %v8500_v45 = vmul.f32 %v15754_v52, %v15754_v52  ;;  %v15770_v21 = vadd.f32 %v12066_v48, %v8246_v25 }
0x160d   :  { %v8398_v38 = vpop.f32.mrf.mxu0  ;;  %v8259_v58 = vadd.f32 %v10941_v61, %v16146_v29 }
0x160e   :  { %v8461_v15 = vadd.f32 %v8460_v19, %v15754_v52  ;;  %v8530_v54 = vadd.f32 %v8529_v4, %v8499_v46  ;;  %v10943_v49 = vpop.f32.mrf.mxu1  ;;  %v15767_v60 = vadd.f32 %v8398_v38, %v8238_v36  ;;  %v8503_v17 = vmul.f32 %v15770_v21, %v15770_v21  ;;  %v16148_v46 = vld [vmem:[#allocation9_spill] sm:$0xff] }
0x160f   :  { %v12069_v55 = vpop.f32.mrf.mxu0  ;;  %v10944_v27 = vadd.f32 %v10943_v49, %v10942_v56 }
0x1610   :  { %v8531_v41 = vadd.f32 %v8530_v54, %v8500_v45  ;;  %v8462_v9 = vadd.f32 %v8461_v15, %v15767_v60  ;;  %v8501_v20 = vmul.f32 %v15767_v60, %v15767_v60  ;;  %v10945_v28 = vpop.f32.mrf.mxu1  ;;  %v15785_v48 = vadd.f32 %v12069_v55, %v8259_v58  ;;  %v16149_v45 = vld [vmem:[#allocation10_spill] sm:$0xff]  ;;  %v16150_v58 = vld [vmem:[#allocation11_spill] sm:$0xff] }
0x1611   :  { %v8411_v34 = vpop.f32.mrf.mxu0  ;;  %v8262_v4 = vadd.f32 %v10944_v27, %v16148_v46 }
0x1612   :  { %v8463_v6 = vadd.f32 %v8462_v9, %v15761_v62  ;;  %v8532_v51 = vadd.f32 %v8531_v41, %v8501_v20  ;;  %v10946_v12 = vpop.f32.mrf.mxu1  ;;  %v15778_v35 = vadd.f32 %v8411_v34, %v8251_v57  ;;  %v8506_v41 = vmul.f32 %v15785_v48, %v15785_v48 }
0x1613   :  { %v10947_v31 = vadd.f32 %v10946_v12, %v10945_v28  ;;  %v12070_v33 = vpop.f32.mrf.mxu0 }
0x1614   :  { %v8533_v3 = vadd.f32 %v8532_v51, %v8502_v22  ;;  %v8464_v37 = vadd.f32 %v8463_v6, %v15770_v21  ;;  %v10948_v10 = vpop.f32.mrf.mxu1  ;;  %v8504_v42 = vmul.f32 %v15778_v35, %v15778_v35  ;;  %v15793_v38 = vadd.f32 %v12070_v33, %v8262_v4  ;;  %v16151_v33 = vld [vmem:[#allocation12_spill] sm:$0xff] }
0x1615   :  { %v8414_v19 = vpop.f32.mrf.mxu0  ;;  %v8267_v54 = vadd.f32 %v10947_v31, %v16149_v45 }
0x1616   :  { %v8465_v56 = vadd.f32 %v8464_v37, %v15778_v35  ;;  %v8534_v36 = vadd.f32 %v8533_v3, %v8503_v17  ;;  %v10949_v18 = vpop.f32.mrf.mxu1  ;;  %v15791_v25 = vadd.f32 %v8414_v19, %v8254_v24  ;;  %v8507_v6 = vmul.f32 %v15793_v38, %v15793_v38 }
0x1617   :  { %v12073_v15 = vpop.f32.mrf.mxu0  ;;  %v10950_v7 = vadd.f32 %v10949_v18, %v10948_v10  ;;  %v16152_v18 = vld [vmem:[#allocation13_spill] sm:$0xff] }
0x1618   :  { %v8535_v49 = vadd.f32 %v8534_v36, %v8504_v42  ;;  %v8466_v61 = vadd.f32 %v8465_v56, %v15791_v25  ;;  %v8505_v55 = vmul.f32 %v15791_v25, %v15791_v25  ;;  %v10951_v40 = vpop.f32.mrf.mxu1 }
0x1619   :  { %v8427_v57 = vpop.f32.mrf.mxu0  ;;  %v8270_v31 = vadd.f32 %v10950_v7, %v16150_v58 }
0x161a   :  { %v8467_v9 = vadd.f32 %v8466_v61, %v15785_v48  ;;  %v8536_v20 = vadd.f32 %v8535_v49, %v8505_v55  ;;  %v10952_v28 = vpop.f32.mrf.mxu1  ;;  %v15802_v27 = vadd.f32 %v8427_v57, %v8267_v54 }
0x161b   :  { %v10953_v34 = vadd.f32 %v10952_v28, %v10951_v40  ;;  %v12074_v22 = vpop.f32.mrf.mxu0 }
0x161c   :  { %v8537_v51 = vadd.f32 %v8536_v20, %v8506_v41  ;;  %v8468_v12 = vadd.f32 %v8467_v9, %v15793_v38  ;;  %v10954_v29 = vpop.f32.mrf.mxu1  ;;  %v8508_v10 = vmul.f32 %v15802_v27, %v15802_v27 }
0x161d   :  { %v8275_v17 = vadd.f32 %v10953_v34, %v16151_v33  ;;  %v8430_v3 = vpop.f32.mrf.mxu0 }
0x161e   :  { %v8469_v37 = vadd.f32 %v8468_v12, %v15802_v27  ;;  %v8538_v26 = vadd.f32 %v8537_v51, %v8507_v6  ;;  %v10955_v24 = vpop.f32.mrf.mxu1  ;;  %v15812_v46 = vadd.f32 %v8430_v3, %v8270_v31 }
0x161f   :  { %v15814_v4 = vadd.f32 %v12073_v15, %v8275_v17  ;;  %v10956_v19 = vadd.f32 %v10955_v24, %v10954_v29 }
0x1620   :  { %v8539_v56 = vadd.f32 %v8538_v26, %v8508_v10  ;;  %v8470_v42 = vadd.f32 %v8469_v37, %v15812_v46  ;;  %v8509_v36 = vmul.f32 %v15812_v46, %v15812_v46 }
0x1621   :  { %v8278_v45 = vadd.f32 %v10956_v19, %v16152_v18  ;;  %v8510_v54 = vmul.f32 %v15814_v4, %v15814_v4 }
0x1622   :  { %v8471_v49 = vadd.f32 %v8470_v42, %v15814_v4  ;;  %v8540_v7 = vadd.f32 %v8539_v56, %v8509_v36 }
0x1623   :  { %v15823_v61 = vadd.f32 %v12074_v22, %v8278_v45 }
0x1624   :  { %v8541_v55 = vadd.f32 %v8540_v7, %v8510_v54 }
0x1625   :  { %v8511_v15 = vmul.f32 %v15823_v61, %v15823_v61  ;;  %v8472_v40 = vadd.f32 %v8471_v49, %v15823_v61 }
0x1627   :  { %v8473_v57 = vrot.slane %v8472_v40, 4  ;;  %v8542_v41 = vadd.f32 %v8541_v55, %v8511_v15 }
0x1629   :  { %v8474_v9 = vadd.f32 %v8473_v57, %v8472_v40  ;;  %v8543_v20 = vrot.slane %v8542_v41, 4 }
0x162b   :  { %v8475_v28 = vrot.slane %v8474_v9, 2  ;;  %v8544_v34 = vadd.f32 %v8543_v20, %v8542_v41 }
0x162d   :  { %v8476_v6 = vadd.f32 %v8475_v28, %v8474_v9  ;;  %v8545_v51 = vrot.slane %v8544_v34, 2 }
0x162f   :  { %v8477_v12 = vrot.slane %v8476_v6, 1  ;;  %v8546_v29 = vadd.f32 %v8545_v51, %v8544_v34 }
0x1631   :  { %v8478_v58 = vadd.f32 %v8477_v12, %v8476_v6  ;;  %v8547_v31 = vrot.slane %v8546_v29, 1 }
0x1633   :  { %v15828_v22 = vmul.f32 0.00390625, %v8478_v58  ;;  %v8548_v33 = vadd.f32 %v8547_v31, %v8546_v29 }
0x1635   :  { %v8549_v17 = vmul.f32 0.00390625, %v8548_v33  ;;  %v8550_v3 = vmul.f32 %v15828_v22, %v15828_v22  ;;  %v8582_v37 = vsub.f32 %v15812_v46, %v15828_v22  ;;  %v8562_v26 = vsub.f32 %v15677_v0, %v15828_v22 }
0x1636   :  { %v8565_v19 = vsub.f32 %v15694_v14, %v15828_v22  ;;  %v8566_v56 = vsub.f32 %v15709_v43, %v15828_v22  ;;  %v8567_v42 = vsub.f32 %v15703_v16, %v15828_v22  ;;  %v8568_v36 = vsub.f32 %v15716_v50, %v15828_v22 }
0x1637   :  { %v8551_v10 = vsub.f32 %v8549_v17, %v8550_v3  ;;  %v8569_v18 = vsub.f32 %v15726_v11, %v15828_v22  ;;  %v8570_v45 = vsub.f32 %v15741_v13, %v15828_v22  ;;  %v8571_v54 = vsub.f32 %v15735_v2, %v15828_v22 }
0x1638   :  { %v8572_v7 = vsub.f32 %v15746_v63, %v15828_v22  ;;  %v8573_v55 = vsub.f32 %v15754_v52, %v15828_v22  ;;  %v8574_v16 = vsub.f32 %v15767_v60, %v15828_v22  ;;  %v8575_v50 = vsub.f32 %v15761_v62, %v15828_v22 }
0x1639   :  { %v8552_v24 = vmax.f32 %v8551_v10, 0.0  ;;  %v8576_v15 = vsub.f32 %v15770_v21, %v15828_v22  ;;  %v8577_v40 = vsub.f32 %v15778_v35, %v15828_v22  ;;  %v8578_v2 = vsub.f32 %v15791_v25, %v15828_v22 }
0x163a   :  { %v8579_v63 = vsub.f32 %v15785_v48, %v15828_v22  ;;  %v8580_v57 = vsub.f32 %v15793_v38, %v15828_v22  ;;  %v8581_v41 = vsub.f32 %v15802_v27, %v15828_v22  ;;  %v8583_v62 = vsub.f32 %v15814_v4, %v15828_v22  ;;  %v15972_v4 = vld [vmem:[%s16120_s18] ss:$0 sm:$0xff] }
0x163b   :  { %v8585_v49 = vadd.f32 1e-05, %v8552_v24  ;;  %v8553_v9 = vsub.f32 %v15584_v47, %v15828_v22  ;;  %v8554_v20 = vsub.f32 %v15594_v39, %v15828_v22  ;;  %v8555_v48 = vsub.f32 %v15589_v8, %v15828_v22 }
0x163c   :  { %v8556_v38 = vsub.f32 %v15603_v53, %v15828_v22  ;;  %v8557_v28 = vsub.f32 %v15618_v1, %v15828_v22  ;;  %v8559_v34 = vsub.f32 %v15629_v44, %v15828_v22  ;;  %v8560_v6 = vsub.f32 %v15644_v32, %v15828_v22 }
0x163d   :  { %12735 = vrsqrt.f32 %v8585_v49  ;;  %v8558_v39 = vsub.f32 %v15637_v59, %v15828_v22  ;;  %v8561_v47 = vsub.f32 %v15658_v30, %v15828_v22  ;;  %v8563_v8 = vsub.f32 %v15669_v23, %v15828_v22 }
0x163e   :  { %v8564_v53 = vsub.f32 %v15684_v5, %v15828_v22 }
0x164a   :  { %v15888_v51 = vpop.eup %12735 }
0x164b   :  { %v8589_v1 = vmul.f32 %v15888_v51, %v8555_v48  ;;  %v8590_v44 = vmul.f32 %v15888_v51, %v8556_v38  ;;  %v8593_v32 = vmul.f32 %v15888_v51, %v8559_v34  ;;  %v8594_v12 = vmul.f32 %v15888_v51, %v8560_v6 }
0x164c   :  { %v8597_v29 = vmul.f32 %v15888_v51, %v8563_v8  ;;  %v8598_v59 = vmul.f32 %v15888_v51, %v8564_v53  ;;  %v8601_v30 = vmul.f32 %v15888_v51, %v8567_v42  ;;  %v8602_v58 = vmul.f32 %v15888_v51, %v8568_v36 }
0x164d   :  { %v8605_v23 = vmul.f32 %v15888_v51, %v8571_v54  ;;  %v8606_v5 = vmul.f32 %v15888_v51, %v8572_v7  ;;  %v8609_v31 = vmul.f32 %v15888_v51, %v8575_v50  ;;  %v8610_v33 = vmul.f32 %v15888_v51, %v8576_v15 }
0x164e   :  { %v8613_v17 = vmul.f32 %v15888_v51, %v8579_v63  ;;  %v8614_v3 = vmul.f32 %v15888_v51, %v8580_v57  ;;  %v8621_v10 = vmax.f32 %v8589_v1, 0.0  ;;  %v8622_v24 = vmax.f32 %v8590_v44, 0.0 }
0x164f   :  { %v8625_v49 = vmax.f32 %v8593_v32, 0.0  ;;  %v8626_v48 = vmax.f32 %v8594_v12, 0.0  ;;  %v8629_v38 = vmax.f32 %v8597_v29, 0.0  ;;  %v8630_v42 = vmax.f32 %v8598_v59, 0.0 }
0x1650   :  { %v8633_v34 = vmax.f32 %v8601_v30, 0.0  ;;  %v8634_v36 = vmax.f32 %v8602_v58, 0.0  ;;  %v8637_v6 = vmax.f32 %v8605_v23, 0.0  ;;  %v8638_v54 = vmax.f32 %v8606_v5, 0.0 }
0x1651   :  { %v8641_v8 = vmax.f32 %v8609_v31, 0.0  ;;  %v8642_v7 = vmax.f32 %v8610_v33, 0.0  ;;  %v8645_v53 = vmax.f32 %v8613_v17, 0.0  ;;  %v8646_v50 = vmax.f32 %v8614_v3, 0.0 }
0x1652   :  { %v8668_v21 = vpack.c.bf16 %v8622_v24, %v8621_v10  ;;  %v8587_v15 = vmul.f32 %v15888_v51, %v8553_v9  ;;  %v8588_v63 = vmul.f32 %v15888_v51, %v8554_v20  ;;  %v8591_v57 = vmul.f32 %v15888_v51, %v8557_v28 }
0x1653   :  { %v8592_v1 = vmul.f32 %v15888_v51, %v8558_v39  ;;  %v8670_v44 = vpack.c.bf16 %v8626_v48, %v8625_v49  ;;  %v8595_v32 = vmul.f32 %v15888_v51, %v8561_v47  ;;  %v8596_v12 = vmul.f32 %v15888_v51, %v8562_v26 }
0x1654   :  { %v8619_v29 = vmax.f32 %v8587_v15, 0.0  ;;  %v8620_v59 = vmax.f32 %v8588_v63, 0.0  ;;  %v8623_v30 = vmax.f32 %v8591_v57, 0.0  ;;  %v8672_v58 = vpack.c.bf16 %v8630_v42, %v8629_v38 }
0x1655   :  { %v8624_v23 = vmax.f32 %v8592_v1, 0.0  ;;  %v8627_v9 = vmax.f32 %v8595_v32, 0.0  ;;  %v8628_v5 = vmax.f32 %v8596_v12, 0.0  ;;  %v8599_v20 = vmul.f32 %v15888_v51, %v8565_v19 }
0x1656   :  { %v8667_v28 = vpack.c.bf16 %v8620_v59, %v8619_v29  ;;  %v8600_v0 = vmul.f32 %v15888_v51, %v8566_v56  ;;  %v8674_v39 = vpack.c.bf16 %v8634_v36, %v8633_v34  ;;  %v8603_v26 = vmul.f32 %v15888_v51, %v8569_v18 }
0x1657   :  { %v8669_v47 = vpack.c.bf16 %v8624_v23, %v8623_v30  ;;  %v8671_v31 = vpack.c.bf16 %v8628_v5, %v8627_v9  ;;  %v8631_v33 = vmax.f32 %v8599_v20, 0.0  ;;  %v8604_v14 = vmul.f32 %v15888_v51, %v8570_v45 }
0x1658   :  { %12091 = vmatprep.mubr.bf16.mxu1 %v8667_v28  ;;  %v8632_v19 = vmax.f32 %v8600_v0, 0.0  ;;  %v8635_v17 = vmax.f32 %v8603_v26, 0.0  ;;  %v8676_v43 = vpack.c.bf16 %v8638_v54, %v8637_v6  ;;  %v8607_v56 = vmul.f32 %v15888_v51, %v8573_v55 }
0x1659   :  { %12092 = vmatmul.mubr.bf16.vlgmr.msra.gmra.mxu1 %v8668_v21  ;;  %v8636_v11 = vmax.f32 %v8604_v14, 0.0  ;;  %v8608_v18 = vmul.f32 %v15888_v51, %v8574_v16  ;;  %v8678_v3 = vpack.c.bf16 %v8642_v7, %v8641_v8  ;;  %v8611_v13 = vmul.f32 %v15888_v51, %v8577_v40 }
0x165a   :  { %12095 = vmatprep.mubr.bf16.mxu1 %v8669_v47  ;;  %v8673_v45 = vpack.c.bf16 %v8632_v19, %v8631_v33  ;;  %v8639_v10 = vmax.f32 %v8607_v56, 0.0  ;;  %v8612_v52 = vmul.f32 %v15888_v51, %v8578_v2  ;;  %v8680_v55 = vpack.c.bf16 %v8646_v50, %v8645_v53 }
0x165b   :  { %v8675_v21 = vpack.c.bf16 %v8636_v11, %v8635_v17  ;;  %v8640_v24 = vmax.f32 %v8608_v18, 0.0  ;;  %v8643_v60 = vmax.f32 %v8611_v13, 0.0  ;;  %v8615_v16 = vmul.f32 %v15888_v51, %v8581_v41 }
0x165c   :  { %v8644_v35 = vmax.f32 %v8612_v52, 0.0  ;;  %v8616_v40 = vmul.f32 %v15888_v51, %v8582_v37  ;;  %v8617_v25 = vmul.f32 %v15888_v51, %v8583_v62  ;;  %v16153_v2 = vsub.f32 %v15823_v61, %v15828_v22 }
0x165d   :  { %v8677_v48 = vpack.c.bf16 %v8640_v24, %v8639_v10  ;;  %v8647_v27 = vmax.f32 %v8615_v16, 0.0 }
0x165e   :  { %v8618_v49 = vmul.f32 %v15888_v51, %v16153_v2  ;;  %v8679_v38 = vpack.c.bf16 %v8644_v35, %v8643_v60  ;;  %v8648_v41 = vmax.f32 %v8616_v40, 0.0  ;;  %v8649_v42 = vmax.f32 %v8617_v25, 0.0 }
0x1660   :  { %v8650_v34 = vmax.f32 %v8618_v49, 0.0  ;;  %v8681_v36 = vpack.c.bf16 %v8648_v41, %v8647_v27 }
0x1661   :  { %12096 = vmatmul.mubr.bf16.gmra.mxu1 %v8670_v44 }
0x1662   :  { %v8682_v46 = vpack.c.bf16 %v8650_v34, %v8649_v42  ;;  %12099 = vmatprep.mubr.bf16.mxu1 %v8671_v31 }
0x1669   :  { %12100 = vmatmul.mubr.bf16.gmra.mxu1 %v8672_v58 }
0x166a   :  { %12103 = vmatprep.mubr.bf16.mxu1 %v8673_v45 }
0x1671   :  { %12104 = vmatmul.mubr.bf16.gmra.mxu1 %v8674_v39 }
0x1672   :  { %12107 = vmatprep.mubr.bf16.mxu1 %v8675_v21 }
0x1679   :  { %12108 = vmatmul.mubr.bf16.gmra.mxu1 %v8676_v43 }
0x167a   :  { %12111 = vmatprep.mubr.bf16.mxu1 %v8677_v48 }
0x1681   :  { %12112 = vmatmul.mubr.bf16.gmra.mxu1 %v8678_v3 }
0x1682   :  { %12115 = vmatprep.mubr.bf16.mxu1 %v8679_v38 }
0x1689   :  { %12116 = vmatmul.mubr.bf16.gmra.mxu1 %v8680_v55 }
0x168a   :  { %12119 = vmatprep.mubr.bf16.mxu1 %v8681_v36 }
0x1691   :  { %12120 = vmatmul.mubr.bf16.gmra.mxu1 %v8682_v46 }
0x1719   :  { %v12093_v61 = vpop.f32.mrf.mxu1 }
0x171a   :  { %v8781_v22 = vadd.f32 %v12093_v61, %v15972_v4 }
0x171b   :  { %v8772_v37 = vpop.f32.mrf.mxu1 }
0x171c   :  { %8901 = vst [vmem:[%s16121_s19 + $0x10] sm:$0xff] %v8781_v22  ;;  %v8773_v62 = vadd.f32 %v15972_v4, %v8772_v37 }
0x171d   :  { %v12094_v51 = vpop.f32.mrf.mxu1 }
0x171e   :  { %8899 = vst [vmem:[%s16121_s19] sm:$0xff] %v8773_v62  ;;  %v8784_v6 = vadd.f32 %v12094_v51, %v15972_v4 }
0x171f   :  { %v8775_v54 = vpop.f32.mrf.mxu1 }
0x1720   :  { %8902 = vst [vmem:[%s16121_s19 + $0x18] sm:$0xff] %v8784_v6  ;;  %v8776_v8 = vadd.f32 %v15972_v4, %v8775_v54 }
0x1721   :  { %v12097_v7 = vpop.f32.mrf.mxu1 }
0x1722   :  { %8900 = vst [vmem:[%s16121_s19 + $0x8] sm:$0xff] %v8776_v8  ;;  %v8797_v53 = vadd.f32 %v12097_v7, %v15972_v4 }
0x1723   :  { %v8788_v50 = vpop.f32.mrf.mxu1 }
0x1724   :  { %8905 = vst [vmem:[%s16121_s19 + $0x30] sm:$0xff] %v8797_v53  ;;  %v8789_v15 = vadd.f32 %v15972_v4, %v8788_v50 }
0x1725   :  { %v12098_v63 = vpop.f32.mrf.mxu1 }
0x1726   :  { %8903 = vst [vmem:[%s16121_s19 + $0x20] sm:$0xff] %v8789_v15  ;;  %v8800_v57 = vadd.f32 %v12098_v63, %v15972_v4 }
0x1727   :  { %v8791_v1 = vpop.f32.mrf.mxu1 }
0x1728   :  { %8906 = vst [vmem:[%s16121_s19 + $0x38] sm:$0xff] %v8800_v57  ;;  %v8792_v44 = vadd.f32 %v15972_v4, %v8791_v1 }
0x1729   :  { %v12101_v32 = vpop.f32.mrf.mxu1 }
0x172a   :  { %8904 = vst [vmem:[%s16121_s19 + $0x28] sm:$0xff] %v8792_v44  ;;  %v8813_v12 = vadd.f32 %v12101_v32, %v15972_v4 }
0x172b   :  { %v8804_v29 = vpop.f32.mrf.mxu1 }
0x172c   :  { %8909 = vst [vmem:[%s16121_s19 + $0x50] sm:$0xff] %v8813_v12  ;;  %v8805_v59 = vadd.f32 %v15972_v4, %v8804_v29 }
0x172d   :  { %v12102_v30 = vpop.f32.mrf.mxu1 }
0x172e   :  { %8907 = vst [vmem:[%s16121_s19 + $0x40] sm:$0xff] %v8805_v59  ;;  %v8816_v58 = vadd.f32 %v12102_v30, %v15972_v4 }
0x172f   :  { %v8807_v23 = vpop.f32.mrf.mxu1 }
0x1730   :  { %8910 = vst [vmem:[%s16121_s19 + $0x58] sm:$0xff] %v8816_v58  ;;  %v8808_v9 = vadd.f32 %v15972_v4, %v8807_v23 }
0x1731   :  { %v12105_v5 = vpop.f32.mrf.mxu1 }
0x1732   :  { %8908 = vst [vmem:[%s16121_s19 + $0x48] sm:$0xff] %v8808_v9  ;;  %v8829_v20 = vadd.f32 %v12105_v5, %v15972_v4 }
0x1733   :  { %v8820_v28 = vpop.f32.mrf.mxu1 }
0x1734   :  { %8913 = vst [vmem:[%s16121_s19 + $0x70] sm:$0xff] %v8829_v20  ;;  %v8821_v0 = vadd.f32 %v15972_v4, %v8820_v28 }
0x1735   :  { %v12106_v39 = vpop.f32.mrf.mxu1 }
0x1736   :  { %8911 = vst [vmem:[%s16121_s19 + $0x60] sm:$0xff] %v8821_v0  ;;  %v8832_v26 = vadd.f32 %v12106_v39, %v15972_v4 }
0x1737   :  { %v8823_v47 = vpop.f32.mrf.mxu1 }
0x1738   :  { %8914 = vst [vmem:[%s16121_s19 + $0x78] sm:$0xff] %v8832_v26  ;;  %v8824_v31 = vadd.f32 %v15972_v4, %v8823_v47 }
0x1739   :  { %v12109_v33 = vpop.f32.mrf.mxu1 }
0x173a   :  { %8912 = vst [vmem:[%s16121_s19 + $0x68] sm:$0xff] %v8824_v31  ;;  %v8845_v14 = vadd.f32 %v12109_v33, %v15972_v4 }
0x173b   :  { %v8836_v19 = vpop.f32.mrf.mxu1 }
0x173c   :  { %8917 = vst [vmem:[%s16121_s19 + $0x90] sm:$0xff] %v8845_v14  ;;  %v8837_v17 = vadd.f32 %v15972_v4, %v8836_v19 }
0x173d   :  { %v12110_v43 = vpop.f32.mrf.mxu1 }
0x173e   :  { %8915 = vst [vmem:[%s16121_s19 + $0x80] sm:$0xff] %v8837_v17  ;;  %v8848_v56 = vadd.f32 %v12110_v43, %v15972_v4 }
0x173f   :  { %v8839_v11 = vpop.f32.mrf.mxu1 }
0x1740   :  { %8918 = vst [vmem:[%s16121_s19 + $0x98] sm:$0xff] %v8848_v56  ;;  %v8840_v18 = vadd.f32 %v15972_v4, %v8839_v11 }
0x1741   :  { %v12113_v3 = vpop.f32.mrf.mxu1 }
0x1742   :  { %8916 = vst [vmem:[%s16121_s19 + $0x88] sm:$0xff] %v8840_v18  ;;  %v8861_v13 = vadd.f32 %v12113_v3, %v15972_v4 }
0x1743   :  { %v8852_v45 = vpop.f32.mrf.mxu1 }
0x1744   :  { %8921 = vst [vmem:[%s16121_s19 + $0xb0] sm:$0xff] %v8861_v13  ;;  %v8853_v10 = vadd.f32 %v15972_v4, %v8852_v45 }
0x1745   :  { %v12114_v52 = vpop.f32.mrf.mxu1 }
0x1746   :  { %8919 = vst [vmem:[%s16121_s19 + $0xa0] sm:$0xff] %v8853_v10  ;;  %v8864_v55 = vadd.f32 %v12114_v52, %v15972_v4 }
0x1747   :  { %v8855_v21 = vpop.f32.mrf.mxu1 }
0x1748   :  { %8922 = vst [vmem:[%s16121_s19 + $0xb8] sm:$0xff] %v8864_v55  ;;  %v8856_v24 = vadd.f32 %v15972_v4, %v8855_v21 }
0x1749   :  { %v12117_v60 = vpop.f32.mrf.mxu1 }
0x174a   :  { %8920 = vst [vmem:[%s16121_s19 + $0xa8] sm:$0xff] %v8856_v24  ;;  %v8877_v16 = vadd.f32 %v12117_v60, %v15972_v4 }
0x174b   :  { %v8868_v35 = vpop.f32.mrf.mxu1 }
0x174c   :  { %8925 = vst [vmem:[%s16121_s19 + $0xd0] sm:$0xff] %v8877_v16  ;;  %v8869_v40 = vadd.f32 %v15972_v4, %v8868_v35 }
0x174d   :  { %v12118_v25 = vpop.f32.mrf.mxu1 }
0x174e   :  { %8923 = vst [vmem:[%s16121_s19 + $0xc0] sm:$0xff] %v8869_v40  ;;  %v8880_v2 = vadd.f32 %v12118_v25, %v15972_v4 }
0x174f   :  { %v8871_v49 = vpop.f32.mrf.mxu1 }
0x1750   :  { %8926 = vst [vmem:[%s16121_s19 + $0xd8] sm:$0xff] %v8880_v2  ;;  %v8872_v48 = vadd.f32 %v15972_v4, %v8871_v49 }
0x1751   :  { %v12121_v27 = vpop.f32.mrf.mxu1 }
0x1752   :  { %8924 = vst [vmem:[%s16121_s19 + $0xc8] sm:$0xff] %v8872_v48  ;;  %v8893_v38 = vadd.f32 %v12121_v27, %v15972_v4 }
0x1753   :  { %v8884_v41 = vpop.f32.mrf.mxu1 }
0x1754   :  { %8929 = vst [vmem:[%s16121_s19 + $0xf0] sm:$0xff] %v8893_v38  ;;  %v8885_v42 = vadd.f32 %v15972_v4, %v8884_v41 }
0x1755   :  { %v12122_v34 = vpop.f32.mrf.mxu1 }
0x1756   :  { %8927 = vst [vmem:[%s16121_s19 + $0xe0] sm:$0xff] %v8885_v42  ;;  %v8896_v36 = vadd.f32 %v12122_v34, %v15972_v4 }
0x1757   :  { %v8887_v46 = vpop.f32.mrf.mxu1 }
0x1758   :  { %8930 = vst [vmem:[%s16121_s19 + $0xf8] sm:$0xff] %v8896_v36  ;;  %v8888_v61 = vadd.f32 %v15972_v4, %v8887_v46 }
0x175a   :  { %8928 = vst [vmem:[%s16121_s19 + $0xe8] sm:$0xff] %v8888_v61 }

</bundles_post_ra>
